<compile_context>
chip_gen: v7x
topology: tpu7x:2x2x1
jax: 0.10.0
libtpu: 0.0.40
codegen_flags: <defaults>
</compile_context>

<pallas_src>
import math

import jax
import jax.numpy as jnp
import numpy as np
from jax.experimental import pallas as pl
from jax.experimental.pallas import tpu as pltpu


def make_attention_kernel(use_mxu):
    def attention_kernel(x_ref, w_ref, b_ref, o_ref):
        # x_ref: (Bt, S, F); b_ref: (1, S, 1) f32; o_ref: (Bt, F)
        # w_ref: (F, 1) f32 if use_mxu else (1, 1, F) f32
        x = x_ref[...]                       # native dtype; promoted lazily
        b = b_ref[...]                       # (1, S, 1) f32

        if use_mxu:
            bt, s, f = x.shape
            # v7x: MXU is idle in this kernel, so move the K=F contraction
            # there; reshape keeps F on lanes (copy-free when S % 8 == 0).
            scores = jnp.dot(x.reshape(bt * s, f), w_ref[...],
                             preferred_element_type=jnp.float32)
            scores = scores.reshape(bt, s, 1)                    # (Bt, S, 1)
        else:
            # VPU multiply + lane reduce over F; keepdims keeps S on sublanes
            # so no relayout is needed before the weighted sum below.
            scores = jnp.sum(x * w_ref[...], axis=-1, keepdims=True)

        eij = jnp.tanh(scores + b)                               # (Bt, S, 1)
        a = jnp.exp(eij)
        # NOTE: the module subtracts the per-row *min* (not max) — intentional.
        a = a - jnp.min(a, axis=1, keepdims=True)
        a = a / (jnp.sum(a, axis=1, keepdims=True) + 1e-10)      # exact divide

        # Weighted sum over the step axis; `a` is f32 so accumulation is f32.
        out = jnp.sum(x * a, axis=1)                             # (Bt, F)
        o_ref[...] = out.astype(o_ref.dtype)

    return attention_kernel


def _tpu_generation():
    """Best-effort TPU generation from device_kind; defaults to 6 (1 TC)."""
    try:
        kind = jax.devices()[0].device_kind.lower()
    except Exception:
        return 6
    for g in (7, 6, 5, 4, 3, 2):
        if f"v{g}" in kind:
            return g
    return 6


def _choose_block_b(B, S, F, itemsize, *, budget_bytes, prefer_split):
    """Largest Bt (multiple of 8, divides B) whose x tile fits budget_bytes.

    On 2-TC chips (prefer_split), prefer a tiling that yields an even number
    of grid steps so both TensorCores get equal work; on 1-TC chips keep the
    largest tile (fewest grid steps) — forced splits only add ~0.35 us/step.
    """
    per_row = S * F * itemsize
    cap = max(8, (budget_bytes // max(per_row, 1)) // 8 * 8)
    candidates = [bt for bt in range(8, B + 1, 8) if B % bt == 0 and bt <= cap]
    if not candidates:
        return 8
    if prefer_split:
        even = [c for c in candidates if (B // c) % 2 == 0]
        if even:
            return even[-1]
        if candidates[-1] == B and len(candidates) > 1:
            return candidates[-2]
    return candidates[-1]


def attention_forward(x, weight, bias):
    """x: (B, S, F); weight: (F, 1); bias: (S,). Returns (B, F)."""
    B, S, F = x.shape
    gen = _tpu_generation()
    two_tc = gen >= 7
    use_mxu = gen >= 7          # only v7x: elsewhere DMA hides the VPU path

    # Pad batch to a multiple of 8 so every (Bt, F) output block is
    # sublane-aligned and the pipeline keeps proper tiles (padding is zeros
    # and is sliced off after the call).
    Bp = ((B + 7) // 8) * 8
    x_in = jnp.pad(x, ((0, Bp - B), (0, 0), (0, 0))) if Bp != B else x

    itemsize = jnp.dtype(x.dtype).itemsize
    budget = {5: 8 << 20, 6: 12 << 20, 7: 8 << 20}.get(gen, 8 << 20)
    bt = _choose_block_b(Bp, S, F, itemsize,
                         budget_bytes=budget, prefer_split=two_tc)
    grid = (Bp // bt,)

    # Parameters stay float32 (they are tiny); weight layout depends on path.
    if use_mxu:
        w_arg = weight.reshape(F, 1).astype(jnp.float32)
        w_spec = pl.BlockSpec((F, 1), lambda i: (0, 0))
    else:
        w_arg = weight.reshape(1, 1, F).astype(jnp.float32)
        w_spec = pl.BlockSpec((1, 1, F), lambda i: (0, 0, 0))
    b_arg = bias.reshape(1, S, 1).astype(jnp.float32)

    # Explicit scoped-VMEM limit: 2x double-buffered x tile + output + slack,
    # never below the 32 MiB default, capped per generation (v7x: 64 MiB phys).
    x_tile_bytes = bt * S * F * itemsize
    out_tile_bytes = bt * F * itemsize
    vmem_needed = 2 * x_tile_bytes + 2 * out_tile_bytes + (2 << 20)
    vmem_cap = (48 << 20) if gen >= 7 else (96 << 20)
    vmem_limit = int(min(vmem_cap, max(vmem_needed, 32 << 20)))

    cost = pl.CostEstimate(
        flops=int(4 * Bp * S * F),
        transcendentals=int(2 * Bp * S),
        bytes_accessed=int(Bp * S * F * itemsize + Bp * F * itemsize
                           + (F + S) * 4),
    )

    out = pl.pallas_call(
        make_attention_kernel(use_mxu),
        out_shape=jax.ShapeDtypeStruct((Bp, F), x.dtype),
        grid=grid,
        in_specs=[
            pl.BlockSpec((bt, S, F), lambda i: (i, 0, 0)),  # Bt batch rows of x
            w_spec,                                         # shared weight
            pl.BlockSpec((1, S, 1), lambda i: (0, 0, 0)),   # shared bias
        ],
        out_specs=pl.BlockSpec((bt, F), lambda i: (i, 0)),  # lane-dense output
        compiler_params=pltpu.CompilerParams(
            dimension_semantics=("parallel",),
            vmem_limit_bytes=vmem_limit),
        cost_estimate=cost,
    )(x_in, w_arg, b_arg)
    return out[:B] if Bp != B else out


def attention_reference(x, weight, bias):
    """Pure-JAX reference mirroring the PyTorch forward (mask=None)."""
    B, S, F = x.shape
    eij = (x.reshape(-1, F) @ weight).reshape(B, S) + bias
    eij = jnp.tanh(eij)
    a = jnp.exp(eij)
    a = a - jnp.min(a, axis=1, keepdims=True)
    a = a / (jnp.sum(a, axis=1, keepdims=True) + 1e-10)
    return jnp.sum(x * a[..., None], axis=1)


if __name__ == "__main__":
    # Shapes consistent with the module's Attention(feature_dim=512, step_dim=56).
    F_DIM, S_DIM = 512, 56

    key = jax.random.PRNGKey(0)
    kx1, kx2, kw, kb = jax.random.split(key, 4)

    # weight: kaiming_uniform_ on a (F, 1) tensor -> fan_in = 1,
    # bound = sqrt(2) * sqrt(3 / fan_in) = sqrt(6)
    bound = math.sqrt(6.0)
    weight = jax.random.uniform(kw, (F_DIM, 1), minval=-bound, maxval=bound,
                                dtype=jnp.float32)
    # bias is zero-initialized in __init__, but learnable; use small random
    # values here to exercise the add path.
    bias = 0.1 * jax.random.normal(kb, (S_DIM,), dtype=jnp.float32)

    # TODO(synk): optional `mask` argument of forward() is not implemented
    # (mask=None path only).

    for b_sz, kk in ((16, kx1), (10, kx2)):   # 10 exercises the pad-to-8 path
        x = jax.random.normal(kk, (b_sz, S_DIM, F_DIM), dtype=jnp.float32)
        out = jax.block_until_ready(attention_forward(x, weight, bias))
        ref = attention_reference(x, weight, bias)
        np.testing.assert_allclose(np.asarray(out), np.asarray(ref),
                                   rtol=1e-4, atol=1e-5)

    print("KERNEL_OK")
</pallas_src>

<mosaic_0001>
module attributes {stable_mosaic.version = 11 : i64} {
  func.func @attention_kernel(%arg0: i32, %arg1: memref<16x56x512xf32, #tpu.memory_space<vmem>>, %arg2: memref<1x1x512xf32, #tpu.memory_space<vmem>>, %arg3: memref<1x56x1xf32, #tpu.memory_space<vmem>>, %arg4: memref<16x512xf32, #tpu.memory_space<vmem>>) attributes {dimension_semantics = [#tpu.dimension_semantics<parallel>], iteration_bounds = array<i64: 1>, scalar_prefetch = 0 : i64, scratch_operands = 0 : i64, tpu.core_type = #tpu.core_type<tc>, window_params = [{transform_indices = @transform_0, window_bounds = array<i64: 16, 56, 512>}, {pipeline_mode = #tpu.pipeline_mode<synchronous>, transform_indices = @transform_1, window_bounds = array<i64: 1, 1, 512>}, {pipeline_mode = #tpu.pipeline_mode<synchronous>, transform_indices = @transform_2, window_bounds = array<i64: 1, 56, 1>}, {transform_indices = @transform_3, window_bounds = array<i64: 16, 512>}]} {
    %c0 = arith.constant 0 : index
    %c0_0 = arith.constant 0 : index
    %c0_1 = arith.constant 0 : index
    %0 = vector.load %arg1[%c0, %c0_0, %c0_1] : memref<16x56x512xf32, #tpu.memory_space<vmem>>, vector<16x56x512xf32>
    %c0_2 = arith.constant 0 : index
    %c0_3 = arith.constant 0 : index
    %c0_4 = arith.constant 0 : index
    %1 = vector.load %arg3[%c0_2, %c0_3, %c0_4] : memref<1x56x1xf32, #tpu.memory_space<vmem>>, vector<1x56x1xf32>
    %c0_5 = arith.constant 0 : index
    %c0_6 = arith.constant 0 : index
    %c0_7 = arith.constant 0 : index
    %2 = vector.load %arg2[%c0_5, %c0_6, %c0_7] : memref<1x1x512xf32, #tpu.memory_space<vmem>>, vector<1x1x512xf32>
    %3 = vector.broadcast %2 : vector<1x1x512xf32> to vector<16x56x512xf32>
    %4 = arith.mulf %0, %3 : vector<16x56x512xf32>
    %cst = arith.constant dense<0.000000e+00> : vector<16x56xf32>
    %5 = vector.multi_reduction <add>, %4, %cst [2] : vector<16x56x512xf32> to vector<16x56xf32>
    %6 = vector.shape_cast %5 : vector<16x56xf32> to vector<16x56x1xf32>
    %7 = vector.broadcast %1 : vector<1x56x1xf32> to vector<16x56x1xf32>
    %8 = arith.addf %6, %7 : vector<16x56x1xf32>
    %9 = math.tanh %8 : vector<16x56x1xf32>
    %10 = math.exp %9 : vector<16x56x1xf32>
    %cst_8 = arith.constant dense<0x7F800000> : vector<16x1xf32>
    %11 = vector.multi_reduction <minimumf>, %10, %cst_8 [1] : vector<16x56x1xf32> to vector<16x1xf32>
    %12 = vector.shape_cast %11 : vector<16x1xf32> to vector<16x1x1xf32>
    %13 = vector.broadcast %12 : vector<16x1x1xf32> to vector<16x56x1xf32>
    %14 = arith.subf %10, %13 : vector<16x56x1xf32>
    %cst_9 = arith.constant dense<0.000000e+00> : vector<16x1xf32>
    %15 = vector.multi_reduction <add>, %14, %cst_9 [1] : vector<16x56x1xf32> to vector<16x1xf32>
    %16 = vector.shape_cast %15 : vector<16x1xf32> to vector<16x1x1xf32>
    %cst_10 = arith.constant 1.000000e-10 : f32
    %17 = vector.broadcast %cst_10 : f32 to vector<16x1x1xf32>
    %18 = arith.addf %16, %17 : vector<16x1x1xf32>
    %19 = vector.broadcast %18 : vector<16x1x1xf32> to vector<16x56x1xf32>
    %20 = arith.divf %14, %19 : vector<16x56x1xf32>
    %21 = vector.broadcast %20 : vector<16x56x1xf32> to vector<16x56x512xf32>
    %22 = arith.mulf %0, %21 : vector<16x56x512xf32>
    %cst_11 = arith.constant dense<0.000000e+00> : vector<16x512xf32>
    %23 = vector.multi_reduction <add>, %22, %cst_11 [1] : vector<16x56x512xf32> to vector<16x512xf32>
    %c0_12 = arith.constant 0 : index
    %c0_13 = arith.constant 0 : index
    %24 = vector.load %arg4[%c0_12, %c0_13] : memref<16x512xf32, #tpu.memory_space<vmem>>, vector<16x512xf32>
    tpu.vector_store %arg4[%c0_12, %c0_13], %23 {strides = array<i32>} : memref<16x512xf32, #tpu.memory_space<vmem>>, vector<16x512xf32>,
    return
  }
  func.func @transform_0(%arg0: i32) -> (i32, i32, i32) {
    %c0_i32 = arith.constant 0 : i32
    %c0_i32_0 = arith.constant 0 : i32
    %c0_i32_1 = arith.constant 0 : i32
    return %arg0, %c0_i32, %c0_i32_0 : i32, i32, i32
  }
  func.func @transform_1(%arg0: i32) -> (i32, i32, i32) {
    %c0_i32 = arith.constant 0 : i32
    %c0_i32_0 = arith.constant 0 : i32
    %c0_i32_1 = arith.constant 0 : i32
    %c0_i32_2 = arith.constant 0 : i32
    return %c0_i32, %c0_i32_0, %c0_i32_1 : i32, i32, i32
  }
  func.func @transform_2(%arg0: i32) -> (i32, i32, i32) {
    %c0_i32 = arith.constant 0 : i32
    %c0_i32_0 = arith.constant 0 : i32
    %c0_i32_1 = arith.constant 0 : i32
    %c0_i32_2 = arith.constant 0 : i32
    return %c0_i32, %c0_i32_0, %c0_i32_1 : i32, i32, i32
  }
  func.func @transform_3(%arg0: i32) -> (i32, i32) {
    %c0_i32 = arith.constant 0 : i32
    %c0_i32_0 = arith.constant 0 : i32
    return %arg0, %c0_i32 : i32, i32
  }
}

</mosaic_0001>

<bundles_post_ra>
// kernel: tpu_custom_call.1
= control target key start
LH: loop header
LB: loop body
LE: loop exit
PB: predicated region body
PF: predicated region fallthrough
CT: control target
= control target key end

     0   :  { %8 = vsyncpa [#allocation3], 0  ;;  %s9217_s0 = inlined_call_operand.hbm [shape: f32[16,56,512], index: 0, kind: input, shape index: {}]   ;;  %s9218_s1 = inlined_call_operand.hbm [shape: f32[1,1,512], index: 1, kind: input, shape index: {}]   ;;  %s9219_s2 = inlined_call_operand.vmem [shape: f32[1,56,1], index: 2, kind: input, shape index: {}]   ;;  %s9220_s3 = inlined_call_operand.hbm [shape: f32[16,512], index: 3, kind: output, shape index: {}]  }
   0x1   :  { %9 = vsyncpa [#allocation6], 0 }
   0x2   :  { %10 = vsyncpa [#allocation4], 0  ;;  %s5799_s12 = smov [#allocation2]   ;;  %s5727_s16 = scalar_lea.hbm %s9217_s0, 57344 }
   0x3   :  { %s16_s13 = sshll.u32 %s5799_s12, 4  ;;  %p5728_p0 = scmp.ne.s32.totalorder %s9217_s0, %s5727_s16  ;;  %s17_s13 = int_to_ptr.vmem [resolvable:$true] %s16_s13 }
   0x4   :  { %p5731_p1 = scmp.lt.u32.totalorder %s5727_s16, %s9217_s0 }
   0x6   :  { %p5733_p2 = pnand %p5731_p1, %p5728_p0 }
   0x8   :  { %5736 = shalt.err (!%p5733_p2)
}
   0x9   :  { %s5737_s21 = scalar_lea.vmem %s17_s13, 57344  ;;  %p5742_p4 = scmp.lt.s32.totalorder %s17_s13, %s17_s13 }
   0xa   :  { %p5738_p3 = scmp.ne.s32.totalorder %s17_s13, %s5737_s21  ;;  %p5743_p5 = scmp.lt.s32.totalorder %s5737_s21, %s5737_s21 }
   0xc   :  { %p5744_p6 = por %p5743_p5, %p5742_p4 }
   0xe   :  { %p5745_p7 = pnand %p5744_p6, %p5738_p3 }
  0x10   :  { %5748 = shalt.err (!%p5745_p7)
}
  0x11   :  { %s5800_s22 = smov 512   ;;  %s5801_s23 = smov 32  }
  0x12   :  { %22 = dma.hbm_to_vmem [thread:$0]  %s9217_s0, 57344, %s17_s13, [#allocation3], %s5800_s22, %s5800_s22, %s5801_s23  }
  0x13   :  { %s5802_s26 = smov [#allocation5]   ;;  %s5749_s30 = scalar_lea.hbm %s9218_s1, 64 }
  0x14   :  { %s29_s27 = sshll.u32 %s5802_s26, 4  ;;  %p5750_p8 = scmp.ne.s32.totalorder %s9218_s1, %s5749_s30  ;;  %s30_s27 = int_to_ptr.vmem [resolvable:$true] %s29_s27 }
  0x15   :  { %p5753_p9 = scmp.lt.u32.totalorder %s5749_s30, %s9218_s1 }
  0x17   :  { %p5755_p10 = pnand %p5753_p9, %p5750_p8 }
  0x19   :  { %5758 = shalt.err (!%p5755_p10)
}
  0x1a   :  { %s5759_s8 = scalar_lea.vmem %s30_s27, 64  ;;  %p5764_p12 = scmp.lt.s32.totalorder %s30_s27, %s30_s27 }
  0x1b   :  { %p5760_p11 = scmp.ne.s32.totalorder %s30_s27, %s5759_s8  ;;  %p5765_p13 = scmp.lt.s32.totalorder %s5759_s8, %s5759_s8 }
  0x1d   :  { %p5766_p0 = por %p5765_p13, %p5764_p12 }
  0x1f   :  { %p5767_p1 = pnand %p5766_p0, %p5760_p11 }
  0x21   :  { %5770 = shalt.err (!%p5767_p1)
}
  0x22   :  { %32 = dma.hbm_to_vmem [thread:$0]  %s9218_s1, 64, %s30_s27, [#allocation6]  }
  0x23   :  { %5793 = dma.done.wait [#allocation3], 57344  }
  0x24   :  { %5794 = vsyncadd [#allocation3], 4294909952 }
  0x25   :  { %5795 = dma.done.wait [#allocation6], 64  }
  0x26   :  { %5796 = vsyncadd [#allocation6], 4294967232  ;;  %v498_v0 = vlaneseq  ;;  %v49_v6 = vld [vmem:[#allocation2 + $0x40] sm:$0xff]  ;;  %v50_v7 = vld [vmem:[#allocation2 + $0x48] sm:$0xff]  ;;  %vm1974_vm0 = vcmask 7168   ;;  %vm4679_vm1 = vcmask 1041409  }
  0x27   :  { %v51_v8 = vld [vmem:[#allocation2 + $0x50] sm:$0xff]  ;;  %v52_v9 = vld [vmem:[#allocation2 + $0x58] sm:$0xff]  ;;  %v496_v10 = vld [vmem:[#allocation5] sm:$0xf]  ;;  %vm4681_vm2 = vcmask 1042434   ;;  %vm4683_vm3 = vcmask 1043459  }
  0x28   :  { %v499_v1 = vshrl.u32 %v498_v0, 7  ;;  %v41_v11 = vld [vmem:[#allocation2] sm:$0xff]  ;;  %v42_v16 = vld [vmem:[#allocation2 + $0x8] sm:$0xff]  ;;  %v43_v17 = vld [vmem:[#allocation2 + $0x10] sm:$0xff]  ;;  %vm4685_vm4 = vcmask 1044484   ;;  %vm4687_vm5 = vcmask 1045509  }
  0x29   :  { %v44_v18 = vld [vmem:[#allocation2 + $0x18] sm:$0xff]  ;;  %v53_v19 = vld [vmem:[#allocation2 + $0x60] sm:$0xff]  ;;  %v54_v20 = vld [vmem:[#allocation2 + $0x68] sm:$0xff]  ;;  %vm4689_vm6 = vcmask 1046534   ;;  %vm4691_vm7 = vcmask 1047559  }
  0x2a   :  { %v500_v2 = vsub.s32 0, %v499_v1  ;;  %v504_v3 = vsub.s32 1, %v499_v1  ;;  %v508_v4 = vsub.s32 2, %v499_v1  ;;  %v512_v5 = vsub.s32 3, %v499_v1  ;;  %v55_v21 = vld [vmem:[#allocation2 + $0x70] sm:$0xff]  ;;  %v56_v26 = vld [vmem:[#allocation2 + $0x78] sm:$0xff] }
  0x2b   :  { %v45_v27 = vld [vmem:[#allocation2 + $0x20] sm:$0xff]  ;;  %v46_v28 = vld [vmem:[#allocation2 + $0x28] sm:$0xff]  ;;  %v47_v33 = vld [vmem:[#allocation2 + $0x30] sm:$0xff] }
  0x2c   :  { %v5852_v12 = vrot.slane %v496_v10, %v500_v2  ;;  %v5854_v13 = vrot.slane %v496_v10, %v504_v3  ;;  %v5856_v14 = vrot.slane %v496_v10, %v508_v4  ;;  %v5858_v15 = vrot.slane %v496_v10, %v512_v5  ;;  %v48_v34 = vld [vmem:[#allocation2 + $0x38] sm:$0xff]  ;;  %v61_v39 = vld [vmem:[#allocation2 + $0xa0] sm:$0xff]  ;;  %v62_v40 = vld [vmem:[#allocation2 + $0xa8] sm:$0xff] }
  0x2d   :  { %v63_v45 = vld [vmem:[#allocation2 + $0xb0] sm:$0xff]  ;;  %v57_v50 = vld [vmem:[#allocation2 + $0x80] sm:$0xff]  ;;  %v64_v53 = vld [vmem:[#allocation2 + $0xb8] sm:$0xff] }
  0x2e   :  { %v526_v22 = vmul.f32 %v5852_v12, %v49_v6  ;;  %v527_v23 = vmul.f32 %v5854_v13, %v50_v7  ;;  %v528_v24 = vmul.f32 %v5856_v14, %v51_v8  ;;  %v529_v25 = vmul.f32 %v5858_v15, %v52_v9  ;;  %v58_v56 = vld [vmem:[#allocation2 + $0x88] sm:$0xff]  ;;  %v59_v57 = vld [vmem:[#allocation2 + $0x90] sm:$0xff]  ;;  %v69_v61 = vld [vmem:[#allocation2 + $0xe0] sm:$0xff] }
  0x2f   :  { %v518_v29 = vmul.f32 %v5852_v12, %v41_v11  ;;  %v519_v30 = vmul.f32 %v5854_v13, %v42_v16  ;;  %v520_v31 = vmul.f32 %v5856_v14, %v43_v17  ;;  %v521_v32 = vmul.f32 %v5858_v15, %v44_v18  ;;  %v70_v62 = vld [vmem:[#allocation2 + $0xe8] sm:$0xff]  ;;  %v60_v2 = vld [vmem:[#allocation2 + $0x98] sm:$0xff]  ;;  %v71_v4 = vld [vmem:[#allocation2 + $0xf0] sm:$0xff] }
  0x30   :  { %v976_v35 = vadd.f32 %v527_v23, %v526_v22  ;;  %v530_v36 = vmul.f32 %v5852_v12, %v53_v19  ;;  %v531_v37 = vmul.f32 %v5854_v13, %v54_v20  ;;  %v532_v38 = vmul.f32 %v5856_v14, %v55_v21  ;;  %v65_v5 = vld [vmem:[#allocation2 + $0xc0] sm:$0xff]  ;;  %v72_v10 = vld [vmem:[#allocation2 + $0xf8] sm:$0xff]  ;;  %v66_v11 = vld [vmem:[#allocation2 + $0xc8] sm:$0xff] }
  0x31   :  { %v966_v41 = vadd.f32 %v519_v30, %v518_v29  ;;  %v533_v42 = vmul.f32 %v5858_v15, %v56_v26  ;;  %v522_v43 = vmul.f32 %v5852_v12, %v45_v27  ;;  %v523_v44 = vmul.f32 %v5854_v13, %v46_v28  ;;  %v67_v16 = vld [vmem:[#allocation2 + $0xd0] sm:$0xff]  ;;  %v77_v21 = vld [vmem:[#allocation2 + $0x120] sm:$0xff]  ;;  %v78_v22 = vld [vmem:[#allocation2 + $0x128] sm:$0xff] }
  0x32   :  { %v977_v46 = vadd.f32 %v976_v35, %v528_v24  ;;  %v981_v47 = vadd.f32 %v531_v37, %v530_v36  ;;  %v524_v48 = vmul.f32 %v5856_v14, %v47_v33  ;;  %v525_v49 = vmul.f32 %v5858_v15, %v48_v34  ;;  %v68_v26 = vld [vmem:[#allocation2 + $0xd8] sm:$0xff]  ;;  %v79_v28 = vld [vmem:[#allocation2 + $0x130] sm:$0xff]  ;;  %v73_v33 = vld [vmem:[#allocation2 + $0x100] sm:$0xff] }
  0x33   :  { %v967_v51 = vadd.f32 %v966_v41, %v520_v31  ;;  %v971_v52 = vadd.f32 %v523_v44, %v522_v43  ;;  %v538_v54 = vmul.f32 %v5852_v12, %v61_v39  ;;  %v539_v55 = vmul.f32 %v5854_v13, %v62_v40  ;;  %v74_v34 = vld [vmem:[#allocation2 + $0x108] sm:$0xff]  ;;  %v80_v37 = vld [vmem:[#allocation2 + $0x138] sm:$0xff]  ;;  %v75_v40 = vld [vmem:[#allocation2 + $0x110] sm:$0xff] }
  0x34   :  { %v978_v58 = vadd.f32 %v977_v46, %v529_v25  ;;  %v982_v59 = vadd.f32 %v981_v47, %v532_v38  ;;  %v540_v60 = vmul.f32 %v5856_v14, %v63_v45  ;;  %v534_v3 = vmul.f32 %v5852_v12, %v57_v50  ;;  %v85_v45 = vld [vmem:[#allocation2 + $0x160] sm:$0xff]  ;;  %v86_v46 = vld [vmem:[#allocation2 + $0x168] sm:$0xff] }
  0x35   :  { %v968_v63 = vadd.f32 %v967_v51, %v521_v32  ;;  %v972_v0 = vadd.f32 %v971_v52, %v524_v48  ;;  %v991_v1 = vadd.f32 %v539_v55, %v538_v54  ;;  %v541_v7 = vmul.f32 %v5858_v15, %v64_v53  ;;  %v87_v52 = vld [vmem:[#allocation2 + $0x170] sm:$0xff]  ;;  %v81_v53 = vld [vmem:[#allocation2 + $0x140] sm:$0xff] }
  0x36   :  { %979 = vadd.xlane.f32.xlu1 %v978_v58  ;;  %v983_v6 = vadd.f32 %v982_v59, %v533_v42  ;;  %v535_v8 = vmul.f32 %v5854_v13, %v58_v56  ;;  %v536_v9 = vmul.f32 %v5856_v14, %v59_v57  ;;  %v546_v19 = vmul.f32 %v5852_v12, %v69_v61  ;;  %v88_v58 = vld [vmem:[#allocation2 + $0x178] sm:$0xff]  ;;  %v82_v59 = vld [vmem:[#allocation2 + $0x148] sm:$0xff] }
  0x37   :  { %969 = vadd.xlane.f32.xlu0 %v968_v63  ;;  %v973_v17 = vadd.f32 %v972_v0, %v525_v49  ;;  %v992_v18 = vadd.f32 %v991_v1, %v540_v60  ;;  %v547_v20 = vmul.f32 %v5854_v13, %v70_v62  ;;  %v537_v23 = vmul.f32 %v5858_v15, %v60_v2  ;;  %v76_v49 = vld [vmem:[#allocation2 + $0x118] sm:$0xff]  ;;  %v83_v0 = vld [vmem:[#allocation2 + $0x150] sm:$0xff]  ;;  %v93_v1 = vld [vmem:[#allocation2 + $0x1a0] sm:$0xff] }
  0x38   :  { %v986_v24 = vadd.f32 %v535_v8, %v534_v3  ;;  %v548_v25 = vmul.f32 %v5856_v14, %v71_v4  ;;  %v542_v27 = vmul.f32 %v5852_v12, %v65_v5  ;;  %v549_v29 = vmul.f32 %v5858_v15, %v72_v10  ;;  %v94_v2 = vld [vmem:[#allocation2 + $0x1a8] sm:$0xff]  ;;  %v95_v8 = vld [vmem:[#allocation2 + $0x1b0] sm:$0xff] }
  0x39   :  { %v1001_v30 = vadd.f32 %v547_v20, %v546_v19  ;;  %v543_v31 = vmul.f32 %v5854_v13, %v66_v11  ;;  %v544_v32 = vmul.f32 %v5856_v14, %v67_v16  ;;  %v993_v35 = vadd.f32 %v992_v18, %v541_v7  ;;  %v90_v18 = vld [vmem:[#allocation2 + $0x188] sm:$0xff] }
  0x3a   :  { %984 = vadd.xlane.f32.xlu1 %v983_v6  ;;  %v987_v36 = vadd.f32 %v986_v24, %v536_v9  ;;  %v554_v38 = vmul.f32 %v5852_v12, %v77_v21  ;;  %v555_v39 = vmul.f32 %v5854_v13, %v78_v22  ;;  %v545_v42 = vmul.f32 %v5858_v15, %v68_v26  ;;  %v84_v6 = vld [vmem:[#allocation2 + $0x158] sm:$0xff]  ;;  %v91_v24 = vld [vmem:[#allocation2 + $0x190] sm:$0xff] }
  0x3b   :  { %974 = vadd.xlane.f32.xlu0 %v973_v17  ;;  %v1002_v41 = vadd.f32 %v1001_v30, %v548_v25  ;;  %v996_v43 = vadd.f32 %v543_v31, %v542_v27  ;;  %v556_v44 = vmul.f32 %v5856_v14, %v79_v28  ;;  %v550_v50 = vmul.f32 %v5852_v12, %v73_v33  ;;  %v89_v17 = vld [vmem:[#allocation2 + $0x180] sm:$0xff]  ;;  %v96_v21 = vld [vmem:[#allocation2 + $0x1b8] sm:$0xff]  ;;  %v102_v30 = vld [vmem:[#allocation2 + $0x1e8] sm:$0xff] }
  0x3c   :  { %v988_v47 = vadd.f32 %v987_v36, %v537_v23  ;;  %v1011_v48 = vadd.f32 %v555_v39, %v554_v38  ;;  %v551_v51 = vmul.f32 %v5854_v13, %v74_v34  ;;  %v557_v56 = vmul.f32 %v5858_v15, %v80_v37  ;;  %v92_v33 = vld [vmem:[#allocation2 + $0x198] sm:$0xff]  ;;  %v103_v36 = vld [vmem:[#allocation2 + $0x1f0] sm:$0xff]  ;;  %v97_v37 = vld [vmem:[#allocation2 + $0x1c0] sm:$0xff] }
  0x3d   :  { %v1003_v54 = vadd.f32 %v1002_v41, %v549_v29  ;;  %v997_v55 = vadd.f32 %v996_v43, %v544_v32  ;;  %v552_v57 = vmul.f32 %v5856_v14, %v75_v40  ;;  %v562_v62 = vmul.f32 %v5852_v12, %v85_v45  ;;  %v101_v29 = vld [vmem:[#allocation2 + $0x1e0] sm:$0xff]  ;;  %v104_v41 = vld [vmem:[#allocation2 + $0x1f8] sm:$0xff] }
  0x3e   :  { %994 = vadd.xlane.f32.xlu1 %v993_v35  ;;  %v1012_v60 = vadd.f32 %v1011_v48, %v556_v44  ;;  %v1006_v61 = vadd.f32 %v551_v51, %v550_v50  ;;  %v563_v63 = vmul.f32 %v5854_v13, %v86_v46  ;;  %v553_v4 = vmul.f32 %v5858_v15, %v76_v49  ;;  %v109_v48 = vld [vmem:[#allocation2 + $0x220] sm:$0xff]  ;;  %v110_v49 = vld [vmem:[#allocation2 + $0x228] sm:$0xff] }
  0x3f   :  { %989 = vadd.xlane.f32.xlu0 %v988_v47  ;;  %v998_v3 = vadd.f32 %v997_v55, %v545_v42  ;;  %v564_v5 = vmul.f32 %v5856_v14, %v87_v52  ;;  %v558_v7 = vmul.f32 %v5852_v12, %v81_v53  ;;  %v565_v10 = vmul.f32 %v5858_v15, %v88_v58  ;;  %v98_v42 = vld [vmem:[#allocation2 + $0x1c8] sm:$0xff]  ;;  %v99_v47 = vld [vmem:[#allocation2 + $0x1d0] sm:$0xff]  ;;  %v100_v58 = vld [vmem:[#allocation2 + $0x1d8] sm:$0xff] }
  0x40   :  { %v1007_v9 = vadd.f32 %v1006_v61, %v552_v57  ;;  %v1021_v11 = vadd.f32 %v563_v63, %v562_v62  ;;  %v559_v16 = vmul.f32 %v5854_v13, %v82_v59  ;;  %v1013_v19 = vadd.f32 %v1012_v60, %v557_v56  ;;  %v105_v60 = vld [vmem:[#allocation2 + $0x200] sm:$0xff]  ;;  %v106_v61 = vld [vmem:[#allocation2 + $0x208] sm:$0xff] }
  0x41   :  { %v560_v20 = vmul.f32 %v5856_v14, %v83_v0  ;;  %v570_v22 = vmul.f32 %v5852_v12, %v93_v1  ;;  %v571_v23 = vmul.f32 %v5854_v13, %v94_v2  ;;  %v561_v26 = vmul.f32 %v5858_v15, %v84_v6  ;;  %v112_v0 = vld [vmem:[#allocation2 + $0x238] sm:$0xff] }
  0x42   :  { %1004 = vadd.xlane.f32.xlu1 %v1003_v54  ;;  %v1022_v25 = vadd.f32 %v1021_v11, %v564_v5  ;;  %v1016_v27 = vadd.f32 %v559_v16, %v558_v7  ;;  %v572_v28 = vmul.f32 %v5856_v14, %v95_v8  ;;  %v1008_v31 = vadd.f32 %v1007_v9, %v553_v4  ;;  %v111_v54 = vld [vmem:[#allocation2 + $0x230] sm:$0xff]  ;;  %v117_v8 = vld [vmem:[#allocation2 + $0x260] sm:$0xff]  ;;  %v118_v9 = vld [vmem:[#allocation2 + $0x268] sm:$0xff] }
  0x43   :  { %999 = vadd.xlane.f32.xlu0 %v998_v3  ;;  %v1031_v32 = vadd.f32 %v571_v23, %v570_v22  ;;  %v566_v34 = vmul.f32 %v5852_v12, %v89_v17  ;;  %v567_v35 = vmul.f32 %v5854_v13, %v90_v18  ;;  %v573_v39 = vmul.f32 %v5858_v15, %v96_v21  ;;  %v107_v3 = vld [vmem:[#allocation2 + $0x210] sm:$0xff]  ;;  %v108_v16 = vld [vmem:[#allocation2 + $0x218] sm:$0xff] }
  0x44   :  { %v1017_v38 = vadd.f32 %v1016_v27, %v560_v20  ;;  %v568_v40 = vmul.f32 %v5856_v14, %v91_v24  ;;  %v578_v45 = vmul.f32 %v5852_v12, %v101_v29  ;;  %v579_v46 = vmul.f32 %v5854_v13, %v102_v30  ;;  %v113_v20 = vld [vmem:[#allocation2 + $0x240] sm:$0xff] }
  0x45   :  { %v1032_v43 = vadd.f32 %v1031_v32, %v572_v28  ;;  %v1026_v44 = vadd.f32 %v567_v35, %v566_v34  ;;  %v1023_v50 = vadd.f32 %v1022_v25, %v565_v10  ;;  %v569_v51 = vmul.f32 %v5858_v15, %v92_v33  ;;  %v120_v25 = vld [vmem:[#allocation2 + $0x278] sm:$0xff]  ;;  %v125_v32 = vld [vmem:[#allocation2 + $0x2a0] sm:$0xff]  ;;  %v126_v33 = vld [vmem:[#allocation2 + $0x2a8] sm:$0xff] }
  0x46   :  { %1014 = vadd.xlane.f32.xlu1 %v1013_v19  ;;  %v580_v52 = vmul.f32 %v5856_v14, %v103_v36  ;;  %v574_v53 = vmul.f32 %v5852_v12, %v97_v37  ;;  %v1018_v55 = vadd.f32 %v1017_v38, %v561_v26  ;;  %v1041_v57 = vadd.f32 %v579_v46, %v578_v45  ;;  %v119_v19 = vld [vmem:[#allocation2 + $0x270] sm:$0xff]  ;;  %v114_v26 = vld [vmem:[#allocation2 + $0x248] sm:$0xff] }
  0x47   :  { %1009 = vadd.xlane.f32.xlu0 %v1008_v31  ;;  %v1027_v56 = vadd.f32 %v1026_v44, %v568_v40  ;;  %v575_v59 = vmul.f32 %v5854_v13, %v98_v42  ;;  %v581_v62 = vmul.f32 %v5858_v15, %v104_v41  ;;  %v576_v63 = vmul.f32 %v5856_v14, %v99_v47  ;;  %v115_v31 = vld [vmem:[#allocation2 + $0x250] sm:$0xff]  ;;  %v116_v42 = vld [vmem:[#allocation2 + $0x258] sm:$0xff]  ;;  %v121_v44 = vld [vmem:[#allocation2 + $0x280] sm:$0xff] }
  0x48   :  { %v586_v1 = vmul.f32 %v5852_v12, %v109_v48  ;;  %v587_v2 = vmul.f32 %v5854_v13, %v110_v49  ;;  %v1033_v4 = vadd.f32 %v1032_v43, %v573_v39  ;;  %v1042_v5 = vadd.f32 %v1041_v57, %v580_v52  ;;  %v127_v38 = vld [vmem:[#allocation2 + $0x2b0] sm:$0xff]  ;;  %v122_v45 = vld [vmem:[#allocation2 + $0x288] sm:$0xff]  ;;  %v128_v48 = vld [vmem:[#allocation2 + $0x2b8] sm:$0xff] }
  0x49   :  { %v1036_v6 = vadd.f32 %v575_v59, %v574_v53  ;;  %v588_v7 = vmul.f32 %v5856_v14, %v111_v54  ;;  %v577_v10 = vmul.f32 %v5858_v15, %v100_v58  ;;  %v582_v17 = vmul.f32 %v5852_v12, %v105_v60  ;;  %v134_v57 = vld [vmem:[#allocation2 + $0x2e8] sm:$0xff] }
  0x4a   :  { %1024 = vadd.xlane.f32.xlu1 %v1023_v50  ;;  %v1051_v11 = vadd.f32 %v587_v2, %v586_v1  ;;  %v583_v18 = vmul.f32 %v5854_v13, %v106_v61  ;;  %v1028_v21 = vadd.f32 %v1027_v56, %v569_v51  ;;  %v589_v23 = vmul.f32 %v5858_v15, %v112_v0  ;;  %v123_v51 = vld [vmem:[#allocation2 + $0x290] sm:$0xff]  ;;  %v133_v56 = vld [vmem:[#allocation2 + $0x2e0] sm:$0xff] }
  0x4b   :  { %1019 = vadd.xlane.f32.xlu0 %v1018_v55  ;;  %v1037_v22 = vadd.f32 %v1036_v6, %v576_v63  ;;  %v584_v24 = vmul.f32 %v5856_v14, %v107_v3  ;;  %v594_v29 = vmul.f32 %v5852_v12, %v117_v8  ;;  %v595_v30 = vmul.f32 %v5854_v13, %v118_v9  ;;  %v129_v63 = vld [vmem:[#allocation2 + $0x2c0] sm:$0xff]  ;;  %v124_v3 = vld [vmem:[#allocation2 + $0x298] sm:$0xff] }
  0x4c   :  { %v1052_v27 = vadd.f32 %v1051_v11, %v588_v7  ;;  %v1046_v28 = vadd.f32 %v583_v18, %v582_v17  ;;  %v1043_v34 = vadd.f32 %v1042_v5, %v581_v62  ;;  %v585_v35 = vmul.f32 %v5858_v15, %v108_v16  ;;  %v135_v62 = vld [vmem:[#allocation2 + $0x2f0] sm:$0xff]  ;;  %v130_v5 = vld [vmem:[#allocation2 + $0x2c8] sm:$0xff]  ;;  %v141_v11 = vld [vmem:[#allocation2 + $0x320] sm:$0xff] }
  0x4d   :  { %v596_v36 = vmul.f32 %v5856_v14, %v119_v19  ;;  %v590_v37 = vmul.f32 %v5852_v12, %v113_v20  ;;  %v1038_v39 = vadd.f32 %v1037_v22, %v577_v10  ;;  %v1061_v41 = vadd.f32 %v595_v30, %v594_v29  ;;  %v131_v10 = vld [vmem:[#allocation2 + $0x2d0] sm:$0xff]  ;;  %v142_v16 = vld [vmem:[#allocation2 + $0x328] sm:$0xff]  ;;  %v136_v18 = vld [vmem:[#allocation2 + $0x2f8] sm:$0xff] }
  0x4e   :  { %1034 = vadd.xlane.f32.xlu1 %v1033_v4  ;;  %v1047_v40 = vadd.f32 %v1046_v28, %v584_v24  ;;  %v591_v43 = vmul.f32 %v5854_v13, %v114_v26  ;;  %v597_v46 = vmul.f32 %v5858_v15, %v120_v25  ;;  %v592_v47 = vmul.f32 %v5856_v14, %v115_v31  ;;  %v143_v25 = vld [vmem:[#allocation2 + $0x330] sm:$0xff]  ;;  %v137_v26 = vld [vmem:[#allocation2 + $0x300] sm:$0xff]  ;;  %v132_v29 = vld [vmem:[#allocation2 + $0x2d8] sm:$0xff] }
  0x4f   :  { %1029 = vadd.xlane.f32.xlu0 %v1028_v21  ;;  %v602_v49 = vmul.f32 %v5852_v12, %v125_v32  ;;  %v603_v50 = vmul.f32 %v5854_v13, %v126_v33  ;;  %v1053_v52 = vadd.f32 %v1052_v27, %v589_v23  ;;  %v1062_v53 = vadd.f32 %v1061_v41, %v596_v36  ;;  %v138_v27 = vld [vmem:[#allocation2 + $0x308] sm:$0xff]  ;;  %v139_v33 = vld [vmem:[#allocation2 + $0x310] sm:$0xff] }
  0x50   :  { %v1056_v54 = vadd.f32 %v591_v43, %v590_v37  ;;  %v604_v55 = vmul.f32 %v5856_v14, %v127_v38  ;;  %v593_v58 = vmul.f32 %v5858_v15, %v116_v42  ;;  %v598_v60 = vmul.f32 %v5852_v12, %v121_v44  ;;  %v144_v38 = vld [vmem:[#allocation2 + $0x338] sm:$0xff] }
  0x51   :  { %v1071_v59 = vadd.f32 %v603_v50, %v602_v49  ;;  %v599_v61 = vmul.f32 %v5854_v13, %v122_v45  ;;  %v1048_v0 = vadd.f32 %v1047_v40, %v585_v35  ;;  %v605_v2 = vmul.f32 %v5858_v15, %v128_v48  ;;  %v150_v40 = vld [vmem:[#allocation2 + $0x368] sm:$0xff]  ;;  %v140_v43 = vld [vmem:[#allocation2 + $0x318] sm:$0xff] }
  0x52   :  { %1044 = vadd.xlane.f32.xlu1 %v1043_v34  ;;  %v1057_v1 = vadd.f32 %v1056_v54, %v592_v47  ;;  %v600_v4 = vmul.f32 %v5856_v14, %v123_v51  ;;  %v610_v8 = vmul.f32 %v5852_v12, %v133_v56  ;;  %v611_v9 = vmul.f32 %v5854_v13, %v134_v57  ;;  %v145_v47 = vld [vmem:[#allocation2 + $0x340] sm:$0xff]  ;;  %v147_v57 = vld [vmem:[#allocation2 + $0x350] sm:$0xff] }
  0x53   :  { %1039 = vadd.xlane.f32.xlu0 %v1038_v39  ;;  %v1072_v6 = vadd.f32 %v1071_v59, %v604_v55  ;;  %v1066_v7 = vadd.f32 %v599_v61, %v598_v60  ;;  %v1063_v17 = vadd.f32 %v1062_v53, %v597_v46  ;;  %v612_v19 = vmul.f32 %v5856_v14, %v135_v62  ;;  %v149_v39 = vld [vmem:[#allocation2 + $0x360] sm:$0xff]  ;;  %v151_v46 = vld [vmem:[#allocation2 + $0x370] sm:$0xff]  ;;  %v158_v59 = vld [vmem:[#allocation2 + $0x3a8] sm:$0xff] }
  0x54   :  { %v606_v20 = vmul.f32 %v5852_v12, %v129_v63  ;;  %v601_v21 = vmul.f32 %v5858_v15, %v124_v3  ;;  %v1081_v23 = vadd.f32 %v611_v9, %v610_v8  ;;  %v607_v24 = vmul.f32 %v5854_v13, %v130_v5  ;;  %v152_v62 = vld [vmem:[#allocation2 + $0x378] sm:$0xff]  ;;  %v154_v8 = vld [vmem:[#allocation2 + $0x388] sm:$0xff] }
  0x55   :  { %v1067_v22 = vadd.f32 %v1066_v7, %v600_v4  ;;  %v1058_v28 = vadd.f32 %v1057_v1, %v593_v58  ;;  %v608_v30 = vmul.f32 %v5856_v14, %v131_v10  ;;  %v618_v31 = vmul.f32 %v5852_v12, %v141_v11  ;;  %v157_v58 = vld [vmem:[#allocation2 + $0x3a0] sm:$0xff]  ;;  %v159_v1 = vld [vmem:[#allocation2 + $0x3b0] sm:$0xff]  ;;  %v148_v5 = vld [vmem:[#allocation2 + $0x358] sm:$0xff] }
  0x56   :  { %1054 = vadd.xlane.f32.xlu1 %v1053_v52  ;;  %v619_v32 = vmul.f32 %v5854_v13, %v142_v16  ;;  %v1073_v34 = vadd.f32 %v1072_v6, %v605_v2  ;;  %v613_v35 = vmul.f32 %v5858_v15, %v136_v18  ;;  %v1082_v36 = vadd.f32 %v1081_v23, %v612_v19  ;;  %v146_v52 = vld [vmem:[#allocation2 + $0x348] sm:$0xff]  ;;  %v153_v7 = vld [vmem:[#allocation2 + $0x380] sm:$0xff]  ;;  %v160_v11 = vld [vmem:[#allocation2 + $0x3b8] sm:$0xff] }
  0x57   :  { %1049 = vadd.xlane.f32.xlu0 %v1048_v0  ;;  %v1076_v37 = vadd.f32 %v607_v24, %v606_v20  ;;  %v620_v41 = vmul.f32 %v5856_v14, %v143_v25  ;;  %v614_v44 = vmul.f32 %v5852_v12, %v137_v26  ;;  %v615_v45 = vmul.f32 %v5854_v13, %v138_v27  ;;  %v165_v23 = vld [vmem:[#allocation2 + $0x3e0] sm:$0xff]  ;;  %v166_v24 = vld [vmem:[#allocation2 + $0x3e8] sm:$0xff] }
  0x58   :  { %v1091_v42 = vadd.f32 %v619_v32, %v618_v31  ;;  %v1068_v48 = vadd.f32 %v1067_v22, %v601_v21  ;;  %v609_v49 = vmul.f32 %v5858_v15, %v132_v29  ;;  %v616_v51 = vmul.f32 %v5856_v14, %v139_v33  ;;  %v155_v22 = vld [vmem:[#allocation2 + $0x390] sm:$0xff] }
  0x59   :  { %v1077_v50 = vadd.f32 %v1076_v37, %v608_v30  ;;  %v621_v53 = vmul.f32 %v5858_v15, %v144_v38  ;;  %v1086_v54 = vadd.f32 %v615_v45, %v614_v44  ;;  %v626_v55 = vmul.f32 %v5852_v12, %v149_v39  ;;  %v167_v29 = vld [vmem:[#allocation2 + $0x3f0] sm:$0xff]  ;;  %v161_v30 = vld [vmem:[#allocation2 + $0x3c0] sm:$0xff]  ;;  %v162_v37 = vld [vmem:[#allocation2 + $0x3c8] sm:$0xff] }
  0x5a   :  { %1064 = vadd.xlane.f32.xlu1 %v1063_v17  ;;  %v627_v56 = vmul.f32 %v5854_v13, %v150_v40  ;;  %v1083_v60 = vadd.f32 %v1082_v36, %v613_v35  ;;  %v617_v61 = vmul.f32 %v5858_v15, %v140_v43  ;;  %v628_v63 = vmul.f32 %v5856_v14, %v151_v46  ;;  %v156_v35 = vld [vmem:[#allocation2 + $0x398] sm:$0xff]  ;;  %v173_v43 = vld [vmem:[#allocation2 + $0x420] sm:$0xff]  ;;  %v174_v44 = vld [vmem:[#allocation2 + $0x428] sm:$0xff] }
  0x5b   :  { %1059 = vadd.xlane.f32.xlu0 %v1058_v28  ;;  %v622_v0 = vmul.f32 %v5852_v12, %v145_v47  ;;  %v1092_v2 = vadd.f32 %v1091_v42, %v620_v41  ;;  %v1087_v3 = vadd.f32 %v1086_v54, %v616_v51  ;;  %v623_v6 = vmul.f32 %v5854_v13, %v146_v52  ;;  %v168_v36 = vld [vmem:[#allocation2 + $0x3f8] sm:$0xff]  ;;  %v163_v42 = vld [vmem:[#allocation2 + $0x3d0] sm:$0xff]  ;;  %v169_v54 = vld [vmem:[#allocation2 + $0x400] sm:$0xff] }
  0x5c   :  { %v1101_v4 = vadd.f32 %v627_v56, %v626_v55  ;;  %v1078_v9 = vadd.f32 %v1077_v50, %v609_v49  ;;  %v624_v10 = vmul.f32 %v5856_v14, %v147_v57  ;;  %v634_v16 = vmul.f32 %v5852_v12, %v157_v58  ;;  %v175_v49 = vld [vmem:[#allocation2 + $0x430] sm:$0xff]  ;;  %v170_v55 = vld [vmem:[#allocation2 + $0x408] sm:$0xff]  ;;  %v164_v57 = vld [vmem:[#allocation2 + $0x3d8] sm:$0xff] }
  0x5d   :  { %v635_v17 = vmul.f32 %v5854_v13, %v158_v59  ;;  %v629_v18 = vmul.f32 %v5858_v15, %v152_v62  ;;  %v1096_v20 = vadd.f32 %v623_v6, %v622_v0  ;;  %v636_v21 = vmul.f32 %v5856_v14, %v159_v1  ;;  %v176_v59 = vld [vmem:[#allocation2 + $0x438] sm:$0xff]  ;;  %v171_v62 = vld [vmem:[#allocation2 + $0x410] sm:$0xff] }
  0x5e   :  { %1074 = vadd.xlane.f32.xlu1 %v1073_v34  ;;  %v1102_v19 = vadd.f32 %v1101_v4, %v628_v63  ;;  %v625_v25 = vmul.f32 %v5858_v15, %v148_v5  ;;  %v630_v27 = vmul.f32 %v5852_v12, %v153_v7  ;;  %v631_v28 = vmul.f32 %v5854_v13, %v154_v8  ;;  %v182_v4 = vld [vmem:[#allocation2 + $0x468] sm:$0xff] }
  0x5f   :  { %1069 = vadd.xlane.f32.xlu0 %v1068_v48  ;;  %v1111_v26 = vadd.f32 %v635_v17, %v634_v16  ;;  %v1093_v31 = vadd.f32 %v1092_v2, %v621_v53  ;;  %v1088_v32 = vadd.f32 %v1087_v3, %v617_v61  ;;  %v1097_v33 = vadd.f32 %v1096_v20, %v624_v10  ;;  %v181_v3 = vld [vmem:[#allocation2 + $0x460] sm:$0xff]  ;;  %v178_v20 = vld [vmem:[#allocation2 + $0x448] sm:$0xff] }
  0x60   :  { %v637_v34 = vmul.f32 %v5858_v15, %v160_v11  ;;  %v632_v38 = vmul.f32 %v5856_v14, %v155_v22  ;;  %v1106_v39 = vadd.f32 %v631_v28, %v630_v27  ;;  %v642_v40 = vmul.f32 %v5852_v12, %v165_v23  ;;  %v177_v10 = vld [vmem:[#allocation2 + $0x440] sm:$0xff]  ;;  %v190_v27 = vld [vmem:[#allocation2 + $0x4a8] sm:$0xff] }
  0x61   :  { %v643_v41 = vmul.f32 %v5854_v13, %v166_v24  ;;  %v1103_v45 = vadd.f32 %v1102_v19, %v629_v18  ;;  %v1112_v46 = vadd.f32 %v1111_v26, %v636_v21  ;;  %v644_v47 = vmul.f32 %v5856_v14, %v167_v29  ;;  %v172_v18 = vld [vmem:[#allocation2 + $0x418] sm:$0xff]  ;;  %v189_v26 = vld [vmem:[#allocation2 + $0x4a0] sm:$0xff] }
  0x62   :  { %1084 = vadd.xlane.f32.xlu1 %v1083_v60  ;;  %v638_v48 = vmul.f32 %v5852_v12, %v161_v30  ;;  %v1098_v50 = vadd.f32 %v1097_v33, %v625_v25  ;;  %v633_v51 = vmul.f32 %v5858_v15, %v156_v35  ;;  %v639_v53 = vmul.f32 %v5854_v13, %v162_v37  ;;  %v179_v25 = vld [vmem:[#allocation2 + $0x450] sm:$0xff]  ;;  %v184_v30 = vld [vmem:[#allocation2 + $0x478] sm:$0xff] }
  0x63   :  { %1079 = vadd.xlane.f32.xlu0 %v1078_v9  ;;  %v1121_v52 = vadd.f32 %v643_v41, %v642_v40  ;;  %v645_v56 = vmul.f32 %v5858_v15, %v168_v36  ;;  %v640_v58 = vmul.f32 %v5856_v14, %v163_v42  ;;  %v650_v60 = vmul.f32 %v5852_v12, %v173_v43  ;;  %v183_v9 = vld [vmem:[#allocation2 + $0x470] sm:$0xff]  ;;  %v180_v41 = vld [vmem:[#allocation2 + $0x458] sm:$0xff] }
  0x64   :  { %v651_v61 = vmul.f32 %v5854_v13, %v174_v44  ;;  %v1107_v63 = vadd.f32 %v1106_v39, %v632_v38  ;;  %v1116_v1 = vadd.f32 %v639_v53, %v638_v48  ;;  %v652_v2 = vmul.f32 %v5856_v14, %v175_v49  ;;  %v191_v37 = vld [vmem:[#allocation2 + $0x4b0] sm:$0xff]  ;;  %v185_v38 = vld [vmem:[#allocation2 + $0x480] sm:$0xff]  ;;  %v186_v39 = vld [vmem:[#allocation2 + $0x488] sm:$0xff] }
  0x65   :  { %v1122_v0 = vadd.f32 %v1121_v52, %v644_v47  ;;  %v1113_v5 = vadd.f32 %v1112_v46, %v637_v34  ;;  %v646_v7 = vmul.f32 %v5852_v12, %v169_v54  ;;  %v647_v8 = vmul.f32 %v5854_v13, %v170_v55  ;;  %v187_v46 = vld [vmem:[#allocation2 + $0x490] sm:$0xff]  ;;  %v197_v52 = vld [vmem:[#allocation2 + $0x4e0] sm:$0xff]  ;;  %v198_v53 = vld [vmem:[#allocation2 + $0x4e8] sm:$0xff] }
  0x66   :  { %1094 = vadd.xlane.f32.xlu1 %v1093_v31  ;;  %v1131_v6 = vadd.f32 %v651_v61, %v650_v60  ;;  %v641_v11 = vmul.f32 %v5858_v15, %v164_v57  ;;  %v1117_v16 = vadd.f32 %v1116_v1, %v640_v58  ;;  %v653_v17 = vmul.f32 %v5858_v15, %v176_v59  ;;  %v188_v55 = vld [vmem:[#allocation2 + $0x498] sm:$0xff]  ;;  %v199_v58 = vld [vmem:[#allocation2 + $0x4f0] sm:$0xff]  ;;  %v193_v59 = vld [vmem:[#allocation2 + $0x4c0] sm:$0xff] }
  0x67   :  { %1089 = vadd.xlane.f32.xlu0 %v1088_v32  ;;  %v648_v19 = vmul.f32 %v5856_v14, %v171_v62  ;;  %v1126_v22 = vadd.f32 %v647_v8, %v646_v7  ;;  %v658_v23 = vmul.f32 %v5852_v12, %v181_v3  ;;  %v659_v24 = vmul.f32 %v5854_v13, %v182_v4  ;;  %v205_v7 = vld [vmem:[#allocation2 + $0x520] sm:$0xff]  ;;  %v206_v8 = vld [vmem:[#allocation2 + $0x528] sm:$0xff] }
  0x68   :  { %v1132_v21 = vadd.f32 %v1131_v6, %v652_v2  ;;  %v1108_v28 = vadd.f32 %v1107_v63, %v633_v51  ;;  %v1123_v29 = vadd.f32 %v1122_v0, %v645_v56  ;;  %v660_v31 = vmul.f32 %v5856_v14, %v183_v9  ;;  %v192_v51 = vld [vmem:[#allocation2 + $0x4b8] sm:$0xff]  ;;  %v194_v0 = vld [vmem:[#allocation2 + $0x4c8] sm:$0xff]  ;;  %v195_v6 = vld [vmem:[#allocation2 + $0x4d0] sm:$0xff] }
  0x69   :  { %v654_v32 = vmul.f32 %v5852_v12, %v177_v10  ;;  %v649_v33 = vmul.f32 %v5858_v15, %v172_v18  ;;  %v1127_v34 = vadd.f32 %v1126_v22, %v648_v19  ;;  %v1141_v35 = vadd.f32 %v659_v24, %v658_v23  ;;  %v200_v10 = vld [vmem:[#allocation2 + $0x4f8] sm:$0xff]  ;;  %v201_v23 = vld [vmem:[#allocation2 + $0x500] sm:$0xff]  ;;  %v202_v24 = vld [vmem:[#allocation2 + $0x508] sm:$0xff] }
  0x6a   :  { %1104 = vadd.xlane.f32.xlu1 %v1103_v45  ;;  %v655_v36 = vmul.f32 %v5854_v13, %v178_v20  ;;  %v1118_v40 = vadd.f32 %v1117_v16, %v641_v11  ;;  %v656_v42 = vmul.f32 %v5856_v14, %v179_v25  ;;  %v666_v43 = vmul.f32 %v5852_v12, %v189_v26 }
  0x6b   :  { %1099 = vadd.xlane.f32.xlu0 %v1098_v50  ;;  %v667_v44 = vmul.f32 %v5854_v13, %v190_v27  ;;  %v6004_v45 = vadd.f32 %v1132_v21, %v653_v17  ;;  %v661_v47 = vmul.f32 %v5858_v15, %v184_v30  ;;  %v1142_v48 = vadd.f32 %v1141_v35, %v660_v31  ;;  %v207_v17 = vld [vmem:[#allocation2 + $0x530] sm:$0xff]  ;;  %v196_v21 = vld [vmem:[#allocation2 + $0x4d8] sm:$0xff] }
  0x6c   :  { %v1136_v49 = vadd.f32 %v655_v36, %v654_v32  ;;  %v668_v50 = vmul.f32 %v5856_v14, %v191_v37  ;;  %v662_v56 = vmul.f32 %v5852_v12, %v185_v38  ;;  %v663_v57 = vmul.f32 %v5854_v13, %v186_v39  ;;  %v208_v27 = vld [vmem:[#allocation2 + $0x538] sm:$0xff]  ;;  %v203_v35 = vld [vmem:[#allocation2 + $0x510] sm:$0xff]  ;;  %v213_v36 = vld [vmem:[#allocation2 + $0x560] sm:$0xff] }
  0x6d   :  { %v1151_v54 = vadd.f32 %v667_v44, %v666_v43  ;;  %v1128_v60 = vadd.f32 %v1127_v34, %v649_v33  ;;  %v657_v61 = vmul.f32 %v5858_v15, %v180_v41  ;;  %v664_v63 = vmul.f32 %v5856_v14, %v187_v46  ;;  %v214_v37 = vld [vmem:[#allocation2 + $0x568] sm:$0xff]  ;;  %v209_v43 = vld [vmem:[#allocation2 + $0x540] sm:$0xff] }
  0x6e   :  { %1114 = vadd.xlane.f32.xlu1 %v1113_v5  ;;  %v1137_v62 = vadd.f32 %v1136_v49, %v656_v42  ;;  %v669_v1 = vmul.f32 %v5858_v15, %v192_v51  ;;  %v1146_v2 = vadd.f32 %v663_v57, %v662_v56  ;;  %v674_v3 = vmul.f32 %v5852_v12, %v197_v52  ;;  %v215_v42 = vld [vmem:[#allocation2 + $0x570] sm:$0xff]  ;;  %v216_v49 = vld [vmem:[#allocation2 + $0x578] sm:$0xff]  ;;  %v210_v51 = vld [vmem:[#allocation2 + $0x548] sm:$0xff] }
  0x6f   :  { %1109 = vadd.xlane.f32.xlu0 %v1108_v28  ;;  %v675_v4 = vmul.f32 %v5854_v13, %v198_v53  ;;  %v6015_v9 = vadd.f32 %v1142_v48, %v661_v47  ;;  %v665_v5 = vmul.f32 %v5858_v15, %v188_v55  ;;  %v676_v11 = vmul.f32 %v5856_v14, %v199_v58  ;;  %v204_v48 = vld [vmem:[#allocation2 + $0x518] sm:$0xff]  ;;  %v211_v55 = vld [vmem:[#allocation2 + $0x550] sm:$0xff]  ;;  %v221_v56 = vld [vmem:[#allocation2 + $0x5a0] sm:$0xff] }
  0x70   :  { %v670_v16 = vmul.f32 %v5852_v12, %v193_v59  ;;  %v1152_v18 = vadd.f32 %v1151_v54, %v668_v50  ;;  %v1147_v19 = vadd.f32 %v1146_v2, %v664_v63  ;;  %v671_v22 = vmul.f32 %v5854_v13, %v194_v0  ;;  %v222_v57 = vld [vmem:[#allocation2 + $0x5a8] sm:$0xff]  ;;  %v223_v63 = vld [vmem:[#allocation2 + $0x5b0] sm:$0xff] }
  0x71   :  { %v1161_v20 = vadd.f32 %v675_v4, %v674_v3  ;;  %v1138_v25 = vadd.f32 %v1137_v62, %v657_v61  ;;  %v672_v26 = vmul.f32 %v5856_v14, %v195_v6  ;;  %v682_v28 = vmul.f32 %v5852_v12, %v205_v7  ;;  %v217_v3 = vld [vmem:[#allocation2 + $0x580] sm:$0xff]  ;;  %v218_v4 = vld [vmem:[#allocation2 + $0x588] sm:$0xff] }
  0x72   :  { %1124 = vadd.xlane.f32.xlu1 %v1123_v29  ;;  %v683_v30 = vmul.f32 %v5854_v13, %v206_v8  ;;  %v677_v31 = vmul.f32 %v5858_v15, %v200_v10  ;;  %v1156_v33 = vadd.f32 %v671_v22, %v670_v16  ;;  %v684_v34 = vmul.f32 %v5856_v14, %v207_v17  ;;  %v224_v8 = vld [vmem:[#allocation2 + $0x5b8] sm:$0xff] }
  0x73   :  { %1119 = vadd.xlane.f32.xlu0 %v1118_v40  ;;  %v1162_v32 = vadd.f32 %v1161_v20, %v676_v11  ;;  %v673_v29 = vmul.f32 %v5858_v15, %v196_v21  ;;  %v678_v39 = vmul.f32 %v5852_v12, %v201_v23  ;;  %v679_v41 = vmul.f32 %v5854_v13, %v202_v24  ;;  %v219_v11 = vld [vmem:[#allocation2 + $0x590] sm:$0xff]  ;;  %v229_v20 = vld [vmem:[#allocation2 + $0x5e0] sm:$0xff]  ;;  %v230_v21 = vld [vmem:[#allocation2 + $0x5e8] sm:$0xff] }
  0x74   :  { %v1171_v38 = vadd.f32 %v683_v30, %v682_v28  ;;  %v1153_v44 = vadd.f32 %v1152_v18, %v669_v1  ;;  %v6029_v40 = vadd.f32 %v1147_v19, %v665_v5  ;;  %v1157_v46 = vadd.f32 %v1156_v33, %v672_v26  ;;  %v225_v28 = vld [vmem:[#allocation2 + $0x5c0] sm:$0xff] }
  0x75   :  { %v685_v47 = vmul.f32 %v5858_v15, %v208_v27  ;;  %v680_v52 = vmul.f32 %v5856_v14, %v203_v35  ;;  %v1166_v53 = vadd.f32 %v679_v41, %v678_v39  ;;  %v690_v50 = vmul.f32 %v5852_v12, %v213_v36  ;;  %v231_v27 = vld [vmem:[#allocation2 + $0x5f0] sm:$0xff]  ;;  %v238_v39 = vld [vmem:[#allocation2 + $0x628] sm:$0xff] }
  0x76   :  { %1134 = vadd.xlane.f32.xlu1 %v6004_v45  ;;  %v691_v54 = vmul.f32 %v5854_v13, %v214_v37  ;;  %v6036_v58 = vadd.f32 %v1162_v32, %v677_v31  ;;  %v1172_v59 = vadd.f32 %v1171_v38, %v684_v34  ;;  %v692_v61 = vmul.f32 %v5856_v14, %v215_v42  ;;  %v220_v32 = vld [vmem:[#allocation2 + $0x598] sm:$0xff]  ;;  %v226_v34 = vld [vmem:[#allocation2 + $0x5c8] sm:$0xff]  ;;  %v237_v38 = vld [vmem:[#allocation2 + $0x620] sm:$0xff] }
  0x77   :  { %1129 = vadd.xlane.f32.xlu0 %v1128_v60  ;;  %v686_v62 = vmul.f32 %v5852_v12, %v209_v43  ;;  %v6040_v45 = vadd.f32 %v1157_v46, %v673_v29  ;;  %v681_v0 = vmul.f32 %v5858_v15, %v204_v48  ;;  %v687_v2 = vmul.f32 %v5854_v13, %v210_v51  ;;  %v212_v60 = vld [vmem:[#allocation2 + $0x558] sm:$0xff]  ;;  %v227_v29 = vld [vmem:[#allocation2 + $0x5d0] sm:$0xff] }
  0x78   :  { %v1181_v1 = vadd.f32 %v691_v54, %v690_v50  ;;  %v693_v6 = vmul.f32 %v5858_v15, %v216_v49  ;;  %v688_v7 = vmul.f32 %v5856_v14, %v211_v55  ;;  %v698_v5 = vmul.f32 %v5852_v12, %v221_v56  ;;  %v232_v43 = vld [vmem:[#allocation2 + $0x5f8] sm:$0xff]  ;;  %v233_v50 = vld [vmem:[#allocation2 + $0x600] sm:$0xff]  ;;  %v234_v54 = vld [vmem:[#allocation2 + $0x608] sm:$0xff] }
  0x79   :  { %v699_v10 = vmul.f32 %v5854_v13, %v222_v57  ;;  %v1167_v16 = vadd.f32 %v1166_v53, %v680_v52  ;;  %v1176_v18 = vadd.f32 %v687_v2, %v686_v62  ;;  %v700_v19 = vmul.f32 %v5856_v14, %v223_v63  ;;  %v239_v53 = vld [vmem:[#allocation2 + $0x630] sm:$0xff]  ;;  %v228_v55 = vld [vmem:[#allocation2 + $0x5d8] sm:$0xff]  ;;  %v245_v2 = vld [vmem:[#allocation2 + $0x660] sm:$0xff] }
  0x7a   :  { %1144 = vadd.xlane.f32.xlu1 %v6015_v9  ;;  %v1182_v17 = vadd.f32 %v1181_v1, %v692_v61  ;;  %v6050_v22 = vadd.f32 %v1172_v59, %v685_v47  ;;  %v694_v24 = vmul.f32 %v5852_v12, %v217_v3  ;;  %v695_v26 = vmul.f32 %v5854_v13, %v218_v4  ;;  %v235_v61 = vld [vmem:[#allocation2 + $0x610] sm:$0xff]  ;;  %v240_v1 = vld [vmem:[#allocation2 + $0x638] sm:$0xff]  ;;  %v246_v3 = vld [vmem:[#allocation2 + $0x668] sm:$0xff] }
  0x7b   :  { %1139 = vadd.xlane.f32.xlu0 %v1138_v25  ;;  %v1191_v23 = vadd.f32 %v699_v10, %v698_v5  ;;  %v689_v30 = vmul.f32 %v5858_v15, %v212_v60  ;;  %v1177_v9 = vadd.f32 %v1176_v18, %v688_v7  ;;  %v701_v31 = vmul.f32 %v5858_v15, %v224_v8  ;;  %v236_v60 = vld [vmem:[#allocation2 + $0x618] sm:$0xff]  ;;  %v247_v5 = vld [vmem:[#allocation2 + $0x670] sm:$0xff]  ;;  %v241_v10 = vld [vmem:[#allocation2 + $0x640] sm:$0xff] }
  0x7c   :  { %v696_v33 = vmul.f32 %v5856_v14, %v219_v11  ;;  %v1186_v25 = vadd.f32 %v695_v26, %v694_v24  ;;  %v706_v36 = vmul.f32 %v5852_v12, %v229_v20  ;;  %v707_v37 = vmul.f32 %v5854_v13, %v230_v21  ;;  %v243_v24 = vld [vmem:[#allocation2 + $0x650] sm:$0xff]  ;;  %v253_v26 = vld [vmem:[#allocation2 + $0x6a0] sm:$0xff] }
  0x7d   :  { %v1192_v35 = vadd.f32 %v1191_v23, %v700_v19  ;;  %v1168_v41 = vadd.f32 %v1167_v16, %v681_v0  ;;  %v6059_v42 = vadd.f32 %v1182_v17, %v693_v6  ;;  %v708_v46 = vmul.f32 %v5856_v14, %v231_v27  ;;  %v254_v27 = vld [vmem:[#allocation2 + $0x6a8] sm:$0xff] }
  0x7e   :  { %1154 = vadd.xlane.f32.xlu1 %v1153_v44  ;;  %v702_v47 = vmul.f32 %v5852_v12, %v225_v28  ;;  %v697_v48 = vmul.f32 %v5858_v15, %v220_v32  ;;  %v1187_v49 = vadd.f32 %v1186_v25, %v696_v33  ;;  %v1201_v51 = vadd.f32 %v707_v37, %v706_v36  ;;  %v255_v32 = vld [vmem:[#allocation2 + $0x6b0] sm:$0xff]  ;;  %v244_v25 = vld [vmem:[#allocation2 + $0x658] sm:$0xff]  ;;  %v249_v37 = vld [vmem:[#allocation2 + $0x680] sm:$0xff] }
  0x7f   :  { %1149 = vadd.xlane.f32.xlu0 %v6029_v40  ;;  %v703_v52 = vmul.f32 %v5854_v13, %v226_v34  ;;  %v6066_v44 = vadd.f32 %v1177_v9, %v689_v30  ;;  %v704_v56 = vmul.f32 %v5856_v14, %v227_v29  ;;  %v714_v57 = vmul.f32 %v5852_v12, %v237_v38  ;;  %v248_v30 = vld [vmem:[#allocation2 + $0x678] sm:$0xff]  ;;  %v250_v29 = vld [vmem:[#allocation2 + $0x688] sm:$0xff] }
  0x80   :  { %v715_v59 = vmul.f32 %v5854_v13, %v238_v39  ;;  %v6071_v40 = vadd.f32 %v1192_v35, %v701_v31  ;;  %v709_v62 = vmul.f32 %v5858_v15, %v232_v43  ;;  %v1202_v63 = vadd.f32 %v1201_v51, %v708_v46  ;;  %v256_v43 = vld [vmem:[#allocation2 + $0x6b8] sm:$0xff] }
  0x81   :  { %v1196_v0 = vadd.f32 %v703_v52, %v702_v47  ;;  %v716_v4 = vmul.f32 %v5856_v14, %v239_v53  ;;  %v710_v7 = vmul.f32 %v5852_v12, %v233_v50  ;;  %v711_v8 = vmul.f32 %v5854_v13, %v234_v54  ;;  %v251_v52 = vld [vmem:[#allocation2 + $0x690] sm:$0xff]  ;;  %v261_v53 = vld [vmem:[#allocation2 + $0x6e0] sm:$0xff]  ;;  %v262_v50 = vld [vmem:[#allocation2 + $0x6e8] sm:$0xff] }
  0x82   :  { %1164 = vadd.xlane.f32.xlu1 %v6036_v58  ;;  %v1211_v6 = vadd.f32 %v715_v59, %v714_v57  ;;  %v6079_v11 = vadd.f32 %v1187_v49, %v697_v48  ;;  %v705_v16 = vmul.f32 %v5858_v15, %v228_v55  ;;  %v712_v18 = vmul.f32 %v5856_v14, %v235_v61  ;;  %v242_v58 = vld [vmem:[#allocation2 + $0x648] sm:$0xff]  ;;  %v263_v57 = vld [vmem:[#allocation2 + $0x6f0] sm:$0xff]  ;;  %v257_v59 = vld [vmem:[#allocation2 + $0x6c0] sm:$0xff] }
  0x83   :  { %1159 = vadd.xlane.f32.xlu0 %v6040_v45  ;;  %v1197_v17 = vadd.f32 %v1196_v0, %v704_v56  ;;  %v717_v19 = vmul.f32 %v5858_v15, %v240_v1  ;;  %v1206_v20 = vadd.f32 %v711_v8, %v710_v7  ;;  %v722_v21 = vmul.f32 %v5852_v12, %v245_v2  ;;  %v252_v1 = vld [vmem:[#allocation2 + $0x698] sm:$0xff]  ;;  %v269_v8 = vld [vmem:[#allocation2 + $0x720] sm:$0xff] }
  0x84   :  { %v723_v23 = vmul.f32 %v5854_v13, %v246_v3  ;;  %v6086_v28 = vadd.f32 %v1202_v63, %v709_v62  ;;  %v713_v45 = vmul.f32 %v5858_v15, %v236_v60  ;;  %v724_v9 = vmul.f32 %v5856_v14, %v247_v5  ;;  %v264_v2 = vld [vmem:[#allocation2 + $0x6f8] sm:$0xff]  ;;  %v258_v3 = vld [vmem:[#allocation2 + $0x6c8] sm:$0xff] }
  0x85   :  { %v718_v31 = vmul.f32 %v5852_v12, %v241_v10  ;;  %v1212_v33 = vadd.f32 %v1211_v6, %v716_v4  ;;  %v1207_v34 = vadd.f32 %v1206_v20, %v712_v18  ;;  %v719_v36 = vmul.f32 %v5854_v13, %v242_v58  ;;  %v270_v5 = vld [vmem:[#allocation2 + $0x728] sm:$0xff]  ;;  %v271_v58 = vld [vmem:[#allocation2 + $0x730] sm:$0xff] }
  0x86   :  { %1174 = vadd.xlane.f32.xlu1 %v6050_v22  ;;  %v1221_v35 = vadd.f32 %v723_v23, %v722_v21  ;;  %v6093_v38 = vadd.f32 %v1197_v17, %v705_v16  ;;  %v720_v39 = vmul.f32 %v5856_v14, %v243_v24  ;;  %v730_v46 = vmul.f32 %v5852_v12, %v253_v26  ;;  %v265_v23 = vld [vmem:[#allocation2 + $0x700] sm:$0xff]  ;;  %v266_v24 = vld [vmem:[#allocation2 + $0x708] sm:$0xff] }
  0x87   :  { %1169 = vadd.xlane.f32.xlu0 %v1168_v41  ;;  %v731_v47 = vmul.f32 %v5854_v13, %v254_v27  ;;  %v725_v22 = vmul.f32 %v5858_v15, %v248_v30  ;;  %v1216_v49 = vadd.f32 %v719_v36, %v718_v31  ;;  %v732_v51 = vmul.f32 %v5856_v14, %v255_v32  ;;  %v260_v27 = vld [vmem:[#allocation2 + $0x6d8] sm:$0xff]  ;;  %v267_v32 = vld [vmem:[#allocation2 + $0x710] sm:$0xff]  ;;  %v277_v36 = vld [vmem:[#allocation2 + $0x760] sm:$0xff] }
  0x88   :  { %v1222_v48 = vadd.f32 %v1221_v35, %v724_v9  ;;  %v721_v41 = vmul.f32 %v5858_v15, %v244_v25  ;;  %v726_v55 = vmul.f32 %v5852_v12, %v249_v37  ;;  %v727_v56 = vmul.f32 %v5854_v13, %v250_v29  ;;  %v272_v30 = vld [vmem:[#allocation2 + $0x738] sm:$0xff] }
  0x89   :  { %v1231_v54 = vadd.f32 %v731_v47, %v730_v46  ;;  %v6104_v61 = vadd.f32 %v1212_v33, %v717_v19  ;;  %v6106_v62 = vadd.f32 %v1207_v34, %v713_v45  ;;  %v1217_v63 = vadd.f32 %v1216_v49, %v720_v39  ;;  %v279_v46 = vld [vmem:[#allocation2 + $0x770] sm:$0xff]  ;;  %v273_v47 = vld [vmem:[#allocation2 + $0x740] sm:$0xff]  ;;  %v268_v49 = vld [vmem:[#allocation2 + $0x718] sm:$0xff] }
  0x8a   :  { %1184 = vadd.xlane.f32.xlu1 %v6059_v42  ;;  %v733_v0 = vmul.f32 %v5858_v15, %v256_v43  ;;  %v728_v4 = vmul.f32 %v5856_v14, %v251_v52  ;;  %v1226_v6 = vadd.f32 %v727_v56, %v726_v55  ;;  %v738_v60 = vmul.f32 %v5852_v12, %v261_v53  ;;  %v259_v42 = vld [vmem:[#allocation2 + $0x6d0] sm:$0xff]  ;;  %v274_v52 = vld [vmem:[#allocation2 + $0x748] sm:$0xff]  ;;  %v285_v56 = vld [vmem:[#allocation2 + $0x7a0] sm:$0xff] }
  0x8b   :  { %1179 = vadd.xlane.f32.xlu0 %v6066_v44  ;;  %v739_v7 = vmul.f32 %v5854_v13, %v262_v50  ;;  %v6113_v10 = vadd.f32 %v1222_v48, %v725_v22  ;;  %v1232_v16 = vadd.f32 %v1231_v54, %v732_v51  ;;  %v740_v17 = vmul.f32 %v5856_v14, %v263_v57  ;;  %v275_v55 = vld [vmem:[#allocation2 + $0x750] sm:$0xff]  ;;  %v286_v57 = vld [vmem:[#allocation2 + $0x7a8] sm:$0xff] }
  0x8c   :  { %v734_v18 = vmul.f32 %v5852_v12, %v257_v59  ;;  %v6117_v19 = vadd.f32 %v1217_v63, %v721_v41  ;;  %v729_v44 = vmul.f32 %v5858_v15, %v252_v1  ;;  %v735_v21 = vmul.f32 %v5854_v13, %v258_v3 }
  0x8d   :  { %v1241_v20 = vadd.f32 %v739_v7, %v738_v60  ;;  %v741_v26 = vmul.f32 %v5858_v15, %v264_v2  ;;  %v736_v45 = vmul.f32 %v5856_v14, %v259_v42  ;;  %v746_v9 = vmul.f32 %v5852_v12, %v269_v8  ;;  %v287_v60 = vld [vmem:[#allocation2 + $0x7b0] sm:$0xff]  ;;  %v281_v7 = vld [vmem:[#allocation2 + $0x780] sm:$0xff]  ;;  %v282_v42 = vld [vmem:[#allocation2 + $0x788] sm:$0xff] }
  0x8e   :  { %1194 = vadd.xlane.f32.xlu1 %v6071_v40  ;;  %v747_v31 = vmul.f32 %v5854_v13, %v270_v5  ;;  %v1227_v33 = vadd.f32 %v1226_v6, %v728_v4  ;;  %v1236_v35 = vadd.f32 %v735_v21, %v734_v18  ;;  %v748_v25 = vmul.f32 %v5856_v14, %v271_v58  ;;  %v278_v40 = vld [vmem:[#allocation2 + $0x768] sm:$0xff]  ;;  %v283_v18 = vld [vmem:[#allocation2 + $0x790] sm:$0xff] }
  0x8f   :  { %1189 = vadd.xlane.f32.xlu0 %v6079_v11  ;;  %v1242_v34 = vadd.f32 %v1241_v20, %v740_v17  ;;  %v6128_v37 = vadd.f32 %v1232_v16, %v733_v0  ;;  %v742_v39 = vmul.f32 %v5852_v12, %v265_v23  ;;  %v743_v43 = vmul.f32 %v5854_v13, %v266_v24  ;;  %v280_v0 = vld [vmem:[#allocation2 + $0x778] sm:$0xff]  ;;  %v293_v24 = vld [vmem:[#allocation2 + $0x7e0] sm:$0xff] }
  0x90   :  { %v1251_v29 = vadd.f32 %v747_v31, %v746_v9  ;;  %v737_v22 = vmul.f32 %v5858_v15, %v260_v27  ;;  %v1237_v48 = vadd.f32 %v1236_v35, %v736_v45  ;;  %v749_v11 = vmul.f32 %v5858_v15, %v272_v30  ;;  %v288_v23 = vld [vmem:[#allocation2 + $0x7b8] sm:$0xff] }
  0x91   :  { %v744_v51 = vmul.f32 %v5856_v14, %v267_v32  ;;  %v1246_v50 = vadd.f32 %v743_v43, %v742_v39  ;;  %v754_v41 = vmul.f32 %v5852_v12, %v277_v36  ;;  %v755_v54 = vmul.f32 %v5854_v13, %v278_v40  ;;  %v284_v30 = vld [vmem:[#allocation2 + $0x798] sm:$0xff]  ;;  %v289_v32 = vld [vmem:[#allocation2 + $0x7c0] sm:$0xff]  ;;  %v290_v36 = vld [vmem:[#allocation2 + $0x7c8] sm:$0xff] }
  0x92   :  { %1204 = vadd.xlane.f32.xlu1 %v6086_v28  ;;  %v1252_v53 = vadd.f32 %v1251_v29, %v748_v25  ;;  %v6139_v59 = vadd.f32 %v1227_v33, %v729_v44  ;;  %v6141_v63 = vadd.f32 %v1242_v34, %v741_v26  ;;  %v756_v1 = vmul.f32 %v5856_v14, %v279_v46  ;;  %v294_v26 = vld [vmem:[#allocation2 + $0x7e8] sm:$0xff]  ;;  %v291_v43 = vld [vmem:[#allocation2 + $0x7d0] sm:$0xff]  ;;  %v301_v46 = vld [vmem:[#allocation2 + $0x820] sm:$0xff] }
  0x93   :  { %1199 = vadd.xlane.f32.xlu0 %v6093_v38  ;;  %v750_v28 = vmul.f32 %v5852_v12, %v273_v47  ;;  %v745_v2 = vmul.f32 %v5858_v15, %v268_v49  ;;  %v1247_v3 = vadd.f32 %v1246_v50, %v744_v51  ;;  %v1261_v4 = vadd.f32 %v755_v54, %v754_v41  ;;  %v276_v38 = vld [vmem:[#allocation2 + $0x758] sm:$0xff]  ;;  %v302_v47 = vld [vmem:[#allocation2 + $0x828] sm:$0xff] }
  0x94   :  { %v751_v6 = vmul.f32 %v5854_v13, %v274_v52  ;;  %v6147_v8 = vadd.f32 %v1237_v48, %v737_v22  ;;  %v752_v5 = vmul.f32 %v5856_v14, %v275_v55  ;;  %v762_v16 = vmul.f32 %v5852_v12, %v285_v56  ;;  %v303_v52 = vld [vmem:[#allocation2 + $0x830] sm:$0xff]  ;;  %v292_v54 = vld [vmem:[#allocation2 + $0x7d8] sm:$0xff]  ;;  %v297_v56 = vld [vmem:[#allocation2 + $0x800] sm:$0xff] }
  0x95   :  { %v763_v17 = vmul.f32 %v5854_v13, %v286_v57  ;;  %v6153_v58 = vadd.f32 %v1252_v53, %v749_v11  ;;  %v757_v44 = vmul.f32 %v5858_v15, %v280_v0  ;;  %v1262_v20 = vadd.f32 %v1261_v4, %v756_v1  ;;  %v296_v11 = vld [vmem:[#allocation2 + $0x7f8] sm:$0xff] }
  0x96   :  { %1214 = vadd.xlane.f32.xlu1 %v6104_v61  ;;  %v1256_v21 = vadd.f32 %v751_v6, %v750_v28  ;;  %v764_v27 = vmul.f32 %v5856_v14, %v287_v60  ;;  %v758_v9 = vmul.f32 %v5852_v12, %v281_v7  ;;  %v759_v31 = vmul.f32 %v5854_v13, %v282_v42  ;;  %v295_v61 = vld [vmem:[#allocation2 + $0x7f0] sm:$0xff]  ;;  %v304_v1 = vld [vmem:[#allocation2 + $0x838] sm:$0xff]  ;;  %v309_v7 = vld [vmem:[#allocation2 + $0x860] sm:$0xff] }
  0x97   :  { %1209 = vadd.xlane.f32.xlu0 %v6106_v62  ;;  %v1271_v45 = vadd.f32 %v763_v17, %v762_v16  ;;  %v6160_v33 = vadd.f32 %v1247_v3, %v745_v2  ;;  %v753_v34 = vmul.f32 %v5858_v15, %v276_v38  ;;  %v760_v25 = vmul.f32 %v5856_v14, %v283_v18  ;;  %v299_v60 = vld [vmem:[#allocation2 + $0x810] sm:$0xff]  ;;  %v310_v42 = vld [vmem:[#allocation2 + $0x868] sm:$0xff] }
  0x98   :  { %v1257_v35 = vadd.f32 %v1256_v21, %v752_v5  ;;  %v765_v62 = vmul.f32 %v5858_v15, %v288_v23  ;;  %v1266_v40 = vadd.f32 %v759_v31, %v758_v9  ;;  %v770_v29 = vmul.f32 %v5852_v12, %v293_v24  ;;  %v311_v18 = vld [vmem:[#allocation2 + $0x870] sm:$0xff] }
  0x99   :  { %v771_v39 = vmul.f32 %v5854_v13, %v294_v26  ;;  %v6168_v22 = vadd.f32 %v1262_v20, %v757_v44  ;;  %v761_v48 = vmul.f32 %v5858_v15, %v284_v30  ;;  %v772_v49 = vmul.f32 %v5856_v14, %v295_v61  ;;  %v305_v44 = vld [vmem:[#allocation2 + $0x840] sm:$0xff]  ;;  %v300_v26 = vld [vmem:[#allocation2 + $0x818] sm:$0xff]  ;;  %v307_v61 = vld [vmem:[#allocation2 + $0x850] sm:$0xff] }
  0x9a   :  { %1224 = vadd.xlane.f32.xlu1 %v6113_v10  ;;  %v766_v51 = vmul.f32 %v5852_v12, %v289_v32  ;;  %v1272_v53 = vadd.f32 %v1271_v45, %v764_v27  ;;  %v1267_v50 = vadd.f32 %v1266_v40, %v760_v25  ;;  %v767_v55 = vmul.f32 %v5854_v13, %v290_v36  ;;  %v298_v10 = vld [vmem:[#allocation2 + $0x808] sm:$0xff]  ;;  %v317_v32 = vld [vmem:[#allocation2 + $0x8a0] sm:$0xff] }
  0x9b   :  { %1219 = vadd.xlane.f32.xlu0 %v6117_v19  ;;  %v1281_v41 = vadd.f32 %v771_v39, %v770_v29  ;;  %v6175_v57 = vadd.f32 %v1257_v35, %v753_v34  ;;  %v768_v0 = vmul.f32 %v5856_v14, %v291_v43  ;;  %v778_v28 = vmul.f32 %v5852_v12, %v301_v46  ;;  %v306_v27 = vld [vmem:[#allocation2 + $0x848] sm:$0xff]  ;;  %v313_v46 = vld [vmem:[#allocation2 + $0x880] sm:$0xff] }
  0x9c   :  { %v779_v2 = vmul.f32 %v5854_v13, %v302_v47  ;;  %v773_v3 = vmul.f32 %v5858_v15, %v296_v11  ;;  %v1276_v4 = vadd.f32 %v767_v55, %v766_v51  ;;  %v780_v6 = vmul.f32 %v5856_v14, %v303_v52  ;;  %v314_v47 = vld [vmem:[#allocation2 + $0x888] sm:$0xff]  ;;  %v308_v11 = vld [vmem:[#allocation2 + $0x858] sm:$0xff] }
  0x9d   :  { %v1282_v19 = vadd.f32 %v1281_v41, %v772_v49  ;;  %v769_v38 = vmul.f32 %v5858_v15, %v292_v54  ;;  %v774_v16 = vmul.f32 %v5852_v12, %v297_v56  ;;  %v775_v17 = vmul.f32 %v5854_v13, %v298_v10  ;;  %v320_v51 = vld [vmem:[#allocation2 + $0x8b8] sm:$0xff]  ;;  %v325_v56 = vld [vmem:[#allocation2 + $0x8e0] sm:$0xff]  ;;  %v326_v10 = vld [vmem:[#allocation2 + $0x8e8] sm:$0xff] }
  0x9e   :  { %1234 = vadd.xlane.f32.xlu1 %v6128_v37  ;;  %v1291_v5 = vadd.f32 %v779_v2, %v778_v28  ;;  %v6187_v20 = vadd.f32 %v1272_v53, %v765_v62  ;;  %v6189_v21 = vadd.f32 %v1267_v50, %v761_v48  ;;  %v1277_v23 = vadd.f32 %v1276_v4, %v768_v0  ;;  %v312_v37 = vld [vmem:[#allocation2 + $0x878] sm:$0xff]  ;;  %v319_v62 = vld [vmem:[#allocation2 + $0x8b0] sm:$0xff] }
  0x9f   :  { %1229 = vadd.xlane.f32.xlu0 %v6139_v59  ;;  %v781_v24 = vmul.f32 %v5858_v15, %v304_v1  ;;  %v776_v45 = vmul.f32 %v5856_v14, %v299_v60  ;;  %v1286_v30 = vadd.f32 %v775_v17, %v774_v16  ;;  %v786_v9 = vmul.f32 %v5852_v12, %v309_v7  ;;  %v318_v59 = vld [vmem:[#allocation2 + $0x8a8] sm:$0xff]  ;;  %v315_v53 = vld [vmem:[#allocation2 + $0x890] sm:$0xff]  ;;  %v316_v60 = vld [vmem:[#allocation2 + $0x898] sm:$0xff] }
  0xa0   :  { %v787_v31 = vmul.f32 %v5854_v13, %v310_v42  ;;  %v6195_v34 = vadd.f32 %v1282_v19, %v773_v3  ;;  %v1292_v35 = vadd.f32 %v1291_v5, %v780_v6  ;;  %v788_v25 = vmul.f32 %v5856_v14, %v311_v18  ;;  %v327_v2 = vld [vmem:[#allocation2 + $0x8f0] sm:$0xff]  ;;  %v321_v3 = vld [vmem:[#allocation2 + $0x8c0] sm:$0xff]  ;;  %v322_v42 = vld [vmem:[#allocation2 + $0x8c8] sm:$0xff] }
  0xa1   :  { %v782_v36 = vmul.f32 %v5852_v12, %v305_v44  ;;  %v6200_v40 = vadd.f32 %v1277_v23, %v769_v38  ;;  %v777_v29 = vmul.f32 %v5858_v15, %v300_v26  ;;  %v783_v43 = vmul.f32 %v5854_v13, %v306_v27  ;;  %v328_v16 = vld [vmem:[#allocation2 + $0x8f8] sm:$0xff]  ;;  %v323_v44 = vld [vmem:[#allocation2 + $0x8d0] sm:$0xff] }
  0xa2   :  { %1244 = vadd.xlane.f32.xlu1 %v6141_v63  ;;  %v1301_v39 = vadd.f32 %v787_v31, %v786_v9  ;;  %v789_v48 = vmul.f32 %v5858_v15, %v312_v37  ;;  %v784_v49 = vmul.f32 %v5856_v14, %v307_v61  ;;  %v794_v52 = vmul.f32 %v5852_v12, %v317_v32  ;;  %v324_v37 = vld [vmem:[#allocation2 + $0x8d8] sm:$0xff]  ;;  %v335_v61 = vld [vmem:[#allocation2 + $0x930] sm:$0xff]  ;;  %v329_v32 = vld [vmem:[#allocation2 + $0x900] sm:$0xff] }
  0xa3   :  { %1239 = vadd.xlane.f32.xlu0 %v6147_v8  ;;  %v795_v63 = vmul.f32 %v5854_v13, %v318_v59  ;;  %v1287_v50 = vadd.f32 %v1286_v30, %v776_v45  ;;  %v1296_v54 = vadd.f32 %v783_v43, %v782_v36  ;;  %v796_v55 = vmul.f32 %v5856_v14, %v319_v62  ;;  %v334_v45 = vld [vmem:[#allocation2 + $0x928] sm:$0xff] }
  0xa4   :  { %v1302_v41 = vadd.f32 %v1301_v39, %v788_v25  ;;  %v6210_v0 = vadd.f32 %v1292_v35, %v781_v24  ;;  %v790_v1 = vmul.f32 %v5852_v12, %v313_v46  ;;  %v791_v28 = vmul.f32 %v5854_v13, %v314_v47  ;;  %v330_v59 = vld [vmem:[#allocation2 + $0x908] sm:$0xff]  ;;  %v336_v47 = vld [vmem:[#allocation2 + $0x938] sm:$0xff] }
  0xa5   :  { %v1311_v8 = vadd.f32 %v795_v63, %v794_v52  ;;  %v785_v19 = vmul.f32 %v5858_v15, %v308_v11  ;;  %v1297_v4 = vadd.f32 %v1296_v54, %v784_v49  ;;  %v797_v6 = vmul.f32 %v5858_v15, %v320_v51  ;;  %v341_v11 = vld [vmem:[#allocation2 + $0x960] sm:$0xff]  ;;  %v332_v52 = vld [vmem:[#allocation2 + $0x918] sm:$0xff] }
  0xa6   :  { %1254 = vadd.xlane.f32.xlu1 %v6153_v58  ;;  %v792_v7 = vmul.f32 %v5856_v14, %v315_v53  ;;  %v1306_v5 = vadd.f32 %v791_v28, %v790_v1  ;;  %v802_v17 = vmul.f32 %v5852_v12, %v325_v56  ;;  %v803_v18 = vmul.f32 %v5854_v13, %v326_v10  ;;  %v333_v58 = vld [vmem:[#allocation2 + $0x920] sm:$0xff]  ;;  %v338_v10 = vld [vmem:[#allocation2 + $0x948] sm:$0xff]  ;;  %v344_v28 = vld [vmem:[#allocation2 + $0x978] sm:$0xff] }
  0xa7   :  { %1249 = vadd.xlane.f32.xlu0 %v6160_v33  ;;  %v1312_v38 = vadd.f32 %v1311_v8, %v796_v55  ;;  %v6221_v23 = vadd.f32 %v1287_v50, %v777_v29  ;;  %v6223_v24 = vadd.f32 %v1302_v41, %v789_v48  ;;  %v804_v26 = vmul.f32 %v5856_v14, %v327_v2  ;;  %v331_v29 = vld [vmem:[#allocation2 + $0x910] sm:$0xff]  ;;  %v337_v56 = vld [vmem:[#allocation2 + $0x940] sm:$0xff] }
  0xa8   :  { %v798_v27 = vmul.f32 %v5852_v12, %v321_v3  ;;  %v793_v33 = vmul.f32 %v5858_v15, %v316_v60  ;;  %v1307_v30 = vadd.f32 %v1306_v5, %v792_v7  ;;  %v1321_v9 = vadd.f32 %v803_v18, %v802_v17  ;;  %v343_v50 = vld [vmem:[#allocation2 + $0x970] sm:$0xff] }
  0xa9   :  { %v799_v31 = vmul.f32 %v5854_v13, %v322_v42  ;;  %v6230_v35 = vadd.f32 %v1297_v4, %v785_v19  ;;  %v805_v25 = vmul.f32 %v5858_v15, %v328_v16  ;;  %v800_v36 = vmul.f32 %v5856_v14, %v323_v44  ;;  %v339_v19 = vld [vmem:[#allocation2 + $0x950] sm:$0xff]  ;;  %v349_v4 = vld [vmem:[#allocation2 + $0x9a0] sm:$0xff] }
  0xaa   :  { %1264 = vadd.xlane.f32.xlu1 %v6168_v22  ;;  %v810_v62 = vmul.f32 %v5852_v12, %v333_v58  ;;  %v6236_v39 = vadd.f32 %v1312_v38, %v797_v6  ;;  %v1322_v43 = vadd.f32 %v1321_v9, %v804_v26  ;;  %v811_v48 = vmul.f32 %v5854_v13, %v334_v45  ;;  %v342_v22 = vld [vmem:[#allocation2 + $0x968] sm:$0xff]  ;;  %v351_v44 = vld [vmem:[#allocation2 + $0x9b0] sm:$0xff]  ;;  %v345_v58 = vld [vmem:[#allocation2 + $0x980] sm:$0xff] }
  0xab   :  { %1259 = vadd.xlane.f32.xlu0 %v6175_v57  ;;  %v1316_v46 = vadd.f32 %v799_v31, %v798_v27  ;;  %v801_v49 = vmul.f32 %v5858_v15, %v324_v37  ;;  %v812_v51 = vmul.f32 %v5856_v14, %v335_v61  ;;  %v806_v63 = vmul.f32 %v5852_v12, %v329_v32  ;;  %v350_v38 = vld [vmem:[#allocation2 + $0x9a8] sm:$0xff]  ;;  %v352_v61 = vld [vmem:[#allocation2 + $0x9b8] sm:$0xff] }
  0xac   :  { %v807_v53 = vmul.f32 %v5854_v13, %v330_v59  ;;  %v6243_v57 = vadd.f32 %v1307_v30, %v793_v33  ;;  %v1331_v54 = vadd.f32 %v811_v48, %v810_v62  ;;  %v808_v55 = vmul.f32 %v5856_v14, %v331_v29  ;;  %v346_v26 = vld [vmem:[#allocation2 + $0x988] sm:$0xff]  ;;  %v347_v33 = vld [vmem:[#allocation2 + $0x990] sm:$0xff]  ;;  %v357_v59 = vld [vmem:[#allocation2 + $0x9e0] sm:$0xff] }
  0xad   :  { %v1317_v41 = vadd.f32 %v1316_v46, %v800_v36  ;;  %v813_v8 = vmul.f32 %v5858_v15, %v336_v47  ;;  %v818_v2 = vmul.f32 %v5852_v12, %v341_v11  ;;  %v819_v3 = vmul.f32 %v5854_v13, %v342_v22  ;;  %v348_v29 = vld [vmem:[#allocation2 + $0x998] sm:$0xff]  ;;  %v359_v46 = vld [vmem:[#allocation2 + $0x9f0] sm:$0xff] }
  0xae   :  { %1274 = vadd.xlane.f32.xlu1 %v6187_v20  ;;  %v1326_v1 = vadd.f32 %v807_v53, %v806_v63  ;;  %v6251_v6 = vadd.f32 %v1322_v43, %v805_v25  ;;  %v1332_v60 = vadd.f32 %v1331_v54, %v812_v51  ;;  %v809_v7 = vmul.f32 %v5858_v15, %v332_v52  ;;  %v340_v20 = vld [vmem:[#allocation2 + $0x958] sm:$0xff]  ;;  %v358_v25 = vld [vmem:[#allocation2 + $0x9e8] sm:$0xff]  ;;  %v365_v54 = vld [vmem:[#allocation2 + $0xa20] sm:$0xff] }
  0xaf   :  { %1269 = vadd.xlane.f32.xlu0 %v6189_v21  ;;  %v820_v42 = vmul.f32 %v5856_v14, %v343_v50  ;;  %v1341_v16 = vadd.f32 %v819_v3, %v818_v2  ;;  %v814_v17 = vmul.f32 %v5852_v12, %v337_v56  ;;  %v815_v18 = vmul.f32 %v5854_v13, %v338_v10  ;;  %v354_v51 = vld [vmem:[#allocation2 + $0x9c8] sm:$0xff]  ;;  %v360_v63 = vld [vmem:[#allocation2 + $0x9f8] sm:$0xff] }
  0xb0   :  { %v1327_v5 = vadd.f32 %v1326_v1, %v808_v55  ;;  %v6257_v37 = vadd.f32 %v1317_v41, %v801_v49  ;;  %v821_v21 = vmul.f32 %v5858_v15, %v344_v28  ;;  %v816_v27 = vmul.f32 %v5856_v14, %v339_v19  ;;  %v353_v49 = vld [vmem:[#allocation2 + $0x9c0] sm:$0xff]  ;;  %v355_v41 = vld [vmem:[#allocation2 + $0x9d0] sm:$0xff]  ;;  %v356_v1 = vld [vmem:[#allocation2 + $0x9d8] sm:$0xff] }
  0xb1   :  { %v826_v45 = vmul.f32 %v5852_v12, %v349_v4  ;;  %v6263_v30 = vadd.f32 %v1332_v60, %v813_v8  ;;  %v1342_v9 = vadd.f32 %v1341_v16, %v820_v42  ;;  %v1336_v31 = vadd.f32 %v815_v18, %v814_v17  ;;  %v366_v28 = vld [vmem:[#allocation2 + $0xa28] sm:$0xff]  ;;  %v367_v60 = vld [vmem:[#allocation2 + $0xa30] sm:$0xff] }
  0xb2   :  { %1284 = vadd.xlane.f32.xlu1 %v6195_v34  ;;  %v827_v32 = vmul.f32 %v5854_v13, %v350_v38  ;;  %v817_v36 = vmul.f32 %v5858_v15, %v340_v20  ;;  %v828_v62 = vmul.f32 %v5856_v14, %v351_v44  ;;  %v822_v43 = vmul.f32 %v5852_v12, %v345_v58  ;;  %v363_v16 = vld [vmem:[#allocation2 + $0xa10] sm:$0xff]  ;;  %v368_v44 = vld [vmem:[#allocation2 + $0xa38] sm:$0xff] }
  0xb3   :  { %1279 = vadd.xlane.f32.xlu0 %v6200_v40  ;;  %v823_v34 = vmul.f32 %v5854_v13, %v346_v26  ;;  %v6271_v47 = vadd.f32 %v1327_v5, %v809_v7  ;;  %v1337_v48 = vadd.f32 %v1336_v31, %v816_v27  ;;  %v824_v22 = vmul.f32 %v5856_v14, %v347_v33  ;;  %v361_v7 = vld [vmem:[#allocation2 + $0xa00] sm:$0xff]  ;;  %v364_v33 = vld [vmem:[#allocation2 + $0xa18] sm:$0xff] }
  0xb4   :  { %v1351_v11 = vadd.f32 %v827_v32, %v826_v45  ;;  %v829_v40 = vmul.f32 %v5858_v15, %v352_v61  ;;  %v834_v53 = vmul.f32 %v5852_v12, %v357_v59  ;;  %v835_v50 = vmul.f32 %v5854_v13, %v358_v25  ;;  %v373_v26 = vld [vmem:[#allocation2 + $0xa60] sm:$0xff]  ;;  %v375_v61 = vld [vmem:[#allocation2 + $0xa70] sm:$0xff] }
  0xb5   :  { %v1346_v52 = vadd.f32 %v823_v34, %v822_v43  ;;  %v6278_v55 = vadd.f32 %v1342_v9, %v821_v21  ;;  %v825_v10 = vmul.f32 %v5858_v15, %v348_v29  ;;  %v836_v8 = vmul.f32 %v5856_v14, %v359_v46  ;;  %v374_v21 = vld [vmem:[#allocation2 + $0xa68] sm:$0xff]  ;;  %v376_v34 = vld [vmem:[#allocation2 + $0xa78] sm:$0xff] }
  0xb6   :  { %1294 = vadd.xlane.f32.xlu1 %v6210_v0  ;;  %v1352_v56 = vadd.f32 %v1351_v11, %v828_v62  ;;  %v1361_v3 = vadd.f32 %v835_v50, %v834_v53  ;;  %v830_v19 = vmul.f32 %v5852_v12, %v353_v49  ;;  %v831_v4 = vmul.f32 %v5854_v13, %v354_v51  ;;  %v362_v0 = vld [vmem:[#allocation2 + $0xa08] sm:$0xff]  ;;  %v369_v62 = vld [vmem:[#allocation2 + $0xa40] sm:$0xff]  ;;  %v371_v11 = vld [vmem:[#allocation2 + $0xa50] sm:$0xff] }
  0xb7   :  { %1289 = vadd.xlane.f32.xlu0 %v6221_v23  ;;  %v1347_v2 = vadd.f32 %v1346_v52, %v824_v22  ;;  %v6285_v42 = vadd.f32 %v1337_v48, %v817_v36  ;;  %v837_v20 = vmul.f32 %v5858_v15, %v360_v63  ;;  %v832_v38 = vmul.f32 %v5856_v14, %v355_v41  ;;  %v381_v22 = vld [vmem:[#allocation2 + $0xaa0] sm:$0xff]  ;;  %v372_v52 = vld [vmem:[#allocation2 + $0xa58] sm:$0xff]  ;;  %v382_v63 = vld [vmem:[#allocation2 + $0xaa8] sm:$0xff] }
  0xb8   :  { %v842_v5 = vmul.f32 %v5852_v12, %v365_v54  ;;  %v6290_v17 = vadd.f32 %v1352_v56, %v829_v40  ;;  %v1362_v23 = vadd.f32 %v1361_v3, %v836_v8  ;;  %v1356_v18 = vadd.f32 %v831_v4, %v830_v19  ;;  %v383_v56 = vld [vmem:[#allocation2 + $0xab0] sm:$0xff]  ;;  %v378_v8 = vld [vmem:[#allocation2 + $0xa88] sm:$0xff] }
  0xb9   :  { %v843_v58 = vmul.f32 %v5854_v13, %v366_v28  ;;  %v833_v27 = vmul.f32 %v5858_v15, %v356_v1  ;;  %v844_v45 = vmul.f32 %v5856_v14, %v367_v60  ;;  %v838_v9 = vmul.f32 %v5852_v12, %v361_v7  ;;  %v384_v7 = vld [vmem:[#allocation2 + $0xab8] sm:$0xff] }
  0xba   :  { %1304 = vadd.xlane.f32.xlu1 %v6223_v24  ;;  %v839_v31 = vmul.f32 %v5854_v13, %v362_v0  ;;  %v6299_v32 = vadd.f32 %v1347_v2, %v825_v10  ;;  %v1357_v59 = vadd.f32 %v1356_v18, %v832_v38  ;;  %v840_v36 = vmul.f32 %v5856_v14, %v363_v16  ;;  %v370_v24 = vld [vmem:[#allocation2 + $0xa48] sm:$0xff]  ;;  %v377_v10 = vld [vmem:[#allocation2 + $0xa80] sm:$0xff] }
  0xbb   :  { %1299 = vadd.xlane.f32.xlu0 %v6230_v35  ;;  %v1371_v25 = vadd.f32 %v843_v58, %v842_v5  ;;  %v845_v29 = vmul.f32 %v5858_v15, %v368_v44  ;;  %v850_v46 = vmul.f32 %v5852_v12, %v373_v26  ;;  %v851_v48 = vmul.f32 %v5854_v13, %v374_v21  ;;  %v390_v38 = vld [vmem:[#allocation2 + $0xae8] sm:$0xff]  ;;  %v391_v44 = vld [vmem:[#allocation2 + $0xaf0] sm:$0xff]  ;;  %v6334_v58 = vld [vmem:[%s9219_s2] sm:$0xff] }
  0xbc   :  { %v1366_v43 = vadd.f32 %v839_v31, %v838_v9  ;;  %v6305_v49 = vadd.f32 %v1362_v23, %v837_v20  ;;  %v841_v51 = vmul.f32 %v5858_v15, %v364_v33  ;;  %v852_v40 = vmul.f32 %v5856_v14, %v375_v61  ;;  %v389_v20 = vld [vmem:[#allocation2 + $0xae0] sm:$0xff] }
  0xbd   :  { %v1372_v35 = vadd.f32 %v1371_v25, %v844_v45  ;;  %v1381_v50 = vadd.f32 %v851_v48, %v850_v46  ;;  %v846_v41 = vmul.f32 %v5852_v12, %v369_v62  ;;  %v847_v54 = vmul.f32 %v5854_v13, %v370_v24  ;;  %v380_v45 = vld [vmem:[#allocation2 + $0xa98] sm:$0xff]  ;;  %v385_v25 = vld [vmem:[#allocation2 + $0xac0] sm:$0xff] }
  0xbe   :  { %1314 = vadd.xlane.f32.xlu1 %v6236_v39  ;;  %v1367_v53 = vadd.f32 %v1366_v43, %v840_v36  ;;  %v6313_v1 = vadd.f32 %v1357_v59, %v833_v27  ;;  %v853_v28 = vmul.f32 %v5858_v15, %v376_v34  ;;  %v848_v2 = vmul.f32 %v5856_v14, %v371_v11  ;;  %v379_v39 = vld [vmem:[#allocation2 + $0xa90] sm:$0xff]  ;;  %v386_v36 = vld [vmem:[#allocation2 + $0xac8] sm:$0xff]  ;;  %v392_v34 = vld [vmem:[#allocation2 + $0xaf8] sm:$0xff] }
  0xbf   :  { %1309 = vadd.xlane.f32.xlu0 %v6243_v57  ;;  %v858_v3 = vmul.f32 %v5852_v12, %v381_v22  ;;  %v6318_v19 = vadd.f32 %v1372_v35, %v845_v29  ;;  %v1382_v4 = vadd.f32 %v1381_v50, %v852_v40  ;;  %v1376_v60 = vadd.f32 %v847_v54, %v846_v41  ;;  %v6324_v57 = vld [vmem:[%s9219_s2 + $0x10] sm:$0xff]  ;;  %v6351_v11 = vld [vmem:[%s9219_s2 + $0x18] sm:$0xff]  ;;  %v397_v40 = vld [vmem:[#allocation2 + $0xb20] sm:$0xff] }
  0xc0   :  { %v859_v0 = vmul.f32 %v5854_v13, %v382_v63  ;;  %v849_v5 = vmul.f32 %v5858_v15, %v372_v52  ;;  %v860_v16 = vmul.f32 %v5856_v14, %v383_v56  ;;  %v854_v23 = vmul.f32 %v5852_v12, %v377_v10  ;;  %v6358_v52 = vld [vmem:[%s9219_s2 + $0x8] sm:$0xff]  ;;  %v399_v54 = vld [vmem:[#allocation2 + $0xb30] sm:$0xff] }
  0xc1   :  { %v855_v18 = vmul.f32 %v5854_v13, %v378_v8  ;;  %v6336_v26 = vadd.f32 %v1367_v53, %v841_v51  ;;  %v1377_v21 = vadd.f32 %v1376_v60, %v848_v2  ;;  %v856_v33 = vmul.f32 %v5856_v14, %v379_v39  ;;  %v398_v41 = vld [vmem:[#allocation2 + $0xb28] sm:$0xff]  ;;  %v388_v8 = vld [vmem:[#allocation2 + $0xad8] sm:$0xff]  ;;  %v393_v2 = vld [vmem:[#allocation2 + $0xb00] sm:$0xff] }
  0xc2   :  { %1324 = vadd.xlane.f32.xlu1 %v6251_v6  ;;  %v1391_v27 = vadd.f32 %v859_v0, %v858_v3  ;;  %v861_v31 = vmul.f32 %v5858_v15, %v384_v7  ;;  %v866_v6 = vmul.f32 %v5852_v12, %v389_v20  ;;  %v867_v59 = vmul.f32 %v5854_v13, %v390_v38  ;;  %v394_v0 = vld [vmem:[#allocation2 + $0xb08] sm:$0xff]  ;;  %v395_v20 = vld [vmem:[#allocation2 + $0xb10] sm:$0xff] }
  0xc3   :  { %1319 = vadd.xlane.f32.xlu0 %v6257_v37  ;;  %v980_v9 = vpop.xlane.xlu1 %979  ;;  %v1386_v61 = vadd.f32 %v855_v18, %v854_v23  ;;  %v6344_v29 = vadd.f32 %v1382_v4, %v853_v28  ;;  %v868_v46 = vmul.f32 %v5856_v14, %v391_v44  ;;  %v387_v37 = vld [vmem:[#allocation2 + $0xad0] sm:$0xff]  ;;  %v857_v22 = vmul.f32 %v5858_v15, %v380_v45  ;;  %v6375_v38 = vld [vmem:[%s9219_s2 + $0x28] sm:$0xff]  ;;  %v405_v44 = vld [vmem:[#allocation2 + $0xb60] sm:$0xff] }
  0xc4   :  { %v1528_v62 = vadd.f32 %v980_v9, %v6324_v57  ;;  %v970_v24 = vpop.xlane.xlu0 %969  ;;  %v1392_v43 = vadd.f32 %v1391_v27, %v860_v16  ;;  %v1401_v51 = vadd.f32 %v867_v59, %v866_v6  ;;  %v6360_v63 = vadd.f32 %v1377_v21, %v849_v5  ;;  %v400_v16 = vld [vmem:[#allocation2 + $0xb38] sm:$0xff]  ;;  %v6385_v21 = vld [vmem:[%s9219_s2 + $0x20] sm:$0xff]  ;;  %v406_v9 = vld [vmem:[#allocation2 + $0xb68] sm:$0xff] }
  0xc5   :  { %v1526_v48 = vadd.f32 %v970_v24, %v6334_v58  ;;  %v1387_v35 = vadd.f32 %v1386_v61, %v856_v33  ;;  %v862_v53 = vmul.f32 %v5852_v12, %v385_v25  ;;  %v863_v50 = vmul.f32 %v5854_v13, %v386_v36  ;;  %v407_v59 = vld [vmem:[#allocation2 + $0xb70] sm:$0xff]  ;;  %v401_v25 = vld [vmem:[#allocation2 + $0xb40] sm:$0xff] }
  0xc6   :  { %4784 = vtanh.f32 %v1528_v62  ;;  %1334 = vadd.xlane.f32.xlu1 %v6263_v30  ;;  %v6365_v10 = vadd.f32 %v1392_v43, %v861_v31  ;;  %v869_v30 = vmul.f32 %v5858_v15, %v392_v34  ;;  %v864_v28 = vmul.f32 %v5856_v14, %v387_v37  ;;  %v396_v34 = vld [vmem:[#allocation2 + $0xb18] sm:$0xff] }
  0xc7   :  { %4786 = vtanh.f32 %v1526_v48  ;;  %1329 = vadd.xlane.f32.xlu0 %v6271_v47  ;;  %v985_v56 = vpop.xlane.xlu1 %984  ;;  %v1402_v4 = vadd.f32 %v1401_v51, %v868_v46  ;;  %v1396_v60 = vadd.f32 %v863_v50, %v862_v53  ;;  %v874_v7 = vmul.f32 %v5852_v12, %v397_v40  ;;  %v402_v51 = vld [vmem:[#allocation2 + $0xb48] sm:$0xff]  ;;  %v403_v40 = vld [vmem:[#allocation2 + $0xb50] sm:$0xff] }
  0xc8   :  { %v1529_v3 = vadd.f32 %v985_v56, %v6351_v11  ;;  %v975_v39 = vpop.xlane.xlu0 %974  ;;  %v6377_v5 = vadd.f32 %v1387_v35, %v857_v22  ;;  %v875_v23 = vmul.f32 %v5854_v13, %v398_v41  ;;  %v876_v18 = vmul.f32 %v5856_v14, %v399_v54  ;;  %v408_v22 = vld [vmem:[#allocation2 + $0xb78] sm:$0xff]  ;;  %v6403_v53 = vld [vmem:[%s9219_s2 + $0x30] sm:$0xff] }
  0xc9   :  { %v1527_v47 = vadd.f32 %v975_v39, %v6358_v52  ;;  %v865_v27 = vmul.f32 %v5858_v15, %v388_v8  ;;  %v1397_v45 = vadd.f32 %v1396_v60, %v864_v28  ;;  %v870_v33 = vmul.f32 %v5852_v12, %v393_v2  ;;  %v404_v60 = vld [vmem:[#allocation2 + $0xb58] sm:$0xff] }
  0xca   :  { %4788 = vtanh.f32 %v1529_v3  ;;  %1344 = vadd.xlane.f32.xlu1 %v6278_v55  ;;  %v1411_v61 = vadd.f32 %v875_v23, %v874_v7  ;;  %v871_v6 = vmul.f32 %v5854_v13, %v394_v0  ;;  %v872_v55 = vmul.f32 %v5856_v14, %v395_v20  ;;  %v414_v20 = vld [vmem:[#allocation2 + $0xba8] sm:$0xff] }
  0xcb   :  { %4790 = vtanh.f32 %v1527_v47  ;;  %1339 = vadd.xlane.f32.xlu0 %v6285_v42  ;;  %v995_v31 = vpop.xlane.xlu1 %994  ;;  %v6393_v24 = vadd.f32 %v1402_v4, %v869_v30  ;;  %v877_v43 = vmul.f32 %v5858_v15, %v400_v16  ;;  %v882_v46 = vmul.f32 %v5852_v12, %v405_v44  ;;  %v415_v44 = vld [vmem:[#allocation2 + $0xbb0] sm:$0xff] }
  0xcc   :  { %v1531_v36 = vadd.f32 %v995_v31, %v6375_v38  ;;  %v990_v62 = vpop.xlane.xlu0 %989  ;;  %v1412_v37 = vadd.f32 %v1411_v61, %v876_v18  ;;  %v1406_v48 = vadd.f32 %v871_v6, %v870_v33  ;;  %v883_v35 = vmul.f32 %v5854_v13, %v406_v9 }
  0xcd   :  { %v1530_v42 = vadd.f32 %v990_v62, %v6385_v21  ;;  %v6405_v50 = vadd.f32 %v1397_v45, %v865_v27  ;;  %v884_v41 = vmul.f32 %v5856_v14, %v407_v59  ;;  %v878_v54 = vmul.f32 %v5852_v12, %v401_v25  ;;  %v416_v62 = vld [vmem:[#allocation2 + $0xbb8] sm:$0xff] }
  0xce   :  { %4792 = vtanh.f32 %v1531_v36  ;;  %1354 = vadd.xlane.f32.xlu1 %v6290_v17  ;;  %v873_v30 = vmul.f32 %v5858_v15, %v396_v34  ;;  %v1407_v8 = vadd.f32 %v1406_v48, %v872_v55  ;;  %v1421_v28 = vadd.f32 %v883_v35, %v882_v46  ;;  %v413_v17 = vld [vmem:[#allocation2 + $0xba0] sm:$0xff]  ;;  %v410_v34 = vld [vmem:[#allocation2 + $0xb88] sm:$0xff]  ;;  %v411_v48 = vld [vmem:[#allocation2 + $0xb90] sm:$0xff] }
  0xcf   :  { %4794 = vtanh.f32 %v1530_v42  ;;  %1349 = vadd.xlane.f32.xlu0 %v6299_v32  ;;  %v1005_v56 = vpop.xlane.xlu1 %1004  ;;  %v885_v4 = vmul.f32 %v5858_v15, %v408_v22  ;;  %v879_v7 = vmul.f32 %v5854_v13, %v402_v51  ;;  %v880_v0 = vmul.f32 %v5856_v14, %v403_v40  ;;  %v409_v55 = vld [vmem:[#allocation2 + $0xb80] sm:$0xff] }
  0xd0   :  { %v4785_v2 = vpop.eup %4784  ;;  %v1533_v3 = vadd.f32 %v1005_v56, %v6334_v58  ;;  %v1000_v39 = vpop.xlane.xlu0 %999  ;;  %v6416_v23 = vadd.f32 %v1412_v37, %v877_v43  ;;  %v1422_v18 = vadd.f32 %v1421_v28, %v884_v41  ;;  %v890_v33 = vmul.f32 %v5852_v12, %v413_v17  ;;  %v421_v22 = vld [vmem:[#allocation2 + $0xbe0] sm:$0xff] }
  0xd1   :  { %v4787_v47 = vpop.eup %4786  ;;  %v1754_v32 = vmul.f32 1.442695, %v4785_v2  ;;  %v1532_v16 = vadd.f32 %v1000_v39, %v6403_v53  ;;  %v1416_v45 = vadd.f32 %v879_v7, %v878_v54  ;;  %v6421_v31 = vadd.f32 %v1407_v8, %v873_v30  ;;  %v422_v8 = vld [vmem:[#allocation2 + $0xbe8] sm:$0xff]  ;;  %v412_v2 = vld [vmem:[#allocation2 + $0xb98] sm:$0xff]  ;;  %v423_v39 = vld [vmem:[#allocation2 + $0xbf0] sm:$0xff] }
  0xd2   :  { %v1750_v27 = vmul.f32 1.442695, %v4787_v47  ;;  %4796 = vtanh.f32 %v1533_v3  ;;  %1364 = vadd.xlane.f32.xlu1 %v6305_v49  ;;  %v881_v61 = vmul.f32 %v5858_v15, %v404_v60  ;;  %v891_v6 = vmul.f32 %v5854_v13, %v414_v20 }
  0xd3   :  { %4798 = vpow2.f32 %v1754_v32  ;;  %1359 = vadd.xlane.f32.xlu0 %v6313_v1  ;;  %v1015_v9 = vpop.xlane.xlu1 %1014  ;;  %v1417_v49 = vadd.f32 %v1416_v45, %v880_v0  ;;  %v892_v43 = vmul.f32 %v5856_v14, %v415_v44  ;;  %v6429_v51 = vadd.f32 %v1422_v18, %v885_v4  ;;  %v418_v18 = vld [vmem:[#allocation2 + $0xbc8] sm:$0xff]  ;;  %v424_v45 = vld [vmem:[#allocation2 + $0xbf8] sm:$0xff] }
  0xd4   :  { %v4789_v59 = vpop.eup %4788  ;;  %4800 = vpow2.f32 %v1750_v27  ;;  %v1535_v25 = vadd.f32 %v1015_v9, %v6324_v57  ;;  %v1010_v36 = vpop.xlane.xlu0 %1009  ;;  %v1431_v37 = vadd.f32 %v891_v6, %v890_v33  ;;  %v886_v40 = vmul.f32 %v5852_v12, %v409_v55 }
  0xd5   :  { %v4791_v46 = vpop.eup %4790  ;;  %v1756_v1 = vmul.f32 1.442695, %v4789_v59  ;;  %4802 = vtanh.f32 %v1532_v16  ;;  %v1534_v42 = vadd.f32 %v1010_v36, %v6358_v52  ;;  %v6433_v54 = vadd.f32 %v1417_v49, %v881_v61 }
  0xd6   :  { %v1752_v35 = vmul.f32 1.442695, %v4791_v46  ;;  %4804 = vtanh.f32 %v1535_v25  ;;  %1374 = vadd.xlane.f32.xlu1 %v6318_v19  ;;  %v893_v56 = vmul.f32 %v5858_v15, %v416_v62  ;;  %v887_v30 = vmul.f32 %v5854_v13, %v410_v34  ;;  %v419_v25 = vld [vmem:[#allocation2 + $0xbd0] sm:$0xff] }
  0xd7   :  { %4806 = vpow2.f32 %v1756_v1  ;;  %1369 = vadd.xlane.f32.xlu0 %v6336_v26  ;;  %v1025_v41 = vpop.xlane.xlu1 %1024  ;;  %v888_v3 = vmul.f32 %v5856_v14, %v411_v48  ;;  %v898_v4 = vmul.f32 %v5852_v12, %v421_v22  ;;  %v417_v26 = vld [vmem:[#allocation2 + $0xbc0] sm:$0xff]  ;;  %v1432_v20 = vadd.f32 %v1431_v37, %v892_v43 }
  0xd8   :  { %v4793_v28 = vpop.eup %4792  ;;  %4808 = vpow2.f32 %v1752_v35  ;;  %v1537_v17 = vadd.f32 %v1025_v41, %v6385_v21  ;;  %v1020_v19 = vpop.xlane.xlu0 %1019  ;;  %v1426_v32 = vadd.f32 %v887_v30, %v886_v40  ;;  %v899_v16 = vmul.f32 %v5854_v13, %v422_v8  ;;  %v429_v41 = vld [vmem:[#allocation2 + $0xc20] sm:$0xff] }
  0xd9   :  { %v4795_v60 = vpop.eup %4794  ;;  %v1760_v7 = vmul.f32 1.442695, %v4793_v28  ;;  %4810 = vtanh.f32 %v1534_v42  ;;  %v1536_v0 = vadd.f32 %v1020_v19, %v6351_v11  ;;  %v889_v27 = vmul.f32 %v5858_v15, %v412_v2  ;;  %v420_v42 = vld [vmem:[#allocation2 + $0xbd8] sm:$0xff] }
  0xda   :  { %v1758_v47 = vmul.f32 1.442695, %v4795_v60  ;;  %4812 = vtanh.f32 %v1537_v17  ;;  %1384 = vadd.xlane.f32.xlu1 %v6344_v29  ;;  %v900_v33 = vmul.f32 %v5856_v14, %v423_v39  ;;  %v894_v9 = vmul.f32 %v5852_v12, %v417_v26  ;;  %v431_v60 = vld [vmem:[#allocation2 + $0xc30] sm:$0xff] }
  0xdb   :  { %4814 = vpow2.f32 %v1760_v7  ;;  %1379 = vadd.xlane.f32.xlu0 %v6360_v63  ;;  %v1035_v44 = vpop.xlane.xlu1 %1034  ;;  %v1427_v55 = vadd.f32 %v1426_v32, %v888_v3  ;;  %v1441_v59 = vadd.f32 %v899_v16, %v898_v4  ;;  %v895_v62 = vmul.f32 %v5854_v13, %v418_v18 }
  0xdc   :  { %v4797_v61 = vpop.eup %4796  ;;  %4816 = vpow2.f32 %v1758_v47  ;;  %v1539_v6 = vadd.f32 %v1035_v44, %v6403_v53  ;;  %v1030_v29 = vpop.xlane.xlu0 %1029  ;;  %v6455_v34 = vadd.f32 %v1432_v20, %v893_v56  ;;  %v901_v46 = vmul.f32 %v5858_v15, %v424_v45 }
  0xdd   :  { %v6448_v36 = vpop.eup %4798  ;;  %v1764_v49 = vmul.f32 1.442695, %v4797_v61  ;;  %4818 = vtanh.f32 %v1536_v0  ;;  %v1538_v63 = vadd.f32 %v1030_v29, %v6375_v38  ;;  %v1442_v1 = vadd.f32 %v1441_v59, %v900_v33  ;;  %v425_v61 = vld [vmem:[#allocation2 + $0xc00] sm:$0xff] }
  0xde   :  { %v6452_v43 = vpop.eup %4800  ;;  %4820 = vtanh.f32 %v1539_v6  ;;  %1394 = vadd.xlane.f32.xlu1 %v6365_v10  ;;  %v1978_v48 = vsel %vm1974_vm0, %v6448_v36, inf  ;;  %v6461_v35 = vadd.f32 %v1427_v55, %v889_v27  ;;  %v896_v40 = vmul.f32 %v5856_v14, %v419_v25  ;;  %v430_v10 = vld [vmem:[#allocation2 + $0xc28] sm:$0xff] }
  0xdf   :  { %v4803_v37 = vpop.eup %4802  ;;  %4822 = vpow2.f32 %v1764_v49  ;;  %1389 = vadd.xlane.f32.xlu0 %v6377_v5  ;;  %v1045_v22 = vpop.xlane.xlu1 %1044  ;;  %v1975_v30 = vsel %vm1974_vm0, %v6452_v43, inf  ;;  %v897_v3 = vmul.f32 %v5858_v15, %v420_v42  ;;  %v1436_v39 = vadd.f32 %v895_v62, %v894_v9  ;;  %v426_v6 = vld [vmem:[#allocation2 + $0xc08] sm:$0xff] }
  0xe0   :  { %v4805_v56 = vpop.eup %4804  ;;  %v1762_v8 = vmul.f32 1.442695, %v4803_v37  ;;  %4824 = vtanh.f32 %v1538_v63  ;;  %v1541_v28 = vadd.f32 %v1045_v22, %v6358_v52  ;;  %v1040_v17 = vpop.xlane.xlu0 %1039  ;;  %v6474_v26 = vadd.f32 %v1442_v1, %v901_v46  ;;  %v427_v37 = vld [vmem:[#allocation2 + $0xc10] sm:$0xff] }
  0xe1   :  { %v6467_v19 = vpop.eup %4806  ;;  %v1768_v2 = vmul.f32 1.442695, %v4805_v56  ;;  %v1540_v5 = vadd.f32 %v1040_v17, %v6334_v58  ;;  %v906_v7 = vmul.f32 %v5852_v12, %v429_v41  ;;  %v907_v0 = vmul.f32 %v5854_v13, %v430_v10 }
  0xe2   :  { %v6471_v4 = vpop.eup %4808  ;;  %4826 = vpow2.f32 %v1762_v8  ;;  %1404 = vadd.xlane.f32.xlu1 %v6393_v24  ;;  %v1980_v47 = vsel %vm1974_vm0, %v6467_v19, inf  ;;  %v1437_v18 = vadd.f32 %v1436_v39, %v896_v40  ;;  %v432_v24 = vld [vmem:[#allocation2 + $0xc38] sm:$0xff]  ;;  %v902_v22 = vmul.f32 %v5852_v12, %v425_v61 }
  0xe3   :  { %v4811_v20 = vpop.eup %4810  ;;  %v1976_v32 = vsel %vm1974_vm0, %v6471_v4, inf  ;;  %4828 = vpow2.f32 %v1768_v2  ;;  %1399 = vadd.xlane.f32.xlu0 %v6405_v50  ;;  %v1055_v16 = vpop.xlane.xlu1 %1054  ;;  %v908_v50 = vmul.f32 %v5856_v14, %v431_v60  ;;  %v909_v63 = vmul.f32 %v5858_v15, %v432_v24  ;;  %v437_v24 = vld [vmem:[#allocation2 + $0xc60] sm:$0xff] }
  0xe4   :  { %v4813_v44 = vpop.eup %4812  ;;  %v1977_v27 = vmin.f32 %v1975_v30, %v1976_v32  ;;  %v1766_v45 = vmul.f32 1.442695, %v4811_v20  ;;  %4830 = vtanh.f32 %v1541_v28  ;;  %v1543_v33 = vadd.f32 %v1055_v16, %v6351_v11  ;;  %v1050_v9 = vpop.xlane.xlu0 %1049  ;;  %v428_v20 = vld [vmem:[#allocation2 + $0xc18] sm:$0xff] }
  0xe5   :  { %v6484_v29 = vpop.eup %4814  ;;  %v1772_v55 = vmul.f32 1.442695, %v4813_v44  ;;  %4832 = vtanh.f32 %v1540_v5  ;;  %v1542_v59 = vadd.f32 %v1050_v9, %v6324_v57  ;;  %v1451_v62 = vadd.f32 %v907_v0, %v906_v7  ;;  %v438_v44 = vld [vmem:[#allocation2 + $0xc68] sm:$0xff] }
  0xe6   :  { %v6488_v25 = vpop.eup %4816  ;;  %v1979_v49 = vmin.f32 %v1977_v27, %v1978_v48  ;;  %4834 = vpow2.f32 %v1766_v45  ;;  %1414 = vadd.xlane.f32.xlu1 %v6416_v23  ;;  %v6493_v42 = vadd.f32 %v1437_v18, %v897_v3  ;;  %v903_v40 = vmul.f32 %v5854_v13, %v426_v6 }
  0xe7   :  { %v4819_v46 = vpop.eup %4818  ;;  %4836 = vpow2.f32 %v1772_v55  ;;  %1409 = vadd.xlane.f32.xlu0 %v6421_v31  ;;  %v1065_v1 = vpop.xlane.xlu1 %1064  ;;  %v1982_v31 = vsel %vm1974_vm0, %v6488_v25, inf  ;;  %v1452_v28 = vadd.f32 %v1451_v62, %v908_v50  ;;  %v904_v3 = vmul.f32 %v5856_v14, %v427_v37  ;;  %v439_v62 = vld [vmem:[#allocation2 + $0xc70] sm:$0xff] }
  0xe8   :  { %v4821_v41 = vpop.eup %4820  ;;  %v1981_v48 = vmin.f32 %v1979_v49, %v1980_v47  ;;  %v1770_v10 = vmul.f32 1.442695, %v4819_v46  ;;  %4838 = vtanh.f32 %v1543_v33  ;;  %v1545_v23 = vadd.f32 %v1065_v1, %v6375_v38  ;;  %v1060_v56 = vpop.xlane.xlu0 %1059 }
  0xe9   :  { %v6498_v30 = vpop.eup %4822  ;;  %v1776_v8 = vmul.f32 1.442695, %v4821_v41  ;;  %4840 = vtanh.f32 %v1542_v59  ;;  %v1544_v5 = vadd.f32 %v1060_v56, %v6385_v21  ;;  %v1984_v39 = vsel %vm1974_vm0, %v6484_v29, inf }
  0xea   :  { %v4825_v17 = vpop.eup %4824  ;;  %v1983_v2 = vmin.f32 %v1981_v48, %v1982_v31  ;;  %4842 = vpow2.f32 %v1770_v10  ;;  %1424 = vadd.xlane.f32.xlu1 %v6429_v51  ;;  %v1994_v60 = vsel %vm1974_vm0, %v6498_v30, inf  ;;  %v1446_v18 = vadd.f32 %v903_v40, %v902_v22 }
  0xeb   :  { %4844 = vpow2.f32 %v1776_v8  ;;  %v1774_v7 = vmul.f32 1.442695, %v4825_v17  ;;  %1419 = vadd.xlane.f32.xlu0 %v6433_v54  ;;  %v1075_v0 = vpop.xlane.xlu1 %1074  ;;  %v1453_v33 = vadd.f32 %v1452_v28, %v909_v63  ;;  %v905_v6 = vmul.f32 %v5858_v15, %v428_v20 }
  0xec   :  { %v6510_v47 = vpop.eup %4826  ;;  %v1985_v32 = vmin.f32 %v1983_v2, %v1984_v39  ;;  %4846 = vtanh.f32 %v1545_v23  ;;  %v1547_v51 = vadd.f32 %v1075_v0, %v6334_v58  ;;  %v1070_v16 = vpop.xlane.xlu0 %1069  ;;  %v1447_v55 = vadd.f32 %v1446_v18, %v904_v3  ;;  %v440_v3 = vld [vmem:[#allocation2 + $0xc78] sm:$0xff] }
  0xed   :  { %v6513_v27 = vpop.eup %4828  ;;  %v1986_v45 = vsel %vm1974_vm0, %v6510_v47, inf  ;;  %4848 = vpow2.f32 %v1774_v7  ;;  %v1546_v54 = vadd.f32 %v1070_v16, %v6403_v53  ;;  %v914_v46 = vmul.f32 %v5852_v12, %v437_v24 }
  0xee   :  { %v4831_v9 = vpop.eup %4830  ;;  %v1987_v61 = vmin.f32 %v1985_v32, %v1986_v45  ;;  %4850 = vtanh.f32 %v1544_v5  ;;  %1434 = vadd.xlane.f32.xlu1 %v6455_v34  ;;  %v915_v1 = vmul.f32 %v5854_v13, %v438_v44  ;;  %v1997_v48 = vsel %vm1974_vm0, %v6513_v27, inf  ;;  %v433_v45 = vld [vmem:[#allocation2 + $0xc40] sm:$0xff] }
  0xef   :  { %v4833_v59 = vpop.eup %4832  ;;  %v1780_v50 = vmul.f32 1.442695, %v4831_v9  ;;  %4852 = vtanh.f32 %v1547_v51  ;;  %1429 = vadd.xlane.f32.xlu0 %v6461_v35  ;;  %v1085_v49 = vpop.xlane.xlu1 %1084  ;;  %v1448_v31 = vadd.f32 %v1447_v55, %v905_v6  ;;  %v916_v8 = vmul.f32 %v5856_v14, %v439_v62 }
  0xf0   :  { %v6523_v63 = vpop.eup %4834  ;;  %v1988_v37 = vrot.slane %v1987_v61, 4  ;;  %v1778_v22 = vmul.f32 1.442695, %v4833_v59  ;;  %4854 = vtanh.f32 %v1546_v54  ;;  %v1549_v34 = vadd.f32 %v1085_v49, %v6324_v57  ;;  %v1080_v40 = vpop.xlane.xlu0 %1079 }
  0xf1   :  { %v6526_v41 = vpop.eup %4836  ;;  %v1995_v35 = vsel %vm1974_vm0, %v6523_v63, inf  ;;  %4856 = vpow2.f32 %v1780_v50  ;;  %v1548_v10 = vadd.f32 %v1080_v40, %v6358_v52  ;;  %v1461_v39 = vadd.f32 %v915_v1, %v914_v46  ;;  %v435_v46 = vld [vmem:[#allocation2 + $0xc50] sm:$0xff] }
  0xf2   :  { %v4839_v23 = vpop.eup %4838  ;;  %v1996_v56 = vmin.f32 %v1994_v60, %v1995_v35  ;;  %4858 = vpow2.f32 %v1778_v22  ;;  %1444 = vadd.xlane.f32.xlu1 %v6474_v26  ;;  %v6535_v17 = vmin.f32 %v1987_v61, %v1988_v37  ;;  %v2001_v60 = vsel %vm1974_vm0, %v6526_v41, inf }
  0xf3   :  { %v4841_v28 = vpop.eup %4840  ;;  %v1784_v2 = vmul.f32 1.442695, %v4839_v23  ;;  %4860 = vtanh.f32 %v1549_v34  ;;  %1439 = vadd.xlane.f32.xlu0 %v6493_v42  ;;  %v1095_v5 = vpop.xlane.xlu1 %1094  ;;  %v917_v44 = vmul.f32 %v5858_v15, %v440_v3  ;;  %v1462_v6 = vadd.f32 %v1461_v39, %v916_v8 }
  0xf4   :  { %v6538_v7 = vpop.eup %4842  ;;  %v1998_v0 = vmin.f32 %v1996_v56, %v1997_v48  ;;  %v1782_v26 = vmul.f32 1.442695, %v4841_v28  ;;  %4862 = vtanh.f32 %v1548_v10  ;;  %v1090_v20 = vpop.xlane.xlu0 %1089  ;;  %v1551_v42 = vadd.f32 %v1095_v5, %v6385_v21  ;;  %v436_v56 = vld [vmem:[#allocation2 + $0xc58] sm:$0xff] }
  0xf5   :  { %v6542_v32 = vpop.eup %4844  ;;  %v1999_v51 = vsel %vm1974_vm0, %v6538_v7, inf  ;;  %4864 = vpow2.f32 %v1784_v2  ;;  %v1550_v16 = vadd.f32 %v1090_v20, %v6351_v11  ;;  %v1990_v59 = vrot.slane %v6535_v17, 2 }
  0xf6   :  { %v4847_v18 = vpop.eup %4846  ;;  %v2000_v24 = vmin.f32 %v1998_v0, %v1999_v51  ;;  %4866 = vpow2.f32 %v1782_v26  ;;  %1454 = vadd.xlane.f32.xlu1 %v1453_v33  ;;  %v434_v33 = vld [vmem:[#allocation2 + $0xc48] sm:$0xff]  ;;  %v2005_v37 = vsel %vm1974_vm0, %v6542_v32, inf  ;;  %v910_v34 = vmul.f32 %v5852_v12, %v433_v45  ;;  %v441_v45 = vld [vmem:[#allocation2 + $0xc80] sm:$0xff] }
  0xf7   :  { %v6549_v54 = vpop.eup %4848  ;;  %v1788_v9 = vmul.f32 1.442695, %v4847_v18  ;;  %4868 = vtanh.f32 %v1551_v42  ;;  %1449 = vadd.xlane.f32.xlu0 %v1448_v31  ;;  %v1105_v61 = vpop.xlane.xlu1 %1104  ;;  %v1463_v23 = vadd.f32 %v1462_v6, %v917_v44  ;;  %v911_v28 = vmul.f32 %v5854_v13, %v434_v33 }
  0xf8   :  { %v4851_v55 = vpop.eup %4850  ;;  %v2002_v50 = vmin.f32 %v2000_v24, %v2001_v60  ;;  %v2003_v49 = vsel %vm1974_vm0, %v6549_v54, inf  ;;  %4870 = vtanh.f32 %v1550_v16  ;;  %v1100_v62 = vpop.xlane.xlu0 %1099  ;;  %v1553_v10 = vadd.f32 %v1105_v61, %v6403_v53 }
  0xf9   :  { %v4853_v1 = vpop.eup %4852  ;;  %4872 = vpow2.f32 %v1788_v9  ;;  %v1786_v22 = vmul.f32 1.442695, %v4851_v55  ;;  %v912_v2 = vmul.f32 %v5856_v14, %v435_v46  ;;  %v913_v51 = vmul.f32 %v5858_v15, %v436_v56  ;;  %v445_v56 = vld [vmem:[#allocation2 + $0xca0] sm:$0xff] }
  0xfa   :  { %v4855_v40 = vpop.eup %4854  ;;  %v2004_v48 = vmin.f32 %v2002_v50, %v2003_v49  ;;  %v1792_v35 = vmul.f32 1.442695, %v4853_v1  ;;  %1464 = vadd.xlane.f32.xlu1 %v1463_v23  ;;  %v1456_v42 = vadd.f32 %v911_v28, %v910_v34  ;;  %v1991_v18 = vmin.f32 %v6535_v17, %v1990_v59  ;;  %v442_v59 = vld [vmem:[#allocation2 + $0xc88] sm:$0xff]  ;;  %v443_v1 = vld [vmem:[#allocation2 + $0xc90] sm:$0xff]  ;;  %v444_v23 = vld [vmem:[#allocation2 + $0xc98] sm:$0xff] }
  0xfb   :  { %v6558_v31 = vpop.eup %4856  ;;  %4874 = vpow2.f32 %v1786_v22  ;;  %v1790_v8 = vmul.f32 1.442695, %v4855_v40  ;;  %v1115_v5 = vpop.xlane.xlu1 %1114  ;;  %v1552_v44 = vadd.f32 %v1100_v62, %v6375_v38 }
  0xfc   :  { %9317 = vst [vmem:[#allocation11_spill] sm:$0xff] %v6558_v31  ;;  %v6562_v3 = vpop.eup %4858  ;;  %v2006_v39 = vmin.f32 %v2004_v48, %v2005_v37  ;;  %v2014_v60 = vsel %vm1974_vm0, %v6558_v31, inf  ;;  %v1110_v0 = vpop.xlane.xlu0 %1109  ;;  %v1457_v6 = vadd.f32 %v1456_v42, %v912_v2  ;;  %v1555_v55 = vadd.f32 %v1115_v5, %v6358_v52 }
  0xfd   :  { %9318 = vst [vmem:[#allocation12_spill] sm:$0xff] %v6562_v3  ;;  %v4861_v26 = vpop.eup %4860  ;;  %v2013_v20 = vsel %vm1974_vm0, %v6562_v3, inf  ;;  %4876 = vpow2.f32 %v1790_v8  ;;  %v918_v52 = vmul.f32 %v5852_v12, %v441_v45  ;;  %v919_v2 = vmul.f32 %v5854_v13, %v442_v59  ;;  %v448_v45 = vld [vmem:[#allocation2 + $0xcb8] sm:$0xff] }
  0xfe   :  { %v4863_v16 = vpop.eup %4862  ;;  %4878 = vpow2.f32 %v1792_v35  ;;  %v1796_v24 = vmul.f32 1.442695, %v4861_v26  ;;  %v2007_v33 = vrot.slane %v2006_v39, 4  ;;  %v2015_v46 = vmin.f32 %v2013_v20, %v2014_v60  ;;  %v446_v60 = vld [vmem:[#allocation2 + $0xca8] sm:$0xff] }
  0xff   :  { %v6571_v9 = vpop.eup %4864  ;;  %v1794_v61 = vmul.f32 1.442695, %v4863_v16  ;;  %4880 = vtanh.f32 %v1553_v10  ;;  %v1125_v50 = vpop.xlane.xlu1 %1124  ;;  %v1458_v34 = vadd.f32 %v1457_v6, %v913_v51  ;;  %v1554_v10 = vadd.f32 %v1110_v0, %v6334_v58  ;;  %v447_v58 = vld [vmem:[#allocation2 + $0xcb0] sm:$0xff] }
 0x100   :  { %9319 = vst [vmem:[#allocation13_spill] sm:$0xff] %v6571_v9  ;;  %v6574_v49 = vpop.eup %4866  ;;  %v2018_v17 = vsel %vm1974_vm0, %v6571_v9, inf  ;;  %4882 = vpow2.f32 %v1796_v24  ;;  %v1120_v62 = vpop.xlane.xlu0 %1119  ;;  %v920_v5 = vmul.f32 %v5856_v14, %v443_v1  ;;  %v1992_v20 = vrot.slane %v1991_v18, 1  ;;  %v449_v1 = vld [vmem:[#allocation2 + $0xcc0] sm:$0xff]  ;;  %v480_v9 = vld [vmem:[#allocation2 + $0xdb8] sm:$0xff] }
 0x101   :  { %9320 = vst [vmem:[#allocation14_spill] sm:$0xff] %v6574_v49  ;;  %v4869_v37 = vpop.eup %4868  ;;  %v2016_v22 = vsel %vm1974_vm0, %v6574_v49, inf  ;;  %4884 = vpow2.f32 %v1794_v61  ;;  %1459 = vadd.xlane.f32.xlu0 %v1458_v34  ;;  %v6588_v51 = vmin.f32 %v2006_v39, %v2007_v33  ;;  %v921_v24 = vmul.f32 %v5858_v15, %v444_v23 }
 0x102   :  { %v4871_v40 = vpop.eup %4870  ;;  %v2017_v48 = vmin.f32 %v2015_v46, %v2016_v22  ;;  %v1800_v35 = vmul.f32 1.442695, %v4869_v37  ;;  %4886 = vtanh.f32 %v1552_v44  ;;  %v1466_v44 = vadd.f32 %v919_v2, %v918_v52 }
 0x103   :  { %v6582_v8 = vpop.eup %4872  ;;  %v1798_v28 = vmul.f32 1.442695, %v4871_v40  ;;  %4888 = vtanh.f32 %v1555_v55  ;;  %v6586_v26 = vpop.xlane.xlu1 %1134  ;;  %v922_v61 = vmul.f32 %v5852_v12, %v445_v56  ;;  %v923_v55 = vmul.f32 %v5854_v13, %v446_v60 }
 0x104   :  { %9321 = vst [vmem:[#allocation15_spill] sm:$0xff] %v6582_v8  ;;  %v2019_v42 = vmin.f32 %v2017_v48, %v2018_v17  ;;  %4890 = vpow2.f32 %v1800_v35  ;;  %v6590_v0 = vpop.xlane.xlu0 %1129  ;;  %v2022_v6 = vsel %vm1974_vm0, %v6582_v8, inf  ;;  %v1467_v17 = vadd.f32 %v1466_v44, %v920_v5  ;;  %v450_v35 = vld [vmem:[#allocation2 + $0xcc8] sm:$0xff] }
 0x105   :  { %v6592_v16 = vpop.eup %4874  ;;  %4892 = vpow2.f32 %v1798_v28  ;;  %v924_v59 = vmul.f32 %v5856_v14, %v447_v58  ;;  %v6608_v34 = vmin.f32 %v1991_v18, %v1992_v20  ;;  %v925_v40 = vmul.f32 %v5858_v15, %v448_v45 }
 0x106   :  { %9322 = vst [vmem:[#allocation16_spill] sm:$0xff] %v6592_v16  ;;  %v2020_v39 = vsel %vm1974_vm0, %v6592_v16, inf  ;;  %4894 = vtanh.f32 %v1554_v10  ;;  %v1471_v48 = vadd.f32 %v923_v55, %v922_v61  ;;  %v1468_v28 = vadd.f32 %v1467_v17, %v921_v24  ;;  %v451_v24 = vld [vmem:[#allocation2 + $0xcd0] sm:$0xff] }
 0x107   :  { %v6601_v33 = vpop.eup %4876  ;;  %v2021_v46 = vmin.f32 %v2019_v42, %v2020_v39  ;;  %v6604_v37 = vpop.xlane.xlu1 %1144  ;;  %v1557_v2 = vadd.f32 %v1125_v50, %v6351_v11  ;;  %v1556_v5 = vadd.f32 %v1120_v62, %v6324_v57  ;;  %v2009_v18 = vrot.slane %v6588_v51, 2  ;;  %v452_v11 = vld [vmem:[#allocation2 + $0xcd8] sm:$0xff] }
 0x108   :  { %v6606_v22 = vpop.eup %4878  ;;  %v2024_v52 = vsel %vm1974_vm0, %v6601_v33, inf  ;;  %v6613_v10 = vpop.xlane.xlu0 %1139  ;;  %v1472_v42 = vadd.f32 %v1471_v48, %v924_v59  ;;  %v926_v58 = vmul.f32 %v5852_v12, %v449_v1  ;;  %1469 = vadd.xlane.f32.xlu0 %v1468_v28  ;;  %v927_v57 = vmul.f32 %v5854_v13, %v450_v35  ;;  %v453_v48 = vld [vmem:[#allocation2 + $0xce0] sm:$0xff] }
 0x109   :  { %9323 = vst [vmem:[#allocation17_spill] sm:$0xff] %v6606_v22  ;;  %v4881_v23 = vpop.eup %4880  ;;  %v2023_v56 = vmin.f32 %v2021_v46, %v2022_v6  ;;  %v2032_v45 = vsel %vm1974_vm0, %v6606_v22, inf  ;;  %4896 = vtanh.f32 %v1557_v2  ;;  %v929_v28 = vmul.f32 %v5858_v15, %v452_v11  ;;  %v456_v11 = vld [vmem:[#allocation2 + $0xcf8] sm:$0xff] }
 0x10a   :  { %v6617_v60 = vpop.eup %4882  ;;  %v1804_v20 = vmul.f32 1.442695, %v4881_v23  ;;  %v1473_v55 = vadd.f32 %v1472_v42, %v925_v40  ;;  %v1476_v2 = vadd.f32 %v927_v57, %v926_v58  ;;  %v6642_v40 = vsub.f32 %v6510_v47, %v6608_v34 }
 0x10b   :  { %9324 = vst [vmem:[#allocation18_spill] sm:$0xff] %v6617_v60  ;;  %v6621_v44 = vpop.eup %4884  ;;  %v2025_v61 = vmin.f32 %v2023_v56, %v2024_v52  ;;  %v6626_v50 = vpop.xlane.xlu1 %1154  ;;  %v2035_v6 = vsel %vm1974_vm0, %v6617_v60, inf  ;;  %v928_v56 = vmul.f32 %v5856_v14, %v451_v24  ;;  %v454_v60 = vld [vmem:[#allocation2 + $0xce8] sm:$0xff]  ;;  %v930_v58 = vmul.f32 %v5852_v12, %v453_v48 }
 0x10c   :  { %9325 = vst [vmem:[#allocation19_spill] sm:$0xff] %v6621_v44  ;;  %v4887_v62 = vpop.eup %4886  ;;  %v2033_v39 = vsel %vm1974_vm0, %v6621_v44, inf  ;;  %4898 = vpow2.f32 %v1804_v20  ;;  %v6632_v46 = vpop.xlane.xlu0 %1149  ;;  %1474 = vadd.xlane.f32.xlu1 %v1473_v55  ;;  %9328 = vst [vmem:[#allocation22_spill] sm:$0xff] %v6642_v40  ;;  %v1559_v48 = vadd.f32 %v6586_v26, %v6375_v38 }
 0x10d   :  { %v4889_v17 = vpop.eup %4888  ;;  %v2026_v59 = vrot.slane %v2025_v61, 4  ;;  %v2034_v1 = vmin.f32 %v2032_v45, %v2033_v39  ;;  %v1802_v52 = vmul.f32 1.442695, %v4887_v62  ;;  %4900 = vtanh.f32 %v1556_v5  ;;  %v455_v5 = vld [vmem:[#allocation2 + $0xcf0] sm:$0xff] }
 0x10e   :  { %v6634_v35 = vpop.eup %4890  ;;  %v1808_v23 = vmul.f32 1.442695, %v4889_v17  ;;  %v6645_v62 = vmin.f32 %v6588_v51, %v2009_v18  ;;  %v1477_v39 = vadd.f32 %v1476_v2, %v928_v56  ;;  %v931_v51 = vmul.f32 %v5854_v13, %v454_v60  ;;  %v457_v18 = vld [vmem:[#allocation2 + $0xd00] sm:$0xff]  ;;  %v459_v2 = vld [vmem:[#allocation2 + $0xd10] sm:$0xff] }
 0x10f   :  { %9326 = vst [vmem:[#allocation20_spill] sm:$0xff] %v6634_v35  ;;  %v6638_v20 = vpop.eup %4892  ;;  %v2036_v42 = vmin.f32 %v2034_v1, %v2035_v6  ;;  %4902 = vpow2.f32 %v1802_v52  ;;  %v6650_v57 = vpop.xlane.xlu1 %1164  ;;  %v6654_v47 = vmin.f32 %v2025_v61, %v2026_v59  ;;  %v2039_v6 = vsel %vm1974_vm0, %v6634_v35, inf  ;;  %v458_v1 = vld [vmem:[#allocation2 + $0xd08] sm:$0xff]  ;;  %v461_v35 = vld [vmem:[#allocation2 + $0xd20] sm:$0xff] }
 0x110   :  { %9327 = vst [vmem:[#allocation21_spill] sm:$0xff] %v6638_v20  ;;  %v4895_v45 = vpop.eup %4894  ;;  %v2037_v24 = vsel %vm1974_vm0, %v6638_v20, inf  ;;  %v6652_v55 = vpop.xlane.xlu0 %1159  ;;  %4904 = vpow2.f32 %v1808_v23  ;;  %v1478_v52 = vadd.f32 %v1477_v39, %v929_v28  ;;  %v932_v56 = vmul.f32 %v5856_v14, %v455_v5  ;;  %v460_v20 = vld [vmem:[#allocation2 + $0xd18] sm:$0xff]  ;;  %v462_v5 = vld [vmem:[#allocation2 + $0xd28] sm:$0xff] }
 0x111   :  { %v1806_v17 = vmul.f32 1.442695, %v4895_v45  ;;  %v2038_v44 = vmin.f32 %v2036_v42, %v2037_v24  ;;  %v933_v61 = vmul.f32 %v5858_v15, %v456_v11  ;;  %v1481_v59 = vadd.f32 %v931_v51, %v930_v58  ;;  %v463_v11 = vld [vmem:[#allocation2 + $0xd30] sm:$0xff] }
 0x112   :  { %1479 = vadd.xlane.f32.xlu0 %v1478_v52  ;;  %v1558_v60 = vadd.f32 %v6590_v0, %v6385_v21  ;;  %v934_v23 = vmul.f32 %v5852_v12, %v457_v18  ;;  %v935_v28 = vmul.f32 %v5854_v13, %v458_v1  ;;  %v2011_v26 = vrot.slane %v6645_v62, 1  ;;  %v464_v0 = vld [vmem:[#allocation2 + $0xd38] sm:$0xff] }
 0x113   :  { %4906 = vpow2.f32 %v1806_v17  ;;  %v4897_v38 = vpop.eup %4896  ;;  %v1482_v42 = vadd.f32 %v1481_v59, %v932_v56  ;;  %v936_v24 = vmul.f32 %v5856_v14, %v459_v2  ;;  %v937_v39 = vmul.f32 %v5858_v15, %v460_v20  ;;  %v6675_v18 = vpop.xlane.xlu1 %1174 }
 0x114   :  { %4908 = vtanh.f32 %v1559_v48  ;;  %v6667_v45 = vpop.xlane.xlu0 %1169  ;;  %v1812_v17 = vmul.f32 1.442695, %v4897_v38  ;;  %v1486_v21 = vadd.f32 %v935_v28, %v934_v23  ;;  %v938_v51 = vmul.f32 %v5852_v12, %v461_v35  ;;  %v467_v38 = vld [vmem:[#allocation2 + $0xd50] sm:$0xff] }
 0x115   :  { %4910 = vtanh.f32 %v1558_v60  ;;  %v2028_v52 = vrot.slane %v6654_v47, 2  ;;  %v2040_v48 = vmin.f32 %v2038_v44, %v2039_v6  ;;  %v1483_v56 = vadd.f32 %v1482_v42, %v933_v61  ;;  %v6688_v44 = vld [vmem:[%s9219_s2] sm:$0xff] }
 0x116   :  { %v6672_v58 = vpop.eup %4898  ;;  %v939_v2 = vmul.f32 %v5854_v13, %v462_v5  ;;  %v1487_v22 = vadd.f32 %v1486_v21, %v936_v24  ;;  %v940_v60 = vmul.f32 %v5856_v14, %v463_v11  ;;  %4912 = vpow2.f32 %v1812_v17  ;;  %v465_v61 = vld [vmem:[#allocation2 + $0xd40] sm:$0xff]  ;;  %v466_v5 = vld [vmem:[#allocation2 + $0xd48] sm:$0xff] }
 0x117   :  { %9329 = vst [vmem:[#allocation23_spill] sm:$0xff] %v6672_v58  ;;  %v4901_v1 = vpop.eup %4900  ;;  %v2043_v20 = vsel %vm1974_vm0, %v6672_v58, inf  ;;  %1484 = vadd.xlane.f32.xlu1 %v1483_v56  ;;  %v941_v35 = vmul.f32 %v5858_v15, %v464_v0  ;;  %v1561_v6 = vadd.f32 %v6688_v44, %v6604_v37  ;;  %v1560_v17 = vadd.f32 %v6613_v10, %v6403_v53  ;;  %v469_v56 = vld [vmem:[#allocation2 + $0xd60] sm:$0xff] }
 0x118   :  { %v1810_v59 = vmul.f32 1.442695, %v4901_v1  ;;  %v1491_v28 = vadd.f32 %v939_v2, %v938_v51  ;;  %v6692_v42 = vpop.xlane.xlu0 %1179  ;;  %v1488_v11 = vadd.f32 %v1487_v22, %v937_v39  ;;  %v6700_v21 = vsel %vm1974_vm0, %v6642_v40, 0.0  ;;  %v468_v1 = vld [vmem:[#allocation2 + $0xd58] sm:$0xff]  ;;  %v470_v2 = vld [vmem:[#allocation2 + $0xd68] sm:$0xff]  ;;  %v471_v39 = vld [vmem:[#allocation2 + $0xd70] sm:$0xff] }
 0x119   :  { %v6682_v23 = vpop.eup %4902  ;;  %v6703_v0 = vmin.f32 %v6645_v62, %v2011_v26  ;;  %v942_v22 = vmul.f32 %v5852_v12, %v465_v61  ;;  %v943_v53 = vmul.f32 %v5854_v13, %v466_v5  ;;  %v944_v10 = vmul.f32 %v5856_v14, %v467_v38 }
 0x11a   :  { %9330 = vst [vmem:[#allocation24_spill] sm:$0xff] %v6682_v23  ;;  %v2041_v24 = vsel %vm1974_vm0, %v6682_v23, inf  ;;  %4914 = vpow2.f32 %v1810_v59  ;;  %v1492_v51 = vadd.f32 %v1491_v28, %v940_v60  ;;  %v6705_v58 = vpop.eup %4904  ;;  %1489 = vadd.xlane.f32.xlu0 %v1488_v11  ;;  %v6710_v59 = vpop.xlane.xlu1 %1184  ;;  %v6715_v26 = vmin.f32 %v6654_v47, %v2028_v52  ;;  %v472_v28 = vld [vmem:[#allocation2 + $0xd78] sm:$0xff] }
 0x11b   :  { %v2042_v37 = vmin.f32 %v2040_v48, %v2041_v24  ;;  %9331 = vst [vmem:[#allocation25_spill] sm:$0xff] %v6705_v58  ;;  %4916 = vtanh.f32 %v1561_v6  ;;  %v945_v6 = vmul.f32 %v5858_v15, %v468_v1  ;;  %v1496_v61 = vadd.f32 %v943_v53, %v942_v22  ;;  %v474_v22 = vld [vmem:[#allocation2 + $0xd88] sm:$0xff] }
 0x11c   :  { %v1493_v60 = vadd.f32 %v1492_v51, %v941_v35  ;;  %4918 = vtanh.f32 %v1560_v17  ;;  %v946_v5 = vmul.f32 %v5852_v12, %v469_v56  ;;  %v947_v38 = vmul.f32 %v5854_v13, %v470_v2  ;;  %v6725_v35 = vpop.xlane.xlu0 %1189  ;;  %v6731_v56 = vld [vmem:[%s9219_s2 + $0x10] sm:$0xff] }
 0x11d   :  { %v6712_v62 = vpop.eup %4906  ;;  %v2044_v48 = vmin.f32 %v2042_v37, %v2043_v20  ;;  %v2052_v11 = vsel %vm1974_vm0, %v6705_v58, inf  ;;  %v948_v52 = vmul.f32 %v5856_v14, %v471_v39  ;;  %v473_v20 = vld [vmem:[#allocation2 + $0xd80] sm:$0xff]  ;;  %v1497_v37 = vadd.f32 %v1496_v61, %v944_v10 }
 0x11e   :  { %9332 = vst [vmem:[#allocation26_spill] sm:$0xff] %v6712_v62  ;;  %v4909_v24 = vpop.eup %4908  ;;  %v2051_v40 = vsel %vm1974_vm0, %v6712_v62, inf  ;;  %1494 = vadd.xlane.f32.xlu1 %v1493_v60  ;;  %v949_v51 = vmul.f32 %v5858_v15, %v472_v28  ;;  %v1501_v1 = vadd.f32 %v947_v38, %v946_v5  ;;  %v1563_v2 = vadd.f32 %v6731_v56, %v6626_v50  ;;  %v6738_v60 = vld [vmem:[%s9219_s2 + $0x8] sm:$0xff]  ;;  %v475_v28 = vld [vmem:[#allocation2 + $0xd90] sm:$0xff]  ;;  %v476_v5 = vld [vmem:[#allocation2 + $0xd98] sm:$0xff]  ;;  %v6743_v58 = vpop.xlane.xlu1 %1194 }
 0x11f   :  { %v1816_v47 = vmul.f32 1.442695, %v4909_v24  ;;  %v4911_v17 = vpop.eup %4910  ;;  %v2045_v53 = vrot.slane %v2044_v48, 4  ;;  %v1562_v10 = vadd.f32 %v6738_v60, %v6632_v46  ;;  %v1498_v24 = vadd.f32 %v1497_v37, %v945_v6  ;;  %v477_v50 = vld [vmem:[#allocation2 + $0xda0] sm:$0xff]  ;;  %v478_v6 = vld [vmem:[#allocation2 + $0xda8] sm:$0xff] }
 0x120   :  { %v1814_v39 = vmul.f32 1.442695, %v4911_v17  ;;  %v1502_v61 = vadd.f32 %v1501_v1, %v948_v52  ;;  %v950_v38 = vmul.f32 %v5852_v12, %v473_v20  ;;  %v6749_v17 = vsub.f32 %v6549_v54, %v6703_v0  ;;  %v479_v52 = vld [vmem:[#allocation2 + $0xdb0] sm:$0xff] }
 0x121   :  { %4920 = vpow2.f32 %v1816_v47  ;;  %v6745_v47 = vpop.eup %4912  ;;  %v2030_v62 = vrot.slane %v6715_v26, 1  ;;  %v951_v46 = vmul.f32 %v5854_v13, %v474_v22  ;;  %v2053_v1 = vmin.f32 %v2051_v40, %v2052_v11  ;;  %1499 = vadd.xlane.f32.xlu0 %v1498_v24  ;;  %v6760_v22 = vpop.xlane.xlu0 %1199 }
 0x122   :  { %4922 = vtanh.f32 %v1563_v2  ;;  %9333 = vst [vmem:[#allocation27_spill] sm:$0xff] %v6745_v47  ;;  %v1503_v20 = vadd.f32 %v1502_v61, %v949_v51  ;;  %v952_v2 = vmul.f32 %v5856_v14, %v475_v28  ;;  %v953_v54 = vmul.f32 %v5858_v15, %v476_v5 }
 0x123   :  { %4924 = vpow2.f32 %v1814_v39  ;;  %v1506_v16 = vadd.f32 %v951_v46, %v950_v38  ;;  %v954_v39 = vmul.f32 %v5852_v12, %v477_v50  ;;  %v6762_v31 = vmin.f32 %v2044_v48, %v2045_v53  ;;  %v6771_v38 = vld [vmem:[%s9219_s2 + $0x20] sm:$0xff]  ;;  %v482_v53 = vld [vmem:[#allocation2 + $0xdc8] sm:$0xff]  ;;  %v483_v50 = vld [vmem:[#allocation2 + $0xdd0] sm:$0xff] }
 0x124   :  { %v6753_v37 = vpop.eup %4914  ;;  %4926 = vtanh.f32 %v1562_v10  ;;  %v2056_v40 = vsel %vm1974_vm0, %v6745_v47, inf  ;;  %1504 = vadd.xlane.f32.xlu1 %v1503_v20  ;;  %v955_v11 = vmul.f32 %v5854_v13, %v478_v6  ;;  %v956_v51 = vmul.f32 %v5856_v14, %v479_v52  ;;  %v481_v10 = vld [vmem:[#allocation2 + $0xdc0] sm:$0xff]  ;;  %v1205_v52 = vpop.xlane.xlu1 %1204  ;;  %v486_v47 = vld [vmem:[#allocation2 + $0xde8] sm:$0xff] }
 0x125   :  { %9334 = vst [vmem:[#allocation28_spill] sm:$0xff] %v6753_v37  ;;  %v2054_v8 = vsel %vm1974_vm0, %v6753_v37, inf  ;;  %v4917_v49 = vpop.eup %4916  ;;  %v1507_v5 = vadd.f32 %v1506_v16, %v952_v2  ;;  %v1565_v48 = vadd.f32 %v6771_v38, %v6650_v57  ;;  %v957_v6 = vmul.f32 %v5858_v15, %v480_v9  ;;  %v485_v16 = vld [vmem:[#allocation2 + $0xde0] sm:$0xff]  ;;  %v484_v2 = vld [vmem:[#allocation2 + $0xdd8] sm:$0xff]  ;;  %v487_v37 = vld [vmem:[#allocation2 + $0xdf0] sm:$0xff] }
 0x126   :  { %v4919_v28 = vpop.eup %4918  ;;  %v2055_v24 = vmin.f32 %v2053_v1, %v2054_v8  ;;  %v1820_v61 = vmul.f32 1.442695, %v4917_v49  ;;  %v1511_v20 = vadd.f32 %v955_v11, %v954_v39  ;;  %v6779_v8 = vld [vmem:[%s9219_s2 + $0x18] sm:$0xff]  ;;  %v6784_v1 = vmin.f32 %v6715_v26, %v2030_v62 }
 0x127   :  { %v1818_v46 = vmul.f32 1.442695, %v4919_v28  ;;  %v1564_v49 = vadd.f32 %v6779_v8, %v6652_v55  ;;  %v1508_v57 = vadd.f32 %v1507_v5, %v953_v54  ;;  %v958_v28 = vmul.f32 %v5852_v12, %v481_v10  ;;  %v488_v62 = vld [vmem:[#allocation2 + $0xdf8] sm:$0xff]  ;;  %v6793_v54 = vpop.xlane.xlu0 %1209 }
 0x128   :  { %4928 = vpow2.f32 %v1820_v61  ;;  %v1512_v9 = vadd.f32 %v1511_v20, %v956_v51  ;;  %v959_v39 = vmul.f32 %v5854_v13, %v482_v53  ;;  %v960_v11 = vmul.f32 %v5856_v14, %v483_v50 }
 0x129   :  { %4930 = vpow2.f32 %v1818_v46  ;;  %v2047_v55 = vrot.slane %v6762_v31, 2  ;;  %v2057_v23 = vmin.f32 %v2055_v24, %v2056_v40  ;;  %1509 = vadd.xlane.f32.xlu0 %v1508_v57  ;;  %v962_v26 = vmul.f32 %v5852_v12, %v485_v16  ;;  %v1215_v57 = vpop.xlane.xlu1 %1214 }
 0x12a   :  { %4932 = vtanh.f32 %v1565_v48  ;;  %v1513_v51 = vadd.f32 %v1512_v9, %v957_v6  ;;  %v961_v61 = vmul.f32 %v5858_v15, %v484_v2  ;;  %v1516_v5 = vadd.f32 %v959_v39, %v958_v28  ;;  %v6815_v2 = vld [vmem:[%s9219_s2 + $0x28] sm:$0xff] }
 0x12b   :  { %v6789_v3 = vpop.eup %4920  ;;  %4934 = vtanh.f32 %v1564_v49  ;;  %v963_v40 = vmul.f32 %v5854_v13, %v486_v47  ;;  %v964_v24 = vmul.f32 %v5856_v14, %v487_v37  ;;  %v965_v20 = vmul.f32 %v5858_v15, %v488_v62  ;;  %v6808_v49 = vld [vmem:[%s9219_s2 + $0x30] sm:$0xff]  ;;  %v6827_v39 = vpop.xlane.xlu0 %1219 }
 0x12c   :  { %v4923_v10 = vpop.eup %4922  ;;  %v2060_v50 = vsel %vm1974_vm0, %v6789_v3, inf  ;;  %1514 = vadd.xlane.f32.xlu1 %v1513_v51  ;;  %v1517_v6 = vadd.f32 %v1516_v5, %v960_v11  ;;  %v1567_v16 = vadd.f32 %v6808_v49, %v6675_v18  ;;  %v1566_v15 = vadd.f32 %v6815_v2, %v6667_v45 }
 0x12d   :  { %v6796_v53 = vpop.eup %4924  ;;  %v1824_v46 = vmul.f32 1.442695, %v4923_v10  ;;  %v1521_v47 = vadd.f32 %v963_v40, %v962_v26  ;;  %v1569_v28 = vadd.f32 %v6738_v60, %v6710_v59  ;;  %v6823_v18 = vsel %vm1974_vm0, %v6749_v17, 0.0  ;;  %v6845_v5 = vpop.xlane.xlu1 %1224 }
 0x12e   :  { %v4927_v48 = vpop.eup %4926  ;;  %v2058_v12 = vsel %vm1974_vm0, %v6796_v53, inf  ;;  %v1518_v37 = vadd.f32 %v1517_v6, %v961_v61  ;;  %v1568_v9 = vadd.f32 %v6688_v44, %v6692_v42  ;;  %v1571_v45 = vadd.f32 %v6779_v8, %v6743_v58 }
 0x12f   :  { %v2059_v13 = vmin.f32 %v2057_v23, %v2058_v12  ;;  %4936 = vpow2.f32 %v1824_v46  ;;  %v1822_v14 = vmul.f32 1.442695, %v4927_v48  ;;  %v1522_v23 = vadd.f32 %v1521_v47, %v964_v24 }
 0x130   :  { %4938 = vtanh.f32 %v1567_v16  ;;  %1519 = vadd.xlane.f32.xlu0 %v1518_v37  ;;  %v1570_v59 = vadd.f32 %v6731_v56, %v6725_v35  ;;  %v6837_v26 = vsub.f32 %v6601_v33, %v6784_v1  ;;  %v1573_v42 = vadd.f32 %v6815_v2, %v1205_v52 }
 0x131   :  { %4940 = vpow2.f32 %v1822_v14  ;;  %v2061_v11 = vmin.f32 %v2059_v13, %v2060_v50  ;;  %v1523_v10 = vadd.f32 %v1522_v23, %v965_v20  ;;  %v2048_v61 = vmin.f32 %v6762_v31, %v2047_v55  ;;  %v1235_v37 = vpop.xlane.xlu1 %1234 }
 0x132   :  { %4942 = vtanh.f32 %v1566_v15  ;;  %v6833_v62 = vpop.eup %4928  ;;  %v1572_v58 = vadd.f32 %v6771_v38, %v6760_v22  ;;  %v6851_v33 = vsub.f32 %v6452_v43, %v6608_v34  ;;  %v6855_v52 = vsub.f32 %v6471_v4, %v6608_v34  ;;  %v1230_v4 = vpop.xlane.xlu0 %1229 }
 0x133   :  { %4944 = vtanh.f32 %v1569_v28  ;;  %v6840_v51 = vpop.eup %4930  ;;  %1524 = vadd.xlane.f32.xlu1 %v1523_v10  ;;  %v5803_v31 = vmov 0   ;;  %v1575_v40 = vadd.f32 %v6688_v44, %v1215_v57  ;;  %v1574_v48 = vadd.f32 %v6808_v49, %v6793_v54 }
 0x134   :  { %4946 = vtanh.f32 %v1568_v9  ;;  %v4933_v35 = vpop.eup %4932  ;;  %v2062_v50 = vsel %vm1974_vm0, %v6840_v51, inf  ;;  %4782 = vset.pattern.permute.xlu0 %v5803_v31  ;;  %4783 = vset.pattern.permute.xlu1 %v5803_v31  ;;  %v6862_v43 = vsub.f32 %v6448_v36, %v6608_v34  ;;  %v6866_v6 = vsub.f32 %v6467_v19, %v6608_v34 }
 0x135   :  { %4948 = vtanh.f32 %v1571_v45  ;;  %v4935_v55 = vpop.eup %4934  ;;  %v2063_v22 = vmin.f32 %v2061_v11, %v2062_v50  ;;  %v1828_v46 = vmul.f32 1.442695, %v4933_v35  ;;  %v2391_v20 = vsel %vm1974_vm0, %v6851_v33, 0.0 }
 0x136   :  { %4950 = vtanh.f32 %v1570_v59  ;;  %v1826_v24 = vmul.f32 1.442695, %v4935_v55  ;;  %v2049_v57 = vrot.slane %v2048_v61, 1  ;;  %v2070_v54 = vsel %vm1974_vm0, %v6833_v62, inf  ;;  %v1240_v50 = vpop.xlane.xlu0 %1239 }
 0x137   :  { %4952 = vtanh.f32 %v1573_v42  ;;  %v2064_v12 = vrot.slane %v2063_v22, 4  ;;  %v2392_v36 = vsel %vm1974_vm0, %v6855_v52, 0.0  ;;  %v6878_v19 = vsub.f32 %v6488_v25, %v6608_v34 }
 0x138   :  { %4954 = vpow2.f32 %v1828_v46  ;;  %v2393_v47 = vadd.f32 %v2392_v36, %v2391_v20  ;;  %v6884_v23 = vsub.f32 %v6484_v29, %v6608_v34  ;;  %v2394_v9 = vsel %vm1974_vm0, %v6862_v43, 0.0 }
 0x139   :  { %v6870_v16 = vpop.eup %4936  ;;  %4956 = vpow2.f32 %v1826_v24  ;;  %v2065_v14 = vmin.f32 %v2063_v22, %v2064_v12  ;;  %v2396_v59 = vsel %vm1974_vm0, %v6866_v6, 0.0  ;;  %v6892_v34 = vmin.f32 %v2048_v61, %v2049_v57  ;;  %v1245_v57 = vpop.xlane.xlu1 %1244 }
 0x13a   :  { %9335 = vst [vmem:[#allocation29_spill] sm:$0xff] %v6870_v16  ;;  %v4939_v13 = vpop.eup %4938  ;;  %4958 = vtanh.f32 %v1572_v58  ;;  %v2395_v25 = vadd.f32 %v2394_v9, %v2393_v47  ;;  %v2073_v31 = vsel %vm1974_vm0, %v6870_v16, inf  ;;  %v2398_v24 = vsel %vm1974_vm0, %v6878_v19, 0.0 }
 0x13b   :  { %v6880_v15 = vpop.eup %4940  ;;  %v1832_v28 = vmul.f32 1.442695, %v4939_v13  ;;  %4960 = vtanh.f32 %v1575_v40  ;;  %v2066_v42 = vrot.slane %v2065_v14, 2  ;;  %v1577_v61 = vadd.f32 %v6731_v56, %v6845_v5 }
 0x13c   :  { %v4943_v11 = vpop.eup %4942  ;;  %v2071_v45 = vsel %vm1974_vm0, %v6880_v15, inf  ;;  %4962 = vtanh.f32 %v1574_v48  ;;  %v2397_v22 = vadd.f32 %v2396_v59, %v2395_v25  ;;  %v2400_v48 = vsel %vm1974_vm0, %v6884_v23, 0.0 }
 0x13d   :  { %v4945_v10 = vpop.eup %4944  ;;  %v2072_v58 = vmin.f32 %v2070_v54, %v2071_v45  ;;  %4964 = vpow2.f32 %v1832_v28  ;;  %v1830_v35 = vmul.f32 1.442695, %v4943_v11  ;;  %v6902_v13 = vmin.f32 %v2065_v14, %v2066_v42  ;;  %v6913_v42 = vpop.xlane.xlu0 %1249 }
 0x13e   :  { %v4947_v29 = vpop.eup %4946  ;;  %v1836_v55 = vmul.f32 1.442695, %v4945_v10  ;;  %v2399_v54 = vadd.f32 %v2398_v24, %v2397_v22  ;;  %v1576_v25 = vadd.f32 %v6738_v60, %v6827_v39  ;;  %v1579_v5 = vadd.f32 %v6771_v38, %v1235_v37 }
 0x13f   :  { %v4949_v46 = vpop.eup %4948  ;;  %4966 = vpow2.f32 %v1830_v35  ;;  %v1834_v40 = vmul.f32 1.442695, %v4947_v29  ;;  %v2074_v47 = vmin.f32 %v2072_v58, %v2073_v31  ;;  %v1578_v10 = vadd.f32 %v6779_v8, %v1230_v4 }
 0x140   :  { %v4951_v12 = vpop.eup %4950  ;;  %4968 = vpow2.f32 %v1836_v55  ;;  %v1840_v20 = vmul.f32 1.442695, %v4949_v46  ;;  %v2401_v45 = vadd.f32 %v2400_v48, %v2399_v54  ;;  %v1581_v14 = vadd.f32 %v6808_v49, %v1245_v57  ;;  %v1255_v48 = vpop.xlane.xlu1 %1254 }
 0x141   :  { %v4953_v36 = vpop.eup %4952  ;;  %4970 = vpow2.f32 %v1834_v40  ;;  %v1838_v28 = vmul.f32 1.442695, %v4951_v12  ;;  %v6922_v4 = vsub.f32 %v6498_v30, %v6703_v0  ;;  %v6926_v24 = vsub.f32 %v6523_v63, %v6703_v0 }
 0x142   :  { %v6904_v9 = vpop.eup %4954  ;;  %4972 = vpow2.f32 %v1840_v20  ;;  %v1844_v11 = vmul.f32 1.442695, %v4953_v36  ;;  %v2403_v39 = vadd.f32 %v6700_v21, %v2401_v45  ;;  %v1580_v54 = vadd.f32 %v6815_v2, %v1240_v50 }
 0x143   :  { %9336 = vst [vmem:[#allocation30_spill] sm:$0xff] %v6904_v9  ;;  %v6908_v59 = vpop.eup %4956  ;;  %4974 = vpow2.f32 %v1838_v28  ;;  %v2077_v35 = vsel %vm1974_vm0, %v6904_v9, inf  ;;  %v6935_v57 = vsub.f32 %v6513_v27, %v6703_v0  ;;  %v6941_v63 = vsub.f32 %v6538_v7, %v6703_v0  ;;  %v6949_v28 = vpop.xlane.xlu0 %1259  ;;  %v9358_v9 = vld [vmem:[#allocation15_spill] sm:$0xff] }
 0x144   :  { %9337 = vst [vmem:[#allocation31_spill] sm:$0xff] %v6908_v59  ;;  %v4959_v58 = vpop.eup %4958  ;;  %v2075_v29 = vsel %vm1974_vm0, %v6908_v59, inf  ;;  %4976 = vpow2.f32 %v1844_v11  ;;  %v2404_v40 = vrot.slane %v2403_v39, 4  ;;  %v2410_v50 = vsel %vm1974_vm0, %v6922_v4, 0.0 }
 0x145   :  { %v4961_v31 = vpop.eup %4960  ;;  %v2076_v55 = vmin.f32 %v2074_v47, %v2075_v29  ;;  %v1842_v22 = vmul.f32 1.442695, %v4959_v58  ;;  %4978 = vtanh.f32 %v1577_v61  ;;  %v6945_v47 = vsub.f32 %v6526_v41, %v6703_v0 }
 0x146   :  { %v4963_v37 = vpop.eup %4962  ;;  %v1848_v46 = vmul.f32 1.442695, %v4961_v31  ;;  %4980 = vtanh.f32 %v1576_v25  ;;  %v2405_v61 = vadd.f32 %v2404_v40, %v2403_v39  ;;  %v2411_v7 = vsel %vm1974_vm0, %v6926_v24, 0.0 }
 0x147   :  { %v6928_v12 = vpop.eup %4964  ;;  %v2078_v21 = vmin.f32 %v2076_v55, %v2077_v35  ;;  %4982 = vpow2.f32 %v1842_v22  ;;  %v1846_v20 = vmul.f32 1.442695, %v4963_v37  ;;  %v2412_v35 = vadd.f32 %v2411_v7, %v2410_v50  ;;  %v1265_v55 = vpop.xlane.xlu1 %1264 }
 0x148   :  { %9338 = vst [vmem:[#allocation32_spill] sm:$0xff] %v6928_v12  ;;  %v2081_v30 = vsel %vm1974_vm0, %v6928_v12, inf  ;;  %4984 = vpow2.f32 %v1848_v46  ;;  %v2406_v45 = vrot.slane %v2405_v61, 2 }
 0x149   :  { %v6937_v36 = vpop.eup %4966  ;;  %4986 = vpow2.f32 %v1846_v20 }
 0x14a   :  { %v6951_v11 = vpop.eup %4968  ;;  %v2079_v27 = vsel %vm1974_vm0, %v6937_v36, inf  ;;  %4988 = vtanh.f32 %v1579_v5  ;;  %v2407_v31 = vadd.f32 %v2406_v45, %v2405_v61  ;;  %v6967_v5 = vsub.f32 %v6542_v32, %v6703_v0 }
 0x14b   :  { %9339 = vst [vmem:[#allocation33_spill] sm:$0xff] %v6951_v11  ;;  %v6957_v25 = vpop.eup %4970  ;;  %v2080_v58 = vmin.f32 %v2078_v21, %v2079_v27  ;;  %v2090_v41 = vsel %vm1974_vm0, %v6951_v11, inf  ;;  %4990 = vtanh.f32 %v1578_v10  ;;  %v2413_v10 = vsel %vm1974_vm0, %v6935_v57, 0.0  ;;  %v1270_v27 = vpop.xlane.xlu0 %1269 }
 0x14c   :  { %9340 = vst [vmem:[#allocation34_spill] sm:$0xff] %v6957_v25  ;;  %v6961_v29 = vpop.eup %4972  ;;  %v2089_v39 = vsel %vm1974_vm0, %v6957_v25, inf  ;;  %4992 = vtanh.f32 %v1581_v14  ;;  %v2408_v20 = vrot.slane %v2407_v31, 1  ;;  %v2414_v32 = vadd.f32 %v2413_v10, %v2412_v35 }
 0x14d   :  { %9341 = vst [vmem:[#allocation35_spill] sm:$0xff] %v6961_v29  ;;  %v6969_v22 = vpop.eup %4974  ;;  %v2082_v37 = vmin.f32 %v2080_v58, %v2081_v30  ;;  %v2091_v46 = vmin.f32 %v2089_v39, %v2090_v41  ;;  %4994 = vtanh.f32 %v1580_v54  ;;  %v2094_v21 = vsel %vm1974_vm0, %v6961_v29, inf }
 0x14e   :  { %9342 = vst [vmem:[#allocation36_spill] sm:$0xff] %v6969_v22  ;;  %v6973_v40 = vpop.eup %4976  ;;  %v2092_v14 = vsel %vm1974_vm0, %v6969_v22, inf  ;;  %v2415_v54 = vsel %vm1974_vm0, %v6941_v63, 0.0  ;;  %v2409_v7 = vadd.f32 %v2408_v20, %v2407_v31  ;;  %v2417_v39 = vsel %vm1974_vm0, %v6945_v47, 0.0  ;;  %v1275_v20 = vpop.xlane.xlu1 %1274 }
 0x14f   :  { %9343 = vst [vmem:[#allocation37_spill] sm:$0xff] %v6973_v40  ;;  %v4979_v0 = vpop.eup %4978  ;;  %v2083_v61 = vrot.slane %v2082_v37, 4  ;;  %v2093_v50 = vmin.f32 %v2091_v46, %v2092_v14  ;;  %v2098_v30 = vsel %vm1974_vm0, %v6973_v40, inf  ;;  %v2416_v41 = vadd.f32 %v2415_v54, %v2414_v32 }
 0x150   :  { %v4981_v45 = vpop.eup %4980  ;;  %v1852_v58 = vmul.f32 1.442695, %v4979_v0  ;;  %v1583_v46 = vadd.f32 %v6738_v60, %v1255_v48  ;;  %v2695_v11 = vadd.f32 1e-10, %v2409_v7  ;;  %v2068_v0 = vrot.slane %v6902_v13, 1 }
 0x151   :  { %v6985_v29 = vpop.eup %4982  ;;  %v2084_v35 = vmin.f32 %v2082_v37, %v2083_v61  ;;  %v2095_v10 = vmin.f32 %v2093_v50, %v2094_v21  ;;  %v1850_v22 = vmul.f32 1.442695, %v4981_v45  ;;  %v2418_v31 = vadd.f32 %v2417_v39, %v2416_v41  ;;  %v7002_v41 = vpop.xlane.xlu0 %1279 }
 0x152   :  { %9344 = vst [vmem:[#allocation38_spill] sm:$0xff] %v6985_v29  ;;  %v6988_v14 = vpop.eup %4984  ;;  %v2096_v40 = vsel %vm1974_vm0, %v6985_v29, inf  ;;  %4996 = vpow2.f32 %v1852_v58  ;;  %v1582_v61 = vadd.f32 %v6688_v44, %v6913_v42  ;;  %v2421_v58 = vsel %vm1974_vm0, %v6967_v5, 0.0 }
 0x153   :  { %9345 = vst [vmem:[#allocation39_spill] sm:$0xff] %v6988_v14  ;;  %v6992_v32 = vpop.eup %4986  ;;  %v2085_v54 = vrot.slane %v2084_v35, 2  ;;  %v2097_v25 = vmin.f32 %v2095_v10, %v2096_v40  ;;  %4998 = vpow2.f32 %v1850_v22  ;;  %v2420_v21 = vadd.f32 %v6823_v18, %v2418_v31 }
 0x154   :  { %v4989_v37 = vpop.eup %4988  ;;  %v2100_v48 = vsel %vm1974_vm0, %v6992_v32, inf  ;;  %5000 = vrcp.f32 %v2695_v11  ;;  %v1585_v42 = vadd.f32 %v6779_v8, %v1265_v55  ;;  %v1584_v31 = vadd.f32 %v6731_v56, %v6949_v28 }
 0x155   :  { %v4991_v50 = vpop.eup %4990  ;;  %v2099_v45 = vmin.f32 %v2097_v25, %v2098_v30  ;;  %v1856_v7 = vmul.f32 1.442695, %v4989_v37  ;;  %5002 = vtanh.f32 %v1583_v46  ;;  %v2086_v40 = vmin.f32 %v2084_v35, %v2085_v54  ;;  %v1285_v46 = vpop.xlane.xlu1 %1284  ;;  %v9346_v37 = vld [vmem:[#allocation24_spill] sm:$0xff] }
 0x156   :  { %v4993_v22 = vpop.eup %4992  ;;  %v1854_v39 = vmul.f32 1.442695, %v4991_v50  ;;  %v2422_v10 = vadd.f32 %v2421_v58, %v2420_v21  ;;  %5004 = vtanh.f32 %v1582_v61  ;;  %v7009_v12 = vsub.f32 %v9346_v37, %v6892_v34  ;;  %v7016_v50 = vpop.xlane.xlu0 %1289 }
 0x157   :  { %v4995_v11 = vpop.eup %4994  ;;  %v2101_v29 = vmin.f32 %v2099_v45, %v2100_v48  ;;  %5006 = vpow2.f32 %v1856_v7  ;;  %v1860_v18 = vmul.f32 1.442695, %v4993_v22  ;;  %v1587_v54 = vadd.f32 %v6815_v2, %v1275_v20 }
 0x158   :  { %5008 = vpow2.f32 %v1854_v39  ;;  %v1858_v25 = vmul.f32 1.442695, %v4995_v11  ;;  %v2423_v30 = vrot.slane %v2422_v10, 4  ;;  %9347 = vst [vmem:[#allocation24_spill] sm:$0xff] %v7009_v12  ;;  %v1586_v21 = vadd.f32 %v6771_v38, %v1270_v27 }
 0x159   :  { %v2102_v35 = vrot.slane %v2101_v29, 4  ;;  %5010 = vpow2.f32 %v1860_v18  ;;  %v7014_v55 = vmin.f32 %v6902_v13, %v2068_v0  ;;  %v7022_v45 = vsel %vm1974_vm0, %v6837_v26, 0.0  ;;  %v7038_v11 = vpop.xlane.xlu1 %1294 }
 0x15a   :  { %5012 = vpow2.f32 %v1858_v25  ;;  %v2424_v48 = vadd.f32 %v2423_v30, %v2422_v10  ;;  %v2087_v7 = vrot.slane %v2086_v40, 1  ;;  %v7028_v27 = vsel %vm1974_vm0, %v7009_v12, 0.0 }
 0x15b   :  { %v2103_v61 = vmin.f32 %v2101_v29, %v2102_v35  ;;  %5014 = vtanh.f32 %v1585_v42  ;;  %v2108_v13 = vsel %vm1974_vm0, %v6988_v14, inf  ;;  %v7042_v42 = vsub.f32 %v6840_v51, %v7014_v55 }
 0x15c   :  { %v7018_v28 = vpop.eup %4996  ;;  %v2425_v58 = vrot.slane %v2424_v48, 2  ;;  %5016 = vtanh.f32 %v1584_v31  ;;  %v7048_v35 = vmin.f32 %v2086_v40, %v2087_v7 }
 0x15d   :  { %9348 = vst [vmem:[#allocation40_spill] sm:$0xff] %v7018_v28  ;;  %v7024_v20 = vpop.eup %4998  ;;  %v2104_v29 = vrot.slane %v2103_v61, 2  ;;  %5018 = vtanh.f32 %v1587_v54  ;;  %v2111_v22 = vsel %vm1974_vm0, %v7018_v28, inf }
 0x15e   :  { %9349 = vst [vmem:[#allocation41_spill] sm:$0xff] %v7024_v20  ;;  %v7032_v0 = vpop.eup %5000  ;;  %v2109_v39 = vsel %vm1974_vm0, %v7024_v20, inf  ;;  %v2426_v10 = vadd.f32 %v2425_v58, %v2424_v48  ;;  %5020 = vtanh.f32 %v1586_v21  ;;  %v1589_v48 = vadd.f32 %v6688_v44, %v1285_v46  ;;  %v9350_v21 = vld [vmem:[#allocation12_spill] sm:$0xff]  ;;  %v9353_v44 = vld [vmem:[#allocation11_spill] sm:$0xff] }
 0x15f   :  { %v5003_v18 = vpop.eup %5002  ;;  %v2713_v25 = vmul.f32 %v7032_v0, %v6855_v52  ;;  %v2110_v30 = vmin.f32 %v2108_v13, %v2109_v39  ;;  %v2712_v31 = vmul.f32 %v7032_v0, %v6851_v33  ;;  %v7053_v58 = vsub.f32 %v9350_v21, %v6784_v1  ;;  %v7059_v33 = vpop.xlane.xlu0 %1299  ;;  %v9354_v21 = vld [vmem:[#allocation14_spill] sm:$0xff] }
 0x160   :  { %v5005_v37 = vpop.eup %5004  ;;  %v2427_v54 = vrot.slane %v2426_v10, 1  ;;  %v7057_v51 = vmin.f32 %v2103_v61, %v2104_v29  ;;  %v1864_v13 = vmul.f32 1.442695, %v5003_v18  ;;  %v7065_v46 = vsub.f32 %v9353_v44, %v6784_v1  ;;  %v9355_v61 = vld [vmem:[#allocation13_spill] sm:$0xff]  ;;  %v1305_v44 = vpop.xlane.xlu1 %1304 }
 0x161   :  { %v7055_v28 = vpop.eup %5006  ;;  %2846 = vperm.xlu1 %4783, %v2713_v25   ;;  %2841 = vperm.xlu0 %4782, %v2712_v31   ;;  %v2112_v52 = vmin.f32 %v2110_v30, %v2111_v22  ;;  %v1862_v39 = vmul.f32 1.442695, %v5005_v37  ;;  %v7069_v20 = vsub.f32 %v9354_v21, %v6784_v1  ;;  %v7073_v29 = vsub.f32 %v9355_v61, %v6784_v1 }
 0x162   :  { %9351 = vst [vmem:[#allocation12_spill] sm:$0xff] %v7055_v28  ;;  %v7061_v40 = vpop.eup %5008  ;;  %v2428_v7 = vadd.f32 %v2427_v54, %v2426_v10  ;;  %v2714_v18 = vmul.f32 %v7032_v0, %v6862_v43  ;;  %v2115_v10 = vsel %vm1974_vm0, %v7055_v28, inf  ;;  %5022 = vpow2.f32 %v1864_v13 }
 0x163   :  { %9352 = vst [vmem:[#allocation42_spill] sm:$0xff] %v7061_v40  ;;  %v7075_v22 = vpop.eup %5010  ;;  %v2113_v25 = vsel %vm1974_vm0, %v7061_v40, inf  ;;  %v2715_v37 = vmul.f32 %v7032_v0, %v6866_v6  ;;  %5024 = vpow2.f32 %v1862_v39  ;;  %v2106_v61 = vrot.slane %v7057_v51, 1 }
 0x164   :  { %9356 = vst [vmem:[#allocation11_spill] sm:$0xff] %v7075_v22  ;;  %v7083_v30 = vpop.eup %5012  ;;  %v2114_v31 = vmin.f32 %v2112_v52, %v2113_v25  ;;  %v2696_v54 = vadd.f32 1e-10, %v2428_v7  ;;  %v2716_v28 = vmul.f32 %v7032_v0, %v6878_v19  ;;  %5026 = vtanh.f32 %v1589_v48  ;;  %v1310_v48 = vpop.xlane.xlu0 %1309 }
 0x165   :  { %v5015_v21 = vpop.eup %5014  ;;  %2851 = vperm.xlu1 %4783, %v2714_v18   ;;  %v2117_v43 = vsel %vm1974_vm0, %v7083_v30, inf  ;;  %v2429_v6 = vsel %vm1974_vm0, %v7053_v58, 0.0  ;;  %v2119_v7 = vsel %vm1974_vm0, %v7075_v22, inf  ;;  %v9357_v18 = vld [vmem:[#allocation16_spill] sm:$0xff]  ;;  %v2430_v19 = vsel %vm1974_vm0, %v7065_v46, 0.0 }
 0x166   :  { %v5017_v13 = vpop.eup %5016  ;;  %v2116_v40 = vmin.f32 %v2114_v31, %v2115_v10  ;;  %5028 = vrcp.f32 %v2696_v54  ;;  %v1868_v52 = vmul.f32 1.442695, %v5015_v21  ;;  %v7098_v14 = vsub.f32 %v9357_v18, %v6784_v1 }
 0x167   :  { %v5019_v39 = vpop.eup %5018  ;;  %v1866_v25 = vmul.f32 1.442695, %v5017_v13  ;;  %v2431_v54 = vadd.f32 %v2430_v19, %v2429_v6  ;;  %v7104_v22 = vsub.f32 %v9358_v9, %v6784_v1  ;;  %v2432_v13 = vsel %vm1974_vm0, %v7069_v20, 0.0 }
 0x168   :  { %v5021_v12 = vpop.eup %5020  ;;  %v2118_v10 = vmin.f32 %v2116_v40, %v2117_v43  ;;  %5030 = vpow2.f32 %v1868_v52  ;;  %v1872_v31 = vmul.f32 1.442695, %v5019_v39  ;;  %v2434_v16 = vsel %vm1974_vm0, %v7073_v29, 0.0  ;;  %v1315_v40 = vpop.xlane.xlu1 %1314 }
 0x169   :  { %2856 = vperm.xlu1 %4783, %v2715_v37   ;;  %5032 = vpow2.f32 %v1866_v25  ;;  %v1870_v21 = vmul.f32 1.442695, %v5021_v12  ;;  %v2433_v59 = vadd.f32 %v2432_v13, %v2431_v54  ;;  %v1588_v37 = vadd.f32 %v6808_v49, %v7002_v41 }
 0x16a   :  { %v2120_v18 = vmin.f32 %v2118_v10, %v2119_v7  ;;  %5034 = vpow2.f32 %v1872_v31  ;;  %v1591_v12 = vadd.f32 %v6731_v56, %v7038_v11  ;;  %v1590_v1 = vadd.f32 %v6738_v60, %v7016_v50  ;;  %v9360_v56 = vld [vmem:[#allocation22_spill] sm:$0xff]  ;;  %v7132_v7 = vpop.xlane.xlu0 %1319 }
 0x16b   :  { %5036 = vpow2.f32 %v1870_v21  ;;  %v7118_v9 = vsel %vm1974_vm0, %v7042_v42, 0.0  ;;  %v7122_v43 = vsub.f32 %v6937_v36, %v7048_v35  ;;  %v2435_v6 = vadd.f32 %v2434_v16, %v2433_v59 }
 0x16c   :  { %v2121_v52 = vrot.slane %v2120_v18, 4  ;;  %v7124_v39 = vpop.eup %5022  ;;  %v2717_v41 = vmul.f32 %v7032_v0, %v6884_v23  ;;  %v2718_v11 = vmul.f32 %v7032_v0, %v9360_v56  ;;  %v2436_v50 = vsel %vm1974_vm0, %v7098_v14, 0.0  ;;  %v7150_v21 = vpop.xlane.xlu1 %1324 }
 0x16d   :  { %9359 = vst [vmem:[#allocation14_spill] sm:$0xff] %v7124_v39  ;;  %2861 = vperm.xlu1 %4783, %v2716_v28   ;;  %5038 = vtanh.f32 %v1588_v37  ;;  %v7134_v25 = vpop.eup %5024  ;;  %v7137_v36 = vmin.f32 %v7057_v51, %v2106_v61  ;;  %v2437_v59 = vadd.f32 %v2436_v50, %v2435_v6  ;;  %v2438_v23 = vsel %vm1974_vm0, %v7104_v22, 0.0  ;;  %v9363_v6 = vld [vmem:[#allocation19_spill] sm:$0xff] }
 0x16e   :  { %v2122_v16 = vmin.f32 %v2120_v18, %v2121_v52  ;;  %5040 = vtanh.f32 %v1591_v12  ;;  %v5027_v28 = vpop.eup %5026  ;;  %v1593_v0 = vadd.f32 %v6771_v38, %v1305_v44  ;;  %v1592_v19 = vadd.f32 %v6779_v8, %v7059_v33  ;;  %v9361_v18 = vld [vmem:[#allocation17_spill] sm:$0xff] }
 0x16f   :  { %5042 = vtanh.f32 %v1590_v1  ;;  %v2128_v31 = vsel %vm1974_vm0, %v7124_v39, inf  ;;  %v2127_v51 = vsel %vm1974_vm0, %v7134_v25, inf  ;;  %v1876_v61 = vmul.f32 1.442695, %v5027_v28 }
 0x170   :  { %v7144_v10 = vpop.eup %5028  ;;  %v2439_v54 = vadd.f32 %v2438_v23, %v2437_v59  ;;  %v1595_v44 = vadd.f32 %v6808_v49, %v1315_v40  ;;  %v1594_v33 = vadd.f32 %v6815_v2, %v1310_v48  ;;  %v7158_v37 = vsub.f32 %v9361_v18, %v6892_v34  ;;  %v7175_v59 = vpop.xlane.xlu0 %1329 }
 0x171   :  { %v2722_v13 = vmul.f32 %v7144_v10, %v6935_v57  ;;  %2866 = vperm.xlu1 %4783, %v2717_v41   ;;  %v2123_v1 = vrot.slane %v2122_v16, 2  ;;  %5044 = vpow2.f32 %v1876_v61  ;;  %v7165_v56 = vsub.f32 %v9363_v6, %v6892_v34  ;;  %v9365_v41 = vld [vmem:[#allocation18_spill] sm:$0xff]  ;;  %v1335_v6 = vpop.xlane.xlu1 %1334 }
 0x172   :  { %v7160_v12 = vpop.eup %5030  ;;  %v2441_v52 = vadd.f32 %v7022_v45, %v2439_v54  ;;  %v2129_v40 = vmin.f32 %v2127_v51, %v2128_v31  ;;  %v2724_v48 = vmul.f32 %v7144_v10, %v6945_v47  ;;  %5046 = vtanh.f32 %v1593_v0 }
 0x173   :  { %9362 = vst [vmem:[#allocation13_spill] sm:$0xff] %v7160_v12  ;;  %v7167_v57 = vpop.eup %5032  ;;  %2886 = vperm.xlu0 %4782, %v2722_v13   ;;  %v7173_v50 = vsub.f32 %v9365_v41, %v6892_v34  ;;  %v2132_v45 = vsel %vm1974_vm0, %v7160_v12, inf  ;;  %5048 = vtanh.f32 %v1592_v19  ;;  %v2726_v0 = vmul.f32 %v7144_v10, %v6967_v5  ;;  %v9368_v5 = vld [vmem:[#allocation21_spill] sm:$0xff] }
 0x174   :  { %9364 = vst [vmem:[#allocation16_spill] sm:$0xff] %v7167_v57  ;;  %v7177_v28 = vpop.eup %5034  ;;  %v2130_v23 = vsel %vm1974_vm0, %v7167_v57, inf  ;;  %v2442_v61 = vrot.slane %v2441_v52, 4  ;;  %v2720_v51 = vmul.f32 %v7144_v10, %v6922_v4  ;;  %5050 = vtanh.f32 %v1595_v44 }
 0x175   :  { %9366 = vst [vmem:[#allocation15_spill] sm:$0xff] %v7177_v28  ;;  %v7183_v31 = vpop.eup %5036  ;;  %v2131_v47 = vmin.f32 %v2129_v40, %v2130_v23  ;;  %2871 = vperm.xlu1 %4783, %v2718_v11   ;;  %v7189_v54 = vmin.f32 %v2122_v16, %v2123_v1  ;;  %5052 = vtanh.f32 %v1594_v33  ;;  %v7195_v11 = vsel %vm1974_vm0, %v7177_v28, inf  ;;  %v9369_v33 = vld [vmem:[#allocation20_spill] sm:$0xff] }
 0x176   :  { %9367 = vst [vmem:[#allocation22_spill] sm:$0xff] %v7183_v31  ;;  %v2134_v13 = vsel %vm1974_vm0, %v7183_v31, inf  ;;  %v2443_v18 = vadd.f32 %v2442_v61, %v2441_v52  ;;  %v7199_v41 = vsub.f32 %v9368_v5, %v6892_v34  ;;  %v2448_v4 = vsel %vm1974_vm0, %v7158_v37, 0.0  ;;  %v1340_v31 = vpop.xlane.xlu0 %1339 }
 0x177   :  { %v5039_v19 = vpop.eup %5038  ;;  %2896 = vperm.xlu0 %4782, %v2724_v48   ;;  %v2133_v40 = vmin.f32 %v2131_v47, %v2132_v45  ;;  %v7205_v52 = vsub.f32 %v9369_v33, %v6892_v34  ;;  %v2449_v48 = vsel %vm1974_vm0, %v7165_v56, 0.0  ;;  %v9370_v47 = vld [vmem:[#allocation23_spill] sm:$0xff]  ;;  %v2451_v33 = vsel %vm1974_vm0, %v7173_v50, 0.0 }
 0x178   :  { %v5041_v16 = vpop.eup %5040  ;;  %v2444_v44 = vrot.slane %v2443_v18, 2  ;;  %v1874_v1 = vmul.f32 1.442695, %v5039_v19  ;;  %v7213_v5 = vsub.f32 %v9370_v47, %v6892_v34  ;;  %v2450_v28 = vadd.f32 %v2449_v48, %v2448_v4 }
 0x179   :  { %v5043_v23 = vpop.eup %5042  ;;  %v7209_v61 = vmin.f32 %v2133_v40, %v2134_v13  ;;  %2876 = vperm.xlu1 %4783, %v2720_v51   ;;  %v1880_v45 = vmul.f32 1.442695, %v5041_v16  ;;  %v2721_v57 = vmul.f32 %v7144_v10, %v6926_v24  ;;  %v2723_v51 = vmul.f32 %v7144_v10, %v6941_v63  ;;  %v1345_v16 = vpop.xlane.xlu1 %1344 }
 0x17a   :  { %v2445_v12 = vadd.f32 %v2444_v44, %v2443_v18  ;;  %5054 = vpow2.f32 %v1874_v1  ;;  %v1878_v19 = vmul.f32 1.442695, %v5043_v23  ;;  %v2452_v13 = vadd.f32 %v2451_v33, %v2450_v28 }
 0x17b   :  { %2906 = vperm.xlu0 %4782, %v2726_v0   ;;  %5056 = vpow2.f32 %v1880_v45  ;;  %v7221_v40 = vpop.eup %5044  ;;  %v2725_v18 = vmul.f32 %v7144_v10, %v6749_v17  ;;  %v2453_v4 = vsel %vm1974_vm0, %v7199_v41, 0.0  ;;  %v2137_v24 = vmin.f32 %v7209_v61, %v7195_v11  ;;  %v7242_v61 = vld [vmem:[%s9219_s2] sm:$0xff] }
 0x17c   :  { %9371 = vst [vmem:[#allocation17_spill] sm:$0xff] %v7221_v40  ;;  %v2446_v34 = vrot.slane %v2445_v12, 1  ;;  %5058 = vpow2.f32 %v1878_v19  ;;  %v5047_v0 = vpop.eup %5046  ;;  %v2454_v44 = vadd.f32 %v2453_v4, %v2452_v13  ;;  %v2455_v63 = vsel %vm1974_vm0, %v7205_v52, 0.0  ;;  %v7251_v4 = vld [vmem:[%s9219_s2 + $0x10] sm:$0xff] }
 0x17d   :  { %2881 = vperm.xlu1 %4783, %v2721_v57   ;;  %v1597_v28 = vadd.f32 %v6738_v60, %v7150_v21  ;;  %v5049_v1 = vpop.eup %5048  ;;  %v7235_v17 = vsel %vm1974_vm0, %v7221_v40, inf  ;;  %v1884_v48 = vmul.f32 1.442695, %v5047_v0  ;;  %v2459_v23 = vsel %vm1974_vm0, %v7213_v5, 0.0  ;;  %v1350_v21 = vpop.xlane.xlu0 %1349 }
 0x17e   :  { %v2447_v10 = vadd.f32 %v2446_v34, %v2445_v12  ;;  %v5051_v45 = vpop.eup %5050  ;;  %v1882_v11 = vmul.f32 1.442695, %v5049_v1  ;;  %v2456_v57 = vadd.f32 %v2455_v63, %v2454_v44  ;;  %v1596_v60 = vadd.f32 %v7242_v61, %v7132_v7  ;;  %v1355_v44 = vpop.xlane.xlu1 %1354  ;;  %v9372_v63 = vld [vmem:[#allocation26_spill] sm:$0xff] }
 0x17f   :  { %5060 = vtanh.f32 %v1597_v28  ;;  %v5053_v47 = vpop.eup %5052  ;;  %v1888_v12 = vmul.f32 1.442695, %v5051_v45  ;;  %v1599_v33 = vadd.f32 %v6779_v8, %v1335_v6  ;;  %v1598_v7 = vadd.f32 %v7251_v4, %v7175_v59  ;;  %v9373_v6 = vld [vmem:[#allocation25_spill] sm:$0xff]  ;;  %v9374_v59 = vld [vmem:[#allocation28_spill] sm:$0xff] }
 0x180   :  { %v2697_v19 = vadd.f32 1e-10, %v2447_v10  ;;  %5062 = vpow2.f32 %v1884_v48  ;;  %v1886_v13 = vmul.f32 1.442695, %v5053_v47  ;;  %v2458_v34 = vadd.f32 %v7028_v27, %v2456_v57 }
 0x181   :  { %2891 = vperm.xlu1 %4783, %v2723_v51   ;;  %5064 = vpow2.f32 %v1882_v11  ;;  %v1601_v0 = vadd.f32 %v6815_v2, %v1345_v16  ;;  %v7258_v8 = vsub.f32 %v9372_v63, %v7014_v55  ;;  %v7262_v51 = vsub.f32 %v9373_v6, %v7014_v55  ;;  %v7281_v11 = vpop.xlane.xlu0 %1359 }
 0x182   :  { %5066 = vrcp.f32 %v2697_v19  ;;  %v2460_v27 = vadd.f32 %v2459_v23, %v2458_v34  ;;  %v1600_v28 = vadd.f32 %v6771_v38, %v1340_v31  ;;  %v1603_v1 = vadd.f32 %v7242_v61, %v1355_v44 }
 0x183   :  { %5068 = vpow2.f32 %v1888_v12  ;;  %v1602_v2 = vadd.f32 %v6808_v49, %v1350_v21  ;;  %v7271_v16 = vsub.f32 %v9374_v59, %v7014_v55  ;;  %v2467_v48 = vsel %vm1974_vm0, %v7258_v8, 0.0  ;;  %v9377_v21 = vld [vmem:[#allocation27_spill] sm:$0xff]  ;;  %v7297_v59 = vpop.xlane.xlu1 %1364 }
 0x184   :  { %v7266_v10 = vpop.eup %5054  ;;  %5070 = vpow2.f32 %v1886_v13  ;;  %v2461_v38 = vrot.slane %v2460_v27, 4  ;;  %v2468_v31 = vsel %vm1974_vm0, %v7262_v51, 0.0  ;;  %v7287_v47 = vsub.f32 %v9377_v21, %v7014_v55 }
 0x185   :  { %v7275_v45 = vpop.eup %5056  ;;  %v2138_v23 = vsel %vm1974_vm0, %v7266_v10, inf  ;;  %2901 = vperm.xlu1 %4783, %v2725_v18   ;;  %5072 = vtanh.f32 %v1596_v60  ;;  %v2469_v19 = vadd.f32 %v2468_v31, %v2467_v48  ;;  %v2125_v44 = vrot.slane %v7189_v54, 1  ;;  %v7311_v31 = vpop.xlane.xlu0 %1369 }
 0x186   :  { %9375 = vst [vmem:[#allocation19_spill] sm:$0xff] %v7275_v45  ;;  %v7283_v49 = vpop.eup %5058  ;;  %v2139_v57 = vmin.f32 %v2137_v24, %v2138_v23  ;;  %5074 = vtanh.f32 %v1599_v33  ;;  %v2149_v12 = vsel %vm1974_vm0, %v7275_v45, inf  ;;  %v2462_v60 = vadd.f32 %v2461_v38, %v2460_v27 }
 0x187   :  { %9376 = vst [vmem:[#allocation18_spill] sm:$0xff] %v7283_v49  ;;  %v2147_v18 = vsel %vm1974_vm0, %v7283_v49, inf  ;;  %5076 = vtanh.f32 %v1598_v7  ;;  %v2470_v24 = vsel %vm1974_vm0, %v7271_v16, 0.0 }
 0x188   :  { %v2140_v13 = vrot.slane %v2139_v57, 4  ;;  %v2148_v34 = vmin.f32 %v7235_v17, %v2147_v18  ;;  %5078 = vtanh.f32 %v1601_v0  ;;  %v2463_v63 = vrot.slane %v2462_v60, 2 }
 0x189   :  { %v5061_v33 = vpop.eup %5060  ;;  %5080 = vtanh.f32 %v1600_v28  ;;  %v2471_v6 = vadd.f32 %v2470_v24, %v2469_v19  ;;  %v7303_v17 = vsub.f32 %v6796_v53, %v7014_v55  ;;  %v7309_v28 = vsub.f32 %v6789_v3, %v7014_v55 }
 0x18a   :  { %v7299_v48 = vpop.eup %5062  ;;  %v2141_v23 = vmin.f32 %v2139_v57, %v2140_v13  ;;  %v2150_v27 = vmin.f32 %v2148_v34, %v2149_v12  ;;  %5082 = vtanh.f32 %v1603_v1  ;;  %v2464_v0 = vadd.f32 %v2463_v63, %v2462_v60 }
 0x18b   :  { %9378 = vst [vmem:[#allocation21_spill] sm:$0xff] %v7299_v48  ;;  %v7305_v7 = vpop.eup %5064  ;;  %v1892_v38 = vmul.f32 1.442695, %v5061_v33  ;;  %5084 = vtanh.f32 %v1602_v2  ;;  %v7317_v1 = vsub.f32 %v6992_v32, %v7137_v36  ;;  %v2153_v53 = vsel %vm1974_vm0, %v7299_v48, inf }
 0x18c   :  { %9379 = vst [vmem:[#allocation20_spill] sm:$0xff] %v7305_v7  ;;  %v7313_v21 = vpop.eup %5066  ;;  %v2151_v57 = vsel %vm1974_vm0, %v7305_v7, inf  ;;  %v2472_v2 = vsel %vm1974_vm0, %v7287_v47, 0.0  ;;  %v2142_v55 = vrot.slane %v2141_v23, 2  ;;  %v7332_v32 = vmin.f32 %v7189_v54, %v2125_v44 }
 0x18d   :  { %v7325_v19 = vpop.eup %5068  ;;  %v2729_v3 = vmul.f32 %v7313_v21, %v7065_v46  ;;  %v2152_v12 = vmin.f32 %v2150_v27, %v2151_v57  ;;  %v2473_v18 = vadd.f32 %v2472_v2, %v2471_v6  ;;  %v2728_v13 = vmul.f32 %v7313_v21, %v7053_v58  ;;  %v1375_v27 = vpop.xlane.xlu1 %1374 }
 0x18e   :  { %9380 = vst [vmem:[#allocation23_spill] sm:$0xff] %v7325_v19  ;;  %v7329_v60 = vpop.eup %5070  ;;  %v2465_v34 = vrot.slane %v2464_v0, 1  ;;  %v2474_v24 = vsel %vm1974_vm0, %v7303_v17, 0.0  ;;  %5086 = vpow2.f32 %v1892_v38  ;;  %v2476_v6 = vsel %vm1974_vm0, %v7309_v28, 0.0  ;;  %v7346_v38 = vpop.xlane.xlu0 %1379 }
 0x18f   :  { %v5073_v33 = vpop.eup %5072  ;;  %2916 = vperm.xlu0 %4782, %v2729_v3   ;;  %v2154_v63 = vmin.f32 %v2152_v12, %v2153_v53  ;;  %v2155_v46 = vsel %vm1974_vm0, %v7329_v60, inf  ;;  %v2731_v44 = vmul.f32 %v7313_v21, %v7073_v29  ;;  %v2157_v58 = vsel %vm1974_vm0, %v7325_v19, inf  ;;  %2911 = vperm.xlu1 %4783, %v2728_v13  }
 0x190   :  { %v5075_v54 = vpop.eup %5074  ;;  %v2466_v57 = vadd.f32 %v2465_v34, %v2464_v0  ;;  %v1890_v2 = vmul.f32 1.442695, %v5073_v33  ;;  %v2143_v53 = vmin.f32 %v2141_v23, %v2142_v55  ;;  %v2475_v7 = vadd.f32 %v2474_v24, %v2473_v18 }
 0x191   :  { %v5077_v3 = vpop.eup %5076  ;;  %v2156_v12 = vmin.f32 %v2154_v63, %v2155_v46  ;;  %v1896_v48 = vmul.f32 1.442695, %v5075_v54  ;;  %v2730_v40 = vmul.f32 %v7313_v21, %v7069_v20  ;;  %v2733_v23 = vmul.f32 %v7313_v21, %v7104_v22  ;;  %v1385_v46 = vpop.xlane.xlu1 %1384 }
 0x192   :  { %v5079_v45 = vpop.eup %5078  ;;  %v2698_v49 = vadd.f32 1e-10, %v2466_v57  ;;  %5088 = vpow2.f32 %v1890_v2  ;;  %v1894_v29 = vmul.f32 1.442695, %v5077_v3  ;;  %v2477_v13 = vadd.f32 %v2476_v6, %v2475_v7 }
 0x193   :  { %v5081_v39 = vpop.eup %5080  ;;  %2926 = vperm.xlu0 %4782, %v2731_v44   ;;  %v2158_v19 = vmin.f32 %v2156_v12, %v2157_v58  ;;  %5090 = vpow2.f32 %v1896_v48  ;;  %v1900_v0 = vmul.f32 1.442695, %v5079_v45  ;;  %2921 = vperm.xlu1 %4783, %v2730_v40   ;;  %v2732_v55 = vmul.f32 %v7313_v21, %v7098_v14  ;;  %v7368_v40 = vpop.xlane.xlu0 %1389 }
 0x194   :  { %v5083_v34 = vpop.eup %5082  ;;  %5092 = vrcp.f32 %v2698_v49  ;;  %v1898_v18 = vmul.f32 1.442695, %v5081_v39  ;;  %v2479_v63 = vadd.f32 %v7118_v9, %v2477_v13  ;;  %v2144_v48 = vrot.slane %v2143_v53, 1  ;;  %v7364_v39 = vld [vmem:[%s9219_s2 + $0x8] sm:$0xff] }
 0x195   :  { %v5085_v24 = vpop.eup %5084  ;;  %v2159_v33 = vrot.slane %v2158_v19, 4  ;;  %5094 = vpow2.f32 %v1894_v29  ;;  %v1904_v20 = vmul.f32 1.442695, %v5083_v34  ;;  %v1605_v7 = vadd.f32 %v7251_v4, %v7297_v59  ;;  %v7411_v3 = vpop.xlane.xlu1 %1394 }
 0x196   :  { %5096 = vpow2.f32 %v1900_v0  ;;  %v1902_v45 = vmul.f32 1.442695, %v5085_v24  ;;  %v7359_v22 = vsub.f32 %v7083_v30, %v7332_v32  ;;  %v2480_v14 = vrot.slane %v2479_v63, 4  ;;  %v7375_v30 = vld [vmem:[%s9219_s2 + $0x20] sm:$0xff] }
 0x197   :  { %2936 = vperm.xlu0 %4782, %v2733_v23   ;;  %5098 = vpow2.f32 %v1898_v18  ;;  %v1604_v9 = vadd.f32 %v7364_v39, %v7281_v11  ;;  %v2160_v49 = vmin.f32 %v2158_v19, %v2159_v33  ;;  %2931 = vperm.xlu1 %4783, %v2732_v55   ;;  %v2734_v59 = vmul.f32 %v7313_v21, %v6837_v26  ;;  %v7383_v11 = vld [vmem:[%s9219_s2 + $0x18] sm:$0xff]  ;;  %v7425_v55 = vpop.xlane.xlu0 %1399 }
 0x198   :  { %9381 = vst [vmem:[#allocation26_spill] sm:$0xff] %v7359_v22  ;;  %5100 = vpow2.f32 %v1904_v20  ;;  %v1607_v6 = vadd.f32 %v7375_v30, %v1375_v27  ;;  %v7378_v54 = vpop.eup %5086  ;;  %v2481_v44 = vadd.f32 %v2480_v14, %v2479_v63  ;;  %v1606_v26 = vadd.f32 %v7383_v11, %v7311_v31  ;;  %v7396_v27 = vld [vmem:[%s9219_s2 + $0x30] sm:$0xff]  ;;  %v7440_v20 = vld [vmem:[%s9219_s2 + $0x28] sm:$0xff] }
 0x199   :  { %9382 = vst [vmem:[#allocation25_spill] sm:$0xff] %v7378_v54  ;;  %5102 = vpow2.f32 %v1902_v45  ;;  %v7389_v21 = vsub.f32 %v6833_v62, %v7048_v35  ;;  %v7391_v19 = vmin.f32 %v2143_v53, %v2144_v48  ;;  %v1609_v58 = vadd.f32 %v7396_v27, %v1385_v46 }
 0x19a   :  { %5104 = vtanh.f32 %v1605_v7  ;;  %v7401_v57 = vsub.f32 %v6880_v15, %v7048_v35  ;;  %v7405_v31 = vsel %vm1974_vm0, %v7122_v43, 0.0  ;;  %v7409_v62 = vsel %vm1974_vm0, %v7317_v1, 0.0 }
 0x19b   :  { %v2482_v2 = vrot.slane %v2481_v44, 2  ;;  %5106 = vtanh.f32 %v1604_v9  ;;  %v2161_v12 = vrot.slane %v2160_v49, 2  ;;  %v2166_v29 = vsel %vm1974_vm0, %v7378_v54, inf  ;;  %2941 = vperm.xlu1 %4783, %v2734_v59   ;;  %v9394_v54 = vld [vmem:[#allocation24_spill] sm:$0xff] }
 0x19c   :  { %v7413_v53 = vpop.eup %5088  ;;  %5108 = vtanh.f32 %v1607_v6  ;;  %v2486_v15 = vsel %vm1974_vm0, %v7389_v21, 0.0  ;;  %v2487_v23 = vsel %vm1974_vm0, %v7401_v57, 0.0  ;;  %v7431_v24 = vsel %vm1974_vm0, %v7359_v22, 0.0 }
 0x19d   :  { %9383 = vst [vmem:[#allocation28_spill] sm:$0xff] %v7413_v53  ;;  %v7419_v0 = vpop.eup %5090  ;;  %v2165_v13 = vsel %vm1974_vm0, %v7413_v53, inf  ;;  %v2483_v34 = vadd.f32 %v2482_v2, %v2481_v44  ;;  %5110 = vtanh.f32 %v1606_v26  ;;  %v7435_v33 = vsub.f32 %v7266_v10, %v7391_v19  ;;  %v9387_v10 = vld [vmem:[#allocation29_spill] sm:$0xff]  ;;  %v9390_v2 = vld [vmem:[#allocation31_spill] sm:$0xff] }
 0x19e   :  { %9384 = vst [vmem:[#allocation27_spill] sm:$0xff] %v7419_v0  ;;  %v7427_v18 = vpop.eup %5092  ;;  %5112 = vtanh.f32 %v1609_v58  ;;  %v1608_v63 = vadd.f32 %v7440_v20, %v7346_v38  ;;  %v2167_v45 = vmin.f32 %v2165_v13, %v2166_v29  ;;  %v2170_v7 = vsel %vm1974_vm0, %v7419_v0, inf  ;;  %v9391_v13 = vld [vmem:[#allocation30_spill] sm:$0xff]  ;;  %v1405_v0 = vpop.xlane.xlu1 %1404 }
 0x19f   :  { %9385 = vst [vmem:[#allocation43_spill] sm:$0xff] %v7435_v33  ;;  %v7444_v46 = vpop.eup %5094  ;;  %v2736_v48 = vmul.f32 %v7427_v18, %v7158_v37  ;;  %v7452_v14 = vsub.f32 %v9387_v10, %v7048_v35  ;;  %v2737_v38 = vmul.f32 %v7427_v18, %v7165_v56  ;;  %v2484_v6 = vrot.slane %v2483_v34, 1 }
 0x1a0   :  { %9386 = vst [vmem:[#allocation44_spill] sm:$0xff] %v7444_v46  ;;  %v7454_v9 = vpop.eup %5096  ;;  %v2168_v59 = vsel %vm1974_vm0, %v7444_v46, inf  ;;  %v2488_v44 = vadd.f32 %v2487_v23, %v2486_v15  ;;  %v7462_v37 = vmin.f32 %v2160_v49, %v2161_v12  ;;  %v7466_v29 = vsub.f32 %v9390_v2, %v7048_v35  ;;  %v9393_v49 = vld [vmem:[#allocation32_spill] sm:$0xff] }
 0x1a1   :  { %9388 = vst [vmem:[#allocation29_spill] sm:$0xff] %v7454_v9  ;;  %v7460_v26 = vpop.eup %5098  ;;  %2946 = vperm.xlu0 %4782, %v2736_v48   ;;  %v2169_v58 = vmin.f32 %v2167_v45, %v2168_v59  ;;  %v7470_v10 = vsub.f32 %v9391_v13, %v7048_v35  ;;  %2951 = vperm.xlu1 %4783, %v2737_v38   ;;  %5114 = vtanh.f32 %v1608_v63  ;;  %v2489_v2 = vsel %vm1974_vm0, %v7452_v14, 0.0  ;;  %v1410_v13 = vpop.xlane.xlu0 %1409 }
 0x1a2   :  { %9389 = vst [vmem:[#allocation45_spill] sm:$0xff] %v7460_v26  ;;  %v7472_v46 = vpop.eup %5100  ;;  %v2172_v56 = vsel %vm1974_vm0, %v7460_v26, inf  ;;  %v2485_v15 = vadd.f32 %v2484_v6, %v2483_v34  ;;  %v7478_v12 = vsub.f32 %v9393_v49, %v7048_v35  ;;  %v2738_v48 = vmul.f32 %v7427_v18, %v7173_v50 }
 0x1a3   :  { %9392 = vst [vmem:[#allocation31_spill] sm:$0xff] %v7472_v46  ;;  %v7480_v23 = vpop.eup %5102  ;;  %v2740_v45 = vmul.f32 %v7427_v18, %v7205_v52  ;;  %v2171_v59 = vmin.f32 %v2169_v58, %v2170_v7  ;;  %v2174_v34 = vsel %vm1974_vm0, %v7454_v9, inf  ;;  %v2739_v35 = vmul.f32 %v7427_v18, %v7199_v41 }
 0x1a4   :  { %v5105_v38 = vpop.eup %5104  ;;  %v2699_v63 = vadd.f32 1e-10, %v2485_v15  ;;  %v2490_v6 = vadd.f32 %v2489_v2, %v2488_v44  ;;  %v2741_v52 = vmul.f32 %v7427_v18, %v9394_v54  ;;  %v2491_v7 = vsel %vm1974_vm0, %v7466_v29, 0.0 }
 0x1a5   :  { %v5107_v49 = vpop.eup %5106  ;;  %2956 = vperm.xlu0 %4782, %v2738_v48   ;;  %v2173_v50 = vmin.f32 %v2171_v59, %v2172_v56  ;;  %v1908_v26 = vmul.f32 1.442695, %v5105_v38  ;;  %v2176_v53 = vsel %vm1974_vm0, %v7480_v23, inf  ;;  %2961 = vperm.xlu1 %4783, %v2739_v35   ;;  %v2493_v56 = vsel %vm1974_vm0, %v7470_v10, 0.0  ;;  %v1415_v59 = vpop.xlane.xlu1 %1414 }
 0x1a6   :  { %v5109_v58 = vpop.eup %5108  ;;  %5116 = vrcp.f32 %v2699_v63  ;;  %v1906_v15 = vmul.f32 1.442695, %v5107_v49  ;;  %v2492_v9 = vadd.f32 %v2491_v7, %v2490_v6  ;;  %v1611_v22 = vadd.f32 %v7364_v39, %v7411_v3 }
 0x1a7   :  { %v5111_v41 = vpop.eup %5110  ;;  %v2175_v44 = vmin.f32 %v2173_v50, %v2174_v34  ;;  %5118 = vpow2.f32 %v1908_v26  ;;  %v1912_v48 = vmul.f32 1.442695, %v5109_v58  ;;  %v1610_v34 = vadd.f32 %v7242_v61, %v7368_v40  ;;  %v1420_v26 = vpop.xlane.xlu0 %1419 }
 0x1a8   :  { %v5113_v54 = vpop.eup %5112  ;;  %5120 = vpow2.f32 %v1906_v15  ;;  %v1910_v2 = vmul.f32 1.442695, %v5111_v41  ;;  %v2494_v38 = vadd.f32 %v2493_v56, %v2492_v9  ;;  %v7506_v6 = vsel %vm1974_vm0, %v7435_v33, 0.0  ;;  %v9395_v41 = vld [vmem:[#allocation34_spill] sm:$0xff] }
 0x1a9   :  { %2966 = vperm.xlu0 %4782, %v2740_v45   ;;  %v2177_v63 = vmin.f32 %v2175_v44, %v2176_v53  ;;  %5122 = vpow2.f32 %v1912_v48  ;;  %v1916_v35 = vmul.f32 1.442695, %v5113_v54  ;;  %2971 = vperm.xlu1 %4783, %v2741_v52   ;;  %v1613_v9 = vadd.f32 %v7383_v11, %v1405_v0  ;;  %v9396_v48 = vld [vmem:[#allocation33_spill] sm:$0xff] }
 0x1aa   :  { %5124 = vpow2.f32 %v1910_v2  ;;  %v2496_v49 = vadd.f32 %v7405_v31, %v2494_v38  ;;  %v2742_v3 = vmul.f32 %v7427_v18, %v7213_v5  ;;  %v2497_v45 = vsel %vm1974_vm0, %v7478_v12, 0.0  ;;  %v1425_v18 = vpop.xlane.xlu1 %1424 }
 0x1ab   :  { %v2178_v53 = vrot.slane %v2177_v63, 4  ;;  %5126 = vpow2.f32 %v1916_v35  ;;  %v5115_v40 = vpop.eup %5114  ;;  %v1612_v52 = vadd.f32 %v7251_v4, %v7425_v55  ;;  %v2184_v31 = vsel %vm1974_vm0, %v7472_v46, inf  ;;  %v7532_v54 = vpop.xlane.xlu0 %1429 }
 0x1ac   :  { %v2498_v7 = vadd.f32 %v2497_v45, %v2496_v49  ;;  %5128 = vtanh.f32 %v1611_v22  ;;  %v1914_v5 = vmul.f32 1.442695, %v5115_v40  ;;  %v1615_v15 = vadd.f32 %v7440_v20, %v1415_v59 }
 0x1ad   :  { %2976 = vperm.xlu0 %4782, %v2742_v3   ;;  %v7519_v0 = vmin.f32 %v2177_v63, %v2178_v53  ;;  %5130 = vtanh.f32 %v1610_v34  ;;  %v7524_v44 = vsub.f32 %v9395_v41, %v7137_v36  ;;  %v1614_v22 = vadd.f32 %v7375_v30, %v1410_v13  ;;  %v9397_v63 = vld [vmem:[#allocation36_spill] sm:$0xff]  ;;  %v9400_v53 = vld [vmem:[#allocation38_spill] sm:$0xff] }
 0x1ae   :  { %v2499_v58 = vrot.slane %v2498_v7, 4  ;;  %5132 = vtanh.f32 %v1613_v9  ;;  %v1617_v55 = vadd.f32 %v7242_v61, %v1425_v18  ;;  %v7530_v56 = vsub.f32 %v9396_v48, %v7137_v36  ;;  %v9399_v9 = vld [vmem:[#allocation35_spill] sm:$0xff]  ;;  %v1435_v48 = vpop.xlane.xlu1 %1434 }
 0x1af   :  { %5134 = vpow2.f32 %v1914_v5  ;;  %v1616_v59 = vadd.f32 %v7396_v27, %v1420_v26  ;;  %v7539_v35 = vsub.f32 %v9397_v63, %v7137_v36  ;;  %v7548_v3 = vsub.f32 %v9399_v9, %v7137_v36  ;;  %v7584_v50 = vpop.xlane.xlu0 %1439 }
 0x1b0   :  { %v7534_v2 = vpop.eup %5116  ;;  %v2500_v38 = vadd.f32 %v2499_v58, %v2498_v7  ;;  %5136 = vtanh.f32 %v1612_v52  ;;  %v7552_v45 = vsub.f32 %v9400_v53, %v7137_v36  ;;  %v9402_v52 = vld [vmem:[#allocation37_spill] sm:$0xff] }
 0x1b1   :  { %v7541_v34 = vpop.eup %5118  ;;  %v2745_v49 = vmul.f32 %v7534_v2, %v7262_v51  ;;  %v2744_v40 = vmul.f32 %v7534_v2, %v7258_v8  ;;  %v7560_v5 = vsub.f32 %v9402_v52, %v7137_v36  ;;  %v2505_v51 = vsel %vm1974_vm0, %v7524_v44, 0.0 }
 0x1b2   :  { %9398 = vst [vmem:[#allocation30_spill] sm:$0xff] %v7541_v34  ;;  %v7554_v26 = vpop.eup %5120  ;;  %v2501_v7 = vrot.slane %v2500_v38, 2  ;;  %v2187_v58 = vsel %vm1974_vm0, %v7541_v34, inf  ;;  %5138 = vtanh.f32 %v1615_v15  ;;  %v2506_v8 = vsel %vm1974_vm0, %v7530_v56, 0.0 }
 0x1b3   :  { %9401 = vst [vmem:[#allocation32_spill] sm:$0xff] %v7554_v26  ;;  %v7564_v18 = vpop.eup %5122  ;;  %2986 = vperm.xlu0 %4782, %v2745_v49   ;;  %v2185_v41 = vsel %vm1974_vm0, %v7554_v26, inf  ;;  %2981 = vperm.xlu1 %4783, %v2744_v40   ;;  %5140 = vtanh.f32 %v1614_v22  ;;  %v2508_v49 = vsel %vm1974_vm0, %v7539_v35, 0.0  ;;  %v2747_v52 = vmul.f32 %v7534_v2, %v7287_v47 }
 0x1b4   :  { %9403 = vst [vmem:[#allocation24_spill] sm:$0xff] %v7564_v18  ;;  %v7572_v63 = vpop.eup %5124  ;;  %v2186_v36 = vmin.f32 %v2184_v31, %v2185_v41  ;;  %v2502_v9 = vadd.f32 %v2501_v7, %v2500_v38  ;;  %v2749_v13 = vmul.f32 %v7534_v2, %v7309_v28  ;;  %5142 = vtanh.f32 %v1617_v55 }
 0x1b5   :  { %9404 = vst [vmem:[#allocation34_spill] sm:$0xff] %v7572_v63  ;;  %v7576_v53 = vpop.eup %5126  ;;  %v2189_v15 = vsel %vm1974_vm0, %v7572_v63, inf  ;;  %v2746_v40 = vmul.f32 %v7534_v2, %v7271_v16  ;;  %5144 = vtanh.f32 %v1616_v59  ;;  %v2191_v47 = vsel %vm1974_vm0, %v7564_v18, inf  ;;  %v1445_v18 = vpop.xlane.xlu1 %1444 }
 0x1b6   :  { %9405 = vst [vmem:[#allocation33_spill] sm:$0xff] %v7576_v53  ;;  %v5129_v31 = vpop.eup %5128  ;;  %v2188_v38 = vmin.f32 %v2186_v36, %v2187_v58  ;;  %v2503_v22 = vrot.slane %v2502_v9, 1  ;;  %v2748_v63 = vmul.f32 %v7534_v2, %v7303_v17  ;;  %v2507_v28 = vadd.f32 %v2506_v8, %v2505_v51 }
 0x1b7   :  { %v5131_v7 = vpop.eup %5130  ;;  %2996 = vperm.xlu0 %4782, %v2747_v52   ;;  %v1920_v41 = vmul.f32 1.442695, %v5129_v31  ;;  %v2195_v58 = vsel %vm1974_vm0, %v7576_v53, inf  ;;  %2991 = vperm.xlu1 %4783, %v2746_v40   ;;  %v2510_v31 = vsel %vm1974_vm0, %v7548_v3, 0.0  ;;  %v1619_v40 = vadd.f32 %v7251_v4, %v1435_v48 }
 0x1b8   :  { %v5133_v55 = vpop.eup %5132  ;;  %v2190_v34 = vmin.f32 %v2188_v38, %v2189_v15  ;;  %v2504_v36 = vadd.f32 %v2503_v22, %v2502_v9  ;;  %v1918_v26 = vmul.f32 1.442695, %v5131_v7  ;;  %v2509_v52 = vadd.f32 %v2508_v49, %v2507_v28  ;;  %v1450_v22 = vpop.xlane.xlu0 %1449 }
 0x1b9   :  { %v7594_v16 = vpop.eup %5134  ;;  %5146 = vpow2.f32 %v1920_v41  ;;  %v1924_v59 = vmul.f32 1.442695, %v5133_v55  ;;  %v2512_v38 = vsel %vm1974_vm0, %v7552_v45, 0.0  ;;  %v2514_v48 = vsel %vm1974_vm0, %v7560_v5, 0.0 }
 0x1ba   :  { %v5137_v46 = vpop.eup %5136  ;;  %v2192_v17 = vmin.f32 %v2190_v34, %v2191_v47  ;;  %v2193_v51 = vsel %vm1974_vm0, %v7594_v16, inf  ;;  %v2700_v8 = vadd.f32 1e-10, %v2504_v36  ;;  %5148 = vpow2.f32 %v1918_v26 }
 0x1bb   :  { %3006 = vperm.xlu0 %4782, %v2749_v13   ;;  %5150 = vpow2.f32 %v1924_v59  ;;  %v1922_v9 = vmul.f32 1.442695, %v5137_v46  ;;  %v2511_v15 = vadd.f32 %v2510_v31, %v2509_v52  ;;  %3001 = vperm.xlu1 %4783, %v2748_v63   ;;  %v1618_v34 = vadd.f32 %v7364_v39, %v7532_v54  ;;  %v1455_v52 = vpop.xlane.xlu1 %1454 }
 0x1bc   :  { %v2194_v49 = vmin.f32 %v2192_v17, %v2193_v51  ;;  %5152 = vrcp.f32 %v2700_v8  ;;  %v5139_v7 = vpop.eup %5138  ;;  %v9406_v47 = vrot.slane %v7462_v37, 1  ;;  %v2750_v46 = vmul.f32 %v7534_v2, %v7042_v42 }
 0x1bd   :  { %5154 = vpow2.f32 %v1922_v9  ;;  %v2513_v26 = vadd.f32 %v2512_v38, %v2511_v15  ;;  %v5141_v41 = vpop.eup %5140  ;;  %v1928_v55 = vmul.f32 1.442695, %v5139_v7  ;;  %v9407_v54 = vrot.slane %v7519_v0, 2 }
 0x1be   :  { %v7608_v13 = vmin.f32 %v7462_v37, %v9406_v47  ;;  %v2196_v28 = vmin.f32 %v2194_v49, %v2195_v58  ;;  %5156 = vtanh.f32 %v1619_v40  ;;  %v5143_v63 = vpop.eup %5142  ;;  %v1926_v37 = vmul.f32 1.442695, %v5141_v41  ;;  %v9409_v40 = vld [vmem:[#allocation39_spill] sm:$0xff] }
 0x1bf   :  { %v7617_v36 = vmin.f32 %v7519_v0, %v9407_v54  ;;  %v2515_v59 = vadd.f32 %v2514_v48, %v2513_v26  ;;  %5158 = vtanh.f32 %v1618_v34  ;;  %v5145_v31 = vpop.eup %5144  ;;  %3011 = vperm.xlu1 %4783, %v2750_v46   ;;  %v1932_v2 = vmul.f32 1.442695, %v5143_v63  ;;  %v7623_v0 = vpop.xlane.xlu0 %1459  ;;  %v9413_v54 = vld [vmem:[#allocation40_spill] sm:$0xff] }
 0x1c0   :  { %v2197_v42 = vrot.slane %v2196_v28, 4  ;;  %5160 = vpow2.f32 %v1928_v55  ;;  %v1621_v58 = vadd.f32 %v7375_v30, %v1445_v18  ;;  %v1930_v17 = vmul.f32 1.442695, %v5145_v31  ;;  %v7650_v48 = vpop.xlane.xlu1 %1464 }
 0x1c1   :  { %5162 = vpow2.f32 %v1926_v37  ;;  %v2517_v51 = vadd.f32 %v7409_v62, %v2515_v59  ;;  %v1620_v8 = vadd.f32 %v7383_v11, %v7584_v50  ;;  %v7627_v9 = vsub.f32 %v7329_v60, %v7608_v13  ;;  %v9410_v50 = vld [vmem:[#allocation41_spill] sm:$0xff]  ;;  %v9414_v59 = vld [vmem:[#allocation42_spill] sm:$0xff] }
 0x1c2   :  { %v2198_v15 = vmin.f32 %v2196_v28, %v2197_v42  ;;  %5164 = vpow2.f32 %v1932_v2  ;;  %v1623_v38 = vadd.f32 %v7396_v27, %v1455_v52  ;;  %v7634_v62 = vsub.f32 %v9409_v40, %v7332_v32 }
 0x1c3   :  { %v7630_v49 = vpop.eup %5146  ;;  %5166 = vpow2.f32 %v1930_v17  ;;  %v2518_v18 = vrot.slane %v2517_v51, 4  ;;  %v7638_v34 = vsub.f32 %v9410_v50, %v7332_v32  ;;  %v1622_v46 = vadd.f32 %v7440_v20, %v1450_v22  ;;  %v9415_v22 = vld [vmem:[#allocation12_spill] sm:$0xff] }
 0x1c4   :  { %9408 = vst [vmem:[#allocation36_spill] sm:$0xff] %v7630_v49  ;;  %v7640_v7 = vpop.eup %5148  ;;  %v2204_v47 = vsel %vm1974_vm0, %v7630_v49, inf  ;;  %5168 = vtanh.f32 %v1621_v58  ;;  %v2199_v41 = vrot.slane %v2198_v15, 2  ;;  %v7654_v37 = vsub.f32 %v9413_v54, %v7332_v32 }
 0x1c5   :  { %9411 = vst [vmem:[#allocation35_spill] sm:$0xff] %v7640_v7  ;;  %v7646_v26 = vpop.eup %5150  ;;  %v2203_v28 = vsel %vm1974_vm0, %v7640_v7, inf  ;;  %v2519_v55 = vadd.f32 %v2518_v18, %v2517_v51  ;;  %5170 = vtanh.f32 %v1620_v8  ;;  %v7658_v52 = vsub.f32 %v9414_v59, %v7332_v32  ;;  %v7671_v8 = vpop.xlane.xlu0 %1469 }
 0x1c6   :  { %9412 = vst [vmem:[#allocation38_spill] sm:$0xff] %v7646_v26  ;;  %v5153_v63 = vpop.eup %5152  ;;  %5172 = vtanh.f32 %v1623_v38  ;;  %v7662_v31 = vsub.f32 %v9415_v22, %v7332_v32  ;;  %v2205_v58 = vmin.f32 %v2203_v28, %v2204_v47  ;;  %v2524_v17 = vsel %vm1974_vm0, %v7634_v62, 0.0  ;;  %v9417_v22 = vld [vmem:[#allocation11_spill] sm:$0xff] }
 0x1c7   :  { %v7664_v42 = vpop.eup %5154  ;;  %v2752_v2 = vmul.f32 %v5153_v63, %v7389_v21  ;;  %v2525_v51 = vsel %vm1974_vm0, %v7638_v34, 0.0  ;;  %v2208_v18 = vsel %vm1974_vm0, %v7646_v26, inf  ;;  %v2753_v50 = vmul.f32 %v5153_v63, %v7401_v57 }
 0x1c8   :  { %9416 = vst [vmem:[#allocation37_spill] sm:$0xff] %v7664_v42  ;;  %v5157_v38 = vpop.eup %5156  ;;  %v2206_v40 = vsel %vm1974_vm0, %v7664_v42, inf  ;;  %v2520_v54 = vrot.slane %v2519_v55, 2  ;;  %v7678_v47 = vmin.f32 %v2198_v15, %v2199_v41  ;;  %v7682_v60 = vsub.f32 %v9417_v22, %v7332_v32 }
 0x1c9   :  { %v5159_v21 = vpop.eup %5158  ;;  %3016 = vperm.xlu0 %4782, %v2752_v2   ;;  %v2207_v28 = vmin.f32 %v2205_v58, %v2206_v40  ;;  %v1936_v59 = vmul.f32 1.442695, %v5157_v38  ;;  %v2754_v26 = vmul.f32 %v5153_v63, %v7452_v14  ;;  %3021 = vperm.xlu1 %4783, %v2753_v50   ;;  %5174 = vtanh.f32 %v1622_v46  ;;  %v1475_v2 = vpop.xlane.xlu1 %1474 }
 0x1ca   :  { %v7684_v49 = vpop.eup %5160  ;;  %v2521_v7 = vadd.f32 %v2520_v54, %v2519_v55  ;;  %v1934_v42 = vmul.f32 1.442695, %v5159_v21  ;;  %v2755_v15 = vmul.f32 %v5153_v63, %v7466_v29  ;;  %v2526_v41 = vadd.f32 %v2525_v51, %v2524_v17  ;;  %v1480_v51 = vpop.xlane.xlu0 %1479 }
 0x1cb   :  { %9418 = vst [vmem:[#allocation39_spill] sm:$0xff] %v7684_v49  ;;  %v7687_v57 = vpop.eup %5162  ;;  %v2209_v53 = vmin.f32 %v2207_v28, %v2208_v18  ;;  %5176 = vpow2.f32 %v1936_v59  ;;  %v2212_v32 = vsel %vm1974_vm0, %v7684_v49, inf  ;;  %v2756_v46 = vmul.f32 %v5153_v63, %v7470_v10 }
 0x1cc   :  { %9419 = vst [vmem:[#allocation41_spill] sm:$0xff] %v7687_v57  ;;  %v7690_v58 = vpop.eup %5164  ;;  %v2210_v14 = vsel %vm1974_vm0, %v7687_v57, inf  ;;  %v2522_v38 = vrot.slane %v2521_v7, 1  ;;  %5178 = vpow2.f32 %v1934_v42  ;;  %v2758_v29 = vmul.f32 %v5153_v63, %v7478_v12 }
 0x1cd   :  { %9420 = vst [vmem:[#allocation40_spill] sm:$0xff] %v7690_v58  ;;  %v7696_v55 = vpop.eup %5166  ;;  %3026 = vperm.xlu0 %4782, %v2754_v26   ;;  %v2211_v18 = vmin.f32 %v2209_v53, %v2210_v14  ;;  %v2527_v17 = vsel %vm1974_vm0, %v7654_v37, 0.0  ;;  %v2201_v50 = vrot.slane %v7678_v47, 1  ;;  %3031 = vperm.xlu1 %4783, %v2755_v15   ;;  %v2757_v10 = vmul.f32 %v5153_v63, %v7122_v43 }
 0x1ce   :  { %v5169_v40 = vpop.eup %5168  ;;  %v2214_v54 = vsel %vm1974_vm0, %v7696_v55, inf  ;;  %v2523_v21 = vadd.f32 %v2522_v38, %v2521_v7  ;;  %v2528_v42 = vadd.f32 %v2527_v17, %v2526_v41  ;;  %v2529_v12 = vsel %vm1974_vm0, %v7658_v52, 0.0  ;;  %v1485_v41 = vpop.xlane.xlu1 %1484 }
 0x1cf   :  { %v5171_v28 = vpop.eup %5170  ;;  %v2213_v26 = vmin.f32 %v2211_v18, %v2212_v32  ;;  %v1940_v59 = vmul.f32 1.442695, %v5169_v40  ;;  %v2531_v57 = vsel %vm1974_vm0, %v7662_v31, 0.0  ;;  %v1625_v15 = vadd.f32 %v7364_v39, %v7650_v48  ;;  %v1490_v17 = vpop.xlane.xlu0 %1489 }
 0x1d0   :  { %v5173_v53 = vpop.eup %5172  ;;  %v2701_v22 = vadd.f32 1e-10, %v2523_v21  ;;  %v1938_v14 = vmul.f32 1.442695, %v5171_v28  ;;  %v2530_v49 = vadd.f32 %v2529_v12, %v2528_v42  ;;  %v2222_v43 = vsel %vm1974_vm0, %v7690_v58, inf  ;;  %v5329_v58 = vld [vmem:[#allocation2 + $0x140] sm:$0xff] }
 0x1d1   :  { %3036 = vperm.xlu0 %4782, %v2756_v46   ;;  %v2215_v33 = vmin.f32 %v2213_v26, %v2214_v54  ;;  %5180 = vpow2.f32 %v1940_v59  ;;  %v1944_v7 = vmul.f32 1.442695, %v5173_v53  ;;  %3041 = vperm.xlu1 %4783, %v2757_v10   ;;  %v1624_v32 = vadd.f32 %v7242_v61, %v7623_v0 }
 0x1d2   :  { %5182 = vrcp.f32 %v2701_v22  ;;  %v2532_v63 = vadd.f32 %v2531_v57, %v2530_v49  ;;  %v2535_v46 = vsel %vm1974_vm0, %v7682_v60, 0.0  ;;  %v1626_v18 = vadd.f32 %v7251_v4, %v7671_v8 }
 0x1d3   :  { %v2216_v38 = vrot.slane %v2215_v33, 4  ;;  %5184 = vpow2.f32 %v1938_v14  ;;  %v5175_v48 = vpop.eup %5174  ;;  %v1627_v54 = vadd.f32 %v7383_v11, %v1475_v2  ;;  %v1628_v49 = vadd.f32 %v7375_v30, %v1480_v51  ;;  %v9423_v51 = vld [vmem:[#allocation14_spill] sm:$0xff] }
 0x1d4   :  { %5186 = vpow2.f32 %v1944_v7  ;;  %v2534_v40 = vadd.f32 %v7431_v24, %v2532_v63  ;;  %v1942_v21 = vmul.f32 1.442695, %v5175_v48  ;;  %v1629_v42 = vadd.f32 %v7440_v20, %v1485_v41 }
 0x1d5   :  { %v7723_v57 = vpop.eup %5176  ;;  %3046 = vperm.xlu0 %4782, %v2758_v29   ;;  %v2217_v0 = vmin.f32 %v2215_v33, %v2216_v38  ;;  %5188 = vtanh.f32 %v1625_v15  ;;  %v1630_v8 = vadd.f32 %v7396_v27, %v1490_v17  ;;  %v7731_v24 = vsub.f32 %v7134_v25, %v7391_v19  ;;  %v1495_v29 = vpop.xlane.xlu1 %1494 }
 0x1d6   :  { %9421 = vst [vmem:[#allocation42_spill] sm:$0xff] %v7723_v57  ;;  %v7726_v28 = vpop.eup %5178  ;;  %v2536_v4 = vadd.f32 %v2535_v46, %v2534_v40  ;;  %5190 = vtanh.f32 %v1624_v32  ;;  %v2225_v2 = vsel %vm1974_vm0, %v7723_v57, inf  ;;  %v7739_v26 = vsub.f32 %v9423_v51, %v7391_v19  ;;  %v9426_v32 = vld [vmem:[#allocation16_spill] sm:$0xff]  ;;  %v9429_v40 = vld [vmem:[#allocation22_spill] sm:$0xff] }
 0x1d7   :  { %9422 = vst [vmem:[#allocation12_spill] sm:$0xff] %v7726_v28  ;;  %v2223_v33 = vsel %vm1974_vm0, %v7726_v28, inf  ;;  %5192 = vpow2.f32 %v1942_v21  ;;  %v2218_v59 = vrot.slane %v2217_v0, 2  ;;  %v7743_v25 = vsel %vm1974_vm0, %v7627_v9, 0.0 }
 0x1d8   :  { %v2224_v10 = vmin.f32 %v2222_v43, %v2223_v33  ;;  %v2537_v12 = vrot.slane %v2536_v4, 4  ;;  %5194 = vtanh.f32 %v1626_v18  ;;  %v9424_v53 = vrot.slane %v7617_v36, 1 }
 0x1d9   :  { %v7751_v14 = vmin.f32 %v7678_v47, %v2201_v50  ;;  %5196 = vtanh.f32 %v1627_v54  ;;  %v1631_v15 = vadd.f32 %v7242_v61, %v1495_v29  ;;  %v2543_v41 = vsel %vm1974_vm0, %v7731_v24, 0.0  ;;  %v9427_v61 = vld [vmem:[#allocation13_spill] sm:$0xff] }
 0x1da   :  { %v7748_v22 = vmin.f32 %v7617_v36, %v9424_v53  ;;  %v2538_v7 = vadd.f32 %v2537_v12, %v2536_v4  ;;  %5198 = vtanh.f32 %v1628_v49  ;;  %v2226_v63 = vmin.f32 %v2224_v10, %v2225_v2  ;;  %v9430_v49 = vld [vmem:[#allocation15_spill] sm:$0xff] }
 0x1db   :  { %v7756_v43 = vpop.eup %5180  ;;  %5200 = vtanh.f32 %v1629_v42  ;;  %v7760_v38 = vsub.f32 %v9426_v32, %v7391_v19  ;;  %v2544_v36 = vsel %vm1974_vm0, %v7739_v26, 0.0  ;;  %v7766_v50 = vmin.f32 %v2217_v0, %v2218_v59  ;;  %v1500_v42 = vpop.xlane.xlu0 %1499 }
 0x1dc   :  { %9425 = vst [vmem:[#allocation11_spill] sm:$0xff] %v7756_v43  ;;  %v7764_v47 = vpop.eup %5182  ;;  %v2539_v46 = vrot.slane %v2538_v7, 2  ;;  %5202 = vtanh.f32 %v1630_v8  ;;  %v7770_v18 = vsub.f32 %v9427_v61, %v7391_v19  ;;  %v7778_v54 = vsub.f32 %v9429_v40, %v7391_v19 }
 0x1dd   :  { %v7772_v17 = vpop.eup %5184  ;;  %v2761_v48 = vmul.f32 %v7764_v47, %v7530_v56  ;;  %v7782_v21 = vsub.f32 %v9430_v49, %v7391_v19  ;;  %v2545_v0 = vadd.f32 %v2544_v36, %v2543_v41  ;;  %v2229_v8 = vsel %vm1974_vm0, %v7756_v43, inf  ;;  %v5310_v43 = vld [vmem:[#allocation2 + $0x138] sm:$0xff] }
 0x1de   :  { %9428 = vst [vmem:[#allocation14_spill] sm:$0xff] %v7772_v17  ;;  %v7784_v4 = vpop.eup %5186  ;;  %v2227_v2 = vsel %vm1974_vm0, %v7772_v17, inf  ;;  %v2760_v56 = vmul.f32 %v7764_v47, %v7524_v44  ;;  %v2540_v33 = vadd.f32 %v2539_v46, %v2538_v7  ;;  %v2763_v19 = vmul.f32 %v7764_v47, %v7548_v3 }
 0x1df   :  { %9431 = vst [vmem:[#allocation16_spill] sm:$0xff] %v7784_v4  ;;  %v5189_v29 = vpop.eup %5188  ;;  %3056 = vperm.xlu0 %4782, %v2761_v48   ;;  %v2228_v51 = vmin.f32 %v2226_v63, %v2227_v2  ;;  %v2765_v59 = vmul.f32 %v7764_v47, %v7560_v5  ;;  %v2546_v10 = vsel %vm1974_vm0, %v7760_v38, 0.0  ;;  %v2233_v53 = vsel %vm1974_vm0, %v7784_v4, inf  ;;  %v1505_v5 = vpop.xlane.xlu1 %1504 }
 0x1e0   :  { %v5191_v12 = vpop.eup %5190  ;;  %3051 = vperm.xlu1 %4783, %v2760_v56   ;;  %v2541_v41 = vrot.slane %v2540_v33, 1  ;;  %v1948_v44 = vmul.f32 1.442695, %v5189_v29  ;;  %v2762_v7 = vmul.f32 %v7764_v47, %v7539_v35  ;;  %5204 = vtanh.f32 %v1631_v15 }
 0x1e1   :  { %v7802_v32 = vpop.eup %5192  ;;  %v2230_v3 = vmin.f32 %v2228_v51, %v2229_v8  ;;  %v1946_v63 = vmul.f32 1.442695, %v5191_v12  ;;  %v2547_v36 = vadd.f32 %v2546_v10, %v2545_v0  ;;  %v2548_v40 = vsel %vm1974_vm0, %v7770_v18, 0.0  ;;  %v1510_v8 = vpop.xlane.xlu0 %1509 }
 0x1e2   :  { %v5195_v46 = vpop.eup %5194  ;;  %v2231_v61 = vsel %vm1974_vm0, %v7802_v32, inf  ;;  %v2542_v48 = vadd.f32 %v2541_v41, %v2540_v33  ;;  %5206 = vpow2.f32 %v1948_v44  ;;  %v2764_v51 = vmul.f32 %v7764_v47, %v7552_v45 }
 0x1e3   :  { %v5197_v49 = vpop.eup %5196  ;;  %3066 = vperm.xlu0 %4782, %v2763_v19   ;;  %v2232_v2 = vmin.f32 %v2230_v3, %v2231_v61  ;;  %5208 = vpow2.f32 %v1946_v63  ;;  %v1950_v35 = vmul.f32 1.442695, %v5195_v46  ;;  %v2549_v56 = vadd.f32 %v2548_v40, %v2547_v36  ;;  %v1515_v61 = vpop.xlane.xlu1 %1514 }
 0x1e4   :  { %v5199_v29 = vpop.eup %5198  ;;  %v2702_v15 = vadd.f32 1e-10, %v2542_v48  ;;  %3061 = vperm.xlu1 %4783, %v2762_v7   ;;  %v1952_v0 = vmul.f32 1.442695, %v5197_v49  ;;  %v2550_v33 = vsel %vm1974_vm0, %v7778_v54, 0.0  ;;  %v2552_v63 = vsel %vm1974_vm0, %v7782_v21, 0.0 }
 0x1e5   :  { %v5201_v10 = vpop.eup %5200  ;;  %v2234_v12 = vmin.f32 %v2232_v2, %v2233_v53  ;;  %5210 = vpow2.f32 %v1950_v35  ;;  %v1954_v41 = vmul.f32 1.442695, %v5199_v29  ;;  %v2551_v19 = vadd.f32 %v2550_v33, %v2549_v56  ;;  %v1520_v2 = vpop.xlane.xlu0 %1519  ;;  %v9432_v35 = vld [vmem:[#allocation17_spill] sm:$0xff] }
 0x1e6   :  { %v5203_v44 = vpop.eup %5202  ;;  %5212 = vrcp.f32 %v2702_v15  ;;  %v1956_v3 = vmul.f32 1.442695, %v5201_v10  ;;  %v1632_v7 = vadd.f32 %v7364_v39, %v1500_v42  ;;  %v7817_v53 = vsub.f32 %v7480_v23, %v7748_v22  ;;  %v5278_v39 = vld [vmem:[%s9219_s2 + $0x10] sm:$0xff]  ;;  %s5804_s2 = smov [#allocation7]  }
 0x1e7   :  { %3076 = vperm.xlu0 %4782, %v2765_v59   ;;  %v2235_v36 = vrot.slane %v2234_v12, 4  ;;  %5214 = vpow2.f32 %v1952_v0  ;;  %v1958_v45 = vmul.f32 1.442695, %v5203_v44  ;;  %v2553_v46 = vadd.f32 %v2552_v63, %v2551_v19  ;;  %v9433_v0 = vld [vmem:[#allocation18_spill] sm:$0xff]  ;;  %s4763_s28 = sshll.u32 %s5804_s2, 4  ;;  %s4764_s28 = int_to_ptr.vmem [resolvable:$true] %s4763_s28 }
 0x1e8   :  { %v7821_v48 = vsub.f32 %v7594_v16, %v7751_v14  ;;  %3071 = vperm.xlu1 %4783, %v2764_v51   ;;  %5216 = vpow2.f32 %v1954_v41  ;;  %v1633_v42 = vadd.f32 %v5278_v39, %v1505_v5  ;;  %v2220_v59 = vrot.slane %v7766_v50, 1  ;;  %v1525_v41 = vpop.xlane.xlu1 %1524  ;;  %s5771_s29 = scalar_lea.vmem %s4764_s28, 1024  ;;  %p5776_p3 = scmp.lt.s32.totalorder %s4764_s28, %s4764_s28 }
 0x1e9   :  { %v2236_v40 = vmin.f32 %v2234_v12, %v2235_v36  ;;  %5218 = vpow2.f32 %v1956_v3  ;;  %v2555_v49 = vadd.f32 %v7506_v6, %v2553_v46  ;;  %v2766_v23 = vmul.f32 %v7764_v47, %v7317_v1  ;;  %p5772_p2 = scmp.ne.s32.totalorder %s4764_s28, %s5771_s29  ;;  %p5777_p4 = scmp.lt.s32.totalorder %s5771_s29, %s5771_s29 }
 0x1ea   :  { %5220 = vpow2.f32 %v1958_v45  ;;  %v1634_v16 = vadd.f32 %v7383_v11, %v1510_v8  ;;  %v7833_v56 = vsub.f32 %v9432_v35, %v7608_v13  ;;  %v5205_v29 = vpop.eup %5204  ;;  %v1635_v5 = vadd.f32 %v7375_v30, %v1515_v61 }
 0x1eb   :  { %v2556_v15 = vrot.slane %v2555_v49, 4  ;;  %5222 = vtanh.f32 %v1632_v7  ;;  %v7838_v51 = vsub.f32 %v9433_v0, %v7608_v13  ;;  %v7844_v1 = vsel %vm1974_vm0, %v7817_v53, 0.0  ;;  %p5778_p5 = por %p5777_p4, %p5776_p3 }
 0x1ec   :  { %v7840_v6 = vpop.eup %5206  ;;  %v2237_v11 = vrot.slane %v2236_v40, 2  ;;  %3081 = vperm.xlu1 %4783, %v2766_v23   ;;  %5224 = vtanh.f32 %v1633_v42  ;;  %v1636_v47 = vadd.f32 %v7440_v20, %v1520_v2  ;;  %v7851_v30 = vsel %vm1974_vm0, %v7821_v48, 0.0  ;;  %v9439_v23 = vld [vmem:[#allocation20_spill] sm:$0xff] }
 0x1ed   :  { %9434 = vst [vmem:[#allocation13_spill] sm:$0xff] %v7840_v6  ;;  %v7847_v8 = vpop.eup %5208  ;;  %v7854_v33 = vmin.f32 %v7766_v50, %v2220_v59  ;;  %v2242_v10 = vsel %vm1974_vm0, %v7840_v6, inf  ;;  %v2557_v12 = vadd.f32 %v2556_v15, %v2555_v49  ;;  %v1960_v44 = vmul.f32 1.442695, %v5205_v29  ;;  %v9438_v49 = vld [vmem:[#allocation19_spill] sm:$0xff]  ;;  %v9441_v29 = vld [vmem:[#allocation21_spill] sm:$0xff]  ;;  %p5779_p6 = pnand %p5778_p5, %p5772_p2 }
 0x1ee   :  { %9435 = vst [vmem:[#allocation22_spill] sm:$0xff] %v7847_v8  ;;  %v2241_v19 = vsel %vm1974_vm0, %v7847_v8, inf  ;;  %5226 = vtanh.f32 %v1634_v16  ;;  %v2562_v20 = vsel %vm1974_vm0, %v7833_v56, 0.0  ;;  %v2563_v50 = vsel %vm1974_vm0, %v7838_v51, 0.0  ;;  %v5306_v6 = vld [vmem:[#allocation2 + $0xc8] sm:$0xff] }
 0x1ef   :  { %v7862_v3 = vpop.eup %5210  ;;  %v2243_v63 = vmin.f32 %v2241_v19, %v2242_v10  ;;  %v2558_v7 = vrot.slane %v2557_v12, 2  ;;  %5228 = vtanh.f32 %v1635_v5  ;;  %v2238_v45 = vmin.f32 %v2236_v40, %v2237_v11  ;;  %v9443_v19 = vld [vmem:[#allocation23_spill] sm:$0xff] }
 0x1f0   :  { %9436 = vst [vmem:[#allocation15_spill] sm:$0xff] %v7862_v3  ;;  %v5213_v36 = vpop.eup %5212  ;;  %v2244_v46 = vsel %vm1974_vm0, %v7862_v3, inf  ;;  %5230 = vtanh.f32 %v1636_v47  ;;  %v1637_v61 = vadd.f32 %v7396_v27, %v1525_v41  ;;  %v7874_v2 = vsub.f32 %v9438_v49, %v7608_v13 }
 0x1f1   :  { %v7869_v39 = vpop.eup %5214  ;;  %v2768_v42 = vmul.f32 %v5213_v36, %v7634_v62  ;;  %v2245_v59 = vmin.f32 %v2243_v63, %v2244_v46  ;;  %v7878_v16 = vsub.f32 %v9439_v23, %v7608_v13  ;;  %v2769_v27 = vmul.f32 %v5213_v36, %v7638_v34 }
 0x1f2   :  { %9437 = vst [vmem:[#allocation17_spill] sm:$0xff] %v7869_v39  ;;  %v7880_v40 = vpop.eup %5216  ;;  %v2246_v35 = vsel %vm1974_vm0, %v7869_v39, inf  ;;  %v7887_v15 = vsub.f32 %v9441_v29, %v7608_v13  ;;  %v2564_v62 = vadd.f32 %v2563_v50, %v2562_v20  ;;  %5232 = vpow2.f32 %v1960_v44  ;;  %v7904_v44 = vpop.permute.xlu1 %2846 }
 0x1f3   :  { %9440 = vst [vmem:[#allocation18_spill] sm:$0xff] %v7880_v40  ;;  %v7889_v5 = vpop.eup %5218  ;;  %3086 = vperm.xlu0 %4782, %v2768_v42   ;;  %v2247_v0 = vmin.f32 %v2245_v59, %v2246_v35  ;;  %v2248_v11 = vsel %vm1974_vm0, %v7880_v40, inf  ;;  %v2559_v47 = vadd.f32 %v2558_v7, %v2557_v12  ;;  %v2239_v41 = vrot.slane %v2238_v45, 1  ;;  %3091 = vperm.xlu1 %4783, %v2769_v27  }
 0x1f4   :  { %9442 = vst [vmem:[#allocation19_spill] sm:$0xff] %v7889_v5  ;;  %v7893_v10 = vpop.eup %5220  ;;  %v2250_v34 = vsel %vm1974_vm0, %v7889_v5, inf  ;;  %5234 = vtanh.f32 %v1637_v61  ;;  %v7899_v20 = vsub.f32 %v9443_v19, %v7608_v13  ;;  %v2770_v50 = vmul.f32 %v5213_v36, %v7654_v37 }
 0x1f5   :  { %v5223_v63 = vpop.eup %5222  ;;  %v2249_v46 = vmin.f32 %v2247_v0, %v2248_v11  ;;  %v2560_v42 = vrot.slane %v2559_v47, 1  ;;  %v2565_v12 = vsel %vm1974_vm0, %v7874_v2, 0.0  ;;  %v2252_v59 = vsel %vm1974_vm0, %v7893_v10, inf }
 0x1f6   :  { %v5225_v7 = vpop.eup %5224  ;;  %v1962_v49 = vmul.f32 1.442695, %v5223_v63  ;;  %v2771_v61 = vmul.f32 %v5213_v36, %v7658_v52  ;;  %v2566_v23 = vadd.f32 %v2565_v12, %v2564_v62  ;;  %v2567_v37 = vsel %vm1974_vm0, %v7878_v16, 0.0 }
 0x1f7   :  { %3096 = vperm.xlu0 %4782, %v2770_v50   ;;  %v2251_v13 = vmin.f32 %v2249_v46, %v2250_v34  ;;  %v2561_v35 = vadd.f32 %v2560_v42, %v2559_v47  ;;  %v1964_v27 = vmul.f32 1.442695, %v5225_v7  ;;  %v2772_v0 = vmul.f32 %v5213_v36, %v7662_v31  ;;  %v2842_v34 = vpop.permute.xlu0 %2841  ;;  %v9445_v42 = vld [vmem:[#allocation26_spill] sm:$0xff] }
 0x1f8   :  { %v5227_v29 = vpop.eup %5226  ;;  %5236 = vpow2.f32 %v1962_v49  ;;  %3101 = vperm.xlu1 %4783, %v2771_v61   ;;  %v2568_v11 = vadd.f32 %v2567_v37, %v2566_v23  ;;  %v2569_v19 = vsel %vm1974_vm0, %v7887_v15, 0.0  ;;  %v7914_v50 = vmin.f32 %v2238_v45, %v2239_v41  ;;  %v2852_v23 = vpop.permute.xlu1 %2851 }
 0x1f9   :  { %v5229_v63 = vpop.eup %5228  ;;  %v2253_v5 = vmin.f32 %v2251_v13, %v2252_v59  ;;  %v2703_v52 = vadd.f32 1e-10, %v2561_v35  ;;  %5238 = vpow2.f32 %v1964_v27  ;;  %v1966_v62 = vmul.f32 1.442695, %v5227_v29  ;;  %v5279_v13 = vld [vmem:[#allocation2] sm:$0xff]  ;;  %v5280_v27 = vld [vmem:[#allocation2 + $0x8] sm:$0xff] }
 0x1fa   :  { %v5231_v47 = vpop.eup %5230  ;;  %9444 = vst [vmem:[#allocation20_spill] sm:$0xff] %v7914_v50  ;;  %v1968_v46 = vmul.f32 1.442695, %v5229_v63  ;;  %v2773_v12 = vmul.f32 %v5213_v36, %v9445_v42  ;;  %v2570_v7 = vadd.f32 %v2569_v19, %v2568_v11  ;;  %v2774_v31 = vmul.f32 %v5213_v36, %v7682_v60  ;;  %v5281_v60 = vld [vmem:[#allocation2 + $0x20] sm:$0xff]  ;;  %v5282_v19 = vld [vmem:[#allocation2 + $0x28] sm:$0xff]  ;;  %v5283_v63 = vld [vmem:[#allocation2 + $0x10] sm:$0xff] }
 0x1fb   :  { %3106 = vperm.xlu0 %4782, %v2772_v0   ;;  %v2254_v49 = vrot.slane %v2253_v5, 4  ;;  %5240 = vrcp.f32 %v2703_v52  ;;  %v1970_v61 = vmul.f32 1.442695, %v5231_v47  ;;  %v3399_v35 = vmul.f32 %v5279_v13, %v2842_v34  ;;  %v5284_v42 = vld [vmem:[#allocation2 + $0x30] sm:$0xff] }
 0x1fc   :  { %5242 = vpow2.f32 %v1966_v62  ;;  %3111 = vperm.xlu1 %4783, %v2773_v12   ;;  %v2572_v59 = vadd.f32 %v7743_v25, %v2570_v7  ;;  %v3400_v45 = vmul.f32 %v5280_v27, %v2842_v34  ;;  %v7919_v41 = vpop.eup %5232  ;;  %v2573_v29 = vsel %vm1974_vm0, %v7899_v20, 0.0 }
 0x1fd   :  { %9446 = vst [vmem:[#allocation21_spill] sm:$0xff] %v7919_v41  ;;  %v2255_v37 = vmin.f32 %v2253_v5, %v2254_v49  ;;  %5244 = vpow2.f32 %v1968_v46  ;;  %v3403_v36 = vmul.f32 %v5281_v60, %v7904_v44  ;;  %v3404_v25 = vmul.f32 %v5282_v19, %v7904_v44  ;;  %v5285_v46 = vld [vmem:[#allocation2 + $0x18] sm:$0xff]  ;;  %v5288_v19 = vld [vmem:[#allocation2 + $0x48] sm:$0xff] }
 0x1fe   :  { %v5235_v0 = vpop.eup %5234  ;;  %5246 = vpow2.f32 %v1970_v61  ;;  %v2574_v11 = vadd.f32 %v2573_v29, %v2572_v59  ;;  %v3401_v52 = vmul.f32 %v5283_v63, %v2842_v34  ;;  %v3405_v5 = vmul.f32 %v5284_v42, %v7904_v44  ;;  %v5286_v49 = vld [vmem:[#allocation2 + $0x38] sm:$0xff]  ;;  %v5287_v29 = vld [vmem:[#allocation2 + $0x40] sm:$0xff] }
 0x1ff   :  { %3116 = vperm.xlu0 %4782, %v2774_v31   ;;  %v2256_v62 = vrot.slane %v2255_v37, 2  ;;  %v1972_v47 = vmul.f32 1.442695, %v5235_v0  ;;  %v3402_v12 = vmul.f32 %v5285_v46, %v2842_v34  ;;  %v3406_v13 = vmul.f32 %v5286_v49, %v7904_v44  ;;  %v2857_v31 = vpop.permute.xlu1 %2856  ;;  %v5289_v46 = vld [vmem:[#allocation2 + $0x50] sm:$0xff] }
 0x200   :  { %v2575_v7 = vrot.slane %v2574_v11, 4  ;;  %v3847_v27 = vadd.f32 %v3403_v36, %v3399_v35  ;;  %v3859_v61 = vadd.f32 %v3404_v25, %v3400_v45  ;;  %v3407_v60 = vmul.f32 %v5287_v29, %v2852_v23  ;;  %v5291_v29 = vld [vmem:[#allocation2 + $0x60] sm:$0xff] }
 0x201   :  { %v2257_v59 = vmin.f32 %v2255_v37, %v2256_v62  ;;  %5248 = vpow2.f32 %v1972_v47  ;;  %v3408_v63 = vmul.f32 %v5288_v19, %v2852_v23  ;;  %v7931_v0 = vsub.f32 %v7696_v55, %v7854_v33  ;;  %v5290_v47 = vld [vmem:[#allocation2 + $0x58] sm:$0xff] }
 0x202   :  { %v7927_v40 = vpop.eup %5236  ;;  %v2576_v34 = vadd.f32 %v2575_v7, %v2574_v11  ;;  %v3871_v42 = vadd.f32 %v3405_v5, %v3401_v52  ;;  %v3409_v39 = vmul.f32 %v5289_v46, %v2852_v23  ;;  %v2260_v45 = vsel %vm1974_vm0, %v7919_v41, inf  ;;  %v5304_v41 = vld [vmem:[#allocation2 + $0x128] sm:$0xff] }
 0x203   :  { %9447 = vst [vmem:[#allocation23_spill] sm:$0xff] %v7927_v40  ;;  %9448 = vst [vmem:[#allocation26_spill] sm:$0xff] %v7931_v0  ;;  %v7933_v44 = vpop.eup %5238  ;;  %v2258_v35 = vrot.slane %v2257_v59, 1  ;;  %v2261_v37 = vsel %vm1974_vm0, %v7927_v40, inf  ;;  %v3883_v36 = vadd.f32 %v3406_v13, %v3402_v12  ;;  %v3410_v11 = vmul.f32 %v5290_v47, %v2852_v23 }
 0x204   :  { %9449 = vst [vmem:[#allocation46_spill] sm:$0xff] %v7933_v44  ;;  %v2262_v25 = vmin.f32 %v2260_v45, %v2261_v37  ;;  %v2263_v62 = vsel %vm1974_vm0, %v7933_v44, inf  ;;  %v2577_v55 = vrot.slane %v2576_v34, 2  ;;  %v7943_v5 = vsub.f32 %v7802_v32, %v7914_v50  ;;  %v5292_v37 = vld [vmem:[#allocation2 + $0x68] sm:$0xff] }
 0x205   :  { %v5241_v52 = vpop.eup %5240  ;;  %v3848_v7 = vadd.f32 %v3847_v27, %v3407_v60  ;;  %v3860_v49 = vadd.f32 %v3859_v61, %v3408_v63  ;;  %v3411_v19 = vmul.f32 %v5291_v29, %v2857_v31  ;;  %v3872_v45 = vadd.f32 %v3871_v42, %v3409_v39  ;;  %v2862_v60 = vpop.permute.xlu1 %2861  ;;  %v5293_v42 = vld [vmem:[#allocation2 + $0x70] sm:$0xff]  ;;  %v5330_v50 = vld [vmem:[#allocation2 + $0x148] sm:$0xff] }
 0x206   :  { %v7945_v46 = vpop.eup %5242  ;;  %v2777_v12 = vmul.f32 %v5241_v52, %v7739_v26  ;;  %v2264_v13 = vmin.f32 %v2262_v25, %v2263_v62  ;;  %v3412_v44 = vmul.f32 %v5292_v37, %v2857_v31  ;;  %v7950_v23 = vmin.f32 %v2257_v59, %v2258_v35  ;;  %v5294_v62 = vld [vmem:[#allocation2 + $0x78] sm:$0xff] }
 0x207   :  { %9450 = vst [vmem:[#allocation47_spill] sm:$0xff] %v7945_v46  ;;  %v7948_v40 = vpop.eup %5244  ;;  %v2265_v32 = vsel %vm1974_vm0, %v7945_v46, inf  ;;  %v2776_v27 = vmul.f32 %v5241_v52, %v7731_v24  ;;  %v2578_v61 = vadd.f32 %v2577_v55, %v2576_v34  ;;  %v3884_v39 = vadd.f32 %v3883_v36, %v3410_v11 }
 0x208   :  { %9451 = vst [vmem:[#allocation48_spill] sm:$0xff] %v7948_v40  ;;  %9452 = vst [vmem:[#allocation49_spill] sm:$0xff] %v7950_v23  ;;  %v7955_v63 = vpop.eup %5246  ;;  %3126 = vperm.xlu0 %4782, %v2777_v12   ;;  %v2266_v47 = vmin.f32 %v2264_v13, %v2265_v32  ;;  %v2267_v26 = vsel %vm1974_vm0, %v7948_v40, inf  ;;  %v3413_v25 = vmul.f32 %v5293_v42, %v2857_v31  ;;  %v5295_v12 = vld [vmem:[#allocation2 + $0x80] sm:$0xff] }
 0x209   :  { %9453 = vst [vmem:[#allocation50_spill] sm:$0xff] %v7955_v63  ;;  %v2269_v59 = vsel %vm1974_vm0, %v7955_v63, inf  ;;  %3121 = vperm.xlu1 %4783, %v2776_v27   ;;  %v2579_v35 = vrot.slane %v2578_v61, 1  ;;  %v3414_v29 = vmul.f32 %v5294_v62, %v2857_v31  ;;  %v3849_v24 = vadd.f32 %v3848_v7, %v3411_v19  ;;  %v5296_v7 = vld [vmem:[#allocation2 + $0x88] sm:$0xff] }
 0x20a   :  { %v2779_v34 = vmul.f32 %v5241_v52, %v7770_v18  ;;  %v2268_v55 = vmin.f32 %v2266_v47, %v2267_v26  ;;  %v3861_v37 = vadd.f32 %v3860_v49, %v3412_v44  ;;  %v3415_v13 = vmul.f32 %v5295_v12, %v2862_v60  ;;  %v7974_v12 = vpop.permute.xlu0 %2886 }
 0x20b   :  { %v7962_v32 = vpop.eup %5248  ;;  %v7966_v36 = vsub.f32 %v7893_v10, %v7950_v23  ;;  %v2781_v11 = vmul.f32 %v5241_v52, %v7782_v21  ;;  %v2580_v42 = vadd.f32 %v2579_v35, %v2578_v61  ;;  %v2778_v27 = vmul.f32 %v5241_v52, %v7760_v38  ;;  %v9455_v10 = vld [vmem:[#allocation43_spill] sm:$0xff]  ;;  %v5297_v61 = vld [vmem:[#allocation2 + $0x90] sm:$0xff]  ;;  %v5298_v35 = vld [vmem:[#allocation2 + $0x98] sm:$0xff] }
 0x20c   :  { %3136 = vperm.xlu0 %4782, %v2779_v34   ;;  %v2270_v31 = vmin.f32 %v2268_v55, %v2269_v59  ;;  %v2271_v18 = vsel %vm1974_vm0, %v7962_v32, inf  ;;  %v2780_v44 = vmul.f32 %v5241_v52, %v7778_v54  ;;  %v3416_v49 = vmul.f32 %v5296_v7, %v2862_v60  ;;  %v2867_v55 = vpop.permute.xlu1 %2866  ;;  %v9456_v54 = vld [vmem:[#allocation28_spill] sm:$0xff] }
 0x20d   :  { %9454 = vst [vmem:[#allocation51_spill] sm:$0xff] %v7966_v36  ;;  %v2704_v19 = vadd.f32 1e-10, %v2580_v42  ;;  %3131 = vperm.xlu1 %4783, %v2778_v27   ;;  %v3873_v47 = vadd.f32 %v3872_v45, %v3413_v25  ;;  %v3885_v26 = vadd.f32 %v3884_v39, %v3414_v29  ;;  %v2782_v62 = vmul.f32 %v5241_v52, %v9455_v10  ;;  %v9457_v42 = vld [vmem:[#allocation25_spill] sm:$0xff]  ;;  %v9458_v52 = vld [vmem:[#allocation44_spill] sm:$0xff]  ;;  %v5299_v27 = vld [vmem:[#allocation2 + $0x120] sm:$0xff] }
 0x20e   :  { %v2272_v21 = vmin.f32 %v2270_v31, %v2271_v18  ;;  %v3417_v38 = vmul.f32 %v5297_v61, %v2862_v60  ;;  %v3418_v59 = vmul.f32 %v5298_v35, %v2862_v60  ;;  %v3850_v34 = vadd.f32 %v3849_v24, %v3415_v13  ;;  %v9459_v24 = vld [vmem:[#allocation27_spill] sm:$0xff]  ;;  %v9460_v31 = vld [vmem:[#allocation45_spill] sm:$0xff]  ;;  %v2897_v40 = vpop.permute.xlu0 %2896 }
 0x20f   :  { %5250 = vrcp.f32 %v2704_v19  ;;  %v7978_v63 = vsub.f32 %v9456_v54, %v7748_v22  ;;  %v7982_v45 = vsub.f32 %v9457_v42, %v7748_v22  ;;  %v7986_v39 = vsub.f32 %v9458_v52, %v7748_v22  ;;  %v5302_v52 = vld [vmem:[#allocation2 + $0xb0] sm:$0xff] }
 0x210   :  { %3146 = vperm.xlu0 %4782, %v2781_v11   ;;  %v2273_v25 = vrot.slane %v2272_v21, 4  ;;  %v3862_v29 = vadd.f32 %v3861_v37, %v3416_v49  ;;  %v7989_v60 = vmul.f32 %v5299_v27, %v7974_v12  ;;  %v7993_v13 = vsub.f32 %v9459_v24, %v7748_v22  ;;  %v5300_v37 = vld [vmem:[#allocation2 + $0xa0] sm:$0xff]  ;;  %v5303_v24 = vld [vmem:[#allocation2 + $0xb8] sm:$0xff]  ;;  %v5309_v23 = vld [vmem:[#allocation2 + $0x130] sm:$0xff] }
 0x211   :  { %3141 = vperm.xlu1 %4783, %v2780_v44   ;;  %v7997_v18 = vsub.f32 %v9460_v31, %v7748_v22  ;;  %v2581_v7 = vsel %vm1974_vm0, %v7978_v63, 0.0  ;;  %v2582_v11 = vsel %vm1974_vm0, %v7982_v45, 0.0  ;;  %v3419_v49 = vmul.f32 %v5300_v37, %v2867_v55  ;;  %v5301_v44 = vld [vmem:[#allocation2 + $0xa8] sm:$0xff] }
 0x212   :  { %v2274_v19 = vmin.f32 %v2272_v21, %v2273_v25  ;;  %v3874_v10 = vadd.f32 %v3873_v47, %v3417_v38  ;;  %v3886_v61 = vadd.f32 %v3885_v26, %v3418_v59  ;;  %v2583_v35 = vadd.f32 %v2582_v11, %v2581_v7  ;;  %v9461_v21 = vld [vmem:[#allocation29_spill] sm:$0xff]  ;;  %v2872_v38 = vpop.permute.xlu1 %2871 }
 0x213   :  { %v2584_v54 = vsel %vm1974_vm0, %v7986_v39, 0.0  ;;  %v3420_v42 = vmul.f32 %v5301_v44, %v2867_v55  ;;  %v3421_v27 = vmul.f32 %v5302_v52, %v2867_v55  ;;  %v3422_v31 = vmul.f32 %v5303_v24, %v2867_v55  ;;  %v5305_v52 = vld [vmem:[#allocation2 + $0xc0] sm:$0xff] }
 0x214   :  { %v2275_v46 = vrot.slane %v2274_v19, 2  ;;  %v8006_v3 = vmul.f32 %v5304_v41, %v7974_v12  ;;  %v8010_v47 = vsub.f32 %v9461_v21, %v7748_v22  ;;  %v2585_v26 = vadd.f32 %v2584_v54, %v2583_v35  ;;  %v5307_v21 = vld [vmem:[#allocation2 + $0xd0] sm:$0xff]  ;;  %v5308_v54 = vld [vmem:[#allocation2 + $0xd8] sm:$0xff] }
 0x215   :  { %3151 = vperm.xlu1 %4783, %v2782_v62   ;;  %v2586_v59 = vsel %vm1974_vm0, %v7993_v13, 0.0  ;;  %v2588_v25 = vsel %vm1974_vm0, %v7997_v18, 0.0  ;;  %v3851_v55 = vadd.f32 %v3850_v34, %v3419_v49  ;;  %v3863_v7 = vadd.f32 %v3862_v29, %v3420_v42 }
 0x216   :  { %v2276_v11 = vmin.f32 %v2274_v19, %v2275_v46  ;;  %v2587_v37 = vadd.f32 %v2586_v59, %v2585_v26  ;;  %v3875_v44 = vadd.f32 %v3874_v10, %v3421_v27  ;;  %v3887_v41 = vadd.f32 %v3886_v61, %v3422_v31  ;;  %v5311_v31 = vld [vmem:[#allocation2 + $0x160] sm:$0xff] }
 0x217   :  { %v3423_v24 = vmul.f32 %v5305_v52, %v2872_v38  ;;  %v3424_v22 = vmul.f32 %v5306_v6, %v2872_v38  ;;  %v3425_v35 = vmul.f32 %v5307_v21, %v2872_v38  ;;  %v3426_v62 = vmul.f32 %v5308_v54, %v2872_v38  ;;  %v2907_v6 = vpop.permute.xlu0 %2906  ;;  %v5315_v52 = vld [vmem:[#allocation2 + $0x1a0] sm:$0xff] }
 0x218   :  { %v2277_v8 = vrot.slane %v2276_v11, 1  ;;  %v8017_v4 = vmul.f32 %v5309_v23, %v7974_v12  ;;  %v8020_v34 = vmul.f32 %v5310_v43, %v7974_v12  ;;  %v2589_v46 = vadd.f32 %v2588_v25, %v2587_v37  ;;  %v5312_v23 = vld [vmem:[#allocation2 + $0x168] sm:$0xff]  ;;  %v8029_v43 = vpop.permute.xlu1 %2876  ;;  %v5313_v25 = vld [vmem:[#allocation2 + $0x170] sm:$0xff] }
 0x219   :  { %v5251_v29 = vpop.eup %5250  ;;  %v3852_v49 = vadd.f32 %v3851_v55, %v3423_v24  ;;  %v3864_v19 = vadd.f32 %v3863_v7, %v3424_v22  ;;  %v3876_v10 = vadd.f32 %v3875_v44, %v3425_v35  ;;  %v3888_v61 = vadd.f32 %v3887_v41, %v3426_v62  ;;  %v5314_v7 = vld [vmem:[#allocation2 + $0x178] sm:$0xff]  ;;  %v5316_v35 = vld [vmem:[#allocation2 + $0x1a8] sm:$0xff] }
 0x21a   :  { %v2784_v42 = vmul.f32 %v5251_v29, %v7833_v56  ;;  %v2590_v27 = vsel %vm1974_vm0, %v8010_v47, 0.0  ;;  %v8025_v26 = vmul.f32 %v5311_v31, %v2897_v40  ;;  %v8027_v38 = vmul.f32 %v5312_v23, %v2897_v40 }
 0x21b   :  { %v2785_v12 = vmul.f32 %v5251_v29, %v7838_v51  ;;  %v2591_v59 = vadd.f32 %v2590_v27, %v2589_v46  ;;  %v8032_v55 = vmul.f32 %v5313_v25, %v2897_v40  ;;  %v8034_v37 = vmul.f32 %v5314_v7, %v2897_v40 }
 0x21c   :  { %3156 = vperm.xlu0 %4782, %v2784_v42   ;;  %v3853_v56 = vrot.slane %v3852_v49, 4  ;;  %v3865_v44 = vrot.slane %v3864_v19, 4  ;;  %v3877_v41 = vrot.slane %v3876_v10, 4  ;;  %v8036_v24 = vmul.f32 %v5315_v52, %v2907_v6 }
 0x21d   :  { %v8038_v22 = vmin.f32 %v2276_v11, %v2277_v8  ;;  %3161 = vperm.xlu1 %4783, %v2785_v12   ;;  %v2593_v21 = vadd.f32 %v7844_v1, %v2591_v59  ;;  %v3889_v51 = vrot.slane %v3888_v61, 4  ;;  %v8041_v54 = vmul.f32 %v5316_v35, %v2907_v6  ;;  %v2882_v59 = vpop.permute.xlu1 %2881 }
 0x21e   :  { %v2786_v62 = vmul.f32 %v5251_v29, %v7874_v2  ;;  %v3854_v40 = vadd.f32 %v3853_v56, %v3852_v49  ;;  %v3866_v46 = vadd.f32 %v3865_v44, %v3864_v19  ;;  %v3878_v42 = vadd.f32 %v3877_v41, %v3876_v10  ;;  %v5317_v19 = vld [vmem:[#allocation2 + $0x1b0] sm:$0xff]  ;;  %v9464_v56 = vld [vmem:[#allocation31_spill] sm:$0xff] }
 0x21f   :  { %9462 = vst [vmem:[#allocation43_spill] sm:$0xff] %v8038_v22  ;;  %v2788_v27 = vmul.f32 %v5251_v29, %v7887_v15  ;;  %v2594_v31 = vrot.slane %v2593_v21, 4  ;;  %v2787_v23 = vmul.f32 %v5251_v29, %v7878_v16  ;;  %v3890_v25 = vadd.f32 %v3889_v51, %v3888_v61 }
 0x220   :  { %3166 = vperm.xlu0 %4782, %v2786_v62   ;;  %v2790_v8 = vmul.f32 %v5251_v29, %v7899_v20  ;;  %v3855_v11 = vrot.slane %v3854_v40, 2  ;;  %v3867_v1 = vrot.slane %v3866_v46, 2  ;;  %v3879_v12 = vrot.slane %v3878_v42, 2  ;;  %v5318_v62 = vld [vmem:[#allocation2 + $0x1b8] sm:$0xff] }
 0x221   :  { %v8049_v7 = vsub.f32 %v7962_v32, %v8038_v22  ;;  %v2595_v2 = vadd.f32 %v2594_v31, %v2593_v21  ;;  %3171 = vperm.xlu1 %4783, %v2787_v23   ;;  %v3891_v49 = vrot.slane %v3890_v25, 2  ;;  %v8051_v15 = vmul.f32 %v5317_v19, %v2907_v6  ;;  %v9465_v32 = vld [vmem:[#allocation32_spill] sm:$0xff]  ;;  %v2892_v19 = vpop.permute.xlu1 %2891  ;;  %v2917_v22 = vpop.permute.xlu0 %2916 }
 0x222   :  { %v3856_v10 = vadd.f32 %v3855_v11, %v3854_v40  ;;  %v3868_v16 = vadd.f32 %v3867_v1, %v3866_v46  ;;  %v3880_v61 = vadd.f32 %v3879_v12, %v3878_v42  ;;  %v8055_v20 = vsub.f32 %v9464_v56, %v7751_v14  ;;  %v5319_v40 = vld [vmem:[#allocation2 + $0xe0] sm:$0xff] }
 0x223   :  { %9463 = vst [vmem:[#allocation28_spill] sm:$0xff] %v8049_v7  ;;  %v2596_v44 = vrot.slane %v2595_v2, 2  ;;  %v3892_v41 = vadd.f32 %v3891_v49, %v3890_v25  ;;  %v2789_v52 = vmul.f32 %v5251_v29, %v7627_v9  ;;  %v8060_v51 = vsub.f32 %v9465_v32, %v7751_v14  ;;  %v9466_v25 = vld [vmem:[#allocation30_spill] sm:$0xff]  ;;  %v5320_v29 = vld [vmem:[#allocation2 + $0xe8] sm:$0xff] }
 0x224   :  { %3176 = vperm.xlu0 %4782, %v2788_v27   ;;  %v3857_v21 = vrot.slane %v3856_v10, 1  ;;  %v3869_v35 = vrot.slane %v3868_v16, 1  ;;  %v8062_v31 = vmul.f32 %v5318_v62, %v2907_v6  ;;  %v3427_v46 = vmul.f32 %v5319_v40, %v8029_v43  ;;  %v5321_v27 = vld [vmem:[#allocation2 + $0xf0] sm:$0xff]  ;;  %v9467_v6 = vld [vmem:[#allocation34_spill] sm:$0xff] }
 0x225   :  { %v2597_v42 = vadd.f32 %v2596_v44, %v2595_v2  ;;  %v3881_v23 = vrot.slane %v3880_v61, 1  ;;  %v3893_v11 = vrot.slane %v3892_v41, 1  ;;  %3181 = vperm.xlu1 %4783, %v2789_v52   ;;  %v8067_v9 = vsub.f32 %v9466_v25, %v7751_v14  ;;  %v5322_v44 = vld [vmem:[#allocation2 + $0xf8] sm:$0xff]  ;;  %v9468_v32 = vld [vmem:[#allocation24_spill] sm:$0xff]  ;;  %v2927_v28 = vpop.permute.xlu0 %2926 }
 0x226   :  { %v3428_v1 = vmul.f32 %v5320_v29, %v8029_v43  ;;  %v3429_v12 = vmul.f32 %v5321_v27, %v8029_v43  ;;  %v8073_v49 = vsub.f32 %v9467_v6, %v7751_v14  ;;  %v2600_v2 = vsel %vm1974_vm0, %v8055_v20, 0.0  ;;  %v9471_v27 = vld [vmem:[#allocation33_spill] sm:$0xff] }
 0x227   :  { %v2598_v56 = vrot.slane %v2597_v42, 1  ;;  %v3430_v52 = vmul.f32 %v5322_v44, %v8029_v43  ;;  %v8080_v62 = vsub.f32 %v9468_v32, %v7751_v14  ;;  %v2601_v40 = vsel %vm1974_vm0, %v8060_v51, 0.0 }
 0x228   :  { %3186 = vperm.xlu0 %4782, %v2790_v8   ;;  %v8084_v25 = vadd.f32 %v3857_v21, %v3856_v10  ;;  %v8086_v29 = vadd.f32 %v3869_v35, %v3868_v16  ;;  %v8090_v6 = vsub.f32 %v9471_v27, %v7751_v14  ;;  %v2602_v7 = vadd.f32 %v2601_v40, %v2600_v2  ;;  %v5323_v10 = vld [vmem:[#allocation2 + $0x100] sm:$0xff]  ;;  %v5324_v21 = vld [vmem:[#allocation2 + $0x108] sm:$0xff]  ;;  %v2902_v27 = vpop.permute.xlu1 %2901 }
 0x229   :  { %v2599_v17 = vadd.f32 %v2598_v56, %v2597_v42  ;;  %v8092_v43 = vadd.f32 %v3881_v23, %v3880_v61  ;;  %v8094_v44 = vadd.f32 %v3893_v11, %v3892_v41  ;;  %v2603_v32 = vsel %vm1974_vm0, %v8067_v9, 0.0  ;;  %v5325_v42 = vld [vmem:[#allocation2 + $0x110] sm:$0xff]  ;;  %v5326_v23 = vld [vmem:[#allocation2 + $0x118] sm:$0xff] }
 0x22a   :  { %9469 = vst [vmem:[#allocation25_spill] sm:$0xff] %v8084_v25  ;;  %9470 = vst [vmem:[#allocation44_spill] sm:$0xff] %v8086_v29  ;;  %v2604_v57 = vadd.f32 %v2603_v32, %v2602_v7  ;;  %v2605_v8 = vsel %vm1974_vm0, %v8073_v49, 0.0  ;;  %v3431_v16 = vmul.f32 %v5323_v10, %v2882_v59  ;;  %v3432_v35 = vmul.f32 %v5324_v21, %v2882_v59  ;;  %v5327_v32 = vld [vmem:[#allocation2 + $0x1e0] sm:$0xff] }
 0x22b   :  { %9472 = vst [vmem:[#allocation27_spill] sm:$0xff] %v8092_v43  ;;  %9473 = vst [vmem:[#allocation45_spill] sm:$0xff] %v8094_v44  ;;  %v2705_v14 = vadd.f32 1e-10, %v2599_v17  ;;  %v2607_v2 = vsel %vm1974_vm0, %v8080_v62, 0.0  ;;  %v3433_v61 = vmul.f32 %v5325_v42, %v2882_v59  ;;  %v3434_v41 = vmul.f32 %v5326_v23, %v2882_v59  ;;  %v5328_v43 = vld [vmem:[#allocation2 + $0x1e8] sm:$0xff] }
 0x22c   :  { %v2606_v11 = vadd.f32 %v2605_v8, %v2604_v57  ;;  %v2611_v56 = vsel %vm1974_vm0, %v8090_v6, 0.0  ;;  %v3895_v7 = vadd.f32 %v3431_v16, %v3427_v46  ;;  %v3907_v40 = vadd.f32 %v3432_v35, %v3428_v1  ;;  %v5331_v57 = vld [vmem:[#allocation2 + $0x150] sm:$0xff]  ;;  %v5332_v23 = vld [vmem:[#allocation2 + $0x158] sm:$0xff] }
 0x22d   :  { %5252 = vrcp.f32 %v2705_v14  ;;  %v3459_v10 = vmul.f32 %v5327_v32, %v2917_v22  ;;  %v3919_v44 = vadd.f32 %v3433_v61, %v3429_v12  ;;  %v3931_v21 = vadd.f32 %v3434_v41, %v3430_v52  ;;  %v5333_v12 = vld [vmem:[#allocation2 + $0x1f0] sm:$0xff]  ;;  %v5336_v41 = vld [vmem:[#allocation2 + $0x228] sm:$0xff] }
 0x22e   :  { %v2608_v17 = vadd.f32 %v2607_v2, %v2606_v11  ;;  %v3460_v29 = vmul.f32 %v5328_v43, %v2917_v22  ;;  %v3439_v42 = vmul.f32 %v5329_v58, %v2892_v19  ;;  %v3440_v59 = vmul.f32 %v5330_v50, %v2892_v19  ;;  %v5334_v58 = vld [vmem:[#allocation2 + $0x1f8] sm:$0xff]  ;;  %v5335_v50 = vld [vmem:[#allocation2 + $0x220] sm:$0xff] }
 0x22f   :  { %v3441_v8 = vmul.f32 %v5331_v57, %v2892_v19  ;;  %v3442_v25 = vmul.f32 %v5332_v23, %v2892_v19  ;;  %v3896_v46 = vadd.f32 %v3895_v7, %v7989_v60  ;;  %v3908_v1 = vadd.f32 %v3907_v40, %v8006_v3  ;;  %v2912_v7 = vpop.permute.xlu1 %2911  ;;  %v5337_v40 = vld [vmem:[#allocation2 + $0x180] sm:$0xff] }
 0x230   :  { %v2610_v16 = vadd.f32 %v7851_v30, %v2608_v17  ;;  %v8107_v52 = vmul.f32 %v5333_v12, %v2917_v22  ;;  %v3920_v43 = vadd.f32 %v3919_v44, %v8017_v4  ;;  %v3932_v35 = vadd.f32 %v3931_v21, %v8020_v34  ;;  %v5338_v4 = vld [vmem:[#allocation2 + $0x188] sm:$0xff]  ;;  %v5339_v34 = vld [vmem:[#allocation2 + $0x190] sm:$0xff] }
 0x231   :  { %v8111_v14 = vmul.f32 %v5334_v58, %v2917_v22  ;;  %v8113_v2 = vmul.f32 %v5335_v50, %v2927_v28  ;;  %v3897_v19 = vadd.f32 %v3896_v46, %v3439_v42  ;;  %v3909_v61 = vadd.f32 %v3908_v1, %v3440_v59  ;;  %v5340_v22 = vld [vmem:[#allocation2 + $0x198] sm:$0xff]  ;;  %v5341_v59 = vld [vmem:[#allocation2 + $0x230] sm:$0xff] }
 0x232   :  { %v2612_v60 = vadd.f32 %v2611_v56, %v2610_v16  ;;  %v8115_v3 = vmul.f32 %v5336_v41, %v2927_v28  ;;  %v3921_v30 = vadd.f32 %v3920_v43, %v3441_v8  ;;  %v3933_v11 = vadd.f32 %v3932_v35, %v3442_v25  ;;  %v5342_v8 = vld [vmem:[#allocation2 + $0x1c0] sm:$0xff]  ;;  %v5343_v16 = vld [vmem:[#allocation2 + $0x1c8] sm:$0xff]  ;;  %v2937_v35 = vpop.permute.xlu0 %2936 }
 0x233   :  { %v3447_v32 = vmul.f32 %v5337_v40, %v2902_v27  ;;  %v3448_v44 = vmul.f32 %v5338_v4, %v2902_v27  ;;  %v3449_v21 = vmul.f32 %v5339_v34, %v2902_v27  ;;  %v3450_v17 = vmul.f32 %v5340_v22, %v2902_v27  ;;  %v5346_v40 = vld [vmem:[#allocation2 + $0x1d8] sm:$0xff]  ;;  %v5347_v34 = vld [vmem:[#allocation2 + $0x260] sm:$0xff] }
 0x234   :  { %v2613_v57 = vrot.slane %v2612_v60, 4  ;;  %v3898_v23 = vadd.f32 %v3897_v19, %v8025_v26  ;;  %v3910_v42 = vadd.f32 %v3909_v61, %v8027_v38  ;;  %v3922_v56 = vadd.f32 %v3921_v30, %v8032_v55  ;;  %v5344_v38 = vld [vmem:[#allocation2 + $0x1d0] sm:$0xff] }
 0x235   :  { %v8120_v46 = vmul.f32 %v5341_v59, %v2927_v28  ;;  %v3934_v25 = vadd.f32 %v3933_v11, %v8034_v37  ;;  %v3455_v1 = vmul.f32 %v5342_v8, %v2912_v7  ;;  %v3456_v12 = vmul.f32 %v5343_v16, %v2912_v7 }
 0x236   :  { %v2614_v43 = vadd.f32 %v2613_v57, %v2612_v60  ;;  %v3899_v58 = vadd.f32 %v3898_v23, %v3447_v32  ;;  %v3911_v27 = vadd.f32 %v3910_v42, %v3448_v44  ;;  %v3923_v50 = vadd.f32 %v3922_v56, %v3449_v21  ;;  %v5345_v60 = vld [vmem:[#allocation2 + $0x238] sm:$0xff] }
 0x237   :  { %v8123_v41 = vpop.eup %5252  ;;  %v3935_v26 = vadd.f32 %v3934_v25, %v3450_v17  ;;  %v3457_v19 = vmul.f32 %v5344_v38, %v2912_v7  ;;  %v8125_v55 = vadd.f32 %v3459_v10, %v3455_v1  ;;  %v8127_v61 = vadd.f32 %v3460_v29, %v3456_v12 }
 0x238   :  { %v2793_v37 = vmul.f32 %v8123_v41, %v7982_v45  ;;  %v2792_v30 = vmul.f32 %v8123_v41, %v7978_v63  ;;  %v8133_v11 = vmul.f32 %v5345_v60, %v2927_v28  ;;  %v3458_v32 = vmul.f32 %v5346_v40, %v2912_v7  ;;  %v2947_v40 = vpop.permute.xlu0 %2946 }
 0x239   :  { %v2795_v4 = vmul.f32 %v8123_v41, %v7993_v13  ;;  %v2615_v44 = vrot.slane %v2614_v43, 2  ;;  %v8137_v10 = vmul.f32 %v5347_v34, %v2937_v35  ;;  %v3900_v29 = vadd.f32 %v3899_v58, %v8036_v24 }
 0x23a   :  { %v8142_v45 = vsel %vm1974_vm0, %v7931_v0, 0.0  ;;  %3196 = vperm.xlu0 %4782, %v2793_v37   ;;  %3191 = vperm.xlu1 %4783, %v2792_v30   ;;  %v3912_v28 = vadd.f32 %v3911_v27, %v8041_v54  ;;  %v3924_v63 = vadd.f32 %v3923_v50, %v8051_v15  ;;  %v3936_v7 = vadd.f32 %v3935_v26, %v8062_v31  ;;  %v5348_v54 = vld [vmem:[#allocation2 + $0x268] sm:$0xff]  ;;  %v5349_v15 = vld [vmem:[#allocation2 + $0x270] sm:$0xff]  ;;  %v5350_v37 = vld [vmem:[#allocation2 + $0x278] sm:$0xff] }
 0x23b   :  { %v2616_v21 = vadd.f32 %v2615_v44, %v2614_v43  ;;  %v2794_v13 = vmul.f32 %v8123_v41, %v7986_v39  ;;  %v3901_v22 = vrot.slane %v3900_v29, 4  ;;  %v8150_v17 = vadd.f32 %v8107_v52, %v3457_v19  ;;  %v9474_v26 = vld [vmem:[#allocation35_spill] sm:$0xff] }
 0x23c   :  { %v3913_v24 = vrot.slane %v3912_v28, 4  ;;  %v3925_v57 = vrot.slane %v3924_v63, 4  ;;  %v3937_v23 = vrot.slane %v3936_v7, 4  ;;  %v8153_v42 = vadd.f32 %v8111_v14, %v3458_v32 }
 0x23d   :  { %v2617_v56 = vrot.slane %v2616_v21, 1  ;;  %v8155_v59 = vmul.f32 %v5348_v54, %v2937_v35  ;;  %v8157_v31 = vmul.f32 %v5349_v15, %v2937_v35  ;;  %v3902_v25 = vadd.f32 %v3901_v22, %v3900_v29  ;;  %v2922_v29 = vpop.permute.xlu1 %2921  ;;  %v5354_v15 = vld [vmem:[#allocation2 + $0x2b8] sm:$0xff] }
 0x23e   :  { %v8161_v39 = vsel %vm1974_vm0, %v7943_v5, 0.0  ;;  %3206 = vperm.xlu0 %4782, %v2795_v4   ;;  %3201 = vperm.xlu1 %4783, %v2794_v13   ;;  %v3914_v52 = vadd.f32 %v3913_v24, %v3912_v28  ;;  %v3926_v8 = vadd.f32 %v3925_v57, %v3924_v63  ;;  %v3938_v1 = vadd.f32 %v3937_v23, %v3936_v7  ;;  %v9476_v28 = vld [vmem:[#allocation37_spill] sm:$0xff]  ;;  %v5351_v13 = vld [vmem:[#allocation2 + $0x2a0] sm:$0xff]  ;;  %v5352_v24 = vld [vmem:[#allocation2 + $0x2a8] sm:$0xff] }
 0x23f   :  { %v2797_v14 = vmul.f32 %v8123_v41, %v8010_v47  ;;  %v2618_v16 = vadd.f32 %v2617_v56, %v2616_v21  ;;  %v2796_v12 = vmul.f32 %v8123_v41, %v7997_v18  ;;  %v3903_v43 = vrot.slane %v3902_v25, 2  ;;  %v9475_v47 = vld [vmem:[#allocation36_spill] sm:$0xff] }
 0x240   :  { %v3915_v58 = vrot.slane %v3914_v52, 2  ;;  %v3927_v27 = vrot.slane %v3926_v8, 2  ;;  %v3939_v50 = vrot.slane %v3938_v1, 2  ;;  %v8169_v38 = vsub.f32 %v9474_v26, %v7854_v33  ;;  %v5353_v23 = vld [vmem:[#allocation2 + $0x2b0] sm:$0xff] }
 0x241   :  { %v2706_v19 = vadd.f32 1e-10, %v2618_v16  ;;  %v8171_v30 = vmul.f32 %v5350_v37, %v2937_v35  ;;  %v3904_v60 = vadd.f32 %v3903_v43, %v3902_v25  ;;  %v8175_v32 = vsub.f32 %v9475_v47, %v7854_v33  ;;  %v9479_v43 = vld [vmem:[#allocation39_spill] sm:$0xff] }
 0x242   :  { %v8179_v18 = vsel %vm1974_vm0, %v7966_v36, 0.0  ;;  %3216 = vperm.xlu0 %4782, %v2797_v14   ;;  %3211 = vperm.xlu1 %4783, %v2796_v12   ;;  %v3916_v4 = vadd.f32 %v3915_v58, %v3914_v52  ;;  %v3928_v44 = vadd.f32 %v3927_v27, %v3926_v8  ;;  %v3940_v34 = vadd.f32 %v3939_v50, %v3938_v1  ;;  %v9478_v14 = vld [vmem:[#allocation41_spill] sm:$0xff]  ;;  %v5355_v50 = vld [vmem:[#allocation2 + $0x200] sm:$0xff] }
 0x243   :  { %5254 = vrcp.f32 %v2706_v19  ;;  %v2798_v35 = vmul.f32 %v8123_v41, %v7817_v53  ;;  %v8185_v63 = vsub.f32 %v9476_v28, %v7854_v33  ;;  %v2619_v7 = vsel %vm1974_vm0, %v8169_v38, 0.0  ;;  %v9477_v41 = vld [vmem:[#allocation38_spill] sm:$0xff]  ;;  %v5356_v19 = vld [vmem:[#allocation2 + $0x208] sm:$0xff]  ;;  %v5357_v28 = vld [vmem:[#allocation2 + $0x210] sm:$0xff] }
 0x244   :  { %v3905_v21 = vrot.slane %v3904_v60, 1  ;;  %v8189_v22 = vmul.f32 %v5351_v13, %v2947_v40  ;;  %v8191_v57 = vmul.f32 %v5352_v24, %v2947_v40  ;;  %v8193_v56 = vmul.f32 %v5353_v23, %v2947_v40  ;;  %v5358_v24 = vld [vmem:[#allocation2 + $0x218] sm:$0xff] }
 0x245   :  { %v3917_v54 = vrot.slane %v3916_v4, 1  ;;  %v8195_v53 = vmul.f32 %v5354_v15, %v2947_v40  ;;  %v8199_v25 = vsub.f32 %v9477_v41, %v7854_v33  ;;  %v2620_v52 = vsel %vm1974_vm0, %v8175_v32, 0.0  ;;  %v2957_v40 = vpop.permute.xlu0 %2956 }
 0x246   :  { %v3929_v8 = vrot.slane %v3928_v44, 1  ;;  %v3941_v1 = vrot.slane %v3940_v34, 1  ;;  %3221 = vperm.xlu1 %4783, %v2798_v35   ;;  %v8205_v16 = vsub.f32 %v9478_v14, %v7854_v33  ;;  %v2621_v12 = vadd.f32 %v2620_v52, %v2619_v7  ;;  %v2932_v7 = vpop.permute.xlu1 %2931 }
 0x247   :  { %v8209_v58 = vsub.f32 %v9479_v43, %v7854_v33  ;;  %v2622_v27 = vsel %vm1974_vm0, %v8185_v63, 0.0  ;;  %v3463_v26 = vmul.f32 %v5355_v50, %v2922_v29  ;;  %v3464_v37 = vmul.f32 %v5356_v19, %v2922_v29  ;;  %v5359_v43 = vld [vmem:[#allocation2 + $0x240] sm:$0xff]  ;;  %v5362_v19 = vld [vmem:[#allocation2 + $0x258] sm:$0xff] }
 0x248   :  { %v8213_v47 = vadd.f32 %v3905_v21, %v3904_v60  ;;  %v2623_v35 = vadd.f32 %v2622_v27, %v2621_v12  ;;  %v3465_v13 = vmul.f32 %v5357_v28, %v2922_v29  ;;  %v3466_v23 = vmul.f32 %v5358_v24, %v2922_v29  ;;  %v5360_v27 = vld [vmem:[#allocation2 + $0x248] sm:$0xff] }
 0x249   :  { %v8215_v15 = vadd.f32 %v3917_v54, %v3916_v4  ;;  %v2624_v33 = vsel %vm1974_vm0, %v8199_v25, 0.0  ;;  %v3944_v41 = vadd.f32 %v8125_v55, %v3463_v26  ;;  %v3956_v52 = vadd.f32 %v8127_v61, %v3464_v37  ;;  %v5361_v54 = vld [vmem:[#allocation2 + $0x250] sm:$0xff] }
 0x24a   :  { %v2625_v14 = vadd.f32 %v2624_v33, %v2623_v35  ;;  %v2626_v60 = vsel %vm1974_vm0, %v8205_v16, 0.0  ;;  %v3968_v21 = vadd.f32 %v8150_v17, %v3465_v13  ;;  %v3980_v12 = vadd.f32 %v8153_v42, %v3466_v23  ;;  %v2967_v23 = vpop.permute.xlu0 %2966  ;;  %v5363_v33 = vld [vmem:[#allocation2 + $0x2e0] sm:$0xff] }
 0x24b   :  { %v3471_v29 = vmul.f32 %v5359_v43, %v2932_v7  ;;  %v3472_v4 = vmul.f32 %v5360_v27, %v2932_v7  ;;  %v3473_v50 = vmul.f32 %v5361_v54, %v2932_v7  ;;  %v3474_v28 = vmul.f32 %v5362_v19, %v2932_v7  ;;  %v5368_v19 = vld [vmem:[#allocation2 + $0x280] sm:$0xff] }
 0x24c   :  { %v2627_v24 = vadd.f32 %v2626_v60, %v2625_v14  ;;  %v3945_v55 = vadd.f32 %v3944_v41, %v8113_v2  ;;  %v3957_v61 = vadd.f32 %v3956_v52, %v8115_v3  ;;  %v3969_v26 = vadd.f32 %v3968_v21, %v8120_v46  ;;  %v5364_v3 = vld [vmem:[#allocation2 + $0x2e8] sm:$0xff]  ;;  %v5365_v46 = vld [vmem:[#allocation2 + $0x2f0] sm:$0xff]  ;;  %v5366_v52 = vld [vmem:[#allocation2 + $0x2f8] sm:$0xff] }
 0x24d   :  { %v5255_v37 = vpop.eup %5254  ;;  %v8228_v35 = vadd.f32 %v3929_v8, %v3928_v44  ;;  %v8230_v17 = vadd.f32 %v3941_v1, %v3940_v34  ;;  %v2628_v42 = vsel %vm1974_vm0, %v8209_v58, 0.0  ;;  %v3981_v13 = vadd.f32 %v3980_v12, %v8133_v11  ;;  %v2942_v34 = vpop.permute.xlu1 %2941  ;;  %v5367_v12 = vld [vmem:[#allocation2 + $0x320] sm:$0xff] }
 0x24e   :  { %v2800_v7 = vmul.f32 %v5255_v37, %v8055_v20  ;;  %v8236_v2 = vmul.f32 %v5363_v33, %v2957_v40  ;;  %v8238_v41 = vmul.f32 %v5364_v3, %v2957_v40  ;;  %v8240_v44 = vmul.f32 %v5365_v46, %v2957_v40  ;;  %v5371_v3 = vld [vmem:[#allocation2 + $0x298] sm:$0xff] }
 0x24f   :  { %v2801_v8 = vmul.f32 %v5255_v37, %v8060_v51  ;;  %v2629_v1 = vadd.f32 %v2628_v42, %v2627_v24  ;;  %v8243_v14 = vmul.f32 %v5366_v52, %v2957_v40  ;;  %v3946_v11 = vadd.f32 %v3945_v55, %v3471_v29  ;;  %v5369_v51 = vld [vmem:[#allocation2 + $0x288] sm:$0xff]  ;;  %v5370_v42 = vld [vmem:[#allocation2 + $0x290] sm:$0xff] }
 0x250   :  { %3226 = vperm.xlu0 %4782, %v2800_v7   ;;  %v3958_v60 = vadd.f32 %v3957_v61, %v3472_v4  ;;  %v3970_v20 = vadd.f32 %v3969_v26, %v3473_v50  ;;  %v3982_v21 = vadd.f32 %v3981_v13, %v3474_v28  ;;  %v8245_v43 = vmul.f32 %v5367_v12, %v2967_v23  ;;  %v5373_v13 = vld [vmem:[#allocation2 + $0x330] sm:$0xff] }
 0x251   :  { %v2802_v27 = vmul.f32 %v5255_v37, %v8067_v9  ;;  %3231 = vperm.xlu1 %4783, %v2801_v8   ;;  %v2631_v54 = vadd.f32 %v8142_v45, %v2629_v1  ;;  %v3479_v33 = vmul.f32 %v5368_v19, %v2942_v34  ;;  %v3480_v24 = vmul.f32 %v5369_v51, %v2942_v34  ;;  %v5372_v45 = vld [vmem:[#allocation2 + $0x328] sm:$0xff] }
 0x252   :  { %v3481_v40 = vmul.f32 %v5370_v42, %v2942_v34  ;;  %v3482_v29 = vmul.f32 %v5371_v3, %v2942_v34  ;;  %v3947_v4 = vadd.f32 %v3946_v11, %v8137_v10  ;;  %v3959_v50 = vadd.f32 %v3958_v60, %v8155_v59 }
 0x253   :  { %v2632_v28 = vrot.slane %v2631_v54, 4  ;;  %v2803_v55 = vmul.f32 %v5255_v37, %v8073_v49  ;;  %v3971_v9 = vadd.f32 %v3970_v20, %v8157_v31  ;;  %v3983_v61 = vadd.f32 %v3982_v21, %v8171_v30  ;;  %v5374_v31 = vld [vmem:[#allocation2 + $0x338] sm:$0xff] }
 0x254   :  { %3236 = vperm.xlu0 %4782, %v2802_v27   ;;  %v8254_v26 = vmul.f32 %v5372_v45, %v2967_v23  ;;  %v8256_v7 = vmul.f32 %v5373_v13, %v2967_v23  ;;  %v3948_v46 = vadd.f32 %v3947_v4, %v3479_v33  ;;  %v3960_v34 = vadd.f32 %v3959_v50, %v3480_v24  ;;  %v9481_v33 = vld [vmem:[#allocation20_spill] sm:$0xff]  ;;  %v9486_v45 = vld [vmem:[#allocation42_spill] sm:$0xff] }
 0x255   :  { %v2804_v10 = vmul.f32 %v5255_v37, %v8080_v62  ;;  %v2633_v8 = vadd.f32 %v2632_v28, %v2631_v54  ;;  %3241 = vperm.xlu1 %4783, %v2803_v55   ;;  %v3972_v59 = vadd.f32 %v3971_v9, %v3481_v40  ;;  %v3984_v1 = vadd.f32 %v3983_v61, %v3482_v29  ;;  %v9480_v62 = vld [vmem:[#allocation25_spill] sm:$0xff]  ;;  %v9484_v29 = vld [vmem:[#allocation44_spill] sm:$0xff]  ;;  %v2977_v61 = vpop.permute.xlu0 %2976 }
 0x256   :  { %v2806_v49 = vmul.f32 %v5255_v37, %v8090_v6  ;;  %v8260_v52 = vmul.f32 %v5374_v31, %v2967_v23  ;;  %v3949_v30 = vrot.slane %v3948_v46, 4  ;;  %v3961_v11 = vrot.slane %v3960_v34, 4  ;;  %v9482_v6 = vld [vmem:[#allocation40_spill] sm:$0xff] }
 0x257   :  { %v2634_v60 = vrot.slane %v2633_v8, 2  ;;  %v2805_v20 = vmul.f32 %v5255_v37, %v7821_v48  ;;  %v3973_v21 = vrot.slane %v3972_v59, 4  ;;  %v3985_v12 = vrot.slane %v3984_v1, 4  ;;  %v9483_v48 = vld [vmem:[#allocation12_spill] sm:$0xff] }
 0x258   :  { %3246 = vperm.xlu0 %4782, %v2804_v10   ;;  %v3950_v27 = vadd.f32 %v3949_v30, %v3948_v46  ;;  %v3962_v19 = vadd.f32 %v3961_v11, %v3960_v34  ;;  %v8266_v54 = vsel %vm4679_vm1, %v8213_v47, %v9480_v62  ;;  %v8270_v51 = vsub.f32 %v9482_v6, %v9481_v33  ;;  %v9485_v47 = vld [vmem:[#allocation27_spill] sm:$0xff] }
 0x259   :  { %v2635_v23 = vadd.f32 %v2634_v60, %v2633_v8  ;;  %3251 = vperm.xlu1 %4783, %v2805_v20   ;;  %v3974_v24 = vadd.f32 %v3973_v21, %v3972_v59  ;;  %v3986_v42 = vadd.f32 %v3985_v12, %v3984_v1  ;;  %v8274_v37 = vsub.f32 %v9483_v48, %v9481_v33  ;;  %v2952_v8 = vpop.permute.xlu1 %2951  ;;  %v9488_v60 = vld [vmem:[#allocation45_spill] sm:$0xff]  ;;  %v5375_v20 = vld [vmem:[#allocation2 + $0x360] sm:$0xff] }
 0x25a   :  { %v3951_v40 = vrot.slane %v3950_v27, 2  ;;  %v3963_v3 = vrot.slane %v3962_v19, 2  ;;  %v8279_v4 = vsel %vm4679_vm1, %v8215_v15, %v9484_v29  ;;  %v8284_v50 = vsel %vm4679_vm1, %v8228_v35, %v9485_v47  ;;  %v9487_v15 = vld [vmem:[#allocation14_spill] sm:$0xff]  ;;  %v9489_v62 = vld [vmem:[#allocation11_spill] sm:$0xff]  ;;  %v9490_v47 = vld [vmem:[#allocation16_spill] sm:$0xff] }
 0x25b   :  { %v2636_v28 = vrot.slane %v2635_v23, 1  ;;  %v3975_v55 = vrot.slane %v3974_v24, 2  ;;  %v3987_v9 = vrot.slane %v3986_v42, 2  ;;  %v8288_v13 = vsub.f32 %v9486_v45, %v9481_v33  ;;  %v5378_v45 = vld [vmem:[#allocation2 + $0x378] sm:$0xff] }
 0x25c   :  { %3256 = vperm.xlu0 %4782, %v2806_v49   ;;  %v3952_v46 = vadd.f32 %v3951_v40, %v3950_v27  ;;  %v3964_v34 = vadd.f32 %v3963_v3, %v3962_v19  ;;  %v8292_v10 = vsub.f32 %v9487_v15, %v9481_v33  ;;  %v2638_v35 = vsel %vm1974_vm0, %v8270_v51, 0.0  ;;  %v5377_v40 = vld [vmem:[#allocation2 + $0x370] sm:$0xff] }
 0x25d   :  { %v2637_v59 = vadd.f32 %v2636_v28, %v2635_v23  ;;  %v3976_v1 = vadd.f32 %v3975_v55, %v3974_v24  ;;  %v3988_v31 = vadd.f32 %v3987_v9, %v3986_v42  ;;  %v2639_v30 = vsel %vm1974_vm0, %v8274_v37, 0.0  ;;  %v5376_v42 = vld [vmem:[#allocation2 + $0x368] sm:$0xff] }
 0x25e   :  { %v3953_v11 = vrot.slane %v3952_v46, 1  ;;  %v4707_v49 = vsel %vm4679_vm1, %v8230_v17, %v9488_v60  ;;  %v8301_v21 = vmul.f32 %v5375_v20, %v2977_v61  ;;  %v2640_v12 = vadd.f32 %v2639_v30, %v2638_v35  ;;  %v2962_v60 = vpop.permute.xlu1 %2961 }
 0x25f   :  { %v2707_v27 = vadd.f32 1e-10, %v2637_v59  ;;  %v3965_v19 = vrot.slane %v3964_v34, 1  ;;  %v8305_v6 = vsub.f32 %v9489_v62, %v9481_v33  ;;  %v2641_v23 = vsel %vm1974_vm0, %v8288_v13, 0.0  ;;  %v5379_v59 = vld [vmem:[#allocation2 + $0x2c0] sm:$0xff] }
 0x260   :  { %v3977_v24 = vrot.slane %v3976_v1, 1  ;;  %v8309_v48 = vmul.f32 %v5376_v42, %v2977_v61  ;;  %v8311_v3 = vmul.f32 %v5377_v40, %v2977_v61  ;;  %v2642_v17 = vadd.f32 %v2641_v23, %v2640_v12  ;;  %v5381_v23 = vld [vmem:[#allocation2 + $0x2d0] sm:$0xff] }
 0x261   :  { %5256 = vrcp.f32 %v2707_v27  ;;  %v3989_v29 = vrot.slane %v3988_v31, 1  ;;  %v8315_v28 = vsub.f32 %v9490_v47, %v9481_v33  ;;  %v2643_v55 = vsel %vm1974_vm0, %v8292_v10, 0.0  ;;  %v5380_v27 = vld [vmem:[#allocation2 + $0x2c8] sm:$0xff]  ;;  %v5382_v47 = vld [vmem:[#allocation2 + $0x2d8] sm:$0xff] }
 0x262   :  { %v3954_v9 = vadd.f32 %v3953_v11, %v3952_v46  ;;  %v8319_v15 = vmul.f32 %v5378_v45, %v2977_v61  ;;  %v2644_v35 = vadd.f32 %v2643_v55, %v2642_v17  ;;  %v3487_v30 = vmul.f32 %v5379_v59, %v2952_v8  ;;  %v2987_v61 = vpop.permute.xlu0 %2986  ;;  %v5386_v59 = vld [vmem:[#allocation2 + $0x318] sm:$0xff] }
 0x263   :  { %9491 = vst [vmem:[#allocation29_spill] sm:$0xff] %v8315_v28  ;;  %v3966_v20 = vadd.f32 %v3965_v19, %v3964_v34  ;;  %v2645_v12 = vsel %vm1974_vm0, %v8305_v6, 0.0  ;;  %v3488_v62 = vmul.f32 %v5380_v27, %v2952_v8  ;;  %v3489_v33 = vmul.f32 %v5381_v23, %v2952_v8 }
 0x264   :  { %v3978_v42 = vadd.f32 %v3977_v24, %v3976_v1  ;;  %v2646_v40 = vadd.f32 %v2645_v12, %v2644_v35  ;;  %v3490_v36 = vmul.f32 %v5382_v47, %v2952_v8  ;;  %v3991_v46 = vadd.f32 %v3487_v30, %v8189_v22  ;;  %v5383_v8 = vld [vmem:[#allocation2 + $0x300] sm:$0xff]  ;;  %v5384_v22 = vld [vmem:[#allocation2 + $0x308] sm:$0xff] }
 0x265   :  { %v3990_v11 = vadd.f32 %v3989_v29, %v3988_v31  ;;  %v2649_v17 = vsel %vm1974_vm0, %v8315_v28, 0.0  ;;  %v4003_v34 = vadd.f32 %v3488_v62, %v8191_v57  ;;  %v4015_v19 = vadd.f32 %v3489_v33, %v8193_v56  ;;  %v5385_v31 = vld [vmem:[#allocation2 + $0x310] sm:$0xff] }
 0x266   :  { %v8330_v55 = vsel %vm4681_vm2, %v3954_v9, %v8266_v54  ;;  %v2648_v1 = vadd.f32 %v8161_v39, %v2646_v40  ;;  %v4027_v24 = vadd.f32 %v3490_v36, %v8195_v53  ;;  %v3495_v45 = vmul.f32 %v5383_v8, %v2962_v60  ;;  %v2972_v39 = vpop.permute.xlu1 %2971  ;;  %v5389_v40 = vld [vmem:[#allocation2 + $0x3b0] sm:$0xff]  ;;  %v5393_v8 = vld [vmem:[#allocation2 + $0x3e0] sm:$0xff] }
 0x267   :  { %v3496_v35 = vmul.f32 %v5384_v22, %v2962_v60  ;;  %v3497_v29 = vmul.f32 %v5385_v31, %v2962_v60  ;;  %v3498_v30 = vmul.f32 %v5386_v59, %v2962_v60  ;;  %v3992_v57 = vadd.f32 %v3991_v46, %v8236_v2  ;;  %v5387_v2 = vld [vmem:[#allocation2 + $0x3a0] sm:$0xff]  ;;  %v5394_v22 = vld [vmem:[#allocation2 + $0x350] sm:$0xff]  ;;  %v5395_v31 = vld [vmem:[#allocation2 + $0x358] sm:$0xff] }
 0x268   :  { %v2650_v12 = vadd.f32 %v2649_v17, %v2648_v1  ;;  %v4004_v56 = vadd.f32 %v4003_v34, %v8238_v41  ;;  %v4016_v54 = vadd.f32 %v4015_v19, %v8240_v44  ;;  %v4028_v9 = vadd.f32 %v4027_v24, %v8243_v14  ;;  %v8351_v14 = vpop.permute.xlu0 %2996  ;;  %v5391_v34 = vld [vmem:[#allocation2 + $0x348] sm:$0xff]  ;;  %v5392_v1 = vld [vmem:[#allocation2 + $0x3b8] sm:$0xff] }
 0x269   :  { %v8340_v36 = vsel %vm4681_vm2, %v3966_v20, %v8279_v4  ;;  %v8344_v53 = vsel %vm4681_vm2, %v3978_v42, %v8284_v50  ;;  %v8347_v60 = vsel %vm4681_vm2, %v3990_v11, %v4707_v49  ;;  %v8349_v27 = vmul.f32 %v5387_v2, %v2987_v61  ;;  %v5388_v4 = vld [vmem:[#allocation2 + $0x3a8] sm:$0xff]  ;;  %v5390_v49 = vld [vmem:[#allocation2 + $0x340] sm:$0xff] }
 0x26a   :  { %v2651_v41 = vrot.slane %v2650_v12, 4  ;;  %v3993_v62 = vadd.f32 %v3992_v57, %v3495_v45  ;;  %v4005_v44 = vadd.f32 %v4004_v56, %v3496_v35  ;;  %v4017_v23 = vadd.f32 %v4016_v54, %v3497_v29 }
 0x26b   :  { %v8353_v33 = vpop.eup %5256  ;;  %v8355_v20 = vmul.f32 %v5388_v4, %v2987_v61  ;;  %v8357_v50 = vmul.f32 %v5389_v40, %v2987_v61  ;;  %v4029_v42 = vadd.f32 %v4028_v9, %v3498_v30  ;;  %v3503_v47 = vmul.f32 %v5390_v49, %v2972_v39 }
 0x26c   :  { %v2809_v46 = vmul.f32 %v8353_v33, %v8175_v32  ;;  %v2808_v11 = vmul.f32 %v8353_v33, %v8169_v38  ;;  %v2652_v17 = vadd.f32 %v2651_v41, %v2650_v12  ;;  %v3504_v19 = vmul.f32 %v5391_v34, %v2972_v39  ;;  %v5396_v12 = vld [vmem:[#allocation2 + $0x3e8] sm:$0xff]  ;;  %v5397_v41 = vld [vmem:[#allocation2 + $0x3f0] sm:$0xff] }
 0x26d   :  { %v8363_v24 = vmul.f32 %v5392_v1, %v2987_v61  ;;  %v8366_v45 = vmul.f32 %v5393_v8, %v8351_v14  ;;  %v3505_v35 = vmul.f32 %v5394_v22, %v2972_v39  ;;  %v3506_v29 = vmul.f32 %v5395_v31, %v2972_v39 }
 0x26e   :  { %3266 = vperm.xlu0 %4782, %v2809_v46   ;;  %3261 = vperm.xlu1 %4783, %v2808_v11   ;;  %v2653_v32 = vrot.slane %v2652_v17, 2  ;;  %v3994_v59 = vadd.f32 %v3993_v62, %v8245_v43  ;;  %v4006_v38 = vadd.f32 %v4005_v44, %v8254_v26  ;;  %v4018_v30 = vadd.f32 %v4017_v23, %v8256_v7  ;;  %v9492_v62 = vld [vmem:[#allocation49_spill] sm:$0xff]  ;;  %v9495_v46 = vld [vmem:[#allocation15_spill] sm:$0xff] }
 0x26f   :  { %v2811_v61 = vmul.f32 %v8353_v33, %v8199_v25  ;;  %v2810_v57 = vmul.f32 %v8353_v33, %v8185_v63  ;;  %v8376_v56 = vmul.f32 %v5396_v12, %v8351_v14  ;;  %v4030_v54 = vadd.f32 %v4029_v42, %v8260_v52  ;;  %v9493_v25 = vld [vmem:[#allocation22_spill] sm:$0xff]  ;;  %v9494_v63 = vld [vmem:[#allocation13_spill] sm:$0xff] }
 0x270   :  { %v2654_v9 = vadd.f32 %v2653_v32, %v2652_v17  ;;  %v3995_v39 = vadd.f32 %v3994_v59, %v3503_v47  ;;  %v4007_v2 = vadd.f32 %v4006_v38, %v3504_v19  ;;  %v4019_v43 = vadd.f32 %v4018_v30, %v3505_v35  ;;  %v9496_v17 = vld [vmem:[#allocation17_spill] sm:$0xff]  ;;  %v2982_v35 = vpop.permute.xlu1 %2981 }
 0x271   :  { %v8380_v26 = vmul.f32 %v5397_v41, %v8351_v14  ;;  %v4031_v7 = vadd.f32 %v4030_v54, %v3506_v29  ;;  %v8384_v44 = vsub.f32 %v9493_v25, %v9492_v62  ;;  %v8388_v23 = vsub.f32 %v9494_v63, %v9492_v62  ;;  %v5398_v38 = vld [vmem:[#allocation2 + $0x3f8] sm:$0xff]  ;;  %v9498_v41 = vld [vmem:[#allocation19_spill] sm:$0xff] }
 0x272   :  { %3276 = vperm.xlu0 %4782, %v2811_v61   ;;  %v2655_v4 = vrot.slane %v2654_v9, 1  ;;  %3271 = vperm.xlu1 %4783, %v2810_v57   ;;  %v3996_v52 = vadd.f32 %v3995_v39, %v8301_v21  ;;  %v4008_v40 = vadd.f32 %v4007_v2, %v8309_v48  ;;  %v4020_v42 = vadd.f32 %v4019_v43, %v8311_v3  ;;  %v9497_v3 = vld [vmem:[#allocation18_spill] sm:$0xff]  ;;  %v3007_v2 = vpop.permute.xlu0 %3006 }
 0x273   :  { %v2812_v49 = vmul.f32 %v8353_v33, %v8205_v16  ;;  %v4032_v47 = vadd.f32 %v4031_v7, %v8319_v15  ;;  %v8398_v11 = vsub.f32 %v9495_v46, %v9492_v62  ;;  %v8402_v34 = vsub.f32 %v9496_v17, %v9492_v62  ;;  %v5400_v17 = vld [vmem:[#allocation2 + $0x388] sm:$0xff] }
 0x274   :  { %v2656_v19 = vadd.f32 %v2655_v4, %v2654_v9  ;;  %v3997_v1 = vrot.slane %v3996_v52, 4  ;;  %v4009_v21 = vrot.slane %v4008_v40, 4  ;;  %v4021_v8 = vrot.slane %v4020_v42, 4 }
 0x275   :  { %v4033_v48 = vrot.slane %v4032_v47, 4  ;;  %v8406_v22 = vsub.f32 %v9497_v3, %v9492_v62  ;;  %v2657_v16 = vsel %vm1974_vm0, %v8384_v44, 0.0  ;;  %v2658_v15 = vsel %vm1974_vm0, %v8388_v23, 0.0 }
 0x276   :  { %v2708_v31 = vadd.f32 1e-10, %v2656_v19  ;;  %3281 = vperm.xlu1 %4783, %v2812_v49   ;;  %v3998_v29 = vadd.f32 %v3997_v1, %v3996_v52  ;;  %v4010_v32 = vadd.f32 %v4009_v21, %v4008_v40  ;;  %v4022_v59 = vadd.f32 %v4021_v8, %v4020_v42  ;;  %v2992_v1 = vpop.permute.xlu1 %2991 }
 0x277   :  { %v8413_v30 = vmul.f32 %v5398_v38, %v8351_v14  ;;  %v4034_v61 = vadd.f32 %v4033_v48, %v4032_v47  ;;  %v2659_v57 = vadd.f32 %v2658_v15, %v2657_v16  ;;  %v2660_v12 = vsel %vm1974_vm0, %v8398_v11, 0.0  ;;  %v5399_v47 = vld [vmem:[#allocation2 + $0x380] sm:$0xff]  ;;  %v5401_v48 = vld [vmem:[#allocation2 + $0x390] sm:$0xff]  ;;  %v5404_v38 = vld [vmem:[#allocation2 + $0x428] sm:$0xff] }
 0x278   :  { %5258 = vrcp.f32 %v2708_v31  ;;  %v3999_v54 = vrot.slane %v3998_v29, 2  ;;  %v4011_v9 = vrot.slane %v4010_v32, 2  ;;  %v4023_v39 = vrot.slane %v4022_v59, 2  ;;  %v5402_v31 = vld [vmem:[#allocation2 + $0x398] sm:$0xff] }
 0x279   :  { %v4035_v43 = vrot.slane %v4034_v61, 2  ;;  %v8419_v7 = vsub.f32 %v9498_v41, %v9492_v62  ;;  %v2661_v25 = vadd.f32 %v2660_v12, %v2659_v57  ;;  %v2662_v14 = vsel %vm1974_vm0, %v8402_v34, 0.0  ;;  %v5405_v57 = vld [vmem:[#allocation2 + $0x430] sm:$0xff] }
 0x27a   :  { %v4000_v63 = vadd.f32 %v3999_v54, %v3998_v29  ;;  %v4012_v4 = vadd.f32 %v4011_v9, %v4010_v32  ;;  %v4024_v52 = vadd.f32 %v4023_v39, %v4022_v59  ;;  %v2664_v40 = vsel %vm1974_vm0, %v8406_v22, 0.0  ;;  %v5403_v32 = vld [vmem:[#allocation2 + $0x420] sm:$0xff]  ;;  %v3017_v9 = vpop.permute.xlu0 %3016 }
 0x27b   :  { %9499 = vst [vmem:[#allocation31_spill] sm:$0xff] %v8419_v7  ;;  %v4036_v42 = vadd.f32 %v4035_v43, %v4034_v61  ;;  %v2663_v49 = vadd.f32 %v2662_v14, %v2661_v25  ;;  %v3511_v46 = vmul.f32 %v5399_v47, %v2982_v35  ;;  %v3512_v19 = vmul.f32 %v5400_v17, %v2982_v35  ;;  %v5406_v43 = vld [vmem:[#allocation2 + $0x438] sm:$0xff] }
 0x27c   :  { %v4001_v21 = vrot.slane %v4000_v63, 1  ;;  %v4013_v62 = vrot.slane %v4012_v4, 1  ;;  %v4025_v8 = vrot.slane %v4024_v52, 1  ;;  %v3513_v3 = vmul.f32 %v5401_v48, %v2982_v35 }
 0x27d   :  { %v4037_v16 = vrot.slane %v4036_v42, 1  ;;  %v2665_v15 = vadd.f32 %v2664_v40, %v2663_v49  ;;  %v3514_v29 = vmul.f32 %v5402_v31, %v2982_v35  ;;  %v8425_v59 = vmul.f32 %v5403_v32, %v3007_v2  ;;  %v5407_v32 = vld [vmem:[#allocation2 + $0x460] sm:$0xff] }
 0x27e   :  { %v8427_v61 = vmul.f32 %v5404_v38, %v3007_v2  ;;  %v8429_v12 = vmul.f32 %v5405_v57, %v3007_v2  ;;  %v2666_v54 = vsel %vm1974_vm0, %v8419_v7, 0.0  ;;  %v4002_v39 = vadd.f32 %v4001_v21, %v4000_v63  ;;  %v3002_v63 = vpop.permute.xlu1 %3001  ;;  %v5408_v21 = vld [vmem:[#allocation2 + $0x3c0] sm:$0xff]  ;;  %v5437_v7 = vld [vmem:[#allocation2 + $0x530] sm:$0xff] }
 0x27f   :  { %v8433_v41 = vmul.f32 %v5406_v43, %v3007_v2  ;;  %v2667_v25 = vadd.f32 %v2666_v54, %v2665_v15  ;;  %v4039_v35 = vadd.f32 %v8349_v27, %v3511_v46  ;;  %v4014_v14 = vadd.f32 %v4013_v62, %v4012_v4  ;;  %v5409_v27 = vld [vmem:[#allocation2 + $0x3c8] sm:$0xff]  ;;  %v3027_v54 = vpop.permute.xlu0 %3026 }
 0x280   :  { %v4026_v40 = vadd.f32 %v4025_v8, %v4024_v52  ;;  %v4051_v49 = vadd.f32 %v8355_v20, %v3512_v19  ;;  %v4063_v47 = vadd.f32 %v8357_v50, %v3513_v3  ;;  %v4038_v17 = vadd.f32 %v4037_v16, %v4036_v42  ;;  %v5410_v52 = vld [vmem:[#allocation2 + $0x3d0] sm:$0xff]  ;;  %v5411_v20 = vld [vmem:[#allocation2 + $0x3d8] sm:$0xff] }
 0x281   :  { %v2669_v48 = vadd.f32 %v8179_v18, %v2667_v25  ;;  %v4075_v31 = vadd.f32 %v8363_v24, %v3514_v29  ;;  %v8440_v38 = vmul.f32 %v5407_v32, %v3017_v9  ;;  %v3519_v15 = vmul.f32 %v5408_v21, %v2992_v1  ;;  %v5414_v25 = vld [vmem:[#allocation2 + $0x408] sm:$0xff] }
 0x282   :  { %v8442_v2 = vpop.eup %5258  ;;  %v3520_v4 = vmul.f32 %v5409_v27, %v2992_v1  ;;  %v3521_v46 = vmul.f32 %v5410_v52, %v2992_v1  ;;  %v3522_v19 = vmul.f32 %v5411_v20, %v2992_v1  ;;  %v8448_v18 = vsel %vm4683_vm3, %v4002_v39, %v8330_v55  ;;  %v5413_v39 = vld [vmem:[#allocation2 + $0x400] sm:$0xff]  ;;  %v5418_v27 = vld [vmem:[#allocation2 + $0x478] sm:$0xff] }
 0x283   :  { %v2816_v50 = vmul.f32 %v8442_v2, %v8270_v51  ;;  %v2817_v24 = vmul.f32 %v8442_v2, %v8274_v37  ;;  %v2670_v42 = vrot.slane %v2669_v48, 4  ;;  %v4040_v62 = vadd.f32 %v4039_v35, %v3519_v15  ;;  %v5412_v37 = vld [vmem:[#allocation2 + $0x468] sm:$0xff] }
 0x284   :  { %v4052_v8 = vadd.f32 %v4051_v49, %v3520_v4  ;;  %v4064_v3 = vadd.f32 %v4063_v47, %v3521_v46  ;;  %v4076_v16 = vadd.f32 %v4075_v31, %v3522_v19  ;;  %v8454_v29 = vsel %vm4683_vm3, %v4014_v14, %v8340_v36  ;;  %v5415_v14 = vld [vmem:[#allocation2 + $0x410] sm:$0xff]  ;;  %v5416_v47 = vld [vmem:[#allocation2 + $0x418] sm:$0xff] }
 0x285   :  { %3296 = vperm.xlu0 %4782, %v2816_v50   ;;  %v8458_v51 = vsel %vm4683_vm3, %v4026_v40, %v8344_v53  ;;  %3301 = vperm.xlu1 %4783, %v2817_v24   ;;  %v2671_v55 = vadd.f32 %v2670_v42, %v2669_v48  ;;  %v8462_v1 = vsel %vm4683_vm3, %v4038_v17, %v8347_v60  ;;  %v3012_v48 = vpop.permute.xlu1 %3011  ;;  %v5417_v31 = vld [vmem:[#allocation2 + $0x470] sm:$0xff]  ;;  %v5420_v24 = vld [vmem:[#allocation2 + $0x440] sm:$0xff]  ;;  %v5421_v42 = vld [vmem:[#allocation2 + $0x448] sm:$0xff] }
 0x286   :  { %v8464_v57 = vmul.f32 %v5412_v37, %v3017_v9  ;;  %v3527_v43 = vmul.f32 %v5413_v39, %v3002_v63  ;;  %v3528_v35 = vmul.f32 %v5414_v25, %v3002_v63  ;;  %v3529_v49 = vmul.f32 %v5415_v14, %v3002_v63 }
 0x287   :  { %v2672_v36 = vrot.slane %v2671_v55, 2  ;;  %v3530_v53 = vmul.f32 %v5416_v47, %v3002_v63  ;;  %v4041_v40 = vadd.f32 %v4040_v62, %v8366_v45  ;;  %v8467_v32 = vmul.f32 %v5417_v31, %v3017_v9  ;;  %v5419_v45 = vld [vmem:[#allocation2 + $0x4a0] sm:$0xff]  ;;  %v5422_v62 = vld [vmem:[#allocation2 + $0x450] sm:$0xff]  ;;  %v5426_v47 = vld [vmem:[#allocation2 + $0x4b8] sm:$0xff] }
 0x288   :  { %v4053_v60 = vadd.f32 %v4052_v8, %v8376_v56  ;;  %v4065_v17 = vadd.f32 %v4064_v3, %v8380_v26  ;;  %v4077_v21 = vadd.f32 %v4076_v16, %v8413_v30  ;;  %v8472_v4 = vmul.f32 %v5418_v27, %v3017_v9  ;;  %v3037_v9 = vpop.permute.xlu0 %3036  ;;  %v5423_v3 = vld [vmem:[#allocation2 + $0x458] sm:$0xff] }
 0x289   :  { %v2673_v15 = vadd.f32 %v2672_v36, %v2671_v55  ;;  %v8476_v52 = vmul.f32 %v8442_v2, %v8288_v13  ;;  %v4042_v63 = vadd.f32 %v4041_v40, %v3527_v43  ;;  %v8478_v46 = vmul.f32 %v5419_v45, %v3027_v54  ;;  %v5424_v43 = vld [vmem:[#allocation2 + $0x4a8] sm:$0xff] }
 0x28a   :  { %v4054_v20 = vadd.f32 %v4053_v60, %v3528_v35  ;;  %v4066_v19 = vadd.f32 %v4065_v17, %v3529_v49  ;;  %v4078_v50 = vadd.f32 %v4077_v21, %v3530_v53  ;;  %v3535_v26 = vmul.f32 %v5420_v24, %v3012_v48  ;;  %v5425_v35 = vld [vmem:[#allocation2 + $0x4b0] sm:$0xff]  ;;  %v3022_v49 = vpop.permute.xlu1 %3021  ;;  %v9500_v17 = vld [vmem:[#allocation43_spill] sm:$0xff] }
 0x28b   :  { %v2674_v56 = vrot.slane %v2673_v15, 1  ;;  %v3536_v30 = vmul.f32 %v5421_v42, %v3012_v48  ;;  %v3537_v8 = vmul.f32 %v5422_v62, %v3012_v48  ;;  %v3538_v16 = vmul.f32 %v5423_v3, %v3012_v48  ;;  %v9501_v21 = vld [vmem:[#allocation21_spill] sm:$0xff] }
 0x28c   :  { %v4043_v13 = vadd.f32 %v4042_v63, %v8425_v59  ;;  %v4055_v55 = vadd.f32 %v4054_v20, %v8427_v61  ;;  %v4067_v37 = vadd.f32 %v4066_v19, %v8429_v12  ;;  %v8483_v25 = vmul.f32 %v5424_v43, %v3027_v54  ;;  %v5427_v61 = vld [vmem:[#allocation2 + $0x4e0] sm:$0xff] }
 0x28d   :  { %v2675_v39 = vadd.f32 %v2674_v56, %v2673_v15  ;;  %v8485_v36 = vmul.f32 %v5425_v35, %v3027_v54  ;;  %v4079_v14 = vadd.f32 %v4078_v50, %v8433_v41  ;;  %v8488_v53 = vmul.f32 %v5426_v47, %v3027_v54  ;;  %v9502_v41 = vld [vmem:[#allocation23_spill] sm:$0xff]  ;;  %v9503_v56 = vld [vmem:[#allocation46_spill] sm:$0xff]  ;;  %v3047_v47 = vpop.permute.xlu0 %3046 }
 0x28e   :  { %v4044_v40 = vadd.f32 %v4043_v13, %v3535_v26  ;;  %v4056_v48 = vadd.f32 %v4055_v55, %v3536_v30  ;;  %v4068_v59 = vadd.f32 %v4067_v37, %v3537_v8  ;;  %v8490_v60 = vmul.f32 %v5427_v61, %v3037_v9  ;;  %v5428_v54 = vld [vmem:[#allocation2 + $0x4e8] sm:$0xff]  ;;  %v5429_v26 = vld [vmem:[#allocation2 + $0x4f0] sm:$0xff] }
 0x28f   :  { %v2709_v31 = vadd.f32 1e-10, %v2675_v39  ;;  %v4080_v12 = vadd.f32 %v4079_v14, %v3538_v16  ;;  %v8494_v15 = vsub.f32 %v9501_v21, %v9500_v17  ;;  %v8498_v20 = vsub.f32 %v9502_v41, %v9500_v17  ;;  %v9504_v16 = vld [vmem:[#allocation47_spill] sm:$0xff]  ;;  %v8516_v39 = vpop.permute.xlu1 %3031  ;;  %v9505_v61 = vld [vmem:[#allocation48_spill] sm:$0xff] }
 0x290   :  { %v4045_v27 = vrot.slane %v4044_v40, 4  ;;  %v4057_v63 = vrot.slane %v4056_v48, 4  ;;  %v4069_v45 = vrot.slane %v4068_v59, 4  ;;  %v8500_v19 = vmul.f32 %v5428_v54, %v3037_v9 }
 0x291   :  { %5260 = vrcp.f32 %v2709_v31  ;;  %v4081_v50 = vrot.slane %v4080_v12, 4  ;;  %v8504_v24 = vsub.f32 %v9503_v56, %v9500_v17  ;;  %v8506_v42 = vmul.f32 %v5429_v26, %v3037_v9  ;;  %v9507_v26 = vld [vmem:[#allocation50_spill] sm:$0xff] }
 0x292   :  { %v4046_v30 = vadd.f32 %v4045_v27, %v4044_v40  ;;  %v4058_v62 = vadd.f32 %v4057_v63, %v4056_v48  ;;  %v4070_v8 = vadd.f32 %v4069_v45, %v4068_v59  ;;  %v8510_v13 = vsub.f32 %v9504_v16, %v9500_v17  ;;  %v5430_v48 = vld [vmem:[#allocation2 + $0x4f8] sm:$0xff] }
 0x293   :  { %v4082_v3 = vadd.f32 %v4081_v50, %v4080_v12  ;;  %v2676_v55 = vsel %vm1974_vm0, %v8494_v15, 0.0  ;;  %v2677_v37 = vsel %vm1974_vm0, %v8498_v20, 0.0  ;;  %v8518_v59 = vmul.f32 %v5430_v48, %v3037_v9  ;;  %v5431_v50 = vld [vmem:[#allocation2 + $0x520] sm:$0xff] }
 0x294   :  { %v4047_v43 = vrot.slane %v4046_v30, 2  ;;  %v4059_v35 = vrot.slane %v4058_v62, 2  ;;  %v4071_v14 = vrot.slane %v4070_v8, 2  ;;  %v2678_v40 = vadd.f32 %v2677_v37, %v2676_v55 }
 0x295   :  { %v4083_v31 = vrot.slane %v4082_v3, 2  ;;  %v8522_v12 = vsub.f32 %v9505_v61, %v9500_v17  ;;  %v2679_v21 = vsel %vm1974_vm0, %v8504_v24, 0.0  ;;  %v8526_v56 = vmul.f32 %v5431_v50, %v3047_v47  ;;  %v5432_v61 = vld [vmem:[#allocation2 + $0x480] sm:$0xff] }
 0x296   :  { %v4048_v27 = vadd.f32 %v4047_v43, %v4046_v30  ;;  %v4060_v63 = vadd.f32 %v4059_v35, %v4058_v62  ;;  %v4072_v45 = vadd.f32 %v4071_v14, %v4070_v8  ;;  %v2680_v41 = vadd.f32 %v2679_v21, %v2678_v40  ;;  %v5433_v62 = vld [vmem:[#allocation2 + $0x488] sm:$0xff]  ;;  %v5435_v35 = vld [vmem:[#allocation2 + $0x498] sm:$0xff]  ;;  %v8536_v40 = vpop.permute.xlu1 %3041 }
 0x297   :  { %9506 = vst [vmem:[#allocation32_spill] sm:$0xff] %v8522_v12  ;;  %v4084_v54 = vadd.f32 %v4083_v31, %v4082_v3  ;;  %v8530_v9 = vsub.f32 %v9507_v26, %v9500_v17  ;;  %v2681_v16 = vsel %vm1974_vm0, %v8510_v13, 0.0  ;;  %v3543_v28 = vmul.f32 %v5432_v61, %v3022_v49  ;;  %v5434_v3 = vld [vmem:[#allocation2 + $0x490] sm:$0xff] }
 0x298   :  { %v4049_v55 = vrot.slane %v4048_v27, 1  ;;  %v4061_v37 = vrot.slane %v4060_v63, 1  ;;  %v2682_v48 = vadd.f32 %v2681_v16, %v2680_v41  ;;  %v2683_v30 = vsel %vm1974_vm0, %v8522_v12, 0.0  ;;  %v5436_v16 = vld [vmem:[#allocation2 + $0x528] sm:$0xff] }
 0x299   :  { %v3544_v8 = vmul.f32 %v5433_v62, %v3022_v49  ;;  %v3545_v43 = vmul.f32 %v5434_v3, %v3022_v49  ;;  %v3546_v14 = vmul.f32 %v5435_v35, %v3022_v49  ;;  %v4073_v31 = vrot.slane %v4072_v45, 1  ;;  %v5438_v62 = vld [vmem:[#allocation2 + $0x538] sm:$0xff]  ;;  %v9508_v3 = vld [vmem:[#allocation28_spill] sm:$0xff] }
 0x29a   :  { %v4050_v17 = vadd.f32 %v4049_v55, %v4048_v27  ;;  %v4085_v21 = vrot.slane %v4084_v54, 1  ;;  %v2684_v50 = vadd.f32 %v2683_v30, %v2682_v48  ;;  %v4062_v41 = vadd.f32 %v4061_v37, %v4060_v63  ;;  %v3057_v37 = vpop.permute.xlu0 %3056 }
 0x29b   :  { %v8538_v26 = vpop.eup %5260  ;;  %v8540_v61 = vmul.f32 %v5436_v16, %v3047_v47  ;;  %v8542_v0 = vmul.f32 %v5437_v7, %v3047_v47  ;;  %v8544_v12 = vmul.f32 %v5438_v62, %v3047_v47  ;;  %v2685_v55 = vsel %vm1974_vm0, %v8530_v9, 0.0 }
 0x29c   :  { %v2824_v49 = vmul.f32 %v8538_v26, %v8384_v44  ;;  %v2825_v27 = vmul.f32 %v8538_v26, %v8388_v23  ;;  %v4087_v63 = vadd.f32 %v3543_v28, %v8440_v38  ;;  %v2686_v48 = vadd.f32 %v2685_v55, %v2684_v50 }
 0x29d   :  { %v4099_v30 = vadd.f32 %v3544_v8, %v8464_v57  ;;  %v4111_v7 = vadd.f32 %v3545_v43, %v8467_v32  ;;  %v4123_v47 = vadd.f32 %v3546_v14, %v8472_v4  ;;  %v2687_v35 = vsel %vm1974_vm0, %v9508_v3, 0.0  ;;  %v5439_v32 = vld [vmem:[#allocation2 + $0x4c0] sm:$0xff]  ;;  %v8571_v8 = vpop.permute.xlu1 %3051  ;;  %v5441_v43 = vld [vmem:[#allocation2 + $0x4d0] sm:$0xff]  ;;  %v5442_v14 = vld [vmem:[#allocation2 + $0x4d8] sm:$0xff] }
 0x29e   :  { %3331 = vperm.xlu0 %4782, %v2824_v49   ;;  %3336 = vperm.xlu1 %4783, %v2825_v27   ;;  %v4074_v44 = vadd.f32 %v4073_v31, %v4072_v45  ;;  %v4086_v23 = vadd.f32 %v4085_v21, %v4084_v54  ;;  %v8560_v16 = vsel %vm4685_vm4, %v4050_v17, %v8448_v18  ;;  %v5440_v45 = vld [vmem:[#allocation2 + $0x4c8] sm:$0xff]  ;;  %v3067_v27 = vpop.permute.xlu0 %3066 }
 0x29f   :  { %v8564_v28 = vsel %vm4685_vm4, %v4062_v41, %v8454_v29  ;;  %v2688_v38 = vadd.f32 %v2687_v35, %v2686_v48  ;;  %v8568_v57 = vmul.f32 %v8442_v2, %v8292_v10  ;;  %v3551_v4 = vmul.f32 %v5439_v32, %v8516_v39 }
 0x2a0   :  { %v3552_v54 = vmul.f32 %v5440_v45, %v8516_v39  ;;  %v3553_v18 = vmul.f32 %v5441_v43, %v8516_v39  ;;  %v3554_v29 = vmul.f32 %v5442_v14, %v8516_v39  ;;  %v4088_v17 = vadd.f32 %v4087_v63, %v8478_v46  ;;  %v5443_v39 = vld [vmem:[#allocation2 + $0x560] sm:$0xff] }
 0x2a1   :  { %v2689_v31 = vrot.slane %v2688_v38, 4  ;;  %v4100_v10 = vadd.f32 %v4099_v30, %v8483_v25  ;;  %v4112_v21 = vadd.f32 %v4111_v7, %v8485_v36  ;;  %v4124_v50 = vadd.f32 %v4123_v47, %v8488_v53  ;;  %v5444_v53 = vld [vmem:[#allocation2 + $0x568] sm:$0xff]  ;;  %v8600_v45 = vpop.permute.xlu1 %3061 }
 0x2a2   :  { %3306 = vperm.xlu0 %4782, %v8476_v52   ;;  %v8583_v41 = vsel %vm4685_vm4, %v4074_v44, %v8458_v51  ;;  %v8587_v62 = vsel %vm4685_vm4, %v4086_v23, %v8462_v1  ;;  %v8589_v49 = vmul.f32 %v5443_v39, %v3057_v37  ;;  %v4089_v46 = vadd.f32 %v4088_v17, %v3551_v4  ;;  %v5445_v52 = vld [vmem:[#allocation2 + $0x570] sm:$0xff]  ;;  %v5446_v51 = vld [vmem:[#allocation2 + $0x500] sm:$0xff]  ;;  %v5447_v1 = vld [vmem:[#allocation2 + $0x508] sm:$0xff] }
 0x2a3   :  { %v2690_v25 = vadd.f32 %v2689_v31, %v2688_v38  ;;  %v4101_v55 = vadd.f32 %v4100_v10, %v3552_v54  ;;  %v4113_v36 = vadd.f32 %v4112_v21, %v3553_v18  ;;  %v4125_v63 = vadd.f32 %v4124_v50, %v3554_v29  ;;  %v5448_v44 = vld [vmem:[#allocation2 + $0x510] sm:$0xff]  ;;  %v5449_v38 = vld [vmem:[#allocation2 + $0x518] sm:$0xff]  ;;  %v5451_v10 = vld [vmem:[#allocation2 + $0x5a0] sm:$0xff] }
 0x2a4   :  { %v8591_v48 = vmul.f32 %v5444_v53, %v3057_v37  ;;  %v8593_v30 = vmul.f32 %v5445_v52, %v3057_v37  ;;  %v3559_v7 = vmul.f32 %v5446_v51, %v8536_v40  ;;  %v3560_v47 = vmul.f32 %v5447_v1, %v8536_v40  ;;  %v5450_v54 = vld [vmem:[#allocation2 + $0x578] sm:$0xff]  ;;  %v5452_v21 = vld [vmem:[#allocation2 + $0x5a8] sm:$0xff] }
 0x2a5   :  { %v2691_v35 = vrot.slane %v2690_v25, 2  ;;  %v3561_v23 = vmul.f32 %v5448_v44, %v8536_v40  ;;  %v3562_v32 = vmul.f32 %v5449_v38, %v8536_v40  ;;  %v4090_v4 = vadd.f32 %v4089_v46, %v8490_v60  ;;  %v5456_v44 = vld [vmem:[#allocation2 + $0x5e8] sm:$0xff] }
 0x2a6   :  { %v8602_v43 = vmul.f32 %v5450_v54, %v3057_v37  ;;  %v4102_v18 = vadd.f32 %v4101_v55, %v8500_v19  ;;  %v4114_v14 = vadd.f32 %v4113_v36, %v8506_v42  ;;  %v4126_v29 = vadd.f32 %v4125_v63, %v8518_v59  ;;  %v3077_v19 = vpop.permute.xlu0 %3076  ;;  %v5453_v42 = vld [vmem:[#allocation2 + $0x5b0] sm:$0xff]  ;;  %v5454_v59 = vld [vmem:[#allocation2 + $0x5b8] sm:$0xff] }
 0x2a7   :  { %v2692_v17 = vadd.f32 %v2691_v35, %v2690_v25  ;;  %v8609_v31 = vmul.f32 %v8538_v26, %v8398_v11  ;;  %v8611_v40 = vmul.f32 %v5451_v10, %v3067_v27  ;;  %v4091_v60 = vadd.f32 %v4090_v4, %v3559_v7 }
 0x2a8   :  { %v8613_v50 = vmul.f32 %v5452_v21, %v3067_v27  ;;  %v4103_v37 = vadd.f32 %v4102_v18, %v3560_v47  ;;  %v4115_v39 = vadd.f32 %v4114_v14, %v3561_v23  ;;  %v4127_v46 = vadd.f32 %v4126_v29, %v3562_v32  ;;  %v5455_v47 = vld [vmem:[#allocation2 + $0x5e0] sm:$0xff]  ;;  %v8631_v23 = vpop.permute.xlu1 %3071  ;;  %v5459_v18 = vld [vmem:[#allocation2 + $0x550] sm:$0xff] }
 0x2a9   :  { %v2693_v55 = vrot.slane %v2692_v17, 1  ;;  %v8615_v36 = vmul.f32 %v5453_v42, %v3067_v27  ;;  %v8617_v25 = vmul.f32 %v5454_v59, %v3067_v27  ;;  %v4092_v11 = vadd.f32 %v4091_v60, %v8526_v56  ;;  %v5457_v32 = vld [vmem:[#allocation2 + $0x540] sm:$0xff]  ;;  %v5460_v60 = vld [vmem:[#allocation2 + $0x5f0] sm:$0xff] }
 0x2aa   :  { %v8622_v63 = vmul.f32 %v8538_v26, %v8402_v34  ;;  %v4104_v53 = vadd.f32 %v4103_v37, %v8540_v61  ;;  %v4116_v52 = vadd.f32 %v4115_v39, %v8542_v0  ;;  %v4128_v51 = vadd.f32 %v4127_v46, %v8544_v12  ;;  %v5458_v12 = vld [vmem:[#allocation2 + $0x548] sm:$0xff]  ;;  %v3087_v37 = vpop.permute.xlu0 %3086  ;;  %v5461_v46 = vld [vmem:[#allocation2 + $0x5f8] sm:$0xff] }
 0x2ab   :  { %v2694_v7 = vadd.f32 %v2693_v55, %v2692_v17  ;;  %v4093_v1 = vrot.slane %v4092_v11, 4  ;;  %v8627_v35 = vmul.f32 %v5455_v47, %v3077_v19  ;;  %v8629_v27 = vmul.f32 %v5456_v44, %v3077_v19 }
 0x2ac   :  { %v4105_v56 = vrot.slane %v4104_v53, 4  ;;  %v4117_v38 = vrot.slane %v4116_v52, 4  ;;  %v4129_v34 = vrot.slane %v4128_v51, 4  ;;  %v3567_v61 = vmul.f32 %v5457_v32, %v8571_v8 }
 0x2ad   :  { %v2710_v4 = vadd.f32 1e-10, %v2694_v7  ;;  %v4094_v0 = vadd.f32 %v4093_v1, %v4092_v11  ;;  %v3568_v54 = vmul.f32 %v5458_v12, %v8571_v8  ;;  %v3569_v14 = vmul.f32 %v5459_v18, %v8571_v8  ;;  %v5462_v1 = vld [vmem:[#allocation2 + $0x558] sm:$0xff]  ;;  %v5464_v12 = vld [vmem:[#allocation2 + $0x588] sm:$0xff] }
 0x2ae   :  { %v4106_v29 = vadd.f32 %v4105_v56, %v4104_v53  ;;  %v4118_v17 = vadd.f32 %v4117_v38, %v4116_v52  ;;  %v4130_v10 = vadd.f32 %v4129_v34, %v4128_v51  ;;  %v8636_v21 = vmul.f32 %v5460_v60, %v3077_v19  ;;  %v8648_v56 = vpop.permute.xlu1 %3081 }
 0x2af   :  { %5262 = vrcp.f32 %v2710_v4  ;;  %v4095_v39 = vrot.slane %v4094_v0, 2  ;;  %v8638_v55 = vmul.f32 %v5461_v46, %v3077_v19  ;;  %v8642_v42 = vmul.f32 %v8442_v2, %v8305_v6  ;;  %v5463_v6 = vld [vmem:[#allocation2 + $0x580] sm:$0xff] }
 0x2b0   :  { %v4107_v59 = vrot.slane %v4106_v29, 2  ;;  %v4119_v11 = vrot.slane %v4118_v17, 2  ;;  %v4131_v7 = vrot.slane %v4130_v10, 2  ;;  %v3570_v53 = vmul.f32 %v5462_v1, %v8571_v8  ;;  %v5465_v8 = vld [vmem:[#allocation2 + $0x590] sm:$0xff] }
 0x2b1   :  { %v4096_v52 = vadd.f32 %v4095_v39, %v4094_v0  ;;  %v4135_v51 = vadd.f32 %v8589_v49, %v3567_v61  ;;  %v4147_v47 = vadd.f32 %v8591_v48, %v3568_v54  ;;  %v4159_v44 = vadd.f32 %v8593_v30, %v3569_v14  ;;  %v5466_v49 = vld [vmem:[#allocation2 + $0x598] sm:$0xff]  ;;  %v5468_v39 = vld [vmem:[#allocation2 + $0x628] sm:$0xff] }
 0x2b2   :  { %v4108_v19 = vadd.f32 %v4107_v59, %v4106_v29  ;;  %v4120_v38 = vadd.f32 %v4119_v11, %v4118_v17  ;;  %v4132_v34 = vadd.f32 %v4131_v7, %v4130_v10  ;;  %v3575_v32 = vmul.f32 %v5463_v6, %v8600_v45  ;;  %v3097_v29 = vpop.permute.xlu0 %3096  ;;  %v5467_v10 = vld [vmem:[#allocation2 + $0x620] sm:$0xff]  ;;  %v5469_v59 = vld [vmem:[#allocation2 + $0x630] sm:$0xff]  ;;  %v5470_v7 = vld [vmem:[#allocation2 + $0x638] sm:$0xff] }
 0x2b3   :  { %v4097_v4 = vrot.slane %v4096_v52, 1  ;;  %v3576_v18 = vmul.f32 %v5464_v12, %v8600_v45  ;;  %v3577_v0 = vmul.f32 %v5465_v8, %v8600_v45  ;;  %v3578_v48 = vmul.f32 %v5466_v49, %v8600_v45  ;;  %v8671_v8 = vpop.permute.xlu1 %3091 }
 0x2b4   :  { %v4109_v61 = vrot.slane %v4108_v19, 1  ;;  %v4121_v30 = vrot.slane %v4120_v38, 1  ;;  %v4133_v54 = vrot.slane %v4132_v34, 1  ;;  %v4171_v14 = vadd.f32 %v8602_v43, %v3570_v53 }
 0x2b5   :  { %v4098_v17 = vadd.f32 %v4097_v4, %v4096_v52  ;;  %v8655_v60 = vmul.f32 %v5467_v10, %v3087_v37  ;;  %v8657_v46 = vmul.f32 %v5468_v39, %v3087_v37  ;;  %v8659_v11 = vmul.f32 %v5469_v59, %v3087_v37  ;;  %v5471_v39 = vld [vmem:[#allocation2 + $0x660] sm:$0xff] }
 0x2b6   :  { %v8661_v1 = vmul.f32 %v5470_v7, %v3087_v37  ;;  %v8665_v45 = vmul.f32 %v8538_v26, %v8406_v22  ;;  %v8669_v43 = vmul.f32 %v8353_v33, %v8209_v58  ;;  %v4136_v53 = vadd.f32 %v4135_v51, %v3575_v32  ;;  %v5472_v58 = vld [vmem:[#allocation2 + $0x668] sm:$0xff]  ;;  %v5473_v51 = vld [vmem:[#allocation2 + $0x5c0] sm:$0xff] }
 0x2b7   :  { %v4110_v52 = vadd.f32 %v4109_v61, %v4108_v19  ;;  %v4148_v6 = vadd.f32 %v4147_v47, %v3576_v18  ;;  %v4160_v4 = vadd.f32 %v4159_v44, %v3577_v0  ;;  %v4172_v12 = vadd.f32 %v4171_v14, %v3578_v48  ;;  %v5474_v44 = vld [vmem:[#allocation2 + $0x5c8] sm:$0xff]  ;;  %v5476_v18 = vld [vmem:[#allocation2 + $0x670] sm:$0xff]  ;;  %v5477_v48 = vld [vmem:[#allocation2 + $0x5d8] sm:$0xff] }
 0x2b8   :  { %v4122_v49 = vadd.f32 %v4121_v30, %v4120_v38  ;;  %v4134_v10 = vadd.f32 %v4133_v54, %v4132_v34  ;;  %v8675_v37 = vsel %vm4687_vm5, %v4098_v17, %v8560_v16  ;;  %v8677_v22 = vmul.f32 %v5471_v39, %v3097_v29  ;;  %v5475_v38 = vld [vmem:[#allocation2 + $0x5d0] sm:$0xff]  ;;  %v3107_v30 = vpop.permute.xlu0 %3106  ;;  %v5478_v54 = vld [vmem:[#allocation2 + $0x678] sm:$0xff] }
 0x2b9   :  { %v8679_v59 = vpop.eup %5262  ;;  %v8681_v7 = vmul.f32 %v5472_v58, %v3097_v29  ;;  %v3583_v47 = vmul.f32 %v5473_v51, %v8631_v23  ;;  %v3584_v19 = vmul.f32 %v5474_v44, %v8631_v23  ;;  %v3585_v34 = vmul.f32 %v5475_v38, %v8631_v23  ;;  %v5482_v51 = vld [vmem:[#allocation2 + $0x618] sm:$0xff] }
 0x2ba   :  { %v2833_v16 = vmul.f32 %v8679_v59, %v8498_v20  ;;  %v2832_v32 = vmul.f32 %v8679_v59, %v8494_v15  ;;  %v8690_v0 = vmul.f32 %v5476_v18, %v3097_v29  ;;  %v3586_v61 = vmul.f32 %v5477_v48, %v8631_v23 }
 0x2bb   :  { %v8693_v14 = vmul.f32 %v5478_v54, %v3097_v29  ;;  %v4137_v17 = vadd.f32 %v4136_v53, %v8611_v40  ;;  %v4149_v39 = vadd.f32 %v4148_v6, %v8613_v50  ;;  %v4161_v58 = vadd.f32 %v4160_v4, %v8615_v36  ;;  %v8711_v36 = vpop.permute.xlu1 %3101  ;;  %v5480_v4 = vld [vmem:[#allocation2 + $0x608] sm:$0xff]  ;;  %v9510_v54 = vld [vmem:[#allocation26_spill] sm:$0xff] }
 0x2bc   :  { %3371 = vperm.xlu0 %4782, %v2833_v16   ;;  %3366 = vperm.xlu1 %4783, %v2832_v32   ;;  %v8700_v15 = vsel %vm4687_vm5, %v4110_v52, %v8564_v28  ;;  %v8704_v20 = vsel %vm4687_vm5, %v4122_v49, %v8583_v41  ;;  %v4173_v23 = vadd.f32 %v4172_v12, %v8617_v25  ;;  %v5479_v52 = vld [vmem:[#allocation2 + $0x600] sm:$0xff]  ;;  %v5481_v49 = vld [vmem:[#allocation2 + $0x610] sm:$0xff]  ;;  %v3117_v44 = vpop.permute.xlu0 %3116  ;;  %v5484_v32 = vld [vmem:[#allocation2 + $0x6a8] sm:$0xff] }
 0x2bd   :  { %v8709_v29 = vsel %vm4687_vm5, %v4134_v10, %v8587_v62  ;;  %v4138_v40 = vadd.f32 %v4137_v17, %v3583_v47  ;;  %v4150_v50 = vadd.f32 %v4149_v39, %v3584_v19  ;;  %v4162_v53 = vadd.f32 %v4161_v58, %v3585_v34  ;;  %v9509_v19 = vld [vmem:[#allocation32_spill] sm:$0xff]  ;;  %v5483_v34 = vld [vmem:[#allocation2 + $0x6a0] sm:$0xff] }
 0x2be   :  { %v2834_v6 = vmul.f32 %v8679_v59, %v8504_v24  ;;  %v2835_v28 = vmul.f32 %v8679_v59, %v8510_v13  ;;  %v8719_v41 = vmul.f32 %v8442_v2, %v7943_v5  ;;  %v4174_v25 = vadd.f32 %v4173_v23, %v3586_v61  ;;  %v9511_v39 = vld [vmem:[#allocation31_spill] sm:$0xff] }
 0x2bf   :  { %v3591_v62 = vmul.f32 %v5479_v52, %v8648_v56  ;;  %v3592_v12 = vmul.f32 %v5480_v4, %v8648_v56  ;;  %v3593_v10 = vmul.f32 %v5481_v49, %v8648_v56  ;;  %v3594_v24 = vmul.f32 %v5482_v51, %v8648_v56  ;;  %v5489_v4 = vld [vmem:[#allocation2 + $0x648] sm:$0xff]  ;;  %v5490_v49 = vld [vmem:[#allocation2 + $0x650] sm:$0xff] }
 0x2c0   :  { %3311 = vperm.xlu0 %4782, %v8568_v57   ;;  %3341 = vperm.xlu1 %4783, %v8609_v31   ;;  %v4139_v5 = vadd.f32 %v4138_v40, %v8627_v35  ;;  %v4151_v13 = vadd.f32 %v4150_v50, %v8629_v27  ;;  %v4163_v47 = vadd.f32 %v4162_v53, %v8636_v21  ;;  %v5485_v31 = vld [vmem:[#allocation2 + $0x6b0] sm:$0xff]  ;;  %v5486_v21 = vld [vmem:[#allocation2 + $0x6b8] sm:$0xff]  ;;  %v8751_v40 = vpop.permute.xlu1 %3111 }
 0x2c1   :  { %v8732_v38 = vmul.f32 %v8679_v59, %v9509_v19  ;;  %v8734_v16 = vmul.f32 %v5483_v34, %v3107_v30  ;;  %v8736_v56 = vmul.f32 %v5484_v32, %v3107_v30  ;;  %v4175_v57 = vadd.f32 %v4174_v25, %v8638_v55  ;;  %v5487_v25 = vld [vmem:[#allocation2 + $0x6e0] sm:$0xff]  ;;  %v5492_v19 = vld [vmem:[#allocation2 + $0x6e8] sm:$0xff]  ;;  %v5493_v32 = vld [vmem:[#allocation2 + $0x6f0] sm:$0xff] }
 0x2c2   :  { %v8739_v18 = vmul.f32 %v5485_v31, %v3107_v30  ;;  %v4140_v35 = vadd.f32 %v4139_v5, %v3591_v62  ;;  %v4152_v27 = vadd.f32 %v4151_v13, %v3592_v12  ;;  %v4164_v48 = vadd.f32 %v4163_v47, %v3593_v10  ;;  %v5488_v62 = vld [vmem:[#allocation2 + $0x640] sm:$0xff]  ;;  %v3127_v13 = vpop.permute.xlu0 %3126  ;;  %v5494_v31 = vld [vmem:[#allocation2 + $0x6f8] sm:$0xff] }
 0x2c3   :  { %v8741_v61 = vmul.f32 %v5486_v21, %v3107_v30  ;;  %v8745_v17 = vmul.f32 %v8353_v33, %v9510_v54  ;;  %v8749_v58 = vmul.f32 %v8538_v26, %v9511_v39  ;;  %v4176_v23 = vadd.f32 %v4175_v57, %v3594_v24  ;;  %v9512_v54 = vld [vmem:[#allocation29_spill] sm:$0xff] }
 0x2c4   :  { %3346 = vperm.xlu0 %4782, %v8622_v63   ;;  %3376 = vperm.xlu1 %4783, %v2834_v6   ;;  %v4141_v55 = vrot.slane %v4140_v35, 4  ;;  %v4153_v50 = vrot.slane %v4152_v27, 4  ;;  %v4165_v53 = vrot.slane %v4164_v48, 4  ;;  %v8754_v30 = vmul.f32 %v5487_v25, %v3117_v44  ;;  %v5491_v6 = vld [vmem:[#allocation2 + $0x658] sm:$0xff] }
 0x2c5   :  { %v4177_v52 = vrot.slane %v4176_v23, 4  ;;  %v3599_v33 = vmul.f32 %v5488_v62, %v8671_v8  ;;  %v3600_v12 = vmul.f32 %v5489_v4, %v8671_v8  ;;  %v3601_v10 = vmul.f32 %v5490_v49, %v8671_v8  ;;  %v5495_v62 = vld [vmem:[#allocation2 + $0x680] sm:$0xff] }
 0x2c6   :  { %v4142_v51 = vadd.f32 %v4141_v55, %v4140_v35  ;;  %v4154_v24 = vadd.f32 %v4153_v50, %v4152_v27  ;;  %v4166_v63 = vadd.f32 %v4165_v53, %v4164_v48  ;;  %v3602_v5 = vmul.f32 %v5491_v6, %v8671_v8  ;;  %v8774_v53 = vpop.permute.xlu1 %3121  ;;  %v5497_v6 = vld [vmem:[#allocation2 + $0x690] sm:$0xff] }
 0x2c7   :  { %v4178_v47 = vadd.f32 %v4177_v52, %v4176_v23  ;;  %v8760_v34 = vmul.f32 %v5492_v19, %v3117_v44  ;;  %v8762_v57 = vmul.f32 %v5493_v32, %v3117_v44  ;;  %v8764_v21 = vmul.f32 %v5494_v31, %v3117_v44  ;;  %v5499_v19 = vld [vmem:[#allocation2 + $0x720] sm:$0xff]  ;;  %v5500_v31 = vld [vmem:[#allocation2 + $0x728] sm:$0xff] }
 0x2c8   :  { %3381 = vperm.xlu0 %4782, %v2835_v28   ;;  %3316 = vperm.xlu1 %4783, %v8642_v42   ;;  %v4143_v35 = vrot.slane %v4142_v51, 2  ;;  %v4155_v27 = vrot.slane %v4154_v24, 2  ;;  %v4167_v48 = vrot.slane %v4166_v63, 2  ;;  %v8769_v8 = vmul.f32 %v8442_v2, %v9512_v54  ;;  %v5496_v2 = vld [vmem:[#allocation2 + $0x688] sm:$0xff] }
 0x2c9   :  { %v4179_v39 = vrot.slane %v4178_v47, 2  ;;  %v4183_v23 = vadd.f32 %v3599_v33, %v8655_v60  ;;  %v4195_v55 = vadd.f32 %v3600_v12, %v8657_v46  ;;  %v4207_v50 = vadd.f32 %v3601_v10, %v8659_v11  ;;  %v5498_v12 = vld [vmem:[#allocation2 + $0x698] sm:$0xff]  ;;  %v3137_v10 = vpop.permute.xlu0 %3136 }
 0x2ca   :  { %v4144_v44 = vadd.f32 %v4143_v35, %v4142_v51  ;;  %v4156_v28 = vadd.f32 %v4155_v27, %v4154_v24  ;;  %v4168_v25 = vadd.f32 %v4167_v48, %v4166_v63  ;;  %v4219_v42 = vadd.f32 %v3602_v5, %v8661_v1 }
 0x2cb   :  { %v4180_v52 = vadd.f32 %v4179_v39, %v4178_v47  ;;  %v3607_v4 = vmul.f32 %v5495_v62, %v8711_v36  ;;  %v3608_v49 = vmul.f32 %v5496_v2, %v8711_v36  ;;  %v3609_v60 = vmul.f32 %v5497_v6, %v8711_v36  ;;  %v5503_v62 = vld [vmem:[#allocation2 + $0x6c0] sm:$0xff]  ;;  %v5506_v2 = vld [vmem:[#allocation2 + $0x6d8] sm:$0xff] }
 0x2cc   :  { %3351 = vperm.xlu0 %4782, %v8665_v45   ;;  %3286 = vperm.xlu1 %4783, %v8669_v43   ;;  %v4145_v46 = vrot.slane %v4144_v44, 1  ;;  %v4157_v11 = vrot.slane %v4156_v28, 1  ;;  %v4169_v33 = vrot.slane %v4168_v25, 1  ;;  %v3610_v1 = vmul.f32 %v5498_v12, %v8711_v36  ;;  %v5501_v36 = vld [vmem:[#allocation2 + $0x730] sm:$0xff] }
 0x2cd   :  { %v4181_v51 = vrot.slane %v4180_v52, 1  ;;  %v4184_v24 = vadd.f32 %v4183_v23, %v8677_v22  ;;  %v4196_v63 = vadd.f32 %v4195_v55, %v8681_v7  ;;  %v4208_v5 = vadd.f32 %v4207_v50, %v8690_v0  ;;  %v8795_v7 = vpop.permute.xlu1 %3131  ;;  %v5502_v0 = vld [vmem:[#allocation2 + $0x738] sm:$0xff]  ;;  %v9513_v55 = vld [vmem:[#allocation51_spill] sm:$0xff] }
 0x2ce   :  { %v4146_v47 = vadd.f32 %v4145_v46, %v4144_v44  ;;  %v2837_v45 = vmul.f32 %v8679_v59, %v8530_v9  ;;  %v8788_v43 = vmul.f32 %v5499_v19, %v3127_v13  ;;  %v4220_v32 = vadd.f32 %v4219_v42, %v8693_v14 }
 0x2cf   :  { %v8791_v35 = vmul.f32 %v5500_v31, %v3127_v13  ;;  %v8793_v27 = vmul.f32 %v5501_v36, %v3127_v13  ;;  %v4185_v22 = vadd.f32 %v4184_v24, %v3607_v4  ;;  %v4197_v48 = vadd.f32 %v4196_v63, %v3608_v49  ;;  %v3147_v4 = vpop.permute.xlu0 %3146 }
 0x2d0   :  { %3321 = vperm.xlu1 %4783, %v8719_v41   ;;  %3386 = vperm.xlu0 %4782, %v8732_v38   ;;  %v4158_v9 = vadd.f32 %v4157_v11, %v4156_v28  ;;  %v8799_v54 = vmul.f32 %v5502_v0, %v3127_v13  ;;  %v4209_v39 = vadd.f32 %v4208_v5, %v3609_v60  ;;  %v5504_v28 = vld [vmem:[#allocation2 + $0x6c8] sm:$0xff]  ;;  %v5511_v5 = vld [vmem:[#allocation2 + $0x7a0] sm:$0xff] }
 0x2d1   :  { %v4170_v14 = vadd.f32 %v4169_v33, %v4168_v25  ;;  %v4182_v23 = vadd.f32 %v4181_v51, %v4180_v52  ;;  %v2830_v50 = vmul.f32 %v8538_v26, %v9513_v55  ;;  %v4221_v44 = vadd.f32 %v4220_v32, %v3610_v1  ;;  %v5505_v25 = vld [vmem:[#allocation2 + $0x6d0] sm:$0xff] }
 0x2d2   :  { %v8805_v42 = vsel %vm4689_vm6, %v4146_v47, %v8675_v37  ;;  %v2838_v41 = vmul.f32 %v8679_v59, %v9508_v3  ;;  %v3615_v38 = vmul.f32 %v5503_v62, %v8751_v40  ;;  %v3616_v13 = vmul.f32 %v5504_v28, %v8751_v40  ;;  %v5509_v33 = vld [vmem:[#allocation2 + $0x770] sm:$0xff]  ;;  %v5518_v28 = vld [vmem:[#allocation2 + $0x718] sm:$0xff] }
 0x2d3   :  { %v3617_v52 = vmul.f32 %v5505_v25, %v8751_v40  ;;  %v3618_v26 = vmul.f32 %v5506_v2, %v8751_v40  ;;  %v4186_v49 = vadd.f32 %v4185_v22, %v8734_v16  ;;  %v4198_v37 = vadd.f32 %v4197_v48, %v8736_v56  ;;  %v8831_v40 = vpop.permute.xlu1 %3141  ;;  %v8848_v19 = vpop.permute.xlu0 %3156  ;;  %v5519_v2 = vld [vmem:[#allocation2 + $0x740] sm:$0xff] }
 0x2d4   :  { %3291 = vperm.xlu1 %4783, %v8745_v17   ;;  %3356 = vperm.xlu0 %4782, %v8749_v58   ;;  %v8819_v3 = vsel %vm4689_vm6, %v4158_v9, %v8700_v15  ;;  %v4210_v59 = vadd.f32 %v4209_v39, %v8739_v18  ;;  %v4222_v6 = vadd.f32 %v4221_v44, %v8741_v61  ;;  %v5507_v58 = vld [vmem:[#allocation2 + $0x760] sm:$0xff]  ;;  %v5508_v15 = vld [vmem:[#allocation2 + $0x768] sm:$0xff] }
 0x2d5   :  { %v8825_v60 = vsel %vm4689_vm6, %v4170_v14, %v8704_v20  ;;  %v8829_v16 = vsel %vm4689_vm6, %v4182_v23, %v8709_v29  ;;  %v4187_v56 = vadd.f32 %v4186_v49, %v3615_v38  ;;  %v4199_v17 = vadd.f32 %v4198_v37, %v3616_v13  ;;  %v5510_v20 = vld [vmem:[#allocation2 + $0x778] sm:$0xff]  ;;  %v5516_v39 = vld [vmem:[#allocation2 + $0x708] sm:$0xff]  ;;  %v5517_v23 = vld [vmem:[#allocation2 + $0x710] sm:$0xff] }
 0x2d6   :  { %v8833_v46 = vmul.f32 %v5507_v58, %v3137_v10  ;;  %v8835_v11 = vmul.f32 %v5508_v15, %v3137_v10  ;;  %v4211_v18 = vadd.f32 %v4210_v59, %v3617_v52  ;;  %v4223_v61 = vadd.f32 %v4222_v6, %v3618_v26  ;;  %v5520_v59 = vld [vmem:[#allocation2 + $0x748] sm:$0xff]  ;;  %v5522_v15 = vld [vmem:[#allocation2 + $0x758] sm:$0xff] }
 0x2d7   :  { %v8837_v12 = vmul.f32 %v5509_v33, %v3137_v10  ;;  %v8839_v1 = vmul.f32 %v5510_v20, %v3137_v10  ;;  %v4188_v29 = vadd.f32 %v4187_v56, %v8754_v30  ;;  %v4200_v51 = vadd.f32 %v4199_v17, %v8760_v34  ;;  %v5512_v10 = vld [vmem:[#allocation2 + $0x7a8] sm:$0xff]  ;;  %v5513_v30 = vld [vmem:[#allocation2 + $0x700] sm:$0xff]  ;;  %v8859_v44 = vpop.permute.xlu1 %3151  ;;  %v8866_v56 = vpop.permute.xlu0 %3166 }
 0x2d8   :  { %3326 = vperm.xlu1 %4783, %v8769_v8   ;;  %3391 = vperm.xlu0 %4782, %v2837_v45   ;;  %v4212_v24 = vadd.f32 %v4211_v18, %v8762_v57  ;;  %v4224_v63 = vadd.f32 %v4223_v61, %v8764_v21  ;;  %v8846_v47 = vmul.f32 %v5511_v5, %v3147_v4  ;;  %v5514_v45 = vld [vmem:[#allocation2 + $0x7b0] sm:$0xff]  ;;  %v5515_v57 = vld [vmem:[#allocation2 + $0x7b8] sm:$0xff] }
 0x2d9   :  { %v4189_v32 = vrot.slane %v4188_v29, 4  ;;  %v4201_v31 = vrot.slane %v4200_v51, 4  ;;  %v8850_v36 = vmul.f32 %v5512_v10, %v3147_v4  ;;  %v3623_v34 = vmul.f32 %v5513_v30, %v8774_v53 }
 0x2da   :  { %v4213_v22 = vrot.slane %v4212_v24, 4  ;;  %v4225_v8 = vrot.slane %v4224_v63, 4  ;;  %v8853_v48 = vmul.f32 %v5514_v45, %v3147_v4  ;;  %v8855_v21 = vmul.f32 %v5515_v57, %v3147_v4  ;;  %v5525_v57 = vld [vmem:[#allocation2 + $0x788] sm:$0xff] }
 0x2db   :  { %v4190_v9 = vadd.f32 %v4189_v32, %v4188_v29  ;;  %v4202_v0 = vadd.f32 %v4201_v31, %v4200_v51  ;;  %v3624_v14 = vmul.f32 %v5516_v39, %v8774_v53  ;;  %v3625_v55 = vmul.f32 %v5517_v23, %v8774_v53  ;;  %v8875_v32 = vpop.permute.xlu1 %3161 }
 0x2dc   :  { %3361 = vperm.xlu1 %4783, %v2830_v50   ;;  %3396 = vperm.xlu0 %4782, %v2838_v41   ;;  %v4214_v62 = vadd.f32 %v4213_v22, %v4212_v24  ;;  %v4226_v38 = vadd.f32 %v4225_v8, %v4224_v63  ;;  %v3626_v13 = vmul.f32 %v5518_v28, %v8774_v53  ;;  %v5521_v50 = vld [vmem:[#allocation2 + $0x750] sm:$0xff]  ;;  %v5523_v24 = vld [vmem:[#allocation2 + $0x7e0] sm:$0xff] }
 0x2dd   :  { %v4191_v4 = vrot.slane %v4190_v9, 2  ;;  %v4203_v25 = vrot.slane %v4202_v0, 2  ;;  %v4231_v52 = vadd.f32 %v8788_v43, %v3623_v34  ;;  %v3631_v26 = vmul.f32 %v5519_v2, %v8795_v7  ;;  %v5524_v8 = vld [vmem:[#allocation2 + $0x780] sm:$0xff] }
 0x2de   :  { %v4215_v49 = vrot.slane %v4214_v62, 2  ;;  %v4227_v37 = vrot.slane %v4226_v38, 2  ;;  %v3632_v6 = vmul.f32 %v5520_v59, %v8795_v7  ;;  %v3633_v41 = vmul.f32 %v5521_v50, %v8795_v7  ;;  %v5532_v50 = vld [vmem:[#allocation2 + $0x7c0] sm:$0xff] }
 0x2df   :  { %v4192_v17 = vadd.f32 %v4191_v4, %v4190_v9  ;;  %v4204_v58 = vadd.f32 %v4203_v25, %v4202_v0  ;;  %v4243_v53 = vadd.f32 %v8791_v35, %v3624_v14  ;;  %v3634_v43 = vmul.f32 %v5522_v15, %v8795_v7  ;;  %v5526_v0 = vld [vmem:[#allocation2 + $0x790] sm:$0xff]  ;;  %v8880_v14 = vpop.permute.xlu0 %3176  ;;  %v5535_v15 = vld [vmem:[#allocation2 + $0x7d8] sm:$0xff] }
 0x2e0   :  { %v4216_v18 = vadd.f32 %v4215_v49, %v4214_v62  ;;  %v4228_v61 = vadd.f32 %v4227_v37, %v4226_v38  ;;  %v4255_v33 = vadd.f32 %v8793_v27, %v3625_v55  ;;  %v4267_v20 = vadd.f32 %v8799_v54, %v3626_v13  ;;  %v5527_v62 = vld [vmem:[#allocation2 + $0x798] sm:$0xff] }
 0x2e1   :  { %v4193_v29 = vrot.slane %v4192_v17, 1  ;;  %v4205_v51 = vrot.slane %v4204_v58, 1  ;;  %v8873_v63 = vmul.f32 %v5523_v24, %v8848_v19  ;;  %v4232_v5 = vadd.f32 %v4231_v52, %v3631_v26  ;;  %v5530_v26 = vld [vmem:[#allocation2 + $0x7f8] sm:$0xff] }
 0x2e2   :  { %v4217_v31 = vrot.slane %v4216_v18, 1  ;;  %v4229_v35 = vrot.slane %v4228_v61, 1  ;;  %v4244_v10 = vadd.f32 %v4243_v53, %v3632_v6  ;;  %v4256_v30 = vadd.f32 %v4255_v33, %v3633_v41 }
 0x2e3   :  { %v4194_v7 = vadd.f32 %v4193_v29, %v4192_v17  ;;  %v4206_v34 = vadd.f32 %v4205_v51, %v4204_v58  ;;  %v4268_v22 = vadd.f32 %v4267_v20, %v3634_v43  ;;  %v3639_v27 = vmul.f32 %v5524_v8, %v8831_v40  ;;  %v5533_v17 = vld [vmem:[#allocation2 + $0x7c8] sm:$0xff]  ;;  %v8916_v33 = vpop.permute.xlu0 %3186  ;;  %v5537_v51 = vld [vmem:[#allocation2 + $0x830] sm:$0xff] }
 0x2e4   :  { %v4218_v54 = vadd.f32 %v4217_v31, %v4216_v18  ;;  %v4230_v45 = vadd.f32 %v4229_v35, %v4228_v61  ;;  %v3640_v9 = vmul.f32 %v5525_v57, %v8831_v40  ;;  %v3641_v39 = vmul.f32 %v5526_v0, %v8831_v40  ;;  %v5536_v20 = vld [vmem:[#allocation2 + $0x828] sm:$0xff]  ;;  %v5539_v35 = vld [vmem:[#allocation2 + $0x860] sm:$0xff] }
 0x2e5   :  { %v4692_v23 = vsel %vm4691_vm7, %v4194_v7, %v8805_v42  ;;  %v4699_v55 = vsel %vm4691_vm7, %v4206_v34, %v8819_v3  ;;  %v3642_v38 = vmul.f32 %v5527_v62, %v8831_v40  ;;  %v4233_v28 = vadd.f32 %v4232_v5, %v8833_v46  ;;  %v5528_v3 = vld [vmem:[#allocation2 + $0x7e8] sm:$0xff]  ;;  %v5529_v40 = vld [vmem:[#allocation2 + $0x7f0] sm:$0xff]  ;;  %v5538_v5 = vld [vmem:[#allocation2 + $0x838] sm:$0xff] }
 0x2e6   :  { %v4706_v13 = vsel %vm4691_vm7, %v4218_v54, %v8825_v60  ;;  %v4713_v4 = vsel %vm4691_vm7, %v4230_v45, %v8829_v16  ;;  %4750 = vst [vmem:[#allocation7] sm:$0xff] %v4692_v23  ;;  %4751 = vst [vmem:[#allocation7 + $0x8] sm:$0xff] %v4699_v55  ;;  %v4245_v25 = vadd.f32 %v4244_v10, %v8835_v11  ;;  %v8901_v16 = vpop.permute.xlu1 %3171  ;;  %v5540_v7 = vld [vmem:[#allocation2 + $0x800] sm:$0xff]  ;;  %v5545_v55 = vld [vmem:[#allocation2 + $0x870] sm:$0xff] }
 0x2e7   :  { %v4257_v42 = vadd.f32 %v4256_v30, %v8837_v12  ;;  %4752 = vst [vmem:[#allocation7 + $0x10] sm:$0xff] %v4706_v13  ;;  %4753 = vst [vmem:[#allocation7 + $0x18] sm:$0xff] %v4713_v4  ;;  %v8895_v52 = vmul.f32 %v5528_v3, %v8848_v19  ;;  %v8898_v46 = vmul.f32 %v5529_v40, %v8848_v19  ;;  %v5531_v12 = vld [vmem:[#allocation2 + $0x820] sm:$0xff] }
 0x2e8   :  { %v4234_v60 = vadd.f32 %v4233_v28, %v3639_v27  ;;  %v4269_v2 = vadd.f32 %v4268_v22, %v8839_v1  ;;  %v8904_v11 = vmul.f32 %v5530_v26, %v8848_v19  ;;  %v8907_v49 = vmul.f32 %v5531_v12, %v8866_v56  ;;  %v5534_v1 = vld [vmem:[#allocation2 + $0x7d0] sm:$0xff]  ;;  %v5541_v22 = vld [vmem:[#allocation2 + $0x808] sm:$0xff]  ;;  %v5547_v3 = vld [vmem:[#allocation2 + $0x8a0] sm:$0xff] }
 0x2e9   :  { %v4246_v37 = vadd.f32 %v4245_v25, %v3640_v9  ;;  %v4258_v59 = vadd.f32 %v4257_v42, %v3641_v39  ;;  %v3647_v41 = vmul.f32 %v5532_v50, %v8859_v44  ;;  %v3648_v58 = vmul.f32 %v5533_v17, %v8859_v44  ;;  %v5542_v27 = vld [vmem:[#allocation2 + $0x810] sm:$0xff]  ;;  %v5543_v9 = vld [vmem:[#allocation2 + $0x818] sm:$0xff]  ;;  %v5544_v39 = vld [vmem:[#allocation2 + $0x868] sm:$0xff] }
 0x2ea   :  { %v4270_v6 = vadd.f32 %v4269_v2, %v3642_v38  ;;  %v3649_v53 = vmul.f32 %v5534_v1, %v8859_v44  ;;  %v3650_v19 = vmul.f32 %v5535_v15, %v8859_v44  ;;  %v4235_v43 = vadd.f32 %v4234_v60, %v8846_v47  ;;  %v8930_v54 = vpop.permute.xlu1 %3181  ;;  %v5546_v38 = vld [vmem:[#allocation2 + $0x878] sm:$0xff] }
 0x2eb   :  { %v4247_v18 = vadd.f32 %v4246_v37, %v8850_v36  ;;  %v4259_v61 = vadd.f32 %v4258_v59, %v8853_v48  ;;  %v3660_v29 = vmul.f32 %v5536_v20, %v8866_v56  ;;  %v3661_v24 = vmul.f32 %v5537_v51, %v8866_v56 }
 0x2ec   :  { %v8921_v31 = vmul.f32 %v5538_v5, %v8866_v56  ;;  %v4271_v44 = vadd.f32 %v4270_v6, %v8855_v21  ;;  %v8925_v47 = vmul.f32 %v5539_v35, %v8880_v14  ;;  %v4236_v36 = vadd.f32 %v4235_v43, %v3647_v41  ;;  %v5548_v41 = vld [vmem:[#allocation2 + $0x840] sm:$0xff]  ;;  %v5551_v43 = vld [vmem:[#allocation2 + $0x858] sm:$0xff] }
 0x2ed   :  { %v4248_v48 = vadd.f32 %v4247_v18, %v3648_v58  ;;  %v4260_v10 = vadd.f32 %v4259_v61, %v3649_v53  ;;  %v3655_v34 = vmul.f32 %v5540_v7, %v8875_v32  ;;  %v3656_v8 = vmul.f32 %v5541_v22, %v8875_v32  ;;  %v5549_v58 = vld [vmem:[#allocation2 + $0x848] sm:$0xff]  ;;  %v5550_v53 = vld [vmem:[#allocation2 + $0x850] sm:$0xff]  ;;  %v5554_v7 = vld [vmem:[#allocation2 + $0x8b8] sm:$0xff] }
 0x2ee   :  { %v4272_v30 = vadd.f32 %v4271_v44, %v3650_v19  ;;  %v3657_v56 = vmul.f32 %v5542_v27, %v8875_v32  ;;  %v4237_v21 = vrot.slane %v4236_v36, 4  ;;  %v3658_v0 = vmul.f32 %v5543_v9, %v8875_v32  ;;  %v3197_v32 = vpop.permute.xlu0 %3196  ;;  %v5552_v44 = vld [vmem:[#allocation2 + $0x8a8] sm:$0xff]  ;;  %v5557_v9 = vld [vmem:[#allocation2 + $0x8f0] sm:$0xff] }
 0x2ef   :  { %v4249_v45 = vrot.slane %v4248_v48, 4  ;;  %v4261_v57 = vrot.slane %v4260_v10, 4  ;;  %v8934_v23 = vmul.f32 %v5544_v39, %v8880_v14  ;;  %v8937_v62 = vmul.f32 %v5545_v55, %v8880_v14  ;;  %v5558_v39 = vld [vmem:[#allocation2 + $0x8f8] sm:$0xff] }
 0x2f0   :  { %v8940_v28 = vmul.f32 %v5546_v38, %v8880_v14  ;;  %v4273_v13 = vrot.slane %v4272_v30, 4  ;;  %v4238_v4 = vadd.f32 %v4237_v21, %v4236_v36  ;;  %v8943_v40 = vmul.f32 %v5547_v3, %v8916_v33  ;;  %v5553_v36 = vld [vmem:[#allocation2 + $0x8b0] sm:$0xff] }
 0x2f1   :  { %v4250_v25 = vadd.f32 %v4249_v45, %v4248_v48  ;;  %v4262_v42 = vadd.f32 %v4261_v57, %v4260_v10  ;;  %v4279_v2 = vadd.f32 %v3655_v34, %v8873_v63  ;;  %v4291_v26 = vadd.f32 %v3656_v8, %v8895_v52  ;;  %v8952_v63 = vpop.permute.xlu1 %3191  ;;  %v5556_v45 = vld [vmem:[#allocation2 + $0x8e8] sm:$0xff] }
 0x2f2   :  { %v4274_v60 = vadd.f32 %v4273_v13, %v4272_v30  ;;  %v4303_v12 = vadd.f32 %v3657_v56, %v8898_v46  ;;  %v4239_v37 = vrot.slane %v4238_v4, 2  ;;  %v4315_v6 = vadd.f32 %v3658_v0, %v8904_v11  ;;  %v8959_v30 = vpop.permute.xlu0 %3206  ;;  %v5555_v56 = vld [vmem:[#allocation2 + $0x8e0] sm:$0xff] }
 0x2f3   :  { %v4251_v59 = vrot.slane %v4250_v25, 2  ;;  %v4263_v14 = vrot.slane %v4262_v42, 2  ;;  %v3663_v17 = vmul.f32 %v5548_v41, %v8901_v16  ;;  %v3664_v1 = vmul.f32 %v5549_v58, %v8901_v16  ;;  %v5563_v41 = vld [vmem:[#allocation2 + $0x920] sm:$0xff] }
 0x2f4   :  { %v4275_v50 = vrot.slane %v4274_v60, 2  ;;  %v3665_v15 = vmul.f32 %v5550_v53, %v8901_v16  ;;  %v4240_v52 = vadd.f32 %v4239_v37, %v4238_v4  ;;  %v3666_v18 = vmul.f32 %v5551_v43, %v8901_v16  ;;  %v5560_v4 = vld [vmem:[#allocation2 + $0x888] sm:$0xff] }
 0x2f5   :  { %v4252_v19 = vadd.f32 %v4251_v59, %v4250_v25  ;;  %v4264_v46 = vadd.f32 %v4263_v14, %v4262_v42  ;;  %v4280_v11 = vadd.f32 %v4279_v2, %v8907_v49  ;;  %v4292_v20 = vadd.f32 %v4291_v26, %v3660_v29  ;;  %v8962_v55 = vpop.permute.xlu1 %3201  ;;  %v5561_v42 = vld [vmem:[#allocation2 + $0x890] sm:$0xff]  ;;  %v5565_v53 = vld [vmem:[#allocation2 + $0x8c8] sm:$0xff] }
 0x2f6   :  { %v4276_v61 = vadd.f32 %v4275_v50, %v4274_v60  ;;  %v4304_v51 = vadd.f32 %v4303_v12, %v3661_v24  ;;  %v4241_v5 = vrot.slane %v4240_v52, 1  ;;  %v3676_v35 = vmul.f32 %v5552_v44, %v8916_v33  ;;  %v5562_v60 = vld [vmem:[#allocation2 + $0x898] sm:$0xff]  ;;  %v8980_v50 = vpop.permute.xlu0 %3216 }
 0x2f7   :  { %v3677_v48 = vmul.f32 %v5553_v36, %v8916_v33  ;;  %v4316_v10 = vadd.f32 %v4315_v6, %v8921_v31  ;;  %v3678_v34 = vmul.f32 %v5554_v7, %v8916_v33  ;;  %v4281_v16 = vadd.f32 %v4280_v11, %v3663_v17  ;;  %v5559_v33 = vld [vmem:[#allocation2 + $0x880] sm:$0xff] }
 0x2f8   :  { %v4293_v22 = vadd.f32 %v4292_v20, %v3664_v1  ;;  %v4305_v8 = vadd.f32 %v4304_v51, %v3665_v15  ;;  %v4253_v49 = vrot.slane %v4252_v19, 1  ;;  %v4265_v29 = vrot.slane %v4264_v46, 1  ;;  %v5564_v1 = vld [vmem:[#allocation2 + $0x8c0] sm:$0xff] }
 0x2f9   :  { %v4277_v24 = vrot.slane %v4276_v61, 1  ;;  %v4317_v27 = vadd.f32 %v4316_v10, %v3666_v18  ;;  %v3683_v21 = vmul.f32 %v5555_v56, %v3197_v32  ;;  %v3684_v57 = vmul.f32 %v5556_v45, %v3197_v32  ;;  %v5567_v18 = vld [vmem:[#allocation2 + $0x8d8] sm:$0xff]  ;;  %v8990_v11 = vpop.permute.xlu1 %3211  ;;  %v5571_v56 = vld [vmem:[#allocation2 + $0x960] sm:$0xff] }
 0x2fa   :  { %v3685_v0 = vmul.f32 %v5557_v9, %v3197_v32  ;;  %v3686_v31 = vmul.f32 %v5558_v39, %v3197_v32  ;;  %v8964_v38 = vadd.f32 %v4241_v5, %v4240_v52  ;;  %v3671_v13 = vmul.f32 %v5559_v33, %v8930_v54  ;;  %v5566_v52 = vld [vmem:[#allocation2 + $0x8d0] sm:$0xff] }
 0x2fb   :  { %v3672_v25 = vmul.f32 %v5560_v4, %v8930_v54  ;;  %v3673_v3 = vmul.f32 %v5561_v42, %v8930_v54  ;;  %v3674_v2 = vmul.f32 %v5562_v60, %v8930_v54  ;;  %v4282_v26 = vadd.f32 %v4281_v16, %v8925_v47 }
 0x2fc   :  { %v4294_v32 = vadd.f32 %v4293_v22, %v8934_v23  ;;  %v4306_v12 = vadd.f32 %v4305_v8, %v8937_v62  ;;  %v8973_v37 = vadd.f32 %v4253_v49, %v4252_v19  ;;  %v8975_v59 = vadd.f32 %v4265_v29, %v4264_v46  ;;  %v5568_v22 = vld [vmem:[#allocation2 + $0x928] sm:$0xff]  ;;  %v5569_v49 = vld [vmem:[#allocation2 + $0x930] sm:$0xff]  ;;  %v8997_v29 = vpop.permute.xlu0 %3226 }
 0x2fd   :  { %v8977_v14 = vadd.f32 %v4277_v24, %v4276_v61  ;;  %v4318_v6 = vadd.f32 %v4317_v27, %v8940_v28  ;;  %v8983_v17 = vmul.f32 %v5563_v41, %v8959_v30  ;;  %v4283_v54 = vadd.f32 %v4282_v26, %v3671_v13 }
 0x2fe   :  { %v4295_v47 = vadd.f32 %v4294_v32, %v3672_v25  ;;  %v4307_v58 = vadd.f32 %v4306_v12, %v3673_v3  ;;  %v3679_v62 = vmul.f32 %v5564_v1, %v8952_v63  ;;  %v3680_v15 = vmul.f32 %v5565_v53, %v8952_v63  ;;  %v5575_v25 = vld [vmem:[#allocation2 + $0x918] sm:$0xff]  ;;  %v9006_v3 = vpop.permute.xlu1 %3221  ;;  %v5577_v1 = vld [vmem:[#allocation2 + $0x970] sm:$0xff] }
 0x2ff   :  { %v4319_v23 = vadd.f32 %v4318_v6, %v3674_v2  ;;  %v3681_v19 = vmul.f32 %v5566_v52, %v8952_v63  ;;  %v4284_v28 = vadd.f32 %v4283_v54, %v8943_v40  ;;  %v3682_v61 = vmul.f32 %v5567_v18, %v8952_v63  ;;  %v5578_v53 = vld [vmem:[#allocation2 + $0x978] sm:$0xff] }
 0x300   :  { %v4296_v46 = vadd.f32 %v4295_v47, %v3676_v35  ;;  %v4308_v43 = vadd.f32 %v4307_v58, %v3677_v48  ;;  %v4327_v51 = vadd.f32 %v3683_v21, %v3679_v62  ;;  %v4339_v5 = vadd.f32 %v3684_v57, %v3680_v15  ;;  %v5570_v35 = vld [vmem:[#allocation2 + $0x938] sm:$0xff]  ;;  %v5572_v57 = vld [vmem:[#allocation2 + $0x900] sm:$0xff]  ;;  %v5576_v58 = vld [vmem:[#allocation2 + $0x968] sm:$0xff]  ;;  %v3237_v15 = vpop.permute.xlu0 %3236 }
 0x301   :  { %v4320_v20 = vadd.f32 %v4319_v23, %v3678_v34  ;;  %v4351_v44 = vadd.f32 %v3685_v0, %v3681_v19  ;;  %v4285_v36 = vrot.slane %v4284_v28, 4  ;;  %v4363_v16 = vadd.f32 %v3686_v31, %v3682_v61  ;;  %v5573_v0 = vld [vmem:[#allocation2 + $0x908] sm:$0xff]  ;;  %v5574_v31 = vld [vmem:[#allocation2 + $0x910] sm:$0xff]  ;;  %v5580_v61 = vld [vmem:[#allocation2 + $0x940] sm:$0xff] }
 0x302   :  { %v4297_v10 = vrot.slane %v4296_v46, 4  ;;  %v4309_v7 = vrot.slane %v4308_v43, 4  ;;  %v3692_v8 = vmul.f32 %v5568_v22, %v8959_v30  ;;  %v3693_v40 = vmul.f32 %v5569_v49, %v8959_v30  ;;  %v3232_v49 = vpop.permute.xlu1 %3231 }
 0x303   :  { %v8995_v48 = vmul.f32 %v5570_v35, %v8959_v30  ;;  %v4321_v63 = vrot.slane %v4320_v20, 4  ;;  %v4286_v34 = vadd.f32 %v4285_v36, %v4284_v28  ;;  %v9000_v21 = vmul.f32 %v5571_v56, %v8980_v50 }
 0x304   :  { %v4298_v24 = vadd.f32 %v4297_v10, %v4296_v46  ;;  %v4310_v27 = vadd.f32 %v4309_v7, %v4308_v43  ;;  %v3687_v9 = vmul.f32 %v5572_v57, %v8962_v55  ;;  %v3688_v39 = vmul.f32 %v5573_v0, %v8962_v55  ;;  %v5579_v46 = vld [vmem:[#allocation2 + $0x9a0] sm:$0xff] }
 0x305   :  { %v4322_v45 = vadd.f32 %v4321_v63, %v4320_v20  ;;  %v3689_v30 = vmul.f32 %v5574_v31, %v8962_v55  ;;  %v4287_v33 = vrot.slane %v4286_v34, 2  ;;  %v3690_v42 = vmul.f32 %v5575_v25, %v8962_v55  ;;  %v5586_v31 = vld [vmem:[#allocation2 + $0x9b8] sm:$0xff] }
 0x306   :  { %v4299_v13 = vrot.slane %v4298_v24, 2  ;;  %v4311_v4 = vrot.slane %v4310_v27, 2  ;;  %v4328_v2 = vadd.f32 %v4327_v51, %v3687_v9  ;;  %v4340_v26 = vadd.f32 %v4339_v5, %v3688_v39  ;;  %v5581_v51 = vld [vmem:[#allocation2 + $0x948] sm:$0xff]  ;;  %v3247_v9 = vpop.permute.xlu0 %3246  ;;  %v5585_v39 = vld [vmem:[#allocation2 + $0x9b0] sm:$0xff] }
 0x307   :  { %v4323_v60 = vrot.slane %v4322_v45, 2  ;;  %v4352_v32 = vadd.f32 %v4351_v44, %v3689_v30  ;;  %v4288_v12 = vadd.f32 %v4287_v33, %v4286_v34  ;;  %v4364_v54 = vadd.f32 %v4363_v16, %v3690_v42  ;;  %v5582_v44 = vld [vmem:[#allocation2 + $0x950] sm:$0xff]  ;;  %v5583_v16 = vld [vmem:[#allocation2 + $0x958] sm:$0xff]  ;;  %v5587_v33 = vld [vmem:[#allocation2 + $0x9e0] sm:$0xff] }
 0x308   :  { %v4300_v6 = vadd.f32 %v4299_v13, %v4298_v24  ;;  %v4312_v41 = vadd.f32 %v4311_v4, %v4310_v27  ;;  %v3700_v23 = vmul.f32 %v5576_v58, %v8980_v50  ;;  %v3701_v62 = vmul.f32 %v5577_v1, %v8980_v50  ;;  %v5588_v13 = vld [vmem:[#allocation2 + $0x980] sm:$0xff]  ;;  %v5589_v4 = vld [vmem:[#allocation2 + $0x988] sm:$0xff]  ;;  %v5590_v42 = vld [vmem:[#allocation2 + $0x990] sm:$0xff] }
 0x309   :  { %v4324_v47 = vadd.f32 %v4323_v60, %v4322_v45  ;;  %v3702_v55 = vmul.f32 %v5578_v53, %v8980_v50  ;;  %v4289_v52 = vrot.slane %v4288_v12, 1  ;;  %v9012_v43 = vmul.f32 %v5579_v46, %v8997_v29  ;;  %v5594_v1 = vld [vmem:[#allocation2 + $0x9f8] sm:$0xff] }
 0x30a   :  { %v4301_v19 = vrot.slane %v4300_v6, 1  ;;  %v4313_v28 = vrot.slane %v4312_v41, 1  ;;  %v3695_v20 = vmul.f32 %v5580_v61, %v8990_v11  ;;  %v3696_v5 = vmul.f32 %v5581_v51, %v8990_v11 }
 0x30b   :  { %v4325_v18 = vrot.slane %v4324_v47, 1  ;;  %v3697_v36 = vmul.f32 %v5582_v44, %v8990_v11  ;;  %v4290_v10 = vadd.f32 %v4289_v52, %v4288_v12  ;;  %v3698_v22 = vmul.f32 %v5583_v16, %v8990_v11 }
 0x30c   :  { %v4302_v50 = vadd.f32 %v4301_v19, %v4300_v6  ;;  %v4314_v7 = vadd.f32 %v4313_v28, %v4312_v41  ;;  %v4329_v63 = vadd.f32 %v4328_v2, %v8983_v17  ;;  %v4341_v34 = vadd.f32 %v4340_v26, %v3692_v8  ;;  %v5591_v2 = vld [vmem:[#allocation2 + $0x998] sm:$0xff]  ;;  %v3242_v6 = vpop.permute.xlu1 %3241  ;;  %v5592_v41 = vld [vmem:[#allocation2 + $0x9e8] sm:$0xff]  ;;  %v5595_v19 = vld [vmem:[#allocation2 + $0xa20] sm:$0xff] }
 0x30d   :  { %v4326_v35 = vadd.f32 %v4325_v18, %v4324_v47  ;;  %v4353_v24 = vadd.f32 %v4352_v32, %v3693_v40  ;;  %v9021_v27 = vsel %vm4679_vm1, %v4290_v10, %v8964_v38  ;;  %v4365_v11 = vadd.f32 %v4364_v54, %v8995_v48  ;;  %v5584_v38 = vld [vmem:[#allocation2 + $0x9a8] sm:$0xff]  ;;  %v5593_v47 = vld [vmem:[#allocation2 + $0x9f0] sm:$0xff] }
 0x30e   :  { %v9025_v56 = vsel %vm4679_vm1, %v4302_v50, %v8973_v37  ;;  %v9029_v45 = vsel %vm4679_vm1, %v4314_v7, %v8975_v59  ;;  %v4330_v17 = vadd.f32 %v4329_v63, %v3695_v20  ;;  %v4342_v8 = vadd.f32 %v4341_v34, %v3696_v5  ;;  %v5598_v5 = vld [vmem:[#allocation2 + $0x9d0] sm:$0xff]  ;;  %v5600_v7 = vld [vmem:[#allocation2 + $0xa28] sm:$0xff]  ;;  %v5602_v63 = vld [vmem:[#allocation2 + $0xa38] sm:$0xff] }
 0x30f   :  { %v9034_v57 = vsel %vm4679_vm1, %v4326_v35, %v8977_v14  ;;  %v4354_v40 = vadd.f32 %v4353_v24, %v3697_v36  ;;  %v3708_v0 = vmul.f32 %v5584_v38, %v8997_v29  ;;  %v3709_v37 = vmul.f32 %v5585_v39, %v8997_v29 }
 0x310   :  { %v3710_v59 = vmul.f32 %v5586_v31, %v8997_v29  ;;  %v4366_v30 = vadd.f32 %v4365_v11, %v3698_v22  ;;  %v9039_v48 = vmul.f32 %v5587_v33, %v3237_v15  ;;  %v3703_v14 = vmul.f32 %v5588_v13, %v9006_v3  ;;  %v5601_v22 = vld [vmem:[#allocation2 + $0xa30] sm:$0xff]  ;;  %v3252_v39 = vpop.permute.xlu1 %3251 }
 0x311   :  { %v3704_v25 = vmul.f32 %v5589_v4, %v9006_v3  ;;  %v3705_v60 = vmul.f32 %v5590_v42, %v9006_v3  ;;  %v3706_v26 = vmul.f32 %v5591_v2, %v9006_v3  ;;  %v4331_v32 = vadd.f32 %v4330_v17, %v9000_v21  ;;  %v9048_v3 = vpop.permute.xlu0 %3256  ;;  %v5596_v21 = vld [vmem:[#allocation2 + $0x9c0] sm:$0xff]  ;;  %v5605_v2 = vld [vmem:[#allocation2 + $0xa08] sm:$0xff] }
 0x312   :  { %v4343_v12 = vadd.f32 %v4342_v8, %v3700_v23  ;;  %v4355_v29 = vadd.f32 %v4354_v40, %v3701_v62  ;;  %v3716_v54 = vmul.f32 %v5592_v41, %v3237_v15  ;;  %v3717_v58 = vmul.f32 %v5593_v47, %v3237_v15  ;;  %v5597_v62 = vld [vmem:[#allocation2 + $0x9c8] sm:$0xff]  ;;  %v5603_v40 = vld [vmem:[#allocation2 + $0xa60] sm:$0xff] }
 0x313   :  { %v3718_v53 = vmul.f32 %v5594_v1, %v3237_v15  ;;  %v4367_v52 = vadd.f32 %v4366_v30, %v3702_v55  ;;  %v9046_v28 = vmul.f32 %v5595_v19, %v3247_v9  ;;  %v4332_v46 = vadd.f32 %v4331_v32, %v3703_v14  ;;  %v5599_v15 = vld [vmem:[#allocation2 + $0x9d8] sm:$0xff]  ;;  %v5604_v42 = vld [vmem:[#allocation2 + $0xa00] sm:$0xff]  ;;  %v5606_v32 = vld [vmem:[#allocation2 + $0xa10] sm:$0xff] }
 0x314   :  { %v4344_v18 = vadd.f32 %v4343_v12, %v3704_v25  ;;  %v4356_v61 = vadd.f32 %v4355_v29, %v3705_v60  ;;  %v3711_v23 = vmul.f32 %v5596_v21, %v3232_v49  ;;  %v3712_v51 = vmul.f32 %v5597_v62, %v3232_v49  ;;  %v5607_v1 = vld [vmem:[#allocation2 + $0xa18] sm:$0xff]  ;;  %v9061_v21 = vpop.permute.xlu1 %3261  ;;  %v5608_v62 = vld [vmem:[#allocation2 + $0xa68] sm:$0xff] }
 0x315   :  { %v4368_v20 = vadd.f32 %v4367_v52, %v3706_v26  ;;  %v3713_v44 = vmul.f32 %v5598_v5, %v3232_v49  ;;  %v4333_v36 = vrot.slane %v4332_v46, 4  ;;  %v3714_v55 = vmul.f32 %v5599_v15, %v3232_v49  ;;  %v5610_v15 = vld [vmem:[#allocation2 + $0xa78] sm:$0xff] }
 0x316   :  { %v4345_v10 = vrot.slane %v4344_v18, 4  ;;  %v4357_v50 = vrot.slane %v4356_v61, 4  ;;  %v9050_v16 = vmul.f32 %v5600_v7, %v3247_v9  ;;  %v9052_v35 = vmul.f32 %v5601_v22, %v3247_v9 }
 0x317   :  { %v9054_v34 = vmul.f32 %v5602_v63, %v3247_v9  ;;  %v4369_v24 = vrot.slane %v4368_v20, 4  ;;  %v4334_v11 = vadd.f32 %v4333_v36, %v4332_v46  ;;  %v9057_v38 = vmul.f32 %v5603_v40, %v9048_v3  ;;  %v5613_v40 = vld [vmem:[#allocation2 + $0xa48] sm:$0xff] }
 0x318   :  { %v4346_v17 = vadd.f32 %v4345_v10, %v4344_v18  ;;  %v4358_v8 = vadd.f32 %v4357_v50, %v4356_v61  ;;  %v4375_v49 = vadd.f32 %v3711_v23, %v9012_v43  ;;  %v4387_v30 = vadd.f32 %v3712_v51, %v3708_v0  ;;  %v3267_v61 = vpop.permute.xlu0 %3266 }
 0x319   :  { %v4370_v31 = vadd.f32 %v4369_v24, %v4368_v20  ;;  %v4399_v33 = vadd.f32 %v3713_v44, %v3709_v37  ;;  %v4335_v13 = vrot.slane %v4334_v11, 2  ;;  %v4411_v25 = vadd.f32 %v3714_v55, %v3710_v59  ;;  %v5611_v24 = vld [vmem:[#allocation2 + $0xaa0] sm:$0xff] }
 0x31a   :  { %v4347_v14 = vrot.slane %v4346_v17, 2  ;;  %v4359_v4 = vrot.slane %v4358_v8, 2  ;;  %v3719_v60 = vmul.f32 %v5604_v42, %v3242_v6  ;;  %v3720_v26 = vmul.f32 %v5605_v2, %v3242_v6 }
 0x31b   :  { %v4371_v9 = vrot.slane %v4370_v31, 2  ;;  %v3721_v12 = vmul.f32 %v5606_v32, %v3242_v6  ;;  %v4336_v29 = vadd.f32 %v4335_v13, %v4334_v11  ;;  %v3722_v52 = vmul.f32 %v5607_v1, %v3242_v6  ;;  %v5622_v1 = vld [vmem:[#allocation2 + $0xaf0] sm:$0xff] }
 0x31c   :  { %v4348_v41 = vadd.f32 %v4347_v14, %v4346_v17  ;;  %v4360_v47 = vadd.f32 %v4359_v4, %v4358_v8  ;;  %v4376_v43 = vadd.f32 %v4375_v49, %v9039_v48  ;;  %v4388_v0 = vadd.f32 %v4387_v30, %v3716_v54  ;;  %v5609_v54 = vld [vmem:[#allocation2 + $0xa70] sm:$0xff]  ;;  %v3277_v30 = vpop.permute.xlu0 %3276  ;;  %v3272_v4 = vpop.permute.xlu1 %3271 }
 0x31d   :  { %v4372_v19 = vadd.f32 %v4371_v9, %v4370_v31  ;;  %v4400_v37 = vadd.f32 %v4399_v33, %v3717_v58  ;;  %v4337_v46 = vrot.slane %v4336_v29, 1  ;;  %v4412_v20 = vadd.f32 %v4411_v25, %v3718_v53  ;;  %v5615_v33 = vld [vmem:[#allocation2 + $0xa58] sm:$0xff]  ;;  %v5616_v25 = vld [vmem:[#allocation2 + $0xaa8] sm:$0xff] }
 0x31e   :  { %v4349_v18 = vrot.slane %v4348_v41, 1  ;;  %v4361_v59 = vrot.slane %v4360_v47, 1  ;;  %v3732_v51 = vmul.f32 %v5608_v62, %v9048_v3  ;;  %v4377_v5 = vadd.f32 %v4376_v43, %v3719_v60  ;;  %v5618_v60 = vld [vmem:[#allocation2 + $0xab8] sm:$0xff] }
 0x31f   :  { %v4373_v23 = vrot.slane %v4372_v19, 1  ;;  %v4389_v44 = vadd.f32 %v4388_v0, %v3720_v26  ;;  %v4338_v36 = vadd.f32 %v4337_v46, %v4336_v29  ;;  %v4401_v50 = vadd.f32 %v4400_v37, %v3721_v12  ;;  %v5623_v43 = vld [vmem:[#allocation2 + $0xaf8] sm:$0xff] }
 0x320   :  { %v4350_v6 = vadd.f32 %v4349_v18, %v4348_v41  ;;  %v4362_v10 = vadd.f32 %v4361_v59, %v4360_v47  ;;  %v3733_v58 = vmul.f32 %v5609_v54, %v9048_v3  ;;  %v3734_v55 = vmul.f32 %v5610_v15, %v9048_v3  ;;  %v5612_v3 = vld [vmem:[#allocation2 + $0xa40] sm:$0xff]  ;;  %v5624_v59 = vld [vmem:[#allocation2 + $0xa88] sm:$0xff]  ;;  %v5626_v62 = vld [vmem:[#allocation2 + $0xa98] sm:$0xff] }
 0x321   :  { %v4374_v48 = vadd.f32 %v4373_v23, %v4372_v19  ;;  %v4413_v53 = vadd.f32 %v4412_v20, %v3722_v52  ;;  %v9068_v7 = vsel %vm4681_vm2, %v4338_v36, %v9021_v27  ;;  %v3739_v11 = vmul.f32 %v5611_v24, %v3267_v61  ;;  %v5614_v27 = vld [vmem:[#allocation2 + $0xa50] sm:$0xff]  ;;  %v5619_v41 = vld [vmem:[#allocation2 + $0xa80] sm:$0xff] }
 0x322   :  { %v9072_v22 = vsel %vm4681_vm2, %v4350_v6, %v9025_v56  ;;  %v9076_v63 = vsel %vm4681_vm2, %v4362_v10, %v9029_v45  ;;  %v3727_v8 = vmul.f32 %v5612_v3, %v3252_v39  ;;  %v3728_v31 = vmul.f32 %v5613_v40, %v3252_v39  ;;  %v5625_v20 = vld [vmem:[#allocation2 + $0xa90] sm:$0xff]  ;;  %v5627_v54 = vld [vmem:[#allocation2 + $0xac0] sm:$0xff] }
 0x323   :  { %v9080_v17 = vsel %vm4681_vm2, %v4374_v48, %v9034_v57  ;;  %v3729_v49 = vmul.f32 %v5614_v27, %v3252_v39  ;;  %v3730_v56 = vmul.f32 %v5615_v33, %v3252_v39  ;;  %v4378_v13 = vadd.f32 %v4377_v5, %v9046_v28  ;;  %v5617_v57 = vld [vmem:[#allocation2 + $0xab0] sm:$0xff]  ;;  %v5620_v28 = vld [vmem:[#allocation2 + $0xae0] sm:$0xff] }
 0x324   :  { %v4390_v45 = vadd.f32 %v4389_v44, %v9050_v16  ;;  %v4402_v14 = vadd.f32 %v4401_v50, %v9052_v35  ;;  %v3740_v9 = vmul.f32 %v5616_v25, %v3267_v61  ;;  %v3741_v42 = vmul.f32 %v5617_v57, %v3267_v61  ;;  %v5621_v16 = vld [vmem:[#allocation2 + $0xae8] sm:$0xff]  ;;  %v3282_v50 = vpop.permute.xlu1 %3281  ;;  %v5629_v15 = vld [vmem:[#allocation2 + $0xad0] sm:$0xff] }
 0x325   :  { %v3742_v2 = vmul.f32 %v5618_v60, %v3267_v61  ;;  %v4414_v26 = vadd.f32 %v4413_v53, %v9054_v34  ;;  %v4379_v32 = vadd.f32 %v4378_v13, %v3727_v8  ;;  %v3735_v39 = vmul.f32 %v5619_v41, %v9061_v21  ;;  %v5630_v8 = vld [vmem:[#allocation2 + $0xad8] sm:$0xff] }
 0x326   :  { %v4391_v12 = vadd.f32 %v4390_v45, %v3728_v31  ;;  %v4403_v29 = vadd.f32 %v4402_v14, %v3729_v49  ;;  %v9087_v47 = vmul.f32 %v5620_v28, %v3277_v30  ;;  %v9089_v35 = vmul.f32 %v5621_v16, %v3277_v30  ;;  %v5634_v28 = vld [vmem:[#allocation2 + $0xb18] sm:$0xff] }
 0x327   :  { %v9091_v52 = vmul.f32 %v5622_v1, %v3277_v30  ;;  %v4415_v19 = vadd.f32 %v4414_v26, %v3730_v56  ;;  %v3750_v0 = vmul.f32 %v5623_v43, %v3277_v30  ;;  %v4380_v34 = vadd.f32 %v4379_v32, %v9057_v38  ;;  %v3297_v30 = vpop.permute.xlu0 %3296 }
 0x328   :  { %v4392_v37 = vadd.f32 %v4391_v12, %v3732_v51  ;;  %v4404_v46 = vadd.f32 %v4403_v29, %v3733_v58  ;;  %v3736_v61 = vmul.f32 %v5624_v59, %v9061_v21  ;;  %v3737_v23 = vmul.f32 %v5625_v20, %v9061_v21  ;;  %v5628_v51 = vld [vmem:[#allocation2 + $0xac8] sm:$0xff]  ;;  %v5631_v12 = vld [vmem:[#allocation2 + $0xb00] sm:$0xff]  ;;  %v3302_v41 = vpop.permute.xlu1 %3301 }
 0x329   :  { %v4416_v18 = vadd.f32 %v4415_v19, %v3734_v55  ;;  %v3738_v5 = vmul.f32 %v5626_v62, %v9061_v21  ;;  %v4381_v44 = vrot.slane %v4380_v34, 4  ;;  %v4423_v10 = vadd.f32 %v3739_v11, %v3735_v39  ;;  %v5632_v39 = vld [vmem:[#allocation2 + $0xb08] sm:$0xff] }
 0x32a   :  { %v4393_v36 = vrot.slane %v4392_v37, 4  ;;  %v4405_v6 = vrot.slane %v4404_v46, 4  ;;  %v3743_v38 = vmul.f32 %v5627_v54, %v3272_v4  ;;  %v3744_v58 = vmul.f32 %v5628_v51, %v3272_v4  ;;  %v5638_v54 = vld [vmem:[#allocation2 + $0xb78] sm:$0xff] }
 0x32b   :  { %v4417_v48 = vrot.slane %v4416_v18, 4  ;;  %v3745_v55 = vmul.f32 %v5629_v15, %v3272_v4  ;;  %v4382_v53 = vadd.f32 %v4381_v44, %v4380_v34  ;;  %v3746_v40 = vmul.f32 %v5630_v8, %v3272_v4  ;;  %v3332_v1 = vpop.permute.xlu0 %3331  ;;  %v5635_v44 = vld [vmem:[#allocation2 + $0xb60] sm:$0xff] }
 0x32c   :  { %v4394_v24 = vadd.f32 %v4393_v36, %v4392_v37  ;;  %v4406_v3 = vadd.f32 %v4405_v6, %v4404_v46  ;;  %v4435_v27 = vadd.f32 %v3740_v9, %v3736_v61  ;;  %v4447_v21 = vadd.f32 %v3741_v42, %v3737_v23  ;;  %v5633_v42 = vld [vmem:[#allocation2 + $0xb10] sm:$0xff]  ;;  %v5636_v6 = vld [vmem:[#allocation2 + $0xb68] sm:$0xff] }
 0x32d   :  { %v4418_v31 = vadd.f32 %v4417_v48, %v4416_v18  ;;  %v4459_v49 = vadd.f32 %v3742_v2, %v3738_v5  ;;  %v4383_v33 = vrot.slane %v4382_v53, 2  ;;  %v4424_v13 = vadd.f32 %v4423_v10, %v3743_v38 }
 0x32e   :  { %v4395_v11 = vrot.slane %v4394_v24, 2  ;;  %v4407_v56 = vrot.slane %v4406_v3, 2  ;;  %v4436_v14 = vadd.f32 %v4435_v27, %v3744_v58  ;;  %v4448_v25 = vadd.f32 %v4447_v21, %v3745_v55  ;;  %v5642_v21 = vld [vmem:[#allocation2 + $0xb98] sm:$0xff] }
 0x32f   :  { %v4419_v45 = vrot.slane %v4418_v31, 2  ;;  %v4460_v57 = vadd.f32 %v4459_v49, %v3746_v40  ;;  %v4384_v60 = vadd.f32 %v4383_v33, %v4382_v53  ;;  %v3751_v29 = vmul.f32 %v5631_v12, %v3282_v50  ;;  %v3307_v8 = vpop.permute.xlu0 %3306  ;;  %v5643_v33 = vld [vmem:[#allocation2 + $0xc60] sm:$0xff] }
 0x330   :  { %v4396_v26 = vadd.f32 %v4395_v11, %v4394_v24  ;;  %v4408_v32 = vadd.f32 %v4407_v56, %v4406_v3  ;;  %v3752_v9 = vmul.f32 %v5632_v39, %v3282_v50  ;;  %v3753_v2 = vmul.f32 %v5633_v42, %v3282_v50  ;;  %v5641_v24 = vld [vmem:[#allocation2 + $0xb90] sm:$0xff]  ;;  %v5644_v56 = vld [vmem:[#allocation2 + $0xc68] sm:$0xff] }
 0x331   :  { %v4420_v4 = vadd.f32 %v4419_v45, %v4418_v31  ;;  %v3754_v16 = vmul.f32 %v5634_v28, %v3282_v50  ;;  %v4385_v19 = vrot.slane %v4384_v60, 1  ;;  %v4425_v37 = vadd.f32 %v4424_v13, %v9087_v47  ;;  %v5637_v50 = vld [vmem:[#allocation2 + $0xb70] sm:$0xff]  ;;  %v5639_v47 = vld [vmem:[#allocation2 + $0xb80] sm:$0xff] }
 0x332   :  { %v4397_v43 = vrot.slane %v4396_v26, 1  ;;  %v4409_v34 = vrot.slane %v4408_v32, 1  ;;  %v4437_v18 = vadd.f32 %v4436_v14, %v9089_v35  ;;  %v4449_v59 = vadd.f32 %v4448_v25, %v9091_v52  ;;  %v5640_v35 = vld [vmem:[#allocation2 + $0xb88] sm:$0xff]  ;;  %v3337_v52 = vpop.permute.xlu1 %3336 }
 0x333   :  { %v4421_v46 = vrot.slane %v4420_v4, 1  ;;  %v4461_v61 = vadd.f32 %v4460_v57, %v3750_v0  ;;  %v4386_v20 = vadd.f32 %v4385_v19, %v4384_v60  ;;  %v3763_v36 = vmul.f32 %v5635_v44, %v3297_v30  ;;  %v5647_v60 = vld [vmem:[#allocation2 + $0xba0] sm:$0xff]  ;;  %v5656_v44 = vld [vmem:[#allocation2 + $0xd28] sm:$0xff] }
 0x334   :  { %v4398_v23 = vadd.f32 %v4397_v43, %v4396_v26  ;;  %v4410_v62 = vadd.f32 %v4409_v34, %v4408_v32  ;;  %v3764_v10 = vmul.f32 %v5636_v6, %v3297_v30  ;;  %v3765_v48 = vmul.f32 %v5637_v50, %v3297_v30  ;;  %v5648_v32 = vld [vmem:[#allocation2 + $0xc40] sm:$0xff]  ;;  %v5657_v6 = vld [vmem:[#allocation2 + $0xd30] sm:$0xff] }
 0x335   :  { %v4422_v5 = vadd.f32 %v4421_v46, %v4420_v4  ;;  %v3766_v38 = vmul.f32 %v5638_v54, %v3297_v30  ;;  %v9100_v51 = vadd.f32 %v4425_v37, %v3751_v29  ;;  %v3767_v58 = vmul.f32 %v5639_v47, %v3302_v41  ;;  %v5649_v29 = vld [vmem:[#allocation2 + $0xc48] sm:$0xff]  ;;  %v5650_v4 = vld [vmem:[#allocation2 + $0xc50] sm:$0xff] }
 0x336   :  { %v3768_v15 = vmul.f32 %v5640_v35, %v3302_v41  ;;  %v9102_v0 = vadd.f32 %v4437_v18, %v3752_v9  ;;  %v9104_v55 = vadd.f32 %v4449_v59, %v3753_v2  ;;  %v9106_v53 = vadd.f32 %v4461_v61, %v3754_v16  ;;  %v5651_v9 = vld [vmem:[#allocation2 + $0xc58] sm:$0xff]  ;;  %v5652_v2 = vld [vmem:[#allocation2 + $0xba8] sm:$0xff]  ;;  %v5653_v16 = vld [vmem:[#allocation2 + $0xbb0] sm:$0xff] }
 0x337   :  { %v3769_v3 = vmul.f32 %v5641_v24, %v3302_v41  ;;  %v9110_v40 = vsel %vm4683_vm3, %v4386_v20, %v9068_v7  ;;  %v9114_v31 = vsel %vm4683_vm3, %v4398_v23, %v9072_v22  ;;  %v9118_v27 = vsel %vm4683_vm3, %v4410_v62, %v9076_v63  ;;  %v5645_v7 = vld [vmem:[#allocation2 + $0xc70] sm:$0xff]  ;;  %v5646_v22 = vld [vmem:[#allocation2 + $0xc78] sm:$0xff]  ;;  %v5655_v62 = vld [vmem:[#allocation2 + $0xd20] sm:$0xff] }
 0x338   :  { %v3770_v49 = vmul.f32 %v5642_v21, %v3302_v41  ;;  %v9122_v30 = vsel %vm4683_vm3, %v4422_v5, %v9080_v17  ;;  %v3795_v11 = vmul.f32 %v5643_v33, %v3337_v52  ;;  %v3796_v13 = vmul.f32 %v5644_v56, %v3337_v52  ;;  %v5654_v59 = vld [vmem:[#allocation2 + $0xbb8] sm:$0xff]  ;;  %v5663_v33 = vld [vmem:[#allocation2 + $0xc80] sm:$0xff]  ;;  %v5664_v56 = vld [vmem:[#allocation2 + $0xc88] sm:$0xff] }
 0x339   :  { %v3797_v45 = vmul.f32 %v5645_v7, %v3337_v52  ;;  %v4471_v14 = vadd.f32 %v3767_v58, %v3763_v36  ;;  %v4483_v25 = vadd.f32 %v3768_v15, %v3764_v10  ;;  %v3798_v57 = vmul.f32 %v5646_v22, %v3337_v52  ;;  %v5661_v15 = vld [vmem:[#allocation2 + $0xd38] sm:$0xff]  ;;  %v5665_v7 = vld [vmem:[#allocation2 + $0xc90] sm:$0xff] }
 0x33a   :  { %v3771_v26 = vmul.f32 %v5647_v60, %v3307_v8  ;;  %v4495_v63 = vadd.f32 %v3769_v3, %v3765_v48  ;;  %v3791_v12 = vmul.f32 %v5648_v32, %v3332_v1  ;;  %v3792_v41 = vmul.f32 %v5649_v29, %v3332_v1  ;;  %v5659_v48 = vld [vmem:[#allocation2 + $0xd48] sm:$0xff]  ;;  %v5662_v24 = vld [vmem:[#allocation2 + $0xd58] sm:$0xff] }
 0x33b   :  { %v3793_v17 = vmul.f32 %v5650_v4, %v3332_v1  ;;  %v4507_v39 = vadd.f32 %v3770_v49, %v3766_v38  ;;  %v3794_v42 = vmul.f32 %v5651_v9, %v3332_v1  ;;  %v3772_v28 = vmul.f32 %v5652_v2, %v3307_v8  ;;  %v3367_v43 = vpop.permute.xlu1 %3366  ;;  %v3372_v34 = vpop.permute.xlu0 %3371  ;;  %v5658_v1 = vld [vmem:[#allocation2 + $0xd40] sm:$0xff]  ;;  %v5660_v38 = vld [vmem:[#allocation2 + $0xd50] sm:$0xff]  ;;  %v5670_v4 = vld [vmem:[#allocation2 + $0xbd8] sm:$0xff] }
 0x33c   :  { %v3773_v19 = vmul.f32 %v5653_v16, %v3307_v8  ;;  %v4519_v37 = vadd.f32 %v3795_v11, %v3791_v12  ;;  %v4531_v46 = vadd.f32 %v3796_v13, %v3792_v41  ;;  %v3774_v61 = vmul.f32 %v5654_v59, %v3307_v8  ;;  %v5672_v59 = vld [vmem:[#allocation2 + $0xd68] sm:$0xff] }
 0x33d   :  { %v4543_v18 = vadd.f32 %v3797_v45, %v3793_v17  ;;  %v4555_v20 = vadd.f32 %v3798_v57, %v3794_v42  ;;  %v4472_v23 = vadd.f32 %v4471_v14, %v3771_v26  ;;  %v3819_v5 = vmul.f32 %v5655_v62, %v3367_v43  ;;  %v5666_v14 = vld [vmem:[#allocation2 + $0xc98] sm:$0xff]  ;;  %v5667_v57 = vld [vmem:[#allocation2 + $0xbc0] sm:$0xff]  ;;  %v5668_v26 = vld [vmem:[#allocation2 + $0xbc8] sm:$0xff] }
 0x33e   :  { %v3820_v36 = vmul.f32 %v5656_v44, %v3367_v43  ;;  %v3821_v10 = vmul.f32 %v5657_v6, %v3367_v43  ;;  %v3823_v50 = vmul.f32 %v5658_v1, %v3372_v34  ;;  %v3824_v54 = vmul.f32 %v5659_v48, %v3372_v34  ;;  %v5673_v62 = vld [vmem:[#allocation2 + $0xd70] sm:$0xff]  ;;  %v5675_v48 = vld [vmem:[#allocation2 + $0xca0] sm:$0xff] }
 0x33f   :  { %v3825_v47 = vmul.f32 %v5660_v38, %v3372_v34  ;;  %v4484_v58 = vadd.f32 %v4483_v25, %v3772_v28  ;;  %v4496_v35 = vadd.f32 %v4495_v63, %v3773_v19  ;;  %v3822_v52 = vmul.f32 %v5661_v15, %v3367_v43  ;;  %v3342_v8 = vpop.permute.xlu1 %3341  ;;  %v3312_v21 = vpop.permute.xlu0 %3311  ;;  %v5669_v63 = vld [vmem:[#allocation2 + $0xbd0] sm:$0xff]  ;;  %v5671_v43 = vld [vmem:[#allocation2 + $0xd60] sm:$0xff] }
 0x340   :  { %v3826_v3 = vmul.f32 %v5662_v24, %v3372_v34  ;;  %v4508_v49 = vadd.f32 %v4507_v39, %v3774_v61  ;;  %v3799_v11 = vmul.f32 %v5663_v33, %v3342_v8  ;;  %v3800_v13 = vmul.f32 %v5664_v56, %v3342_v8  ;;  %v5682_v56 = vld [vmem:[#allocation2 + $0xbf8] sm:$0xff] }
 0x341   :  { %v3801_v45 = vmul.f32 %v5665_v7, %v3342_v8  ;;  %v3802_v22 = vmul.f32 %v5666_v14, %v3342_v8  ;;  %v3775_v60 = vmul.f32 %v5667_v57, %v3312_v21  ;;  %v3776_v25 = vmul.f32 %v5668_v26, %v3312_v21  ;;  %v5683_v7 = vld [vmem:[#allocation2 + $0xd80] sm:$0xff]  ;;  %v5684_v14 = vld [vmem:[#allocation2 + $0xd88] sm:$0xff]  ;;  %v5685_v57 = vld [vmem:[#allocation2 + $0xd90] sm:$0xff] }
 0x342   :  { %v3777_v32 = vmul.f32 %v5669_v63, %v3312_v21  ;;  %v4567_v12 = vadd.f32 %v3823_v50, %v3819_v5  ;;  %v4579_v29 = vadd.f32 %v3824_v54, %v3820_v36  ;;  %v4591_v41 = vadd.f32 %v3825_v47, %v3821_v10  ;;  %v5674_v36 = vld [vmem:[#allocation2 + $0xd78] sm:$0xff] }
 0x343   :  { %v3778_v17 = vmul.f32 %v5670_v4, %v3312_v21  ;;  %v4603_v39 = vadd.f32 %v3826_v3, %v3822_v52  ;;  %v4520_v9 = vadd.f32 %v4519_v37, %v3799_v11  ;;  %v4532_v42 = vadd.f32 %v4531_v46, %v3800_v13  ;;  %v3377_v28 = vpop.permute.xlu1 %3376  ;;  %v3347_v16 = vpop.permute.xlu0 %3346  ;;  %v5676_v37 = vld [vmem:[#allocation2 + $0xca8] sm:$0xff]  ;;  %v5678_v52 = vld [vmem:[#allocation2 + $0xcb8] sm:$0xff]  ;;  %v5681_v11 = vld [vmem:[#allocation2 + $0xbf0] sm:$0xff] }
 0x344   :  { %v4544_v2 = vadd.f32 %v4543_v18, %v3801_v45  ;;  %v4556_v19 = vadd.f32 %v4555_v20, %v3802_v22  ;;  %v3827_v34 = vmul.f32 %v5671_v43, %v3377_v28  ;;  %v3828_v61 = vmul.f32 %v5672_v59, %v3377_v28  ;;  %v5677_v18 = vld [vmem:[#allocation2 + $0xcb0] sm:$0xff]  ;;  %v5687_v43 = vld [vmem:[#allocation2 + $0xb20] sm:$0xff]  ;;  %v5688_v59 = vld [vmem:[#allocation2 + $0xb28] sm:$0xff] }
 0x345   :  { %v3829_v44 = vmul.f32 %v5673_v62, %v3377_v28  ;;  %v4473_v6 = vadd.f32 %v4472_v23, %v3775_v60  ;;  %v4485_v1 = vadd.f32 %v4484_v58, %v3776_v25  ;;  %v4497_v5 = vadd.f32 %v4496_v35, %v3777_v32  ;;  %v5679_v23 = vld [vmem:[#allocation2 + $0xbe0] sm:$0xff]  ;;  %v5680_v35 = vld [vmem:[#allocation2 + $0xbe8] sm:$0xff]  ;;  %v5686_v32 = vld [vmem:[#allocation2 + $0xd98] sm:$0xff] }
 0x346   :  { %v3830_v10 = vmul.f32 %v5674_v36, %v3377_v28  ;;  %v4509_v50 = vadd.f32 %v4508_v49, %v3778_v17  ;;  %v3803_v54 = vmul.f32 %v5675_v48, %v3347_v16  ;;  %v3804_v46 = vmul.f32 %v5676_v37, %v3347_v16  ;;  %v5689_v62 = vld [vmem:[#allocation2 + $0xb30] sm:$0xff] }
 0x347   :  { %v3805_v38 = vmul.f32 %v5677_v18, %v3347_v16  ;;  %v4568_v47 = vadd.f32 %v4567_v12, %v3827_v34  ;;  %v4580_v20 = vadd.f32 %v4579_v29, %v3828_v61  ;;  %v4592_v15 = vadd.f32 %v4591_v41, %v3829_v44  ;;  %v3317_v3 = vpop.permute.xlu1 %3316  ;;  %v3382_v8 = vpop.permute.xlu0 %3381 }
 0x348   :  { %v3806_v24 = vmul.f32 %v5678_v52, %v3347_v16  ;;  %v4604_v21 = vadd.f32 %v4603_v39, %v3830_v10  ;;  %v3779_v58 = vmul.f32 %v5679_v23, %v3317_v3  ;;  %v3780_v33 = vmul.f32 %v5680_v35, %v3317_v3  ;;  %v5697_v23 = vld [vmem:[#allocation2 + $0xc10] sm:$0xff]  ;;  %v5698_v35 = vld [vmem:[#allocation2 + $0xc18] sm:$0xff] }
 0x349   :  { %v3781_v49 = vmul.f32 %v5681_v11, %v3317_v3  ;;  %v3782_v13 = vmul.f32 %v5682_v56, %v3317_v3  ;;  %v3831_v45 = vmul.f32 %v5683_v7, %v3382_v8  ;;  %v3832_v22 = vmul.f32 %v5684_v14, %v3382_v8  ;;  %v5699_v11 = vld [vmem:[#allocation2 + $0xda0] sm:$0xff]  ;;  %v5701_v56 = vld [vmem:[#allocation2 + $0xdb0] sm:$0xff] }
 0x34a   :  { %v3833_v60 = vmul.f32 %v5685_v57, %v3382_v8  ;;  %v4521_v26 = vadd.f32 %v4520_v9, %v3803_v54  ;;  %v4533_v25 = vadd.f32 %v4532_v42, %v3804_v46  ;;  %v4545_v63 = vadd.f32 %v4544_v2, %v3805_v38  ;;  %v5690_v42 = vld [vmem:[#allocation2 + $0xb38] sm:$0xff]  ;;  %v5691_v54 = vld [vmem:[#allocation2 + $0xcc0] sm:$0xff] }
 0x34b   :  { %v3834_v12 = vmul.f32 %v5686_v32, %v3382_v8  ;;  %v4557_v29 = vadd.f32 %v4556_v19, %v3806_v24  ;;  %v4474_v41 = vadd.f32 %v4473_v6, %v3779_v58  ;;  %v4486_v4 = vadd.f32 %v4485_v1, %v3780_v33  ;;  %v3287_v39 = vpop.permute.xlu1 %3286  ;;  %v3352_v28 = vpop.permute.xlu0 %3351  ;;  %v5692_v6 = vld [vmem:[#allocation2 + $0xcc8] sm:$0xff]  ;;  %v5694_v38 = vld [vmem:[#allocation2 + $0xcd8] sm:$0xff]  ;;  %v5695_v24 = vld [vmem:[#allocation2 + $0xc00] sm:$0xff] }
 0x34c   :  { %v4498_v17 = vadd.f32 %v4497_v5, %v3781_v49  ;;  %v4510_v16 = vadd.f32 %v4509_v50, %v3782_v13  ;;  %v3755_v34 = vmul.f32 %v5687_v43, %v3287_v39  ;;  %v3756_v61 = vmul.f32 %v5688_v59, %v3287_v39  ;;  %v5693_v5 = vld [vmem:[#allocation2 + $0xcd0] sm:$0xff]  ;;  %v5696_v8 = vld [vmem:[#allocation2 + $0xc08] sm:$0xff] }
 0x34d   :  { %v3757_v44 = vmul.f32 %v5689_v62, %v3287_v39  ;;  %v4569_v36 = vadd.f32 %v4568_v47, %v3831_v45  ;;  %v4581_v10 = vadd.f32 %v4580_v20, %v3832_v22  ;;  %v4593_v9 = vadd.f32 %v4592_v15, %v3833_v60  ;;  %v5700_v49 = vld [vmem:[#allocation2 + $0xda8] sm:$0xff] }
 0x34e   :  { %v3758_v2 = vmul.f32 %v5690_v42, %v3287_v39  ;;  %v4605_v48 = vadd.f32 %v4604_v21, %v3834_v12  ;;  %v3807_v19 = vmul.f32 %v5691_v54, %v3352_v28  ;;  %v3808_v1 = vmul.f32 %v5692_v6, %v3352_v28  ;;  %v5707_v54 = vld [vmem:[#allocation2 + $0xce0] sm:$0xff]  ;;  %v5708_v6 = vld [vmem:[#allocation2 + $0xce8] sm:$0xff] }
 0x34f   :  { %v3809_v37 = vmul.f32 %v5693_v5, %v3352_v28  ;;  %v4427_v50 = vadd.f32 %v9100_v51, %v3755_v34  ;;  %v4439_v46 = vadd.f32 %v9102_v0, %v3756_v61  ;;  %v4451_v18 = vadd.f32 %v9104_v55, %v3757_v44  ;;  %v3322_v47 = vpop.permute.xlu1 %3321  ;;  %v3387_v20 = vpop.permute.xlu0 %3386  ;;  %v5704_v34 = vld [vmem:[#allocation2 + $0xb48] sm:$0xff]  ;;  %v5705_v61 = vld [vmem:[#allocation2 + $0xb50] sm:$0xff] }
 0x350   :  { %v3810_v52 = vmul.f32 %v5694_v38, %v3352_v28  ;;  %v4463_v15 = vadd.f32 %v9106_v53, %v3758_v2  ;;  %v3783_v3 = vmul.f32 %v5695_v24, %v3322_v47  ;;  %v3784_v21 = vmul.f32 %v5696_v8, %v3322_v47  ;;  %v5702_v53 = vld [vmem:[#allocation2 + $0xdb8] sm:$0xff]  ;;  %v5703_v28 = vld [vmem:[#allocation2 + $0xb40] sm:$0xff] }
 0x351   :  { %v3785_v58 = vmul.f32 %v5697_v23, %v3322_v47  ;;  %v3786_v33 = vmul.f32 %v5698_v35, %v3322_v47  ;;  %v3835_v51 = vmul.f32 %v5699_v11, %v3387_v20  ;;  %v3836_v0 = vmul.f32 %v5700_v49, %v3387_v20 }
 0x352   :  { %v3837_v55 = vmul.f32 %v5701_v56, %v3387_v20  ;;  %v9128_v13 = vadd.f32 %v4521_v26, %v3807_v19  ;;  %v9130_v7 = vadd.f32 %v4533_v25, %v3808_v1  ;;  %v9132_v45 = vadd.f32 %v4545_v63, %v3809_v37 }
 0x353   :  { %v3838_v14 = vmul.f32 %v5702_v53, %v3387_v20  ;;  %v9134_v22 = vadd.f32 %v4557_v29, %v3810_v52  ;;  %v4475_v57 = vadd.f32 %v4474_v41, %v3783_v3  ;;  %v4487_v60 = vadd.f32 %v4486_v4, %v3784_v21  ;;  %v3292_v12 = vpop.permute.xlu1 %3291  ;;  %v9136_v62 = vpop.permute.xlu0 %3356  ;;  %v5706_v29 = vld [vmem:[#allocation2 + $0xb58] sm:$0xff]  ;;  %v5710_v52 = vld [vmem:[#allocation2 + $0xc20] sm:$0xff] }
 0x354   :  { %v4499_v32 = vadd.f32 %v4498_v17, %v3785_v58  ;;  %v4511_v39 = vadd.f32 %v4510_v16, %v3786_v33  ;;  %v3759_v43 = vmul.f32 %v5703_v28, %v3292_v12  ;;  %v3760_v59 = vmul.f32 %v5704_v34, %v3292_v12 }
 0x355   :  { %v3761_v26 = vmul.f32 %v5705_v61, %v3292_v12  ;;  %v9138_v25 = vadd.f32 %v4569_v36, %v3835_v51  ;;  %v9140_v63 = vadd.f32 %v4581_v10, %v3836_v0  ;;  %v9142_v44 = vadd.f32 %v4593_v9, %v3837_v55  ;;  %v5709_v36 = vld [vmem:[#allocation2 + $0xcf0] sm:$0xff] }
 0x356   :  { %v3762_v41 = vmul.f32 %v5706_v29, %v3292_v12  ;;  %v9144_v4 = vadd.f32 %v4605_v48, %v3838_v14  ;;  %v4428_v17 = vadd.f32 %v4427_v50, %v3759_v43  ;;  %v4440_v16 = vadd.f32 %v4439_v46, %v3760_v59  ;;  %v5711_v50 = vld [vmem:[#allocation2 + $0xc28] sm:$0xff] }
 0x357   :  { %v4452_v42 = vadd.f32 %v4451_v18, %v3761_v26  ;;  %v3811_v19 = vmul.f32 %v5707_v54, %v9136_v62  ;;  %v3812_v1 = vmul.f32 %v5708_v6, %v9136_v62  ;;  %v3813_v10 = vmul.f32 %v5709_v36, %v9136_v62  ;;  %v3327_v5 = vpop.permute.xlu1 %3326  ;;  %v5712_v18 = vld [vmem:[#allocation2 + $0xc30] sm:$0xff] }
 0x358   :  { %v4464_v2 = vadd.f32 %v4463_v15, %v3762_v41  ;;  %v4429_v9 = vrot.slane %v4428_v17, 4  ;;  %v4441_v37 = vrot.slane %v4440_v16, 4  ;;  %v3787_v48 = vmul.f32 %v5710_v52, %v3327_v5  ;;  %v5713_v15 = vld [vmem:[#allocation2 + $0xc38] sm:$0xff] }
 0x359   :  { %v4453_v38 = vrot.slane %v4452_v42, 4  ;;  %v3788_v46 = vmul.f32 %v5711_v50, %v3327_v5  ;;  %v3789_v20 = vmul.f32 %v5712_v18, %v3327_v5  ;;  %v3790_v24 = vmul.f32 %v5713_v15, %v3327_v5  ;;  %v3392_v50 = vpop.permute.xlu0 %3391 }
 0x35a   :  { %v4465_v47 = vrot.slane %v4464_v2, 4  ;;  %v4430_v3 = vadd.f32 %v4429_v9, %v4428_v17  ;;  %v4442_v8 = vadd.f32 %v4441_v37, %v4440_v16  ;;  %v4476_v23 = vadd.f32 %v4475_v57, %v3787_v48  ;;  %v5714_v48 = vld [vmem:[#allocation2 + $0xcf8] sm:$0xff] }
 0x35b   :  { %v4454_v21 = vadd.f32 %v4453_v38, %v4452_v42  ;;  %v4488_v35 = vadd.f32 %v4487_v60, %v3788_v46  ;;  %v4500_v33 = vadd.f32 %v4499_v32, %v3789_v20  ;;  %v4512_v11 = vadd.f32 %v4511_v39, %v3790_v24 }
 0x35c   :  { %v4466_v58 = vadd.f32 %v4465_v47, %v4464_v2  ;;  %v4431_v51 = vrot.slane %v4430_v3, 2  ;;  %v4443_v49 = vrot.slane %v4442_v8, 2  ;;  %v4477_v56 = vrot.slane %v4476_v23, 4 }
 0x35d   :  { %v4455_v0 = vrot.slane %v4454_v21, 2  ;;  %v4489_v53 = vrot.slane %v4488_v35, 4  ;;  %v4501_v14 = vrot.slane %v4500_v33, 4  ;;  %v4513_v12 = vrot.slane %v4512_v11, 4 }
 0x35e   :  { %v4467_v55 = vrot.slane %v4466_v58, 2  ;;  %v4432_v28 = vadd.f32 %v4431_v51, %v4430_v3  ;;  %v4444_v43 = vadd.f32 %v4443_v49, %v4442_v8  ;;  %v4478_v59 = vadd.f32 %v4477_v56, %v4476_v23  ;;  %v5720_v51 = vld [vmem:[#allocation2 + $0xd08] sm:$0xff]  ;;  %v5722_v56 = vld [vmem:[#allocation2 + $0xd18] sm:$0xff] }
 0x35f   :  { %v4456_v34 = vadd.f32 %v4455_v0, %v4454_v21  ;;  %v4490_v26 = vadd.f32 %v4489_v53, %v4488_v35  ;;  %v4502_v29 = vadd.f32 %v4501_v14, %v4500_v33  ;;  %v4514_v57 = vadd.f32 %v4513_v12, %v4512_v11  ;;  %v3362_v21 = vpop.permute.xlu1 %3361  ;;  %v5718_v35 = vld [vmem:[#allocation2 + $0xdd8] sm:$0xff]  ;;  %v5719_v11 = vld [vmem:[#allocation2 + $0xd00] sm:$0xff]  ;;  %v5721_v0 = vld [vmem:[#allocation2 + $0xd10] sm:$0xff] }
 0x360   :  { %v4468_v61 = vadd.f32 %v4467_v55, %v4466_v58  ;;  %v4433_v41 = vrot.slane %v4432_v28, 1  ;;  %v4445_v60 = vrot.slane %v4444_v43, 1  ;;  %v4479_v39 = vrot.slane %v4478_v59, 2 }
 0x361   :  { %v4457_v32 = vrot.slane %v4456_v34, 1  ;;  %v4491_v16 = vrot.slane %v4490_v26, 2  ;;  %v4503_v42 = vrot.slane %v4502_v29, 2  ;;  %v4515_v2 = vrot.slane %v4514_v57, 2 }
 0x362   :  { %v4469_v17 = vrot.slane %v4468_v61, 1  ;;  %v4434_v54 = vadd.f32 %v4433_v41, %v4432_v28  ;;  %v4446_v6 = vadd.f32 %v4445_v60, %v4444_v43  ;;  %v4480_v5 = vadd.f32 %v4479_v39, %v4478_v59 }
 0x363   :  { %v4458_v36 = vadd.f32 %v4457_v32, %v4456_v34  ;;  %v4492_v37 = vadd.f32 %v4491_v16, %v4490_v26  ;;  %v4504_v38 = vadd.f32 %v4503_v42, %v4502_v29  ;;  %v4516_v52 = vadd.f32 %v4515_v2, %v4514_v57  ;;  %v5724_v2 = vld [vmem:[#allocation2 + $0xde8] sm:$0xff] }
 0x364   :  { %v4470_v9 = vadd.f32 %v4469_v17, %v4468_v61  ;;  %v3814_v47 = vmul.f32 %v5714_v48, %v9136_v62  ;;  %v4523_v46 = vadd.f32 %v9128_v13, %v3811_v19  ;;  %v4535_v18 = vadd.f32 %v9130_v7, %v3812_v1  ;;  %v5716_v19 = vld [vmem:[#allocation2 + $0xdc8] sm:$0xff]  ;;  %v3397_v61 = vpop.permute.xlu0 %3396 }
 0x365   :  { %v4547_v20 = vadd.f32 %v9132_v45, %v3813_v10  ;;  %v9155_v15 = vsel %vm4685_vm4, %v4434_v54, %v9110_v40  ;;  %v4481_v24 = vrot.slane %v4480_v5, 1  ;;  %v4493_v3 = vrot.slane %v4492_v37, 1  ;;  %v5715_v45 = vld [vmem:[#allocation2 + $0xdc0] sm:$0xff]  ;;  %v5717_v10 = vld [vmem:[#allocation2 + $0xdd0] sm:$0xff] }
 0x366   :  { %v4505_v8 = vrot.slane %v4504_v38, 1  ;;  %v9159_v23 = vsel %vm4685_vm4, %v4446_v6, %v9114_v31  ;;  %v9163_v62 = vsel %vm4685_vm4, %v4458_v36, %v9118_v27  ;;  %v9167_v13 = vsel %vm4685_vm4, %v4470_v9, %v9122_v30  ;;  %v5725_v6 = vld [vmem:[#allocation2 + $0xdf0] sm:$0xff] }
 0x367   :  { %v4517_v7 = vrot.slane %v4516_v52, 1  ;;  %v3839_v40 = vmul.f32 %v5715_v45, %v3392_v50  ;;  %v3840_v1 = vmul.f32 %v5716_v19, %v3392_v50  ;;  %v3841_v58 = vmul.f32 %v5717_v10, %v3392_v50 }
 0x368   :  { %v3842_v33 = vmul.f32 %v5718_v35, %v3392_v50  ;;  %v3815_v31 = vmul.f32 %v5719_v11, %v3362_v21  ;;  %v3816_v49 = vmul.f32 %v5720_v51, %v3362_v21  ;;  %v3817_v27 = vmul.f32 %v5721_v0, %v3362_v21 }
 0x369   :  { %v3818_v55 = vmul.f32 %v5722_v56, %v3362_v21  ;;  %v9169_v53 = vadd.f32 %v4481_v24, %v4480_v5  ;;  %v9171_v30 = vadd.f32 %v4493_v3, %v4492_v37  ;;  %v9173_v14 = vadd.f32 %v4505_v8, %v4504_v38 }
 0x36a   :  { %v4559_v12 = vadd.f32 %v9134_v22, %v3814_v47  ;;  %v9176_v28 = vadd.f32 %v4517_v7, %v4516_v52  ;;  %v4524_v43 = vadd.f32 %v4523_v46, %v3815_v31  ;;  %v4536_v34 = vadd.f32 %v4535_v18, %v3816_v49  ;;  %v5723_v22 = vld [vmem:[#allocation2 + $0xde0] sm:$0xff] }
 0x36b   :  { %v4548_v59 = vadd.f32 %v4547_v20, %v3817_v27  ;;  %v4571_v29 = vadd.f32 %v9138_v25, %v3839_v40  ;;  %v4583_v57 = vadd.f32 %v9140_v63, %v3840_v1  ;;  %v4595_v41 = vadd.f32 %v9142_v44, %v3841_v58  ;;  %v5726_v25 = vld [vmem:[#allocation2 + $0xdf8] sm:$0xff] }
 0x36c   :  { %v4560_v26 = vadd.f32 %v4559_v12, %v3818_v55  ;;  %v4525_v60 = vrot.slane %v4524_v43, 4  ;;  %v4537_v32 = vrot.slane %v4536_v34, 4  ;;  %v4607_v17 = vadd.f32 %v9144_v4, %v3842_v33 }
 0x36d   :  { %v4549_v39 = vrot.slane %v4548_v59, 4  ;;  %v3843_v42 = vmul.f32 %v5723_v22, %v3397_v61  ;;  %v3844_v54 = vmul.f32 %v5724_v2, %v3397_v61  ;;  %v3845_v36 = vmul.f32 %v5725_v6, %v3397_v61 }
 0x36e   :  { %v4561_v16 = vrot.slane %v4560_v26, 4  ;;  %v4526_v5 = vadd.f32 %v4525_v60, %v4524_v43  ;;  %v4538_v9 = vadd.f32 %v4537_v32, %v4536_v34  ;;  %v3846_v38 = vmul.f32 %v5726_v25, %v3397_v61 }
 0x36f   :  { %v4550_v37 = vadd.f32 %v4549_v39, %v4548_v59  ;;  %v4572_v52 = vadd.f32 %v4571_v29, %v3843_v42  ;;  %v4584_v44 = vadd.f32 %v4583_v57, %v3844_v54  ;;  %v4596_v48 = vadd.f32 %v4595_v41, %v3845_v36 }
 0x370   :  { %v4562_v63 = vadd.f32 %v4561_v16, %v4560_v26  ;;  %v4527_v47 = vrot.slane %v4526_v5, 2  ;;  %v4539_v50 = vrot.slane %v4538_v9, 2  ;;  %v4608_v4 = vadd.f32 %v4607_v17, %v3846_v38 }
 0x371   :  { %v4551_v46 = vrot.slane %v4550_v37, 2  ;;  %v4573_v20 = vrot.slane %v4572_v52, 4  ;;  %v4585_v24 = vrot.slane %v4584_v44, 4  ;;  %v4597_v3 = vrot.slane %v4596_v48, 4 }
 0x372   :  { %v4563_v18 = vrot.slane %v4562_v63, 2  ;;  %v4528_v8 = vadd.f32 %v4527_v47, %v4526_v5  ;;  %v4540_v21 = vadd.f32 %v4539_v50, %v4538_v9  ;;  %v4609_v45 = vrot.slane %v4608_v4, 4 }
 0x373   :  { %v4552_v7 = vadd.f32 %v4551_v46, %v4550_v37  ;;  %v4574_v19 = vadd.f32 %v4573_v20, %v4572_v52  ;;  %v4586_v1 = vadd.f32 %v4585_v24, %v4584_v44  ;;  %v4598_v10 = vadd.f32 %v4597_v3, %v4596_v48 }
 0x374   :  { %v4564_v40 = vadd.f32 %v4563_v18, %v4562_v63  ;;  %v4529_v58 = vrot.slane %v4528_v8, 1  ;;  %v4541_v35 = vrot.slane %v4540_v21, 1  ;;  %v4610_v11 = vadd.f32 %v4609_v45, %v4608_v4 }
 0x375   :  { %v4553_v33 = vrot.slane %v4552_v7, 1  ;;  %v4575_v51 = vrot.slane %v4574_v19, 2  ;;  %v4587_v49 = vrot.slane %v4586_v1, 2  ;;  %v4599_v0 = vrot.slane %v4598_v10, 2 }
 0x376   :  { %v4565_v31 = vrot.slane %v4564_v40, 1  ;;  %v4530_v27 = vadd.f32 %v4529_v58, %v4528_v8  ;;  %v4542_v56 = vadd.f32 %v4541_v35, %v4540_v21  ;;  %v4611_v12 = vrot.slane %v4610_v11, 2 }
 0x377   :  { %v4554_v55 = vadd.f32 %v4553_v33, %v4552_v7  ;;  %v4576_v34 = vadd.f32 %v4575_v51, %v4574_v19  ;;  %v4588_v59 = vadd.f32 %v4587_v49, %v4586_v1  ;;  %v4600_v61 = vadd.f32 %v4599_v0, %v4598_v10 }
 0x378   :  { %v4566_v43 = vadd.f32 %v4565_v31, %v4564_v40  ;;  %v4718_v26 = vsel %vm4687_vm5, %v9169_v53, %v9155_v15  ;;  %v4725_v29 = vsel %vm4687_vm5, %v9171_v30, %v9159_v23  ;;  %v4732_v57 = vsel %vm4687_vm5, %v9173_v14, %v9163_v62 }
 0x379   :  { %v4612_v41 = vadd.f32 %v4611_v12, %v4610_v11  ;;  %v4739_v60 = vsel %vm4687_vm5, %v9176_v28, %v9167_v13  ;;  %v4577_v32 = vrot.slane %v4576_v34, 1  ;;  %v4589_v39 = vrot.slane %v4588_v59, 1 }
 0x37a   :  { %v4601_v17 = vrot.slane %v4600_v61, 1  ;;  %v4719_v16 = vsel %vm4689_vm6, %v4530_v27, %v4718_v26  ;;  %v4726_v15 = vsel %vm4689_vm6, %v4542_v56, %v4725_v29  ;;  %v4733_v53 = vsel %vm4689_vm6, %v4554_v55, %v4732_v57 }
 0x37b   :  { %v4613_v22 = vrot.slane %v4612_v41, 1  ;;  %v4740_v23 = vsel %vm4689_vm6, %v4566_v43, %v4739_v60  ;;  %v4578_v62 = vadd.f32 %v4577_v32, %v4576_v34  ;;  %v4590_v30 = vadd.f32 %v4589_v39, %v4588_v59 }
 0x37c   :  { %v4602_v14 = vadd.f32 %v4601_v17, %v4600_v61 }
 0x37d   :  { %v4614_v42 = vadd.f32 %v4613_v22, %v4612_v41  ;;  %v4720_v13 = vsel %vm4691_vm7, %v4578_v62, %v4719_v16  ;;  %v4727_v28 = vsel %vm4691_vm7, %v4590_v30, %v4726_v15 }
 0x37e   :  { %v4734_v2 = vsel %vm4691_vm7, %v4602_v14, %v4733_v53  ;;  %4754 = vst [vmem:[#allocation7 + $0x20] sm:$0xff] %v4720_v13  ;;  %4755 = vst [vmem:[#allocation7 + $0x28] sm:$0xff] %v4727_v28 }
 0x37f   :  { %v4741_v54 = vsel %vm4691_vm7, %v4614_v42, %v4740_v23  ;;  %4756 = vst [vmem:[#allocation7 + $0x30] sm:$0xff] %v4734_v2 }
 0x380   :  { %4757 = vst [vmem:[#allocation7 + $0x38] sm:$0xff] %v4741_v54 }
 0x381   :  { %5782 = shalt.err (!%p5779_p6)
}
 0x382   :  { %s5783_s5 = scalar_lea.hbm %s9220_s3, 1024 }
 0x383   :  { %p5784_p7 = scmp.ne.s32.totalorder %s9220_s3, %s5783_s5  ;;  %p5787_p8 = scmp.lt.u32.totalorder %s5783_s5, %s9220_s3 }
 0x385   :  { %p5789_p9 = pnand %p5787_p8, %p5784_p7 }
 0x387   :  { %5792 = shalt.err (!%p5789_p9)
}
 0x388   :  { %4769 = dma.vmem_to_hbm [thread:$0]  %s4764_s28, 1024, %s9220_s3, [#allocation4], %s5800_s22, %s5800_s22, %s5801_s23  }
 0x389   :  { %5797 = dma.done.wait [#allocation4], 1024  }
 0x38a   :  { %5798 = vsyncadd [#allocation4], 4294966272 }
 0x38b   :  { %4773 = vsyncpa [#allocation3], 1 }
 0x38c   :  { %4774 = vsyncpa [#allocation6], 1 }
 0x38d   :  { %4775 = vsyncpa [#allocation4], 1 }

</bundles_post_ra>
